<compile_context>
chip_gen: v7x
topology: tpu7x:2x2x1
jax: 0.10.0
libtpu: 0.0.40
codegen_flags: <defaults>
</compile_context>

<pallas_src>
import math
from functools import partial

import jax
import jax.numpy as jnp
import numpy as np
from jax.experimental import pallas as pl
from jax.experimental.pallas import tpu as pltpu

_MXU_DTYPE = jnp.bfloat16   # MXU operand & inter-kernel activation dtype
_BN_EPS = 1e-5
_GN_EPS = 1e-5
_VMEM_LIMIT = 64 * 1024 * 1024   # within v7x's 64 MiB physical VMEM


# ----------------------------------------------------------------------------- helpers
def _round_up(x, m):
    return ((x + m - 1) // m) * m


def _choose_tm(m):
    """M tile for the 1x1 matmuls: cap at 512 rows, aim for >=4 grid steps."""
    m8 = _round_up(m, 8)
    if m8 <= 64:
        return m8
    return max(8, min(512, _round_up(pl.cdiv(m, 4), 8)))


def _choose_row_tile(h, w):
    """Row tile for the 3x3 conv grid: a multiple of 8 dividing H, sized so each step
    covers a reasonable number of output pixels while keeping >=2 steps per batch."""
    if h % 8 != 0 or h <= 8:
        return h
    th = 8
    while (th * 2) * 2 <= h and h % (th * 2) == 0 and th * w < 2048:
        th *= 2
    return th


def _apply_act(y, act):
    if act == "silu":
        return y * jax.nn.sigmoid(y)
    if act == "tanh":
        return jnp.tanh(y)
    return y


def _fold_bn(gamma, beta, mean, var, conv_bias=None, eps=_BN_EPS):
    scale = gamma / jnp.sqrt(var + eps)
    bias = beta - mean * scale
    if conv_bias is not None:
        bias = bias + conv_bias * scale
    return scale, bias


# ---------------------------------------------------------------- Pallas kernel bodies
def _fused_cat_mm_kernel(*refs, n_src, act):
    """o = act((sum_i x_i @ w_i) * scale + bias): fused channel-concat 1x1 conv."""
    x_refs = refs[:n_src]
    w_refs = refs[n_src:2 * n_src]
    s_ref = refs[2 * n_src]
    b_ref = refs[2 * n_src + 1]
    o_ref = refs[2 * n_src + 2]
    acc = jnp.dot(x_refs[0][...], w_refs[0][...], preferred_element_type=jnp.float32)
    for i in range(1, n_src):
        acc = acc + jnp.dot(x_refs[i][...], w_refs[i][...],
                            preferred_element_type=jnp.float32)
    y = _apply_act(acc * s_ref[...] + b_ref[...], act)
    o_ref[...] = y.astype(o_ref.dtype)


def _conv3x3_kernel(x_ref, w_ref, s_ref, b_ref, o_ref, *, TH, W, Cin, act):
    # x_ref: (H+2, W+2, Cin) bf16, full padded plane for this batch element.  Its block
    #        index is constant along the row-tile grid axis, so it is DMA'd once per b.
    # w_ref: (9, Cin, Cout) bf16 ; s/b: (1, Cout) f32 ; o_ref: (TH*W, Cout)
    row0 = pl.program_id(1) * TH
    if TH % 8 == 0:
        row0 = pl.multiple_of(row0, 8)
    cout = o_ref.shape[-1]
    acc = jnp.zeros((TH * W, cout), jnp.float32)
    for ky in range(3):
        for kx in range(3):
            xs = x_ref[pl.ds(row0 + ky, TH), kx:kx + W, :].reshape(TH * W, Cin)
            acc = acc + jnp.dot(xs, w_ref[ky * 3 + kx],
                                preferred_element_type=jnp.float32)
    y = _apply_act(acc * s_ref[...] + b_ref[...], act)
    o_ref[...] = y.astype(o_ref.dtype)


def _dsc_gn_silu_kernel(p_ref, w_ref, b_ref, g_ref, beta_ref, mask_ref, o_ref, *,
                        inv_n, eps):
    # p: (HW, 3*Cin)  w: (3*Cin, Cout)  b/g/beta: (1, Cout)  mask: (G, Cout)
    acc = jnp.dot(p_ref[...], w_ref[...], preferred_element_type=jnp.float32)
    acc = acc + b_ref[...]
    masks = mask_ref[...]                                    # (G, Cout)
    s1 = jnp.sum(acc, axis=0, keepdims=True)                 # (1, Cout)
    s2 = jnp.sum(acc * acc, axis=0, keepdims=True)
    gs1 = jnp.sum(masks * s1, axis=1, keepdims=True)         # (G, 1)
    gs2 = jnp.sum(masks * s2, axis=1, keepdims=True)
    mean = gs1 * inv_n
    var = gs2 * inv_n - mean * mean
    rstd = jax.lax.rsqrt(var + eps)
    mean_c = jnp.sum(masks * mean, axis=0, keepdims=True)    # (1, Cout)
    rstd_c = jnp.sum(masks * rstd, axis=0, keepdims=True)
    y = (acc - mean_c) * rstd_c * g_ref[...] + beta_ref[...]
    y = y * jax.nn.sigmoid(y)
    o_ref[...] = y.astype(o_ref.dtype)


# ------------------------------------------------------------------- kernel wrappers
def _fused_1x1(xs_nhwc, p, act="silu", out_dtype=_MXU_DTYPE):
    """Fused channel-concat + 1x1 Conv + folded BN + activation.

    xs_nhwc: list of (B,H,W,Ci) tensors whose channel concatenation is the conv input.
    """
    B, H, W, _ = xs_nhwc[0].shape
    M = B * H * W
    Cout, Kin_total = p["w"].shape[0], p["w"].shape[1]
    ks = [int(t.shape[-1]) for t in xs_nhwc]
    assert sum(ks) == Kin_total
    w_full = p["w"].reshape(Cout, Kin_total)
    scale, bias = _fold_bn(p["g"], p["b"], p["m"], p["v"])

    xs2, slabs = [], []
    off = 0
    for t, ki in zip(xs_nhwc, ks):
        xs2.append(t.reshape(M, ki).astype(_MXU_DTYPE))
        slabs.append(jnp.transpose(w_full[:, off:off + ki]).astype(_MXU_DTYPE))
        off += ki
    s_p = scale.reshape(1, Cout).astype(jnp.float32)
    b_p = bias.reshape(1, Cout).astype(jnp.float32)

    TM = _choose_tm(M)
    grid = (pl.cdiv(M, TM),)
    n_src = len(xs2)
    in_specs = [pl.BlockSpec((TM, ki), lambda i: (i, 0)) for ki in ks]
    in_specs += [pl.BlockSpec((ki, Cout), lambda i: (0, 0)) for ki in ks]
    in_specs += [pl.BlockSpec((1, Cout), lambda i: (0, 0))] * 2

    cost = pl.CostEstimate(
        flops=2 * M * Kin_total * Cout,
        transcendentals=M * Cout,
        bytes_accessed=M * Kin_total * 2 + Kin_total * Cout * 2
        + M * Cout * jnp.dtype(out_dtype).itemsize)

    out = pl.pallas_call(
        partial(_fused_cat_mm_kernel, n_src=n_src, act=act),
        out_shape=jax.ShapeDtypeStruct((M, Cout), out_dtype),
        grid_spec=pltpu.PrefetchScalarGridSpec(
            num_scalar_prefetch=0,
            grid=grid,
            in_specs=in_specs,
            out_specs=pl.BlockSpec((TM, Cout), lambda i: (i, 0)),
        ),
        compiler_params=pltpu.CompilerParams(dimension_semantics=("parallel",)),
        cost_estimate=cost,
    )(*xs2, *slabs, s_p, b_p)
    return out.reshape(B, H, W, Cout)


def _conv3x3_pallas(x_nhwc, w_oihw, scale, bias, act, out_dtype):
    """3x3 stride-1 pad-1 conv + per-channel affine + activation.  Computed in-kernel
    as 9 shifted matmuls over a row-tiled grid; the padded bf16 input plane is DMA'd
    once per batch element (constant block index along the row axis)."""
    B, H, W, Cin = x_nhwc.shape
    Cout = w_oihw.shape[0]
    # bf16 + halo pad BEFORE the kernel: halves the x-tile DMA, no in-kernel casts.
    xp = jnp.pad(x_nhwc.astype(_MXU_DTYPE), ((0, 0), (1, 1), (1, 1), (0, 0)))
    w = jnp.transpose(w_oihw, (2, 3, 1, 0)).reshape(9, Cin, Cout).astype(_MXU_DTYPE)
    s_p = scale.reshape(1, Cout).astype(jnp.float32)
    b_p = bias.reshape(1, Cout).astype(jnp.float32)

    TH = _choose_row_tile(H, W)
    nH = H // TH
    cost = pl.CostEstimate(
        flops=2 * B * H * W * 9 * Cin * Cout,
        transcendentals=B * H * W * Cout,
        bytes_accessed=xp.size * 2 + w.size * 2
        + B * H * W * Cout * jnp.dtype(out_dtype).itemsize)

    out = pl.pallas_call(
        partial(_conv3x3_kernel, TH=TH, W=W, Cin=Cin, act=act),
        out_shape=jax.ShapeDtypeStruct((B, H * W, Cout), out_dtype),
        grid_spec=pltpu.PrefetchScalarGridSpec(
            num_scalar_prefetch=0,
            grid=(B, nH),
            in_specs=[
                pl.BlockSpec((None, H + 2, W + 2, Cin), lambda b, h: (b, 0, 0, 0)),
                pl.BlockSpec((9, Cin, Cout), lambda b, h: (0, 0, 0)),
                pl.BlockSpec((1, Cout), lambda b, h: (0, 0)),
                pl.BlockSpec((1, Cout), lambda b, h: (0, 0)),
            ],
            out_specs=pl.BlockSpec((None, TH * W, Cout), lambda b, h: (b, h, 0)),
        ),
        compiler_params=pltpu.CompilerParams(
            dimension_semantics=("parallel", "parallel"),
            vmem_limit_bytes=_VMEM_LIMIT),
        cost_estimate=cost,
    )(xp, w, s_p, b_p)
    return out.reshape(B, H, W, Cout)


def _dsc_matmul_gn_silu(patches, w, conv_bias, gn_gamma, gn_beta, groups):
    """Snake conv (non-overlapping (3,1)/(1,3) kernel => plain matmul) + bias fused
    with GroupNorm + SiLU, one grid step per batch element."""
    B, HW, K3 = patches.shape
    N = w.shape[1]
    cg = N // groups
    p_c = patches.astype(_MXU_DTYPE)
    w_c = w.astype(_MXU_DTYPE)
    b_p = conv_bias.reshape(1, N).astype(jnp.float32)
    g_p = gn_gamma.reshape(1, N).astype(jnp.float32)
    be_p = gn_beta.reshape(1, N).astype(jnp.float32)
    masks_np = np.zeros((groups, N), np.float32)
    for g in range(groups):
        masks_np[g, g * cg:(g + 1) * cg] = 1.0
    masks = jnp.asarray(masks_np)
    cost = pl.CostEstimate(
        flops=2 * B * HW * K3 * N,
        transcendentals=B * HW * N,
        bytes_accessed=B * HW * K3 * 2 + K3 * N * 2 + B * HW * N * 2)
    out = pl.pallas_call(
        partial(_dsc_gn_silu_kernel, inv_n=1.0 / float(HW * cg), eps=_GN_EPS),
        out_shape=jax.ShapeDtypeStruct((B, HW, N), _MXU_DTYPE),
        grid_spec=pltpu.PrefetchScalarGridSpec(
            num_scalar_prefetch=0,
            grid=(B,),
            in_specs=[
                pl.BlockSpec((None, HW, K3), lambda b: (b, 0, 0)),
                pl.BlockSpec((K3, N), lambda b: (0, 0)),
                pl.BlockSpec((1, N), lambda b: (0, 0)),
                pl.BlockSpec((1, N), lambda b: (0, 0)),
                pl.BlockSpec((1, N), lambda b: (0, 0)),
                pl.BlockSpec((groups, N), lambda b: (0, 0)),
            ],
            out_specs=pl.BlockSpec((None, HW, N), lambda b: (b, 0, 0)),
        ),
        compiler_params=pltpu.CompilerParams(
            dimension_semantics=("parallel",),
            vmem_limit_bytes=_VMEM_LIMIT),
        cost_estimate=cost,
    )(p_c, w_c, b_p, g_p, be_p, masks)
    return out


# --------------------------------------------------- DSC deformable sampling (JAX glue)
def _dsc_coordinate_map(offset_nchw, k, extend_scope, morph, if_offset=True):
    """Faithful port of DSC._coordinate_map_3D (offset already tanh'ed, NCHW)."""
    B, _, PW, PH = offset_nchw.shape
    center = k // 2
    y_off = offset_nchw[:, :k]
    x_off = offset_nchw[:, k:]

    y_center = jnp.broadcast_to(
        jnp.arange(PW, dtype=jnp.float32)[None, None, :, None], (B, k, PW, PH))
    x_center = jnp.broadcast_to(
        jnp.arange(PH, dtype=jnp.float32)[None, None, None, :], (B, k, PW, PH))
    spread = (jnp.arange(k, dtype=jnp.float32) - center)[None, :, None, None]

    def _cumulative(off):
        # Mirrors the reference exactly: zero the center row; range(1, center) is empty
        # for k=3, so the outer rows keep the raw offsets.
        rows = [off[:, i] for i in range(k)]
        rows[center] = jnp.zeros_like(rows[center])
        for idx in range(1, center):
            rows[center + idx] = rows[center + idx - 1] + off[:, center + idx]
            rows[center - idx] = rows[center - idx + 1] + off[:, center - idx]
        return jnp.stack(rows, axis=1)

    if morph == 0:
        y_new = y_center
        x_new = x_center + spread
        if if_offset:
            y_new = y_new + _cumulative(y_off) * extend_scope
        y_out = jnp.transpose(y_new.reshape(B, k, 1, PW, PH),
                              (0, 3, 1, 4, 2)).reshape(B, k * PW, PH)
        x_out = jnp.transpose(x_new.reshape(B, k, 1, PW, PH),
                              (0, 3, 1, 4, 2)).reshape(B, k * PW, PH)
    else:
        y_new = y_center + spread
        x_new = x_center
        if if_offset:
            x_new = x_new + _cumulative(x_off) * extend_scope
        y_out = jnp.transpose(y_new.reshape(B, 1, k, PW, PH),
                              (0, 3, 1, 4, 2)).reshape(B, PW, k * PH)
        x_out = jnp.transpose(x_new.reshape(B, 1, k, PW, PH),
                              (0, 3, 1, 4, 2)).reshape(B, PW, k * PH)
    return y_out, x_out


def _dsc_bilinear_interpolate(feat_nhwc, y_map, x_map, k, morph):
    """Faithful port of DSC._bilinear_interpolate_3D (NHWC feature)."""
    B, PW, PH, C = feat_nhwc.shape
    yf = y_map.reshape(-1).astype(jnp.float32)
    xf = x_map.reshape(-1).astype(jnp.float32)
    max_y = PW - 1
    max_x = PH - 1

    y0 = jnp.floor(yf).astype(jnp.int32)
    y1 = y0 + 1
    x0 = jnp.floor(xf).astype(jnp.int32)
    x1 = x0 + 1

    y0i = jnp.clip(y0, 0, max_y)
    y1i = jnp.clip(y1, 0, max_y)
    x0i = jnp.clip(x0, 0, max_x)
    x1i = jnp.clip(x1, 0, max_x)

    flat = feat_nhwc.reshape(B * PW * PH, C)
    # NOTE: like the PyTorch reference, the batch base offset cancels
    # (index = y*PH + x), i.e. every batch element samples batch 0's feature map.
    va0 = jnp.take(flat, y0i * PH + x0i, axis=0)
    vc0 = jnp.take(flat, y0i * PH + x1i, axis=0)
    va1 = jnp.take(flat, y1i * PH + x0i, axis=0)
    vc1 = jnp.take(flat, y1i * PH + x1i, axis=0)

    y0w = jnp.clip(y0, 0, max_y + 1).astype(jnp.float32)
    y1w = jnp.clip(y1, 0, max_y + 1).astype(jnp.float32)
    x0w = jnp.clip(x0, 0, max_x + 1).astype(jnp.float32)
    x1w = jnp.clip(x1, 0, max_x + 1).astype(jnp.float32)

    wa0 = ((y1w - yf) * (x1w - xf))[:, None]
    wc0 = ((y1w - yf) * (xf - x0w))[:, None]
    wa1 = ((yf - y0w) * (x1w - xf))[:, None]
    wc1 = ((yf - y0w) * (xf - x0w))[:, None]

    out = va0 * wa0 + vc0 * wc0 + va1 * wa1 + vc1 * wc1
    if morph == 0:
        return out.reshape(B, k * PW, PH, C)
    return out.reshape(B, PW, k * PH, C)


# ------------------------------------------------------------------ module forward pass
def _conv3x3_bn_silu(x_nhwc, p):
    scale, bias = _fold_bn(p["g"], p["b"], p["m"], p["v"])
    return _conv3x3_pallas(x_nhwc, p["w"], scale, bias, "silu", _MXU_DTYPE)


def _dsconv_block(x_nhwc, p, morph, k=3, extend_scope=1.0):
    B, H, W, Cin = x_nhwc.shape
    Cout = p["dsc_w"].shape[0]
    # offset conv (3x3) + BN + tanh, fully fused in the Pallas conv kernel (f32 out:
    # coordinate precision).
    off_scale, off_bias = _fold_bn(p["off"]["g"], p["off"]["b"], p["off"]["m"],
                                   p["off"]["v"], conv_bias=p["off"]["cb"])
    off = _conv3x3_pallas(x_nhwc, p["off"]["w"], off_scale, off_bias, "tanh",
                          jnp.float32)
    off_nchw = jnp.transpose(off, (0, 3, 1, 2))

    y_map, x_map = _dsc_coordinate_map(off_nchw, k, extend_scope, morph)
    deformed = _dsc_bilinear_interpolate(x_nhwc, y_map, x_map, k, morph)

    # non-overlapping (k,1)/(1,k) stride-k conv -> pure permutation into patches
    if morph == 0:
        pt = jnp.transpose(deformed.reshape(B, H, k, W, Cin), (0, 1, 3, 4, 2))
    else:
        pt = jnp.transpose(deformed.reshape(B, H, W, k, Cin), (0, 1, 2, 4, 3))
    patches = pt.reshape(B, H * W, Cin * k)
    w = p["dsc_w"].reshape(Cout, Cin * k).T
    groups = Cout // 4
    y = _dsc_matmul_gn_silu(patches, w, p["dsc_b"], p["gn_g"], p["gn_b"], groups)
    return y.reshape(B, H, W, Cout)


def _dysnake_block(x_nhwc, p):
    a = _conv3x3_bn_silu(x_nhwc, p["conv0"])
    bx = _dsconv_block(x_nhwc, p["convx"], morph=0)
    by = _dsconv_block(x_nhwc, p["convy"], morph=1)
    # channel concat fused into the 1x1 conv (3 sources, 3 weight slabs, 1 kernel)
    return _fused_1x1([a, bx, by], p["conv1x1"], act="silu", out_dtype=_MXU_DTYPE)


def _bottleneck_block(x_nhwc, p, add=False):
    y = _dysnake_block(x_nhwc, p["cv1"])
    y = _dysnake_block(y, p["cv2"])
    return x_nhwc + y if add else y


def c2f_dysnakeconv_forward(x_nchw, params):
    x = jnp.transpose(x_nchw, (0, 2, 3, 1)).astype(jnp.float32)   # NCHW -> NHWC
    y = _fused_1x1([x], params["cv1"], act="silu", out_dtype=_MXU_DTYPE)
    c = params["cv1"]["w"].shape[0] // 2
    trunk = [y]                       # y == [chunk0 | chunk1] feeds cv2 rows 0:2c
    cur = y[..., c:]                  # chunk1 feeds the bottleneck chain
    for mp in params["m"]:
        cur = _bottleneck_block(cur, mp, add=False)               # shortcut=False
        trunk.append(cur)
    # C2f trunk concat fused into cv2 (one kernel, per-source weight slabs)
    out = _fused_1x1(trunk, params["cv2"], act="silu", out_dtype=jnp.float32)
    return jnp.transpose(out, (0, 3, 1, 2))                       # NHWC -> NCHW


# ------------------------------------------------------------- pure-JAX reference path
def _ref_conv(x_nhwc, w_oihw, strides, padding):
    # matched precision: bf16 operands, f32 accumulate (same as the Pallas kernels)
    w_hwio = jnp.transpose(w_oihw, (2, 3, 1, 0)).astype(_MXU_DTYPE)
    return jax.lax.conv_general_dilated(
        x_nhwc.astype(_MXU_DTYPE), w_hwio, window_strides=strides, padding=padding,
        dimension_numbers=("NHWC", "HWIO", "NHWC"),
        preferred_element_type=jnp.float32)


def _ref_bn(y, p):
    return (y - p["m"]) / jnp.sqrt(p["v"] + _BN_EPS) * p["g"] + p["b"]


def _silu(y):
    return y * jax.nn.sigmoid(y)


def _ref_groupnorm(y, gamma, beta, groups):
    B, H, W, C = y.shape
    cg = C // groups
    yr = y.reshape(B, H * W, groups, cg)
    mean = jnp.mean(yr, axis=(1, 3), keepdims=True)
    var = jnp.mean(yr * yr, axis=(1, 3), keepdims=True) - mean * mean
    yn = (yr - mean) * jax.lax.rsqrt(var + _GN_EPS)
    return yn.reshape(B, H, W, C) * gamma + beta


def _ref_conv_bn_silu(x, p, pad):
    y = _ref_conv(x, p["w"], (1, 1), [(pad, pad), (pad, pad)])
    return _silu(_ref_bn(y, p))


def _ref_dsconv(x_nhwc, p, morph, k=3, extend_scope=1.0):
    Cout = p["dsc_w"].shape[0]
    off = _ref_conv(x_nhwc, p["off"]["w"], (1, 1), [(1, 1), (1, 1)]) + p["off"]["cb"]
    off = jnp.tanh(_ref_bn(off, p["off"]))
    off_nchw = jnp.transpose(off, (0, 3, 1, 2))
    y_map, x_map = _dsc_coordinate_map(off_nchw, k, extend_scope, morph)
    deformed = _dsc_bilinear_interpolate(x_nhwc, y_map, x_map, k, morph)
    strides = (k, 1) if morph == 0 else (1, k)
    y = _ref_conv(deformed, p["dsc_w"], strides, "VALID") + p["dsc_b"]
    return _silu(_ref_groupnorm(y, p["gn_g"], p["gn_b"], Cout // 4))


def _ref_dysnake(x, p):
    a = _ref_conv_bn_silu(x, p["conv0"], 1)
    bx = _ref_dsconv(x, p["convx"], 0)
    by = _ref_dsconv(x, p["convy"], 1)
    return _ref_conv_bn_silu(jnp.concatenate([a, bx, by], axis=-1), p["conv1x1"], 0)


def _ref_bottleneck(x, p, add=False):
    y = _ref_dysnake(x, p["cv1"])
    y = _ref_dysnake(y, p["cv2"])
    return x + y if add else y


def reference_forward(x_nchw, params):
    x = jnp.transpose(x_nchw, (0, 2, 3, 1)).astype(jnp.float32)
    y = _ref_conv_bn_silu(x, params["cv1"], 0)
    c = params["cv1"]["w"].shape[0] // 2
    ys = [y[..., :c], y[..., c:]]
    for mp in params["m"]:
        ys.append(_ref_bottleneck(ys[-1], mp, add=False))
    out = _ref_conv_bn_silu(jnp.concatenate(ys, axis=-1), params["cv2"], 0)
    return jnp.transpose(out, (0, 3, 1, 2))


# ------------------------------------------------------------------------ parameter init
def _init_conv_bn(key, cin, cout, k):
    k1, k2, k3, k4, k5 = jax.random.split(key, 5)
    fan = cin * k * k
    return {
        "w": jax.random.normal(k1, (cout, cin, k, k), jnp.float32) * math.sqrt(2.0 / fan),
        "g": 1.0 + 0.1 * jax.random.normal(k2, (cout,), jnp.float32),
        "b": 0.1 * jax.random.normal(k3, (cout,), jnp.float32),
        "m": 0.1 * jax.random.normal(k4, (cout,), jnp.float32),
        "v": 1.0 + 0.1 * jnp.abs(jax.random.normal(k5, (cout,), jnp.float32)),
    }


def _init_dsconv(key, cin, cout, k, morph):
    ks = jax.random.split(key, 6)
    off = _init_conv_bn(ks[0], cin, 2 * k, 3)
    off["cb"] = 0.1 * jax.random.normal(ks[1], (2 * k,), jnp.float32)
    kh, kw = (k, 1) if morph == 0 else (1, k)
    fan = cin * k
    return {
        "off": off,
        "dsc_w": jax.random.normal(ks[2], (cout, cin, kh, kw), jnp.float32)
                 * math.sqrt(2.0 / fan),
        "dsc_b": 0.1 * jax.random.normal(ks[3], (cout,), jnp.float32),
        "gn_g": 1.0 + 0.1 * jax.random.normal(ks[4], (cout,), jnp.float32),
        "gn_b": 0.1 * jax.random.normal(ks[5], (cout,), jnp.float32),
    }


def _init_dysnake(key, cin, cout, k=3):
    ks = jax.random.split(key, 4)
    return {
        "conv0": _init_conv_bn(ks[0], cin, cout, 3),
        "convx": _init_dsconv(ks[1], cin, cout, k, 0),
        "convy": _init_dsconv(ks[2], cin, cout, k, 1),
        "conv1x1": _init_conv_bn(ks[3], 3 * cout, cout, 1),
    }


def _init_bottleneck(key, c1, c2):
    k1, k2 = jax.random.split(key)
    c_ = int(c2 * 1.0)
    return {"cv1": _init_dysnake(k1, c1, c_), "cv2": _init_dysnake(k2, c_, c2)}


def init_c2f_dysnake_params(key, c1, c2, n=1, e=0.5):
    c = int(c2 * e)
    ks = jax.random.split(key, 2 + n)
    return {
        "cv1": _init_conv_bn(ks[0], c1, 2 * c, 1),
        "cv2": _init_conv_bn(ks[1], (2 + n) * c, c2, 1),
        "m": [_init_bottleneck(ks[2 + i], c, c) for i in range(n)],
    }


# ---------------------------------------------------------------------------------- main
if __name__ == "__main__":
    key = jax.random.PRNGKey(0)
    kx, kp = jax.random.split(key)

    B, C1, H, W = 2, 4, 16, 16
    C2, N_BLOCKS = 16, 1

    x = jax.random.normal(kx, (B, C1, H, W), jnp.float32)
    params = init_c2f_dysnake_params(kp, C1, C2, n=N_BLOCKS)

    fwd = jax.jit(c2f_dysnakeconv_forward)
    out = jax.block_until_ready(fwd(x, params))
    assert out.shape == (B, C2, H, W), out.shape
    assert bool(jnp.all(jnp.isfinite(out)))

    ref = jax.block_until_ready(jax.jit(reference_forward)(x, params))
    # tolerance accounts for bf16 inter-kernel activations vs the f32-activation
    # reference (both use bf16 MXU operands with f32 accumulation)
    np.testing.assert_allclose(np.asarray(out), np.asarray(ref), rtol=3e-2, atol=3e-2)

    print("KERNEL_OK")
</pallas_src>

<mosaic_0001>
module attributes {stable_mosaic.version = 11 : i64} {
  func.func @_fused_cat_mm_kernel(%arg0: i32, %arg1: memref<128x4xbf16, #tpu.memory_space<vmem>>, %arg2: memref<4x16xbf16, #tpu.memory_space<vmem>>, %arg3: memref<1x16xf32, #tpu.memory_space<vmem>>, %arg4: memref<1x16xf32, #tpu.memory_space<vmem>>, %arg5: memref<128x16xbf16, #tpu.memory_space<vmem>>) attributes {dimension_semantics = [#tpu.dimension_semantics<parallel>], iteration_bounds = array<i64: 4>, scalar_prefetch = 0 : i64, scratch_operands = 0 : i64, tpu.core_type = #tpu.core_type<tc>, window_params = [{transform_indices = @transform_0, window_bounds = array<i64: 128, 4>}, {pipeline_mode = #tpu.pipeline_mode<synchronous>, transform_indices = @transform_1, window_bounds = array<i64: 4, 16>}, {pipeline_mode = #tpu.pipeline_mode<synchronous>, transform_indices = @transform_2, window_bounds = array<i64: 1, 16>}, {pipeline_mode = #tpu.pipeline_mode<synchronous>, transform_indices = @transform_3, window_bounds = array<i64: 1, 16>}, {transform_indices = @transform_4, window_bounds = array<i64: 128, 16>}]} {
    %c0 = arith.constant 0 : index
    %c0_0 = arith.constant 0 : index
    %0 = vector.load %arg1[%c0, %c0_0] : memref<128x4xbf16, #tpu.memory_space<vmem>>, vector<128x4xbf16>
    %c0_1 = arith.constant 0 : index
    %c0_2 = arith.constant 0 : index
    %1 = vector.load %arg2[%c0_1, %c0_2] : memref<4x16xbf16, #tpu.memory_space<vmem>>, vector<4x16xbf16>
    %cst = arith.constant dense<0.000000e+00> : vector<128x16xf32>
    %2 = tpu.matmul %0, %1, %cst {dimension_numbers = #tpu.dot_dimension_numbers<[1], [0], [0], [1], [0, 0, 1, 1], [], []>} : vector<128x4xbf16>, vector<4x16xbf16>, vector<128x16xf32> -> vector<128x16xf32>
    %c0_3 = arith.constant 0 : index
    %c0_4 = arith.constant 0 : index
    %3 = vector.load %arg3[%c0_3, %c0_4] : memref<1x16xf32, #tpu.memory_space<vmem>>, vector<1x16xf32>
    %4 = vector.broadcast %3 : vector<1x16xf32> to vector<128x16xf32>
    %5 = arith.mulf %2, %4 : vector<128x16xf32>
    %c0_5 = arith.constant 0 : index
    %c0_6 = arith.constant 0 : index
    %6 = vector.load %arg4[%c0_5, %c0_6] : memref<1x16xf32, #tpu.memory_space<vmem>>, vector<1x16xf32>
    %7 = vector.broadcast %6 : vector<1x16xf32> to vector<128x16xf32>
    %8 = arith.addf %5, %7 : vector<128x16xf32>
    %9 = arith.negf %8 : vector<128x16xf32>
    %10 = math.exp %9 : vector<128x16xf32>
    %cst_7 = arith.constant 1.000000e+00 : f32
    %11 = vector.broadcast %cst_7 : f32 to vector<128x16xf32>
    %12 = arith.addf %11, %10 : vector<128x16xf32>
    %13 = arith.divf %11, %12 : vector<128x16xf32>
    %14 = arith.mulf %8, %13 : vector<128x16xf32>
    %15 = arith.truncf %14 : vector<128x16xf32> to vector<128x16xbf16>
    %c0_8 = arith.constant 0 : index
    %c0_9 = arith.constant 0 : index
    %16 = vector.load %arg5[%c0_8, %c0_9] : memref<128x16xbf16, #tpu.memory_space<vmem>>, vector<128x16xbf16>
    tpu.vector_store %arg5[%c0_8, %c0_9], %15 {strides = array<i32>} : memref<128x16xbf16, #tpu.memory_space<vmem>>, vector<128x16xbf16>,
    return
  }
  func.func @transform_0(%arg0: i32) -> (i32, i32) {
    %c0_i32 = arith.constant 0 : i32
    %c0_i32_0 = arith.constant 0 : i32
    return %arg0, %c0_i32 : i32, i32
  }
  func.func @transform_1(%arg0: i32) -> (i32, i32) {
    %c0_i32 = arith.constant 0 : i32
    %c0_i32_0 = arith.constant 0 : i32
    %c0_i32_1 = arith.constant 0 : i32
    return %c0_i32, %c0_i32_0 : i32, i32
  }
  func.func @transform_2(%arg0: i32) -> (i32, i32) {
    %c0_i32 = arith.constant 0 : i32
    %c0_i32_0 = arith.constant 0 : i32
    %c0_i32_1 = arith.constant 0 : i32
    return %c0_i32, %c0_i32_0 : i32, i32
  }
  func.func @transform_3(%arg0: i32) -> (i32, i32) {
    %c0_i32 = arith.constant 0 : i32
    %c0_i32_0 = arith.constant 0 : i32
    %c0_i32_1 = arith.constant 0 : i32
    return %c0_i32, %c0_i32_0 : i32, i32
  }
  func.func @transform_4(%arg0: i32) -> (i32, i32) {
    %c0_i32 = arith.constant 0 : i32
    %c0_i32_0 = arith.constant 0 : i32
    return %arg0, %c0_i32 : i32, i32
  }
}

module attributes {stable_mosaic.version = 11 : i64} {
  func.func @_conv3x3_kernel(%arg0: i32, %arg1: i32, %arg2: memref<1x18x18x8xbf16, #tpu.memory_space<vmem>>, %arg3: memref<9x8x8xbf16, #tpu.memory_space<vmem>>, %arg4: memref<1x8xf32, #tpu.memory_space<vmem>>, %arg5: memref<1x8xf32, #tpu.memory_space<vmem>>, %arg6: memref<1x128x8xbf16, #tpu.memory_space<vmem>>) attributes {dimension_semantics = [#tpu.dimension_semantics<parallel>, #tpu.dimension_semantics<parallel>], iteration_bounds = array<i64: 2, 2>, scalar_prefetch = 0 : i64, scratch_operands = 0 : i64, tpu.core_type = #tpu.core_type<tc>, window_params = [{transform_indices = @transform_0, window_bounds = array<i64: 1, 18, 18, 8>}, {pipeline_mode = #tpu.pipeline_mode<synchronous>, transform_indices = @transform_1, window_bounds = array<i64: 9, 8, 8>}, {pipeline_mode = #tpu.pipeline_mode<synchronous>, transform_indices = @transform_2, window_bounds = array<i64: 1, 8>}, {pipeline_mode = #tpu.pipeline_mode<synchronous>, transform_indices = @transform_3, window_bounds = array<i64: 1, 8>}, {transform_indices = @transform_4, window_bounds = array<i64: 1, 128, 8>}]} {
    %c8_i32 = arith.constant 8 : i32
    %0 = arith.muli %arg1, %c8_i32 : i32
    %1 = tpu.assume_multiple %0, 8 : i32
    %cst = arith.constant 0.000000e+00 : f32
    %2 = vector.broadcast %cst : f32 to vector<128x8xf32>
    %c0_i32 = arith.constant 0 : i32
    %3 = arith.addi %1, %c0_i32 : i32
    %c0 = arith.constant 0 : index
    %4 = arith.index_cast %3 : i32 to index
    %c0_0 = arith.constant 0 : index
    %c0_1 = arith.constant 0 : index
    %5 = vector.load %arg2[%c0, %4, %c0_0, %c0_1] : memref<1x18x18x8xbf16, #tpu.memory_space<vmem>>, vector<1x8x16x8xbf16>
    %6 = vector.shape_cast %5 : vector<1x8x16x8xbf16> to vector<8x16x8xbf16>
    %7 = vector.shape_cast %6 : vector<8x16x8xbf16> to vector<128x8xbf16>
    %c0_2 = arith.constant 0 : index
    %c0_3 = arith.constant 0 : index
    %c0_4 = arith.constant 0 : index
    %8 = vector.load %arg3[%c0_2, %c0_3, %c0_4] : memref<9x8x8xbf16, #tpu.memory_space<vmem>>, vector<1x8x8xbf16>
    %9 = vector.shape_cast %8 : vector<1x8x8xbf16> to vector<8x8xbf16>
    %cst_5 = arith.constant dense<0.000000e+00> : vector<128x8xf32>
    %10 = tpu.matmul %7, %9, %cst_5 {dimension_numbers = #tpu.dot_dimension_numbers<[1], [0], [0], [1], [0, 0, 1, 1], [], []>} : vector<128x8xbf16>, vector<8x8xbf16>, vector<128x8xf32> -> vector<128x8xf32>
    %11 = arith.addf %2, %10 : vector<128x8xf32>
    %c0_i32_6 = arith.constant 0 : i32
    %12 = arith.addi %1, %c0_i32_6 : i32
    %c0_7 = arith.constant 0 : index
    %13 = arith.index_cast %12 : i32 to index
    %c1 = arith.constant 1 : index
    %c0_8 = arith.constant 0 : index
    %14 = vector.load %arg2[%c0_7, %13, %c1, %c0_8] : memref<1x18x18x8xbf16, #tpu.memory_space<vmem>>, vector<1x8x16x8xbf16>
    %15 = vector.shape_cast %14 : vector<1x8x16x8xbf16> to vector<8x16x8xbf16>
    %16 = vector.shape_cast %15 : vector<8x16x8xbf16> to vector<128x8xbf16>
    %c1_9 = arith.constant 1 : index
    %c0_10 = arith.constant 0 : index
    %c0_11 = arith.constant 0 : index
    %17 = vector.load %arg3[%c1_9, %c0_10, %c0_11] : memref<9x8x8xbf16, #tpu.memory_space<vmem>>, vector<1x8x8xbf16>
    %18 = vector.shape_cast %17 : vector<1x8x8xbf16> to vector<8x8xbf16>
    %cst_12 = arith.constant dense<0.000000e+00> : vector<128x8xf32>
    %19 = tpu.matmul %16, %18, %cst_12 {dimension_numbers = #tpu.dot_dimension_numbers<[1], [0], [0], [1], [0, 0, 1, 1], [], []>} : vector<128x8xbf16>, vector<8x8xbf16>, vector<128x8xf32> -> vector<128x8xf32>
    %20 = arith.addf %11, %19 : vector<128x8xf32>
    %c0_i32_13 = arith.constant 0 : i32
    %21 = arith.addi %1, %c0_i32_13 : i32
    %c0_14 = arith.constant 0 : index
    %22 = arith.index_cast %21 : i32 to index
    %c2 = arith.constant 2 : index
    %c0_15 = arith.constant 0 : index
    %23 = vector.load %arg2[%c0_14, %22, %c2, %c0_15] : memref<1x18x18x8xbf16, #tpu.memory_space<vmem>>, vector<1x8x16x8xbf16>
    %24 = vector.shape_cast %23 : vector<1x8x16x8xbf16> to vector<8x16x8xbf16>
    %25 = vector.shape_cast %24 : vector<8x16x8xbf16> to vector<128x8xbf16>
    %c2_16 = arith.constant 2 : index
    %c0_17 = arith.constant 0 : index
    %c0_18 = arith.constant 0 : index
    %26 = vector.load %arg3[%c2_16, %c0_17, %c0_18] : memref<9x8x8xbf16, #tpu.memory_space<vmem>>, vector<1x8x8xbf16>
    %27 = vector.shape_cast %26 : vector<1x8x8xbf16> to vector<8x8xbf16>
    %cst_19 = arith.constant dense<0.000000e+00> : vector<128x8xf32>
    %28 = tpu.matmul %25, %27, %cst_19 {dimension_numbers = #tpu.dot_dimension_numbers<[1], [0], [0], [1], [0, 0, 1, 1], [], []>} : vector<128x8xbf16>, vector<8x8xbf16>, vector<128x8xf32> -> vector<128x8xf32>
    %29 = arith.addf %20, %28 : vector<128x8xf32>
    %c1_i32 = arith.constant 1 : i32
    %30 = arith.addi %1, %c1_i32 : i32
    %c0_20 = arith.constant 0 : index
    %31 = arith.index_cast %30 : i32 to index
    %c0_21 = arith.constant 0 : index
    %c0_22 = arith.constant 0 : index
    %32 = vector.load %arg2[%c0_20, %31, %c0_21, %c0_22] : memref<1x18x18x8xbf16, #tpu.memory_space<vmem>>, vector<1x8x16x8xbf16>
    %33 = vector.shape_cast %32 : vector<1x8x16x8xbf16> to vector<8x16x8xbf16>
    %34 = vector.shape_cast %33 : vector<8x16x8xbf16> to vector<128x8xbf16>
    %c3 = arith.constant 3 : index
    %c0_23 = arith.constant 0 : index
    %c0_24 = arith.constant 0 : index
    %35 = vector.load %arg3[%c3, %c0_23, %c0_24] : memref<9x8x8xbf16, #tpu.memory_space<vmem>>, vector<1x8x8xbf16>
    %36 = vector.shape_cast %35 : vector<1x8x8xbf16> to vector<8x8xbf16>
    %cst_25 = arith.constant dense<0.000000e+00> : vector<128x8xf32>
    %37 = tpu.matmul %34, %36, %cst_25 {dimension_numbers = #tpu.dot_dimension_numbers<[1], [0], [0], [1], [0, 0, 1, 1], [], []>} : vector<128x8xbf16>, vector<8x8xbf16>, vector<128x8xf32> -> vector<128x8xf32>
    %38 = arith.addf %29, %37 : vector<128x8xf32>
    %c1_i32_26 = arith.constant 1 : i32
    %39 = arith.addi %1, %c1_i32_26 : i32
    %c0_27 = arith.constant 0 : index
    %40 = arith.index_cast %39 : i32 to index
    %c1_28 = arith.constant 1 : index
    %c0_29 = arith.constant 0 : index
    %41 = vector.load %arg2[%c0_27, %40, %c1_28, %c0_29] : memref<1x18x18x8xbf16, #tpu.memory_space<vmem>>, vector<1x8x16x8xbf16>
    %42 = vector.shape_cast %41 : vector<1x8x16x8xbf16> to vector<8x16x8xbf16>
    %43 = vector.shape_cast %42 : vector<8x16x8xbf16> to vector<128x8xbf16>
    %c4 = arith.constant 4 : index
    %c0_30 = arith.constant 0 : index
    %c0_31 = arith.constant 0 : index
    %44 = vector.load %arg3[%c4, %c0_30, %c0_31] : memref<9x8x8xbf16, #tpu.memory_space<vmem>>, vector<1x8x8xbf16>
    %45 = vector.shape_cast %44 : vector<1x8x8xbf16> to vector<8x8xbf16>
    %cst_32 = arith.constant dense<0.000000e+00> : vector<128x8xf32>
    %46 = tpu.matmul %43, %45, %cst_32 {dimension_numbers = #tpu.dot_dimension_numbers<[1], [0], [0], [1], [0, 0, 1, 1], [], []>} : vector<128x8xbf16>, vector<8x8xbf16>, vector<128x8xf32> -> vector<128x8xf32>
    %47 = arith.addf %38, %46 : vector<128x8xf32>
    %c1_i32_33 = arith.constant 1 : i32
    %48 = arith.addi %1, %c1_i32_33 : i32
    %c0_34 = arith.constant 0 : index
    %49 = arith.index_cast %48 : i32 to index
    %c2_35 = arith.constant 2 : index
    %c0_36 = arith.constant 0 : index
    %50 = vector.load %arg2[%c0_34, %49, %c2_35, %c0_36] : memref<1x18x18x8xbf16, #tpu.memory_space<vmem>>, vector<1x8x16x8xbf16>
    %51 = vector.shape_cast %50 : vector<1x8x16x8xbf16> to vector<8x16x8xbf16>
    %52 = vector.shape_cast %51 : vector<8x16x8xbf16> to vector<128x8xbf16>
    %c5 = arith.constant 5 : index
    %c0_37 = arith.constant 0 : index
    %c0_38 = arith.constant 0 : index
    %53 = vector.load %arg3[%c5, %c0_37, %c0_38] : memref<9x8x8xbf16, #tpu.memory_space<vmem>>, vector<1x8x8xbf16>
    %54 = vector.shape_cast %53 : vector<1x8x8xbf16> to vector<8x8xbf16>
    %cst_39 = arith.constant dense<0.000000e+00> : vector<128x8xf32>
    %55 = tpu.matmul %52, %54, %cst_39 {dimension_numbers = #tpu.dot_dimension_numbers<[1], [0], [0], [1], [0, 0, 1, 1], [], []>} : vector<128x8xbf16>, vector<8x8xbf16>, vector<128x8xf32> -> vector<128x8xf32>
    %56 = arith.addf %47, %55 : vector<128x8xf32>
    %c2_i32 = arith.constant 2 : i32
    %57 = arith.addi %1, %c2_i32 : i32
    %c0_40 = arith.constant 0 : index
    %58 = arith.index_cast %57 : i32 to index
    %c0_41 = arith.constant 0 : index
    %c0_42 = arith.constant 0 : index
    %59 = vector.load %arg2[%c0_40, %58, %c0_41, %c0_42] : memref<1x18x18x8xbf16, #tpu.memory_space<vmem>>, vector<1x8x16x8xbf16>
    %60 = vector.shape_cast %59 : vector<1x8x16x8xbf16> to vector<8x16x8xbf16>
    %61 = vector.shape_cast %60 : vector<8x16x8xbf16> to vector<128x8xbf16>
    %c6 = arith.constant 6 : index
    %c0_43 = arith.constant 0 : index
    %c0_44 = arith.constant 0 : index
    %62 = vector.load %arg3[%c6, %c0_43, %c0_44] : memref<9x8x8xbf16, #tpu.memory_space<vmem>>, vector<1x8x8xbf16>
    %63 = vector.shape_cast %62 : vector<1x8x8xbf16> to vector<8x8xbf16>
    %cst_45 = arith.constant dense<0.000000e+00> : vector<128x8xf32>
    %64 = tpu.matmul %61, %63, %cst_45 {dimension_numbers = #tpu.dot_dimension_numbers<[1], [0], [0], [1], [0, 0, 1, 1], [], []>} : vector<128x8xbf16>, vector<8x8xbf16>, vector<128x8xf32> -> vector<128x8xf32>
    %65 = arith.addf %56, %64 : vector<128x8xf32>
    %c2_i32_46 = arith.constant 2 : i32
    %66 = arith.addi %1, %c2_i32_46 : i32
    %c0_47 = arith.constant 0 : index
    %67 = arith.index_cast %66 : i32 to index
    %c1_48 = arith.constant 1 : index
    %c0_49 = arith.constant 0 : index
    %68 = vector.load %arg2[%c0_47, %67, %c1_48, %c0_49] : memref<1x18x18x8xbf16, #tpu.memory_space<vmem>>, vector<1x8x16x8xbf16>
    %69 = vector.shape_cast %68 : vector<1x8x16x8xbf16> to vector<8x16x8xbf16>
    %70 = vector.shape_cast %69 : vector<8x16x8xbf16> to vector<128x8xbf16>
    %c7 = arith.constant 7 : index
    %c0_50 = arith.constant 0 : index
    %c0_51 = arith.constant 0 : index
    %71 = vector.load %arg3[%c7, %c0_50, %c0_51] : memref<9x8x8xbf16, #tpu.memory_space<vmem>>, vector<1x8x8xbf16>
    %72 = vector.shape_cast %71 : vector<1x8x8xbf16> to vector<8x8xbf16>
    %cst_52 = arith.constant dense<0.000000e+00> : vector<128x8xf32>
    %73 = tpu.matmul %70, %72, %cst_52 {dimension_numbers = #tpu.dot_dimension_numbers<[1], [0], [0], [1], [0, 0, 1, 1], [], []>} : vector<128x8xbf16>, vector<8x8xbf16>, vector<128x8xf32> -> vector<128x8xf32>
    %74 = arith.addf %65, %73 : vector<128x8xf32>
    %c2_i32_53 = arith.constant 2 : i32
    %75 = arith.addi %1, %c2_i32_53 : i32
    %c0_54 = arith.constant 0 : index
    %76 = arith.index_cast %75 : i32 to index
    %c2_55 = arith.constant 2 : index
    %c0_56 = arith.constant 0 : index
    %77 = vector.load %arg2[%c0_54, %76, %c2_55, %c0_56] : memref<1x18x18x8xbf16, #tpu.memory_space<vmem>>, vector<1x8x16x8xbf16>
    %78 = vector.shape_cast %77 : vector<1x8x16x8xbf16> to vector<8x16x8xbf16>
    %79 = vector.shape_cast %78 : vector<8x16x8xbf16> to vector<128x8xbf16>
    %c8 = arith.constant 8 : index
    %c0_57 = arith.constant 0 : index
    %c0_58 = arith.constant 0 : index
    %80 = vector.load %arg3[%c8, %c0_57, %c0_58] : memref<9x8x8xbf16, #tpu.memory_space<vmem>>, vector<1x8x8xbf16>
    %81 = vector.shape_cast %80 : vector<1x8x8xbf16> to vector<8x8xbf16>
    %cst_59 = arith.constant dense<0.000000e+00> : vector<128x8xf32>
    %82 = tpu.matmul %79, %81, %cst_59 {dimension_numbers = #tpu.dot_dimension_numbers<[1], [0], [0], [1], [0, 0, 1, 1], [], []>} : vector<128x8xbf16>, vector<8x8xbf16>, vector<128x8xf32> -> vector<128x8xf32>
    %83 = arith.addf %74, %82 : vector<128x8xf32>
    %c0_60 = arith.constant 0 : index
    %c0_61 = arith.constant 0 : index
    %84 = vector.load %arg4[%c0_60, %c0_61] : memref<1x8xf32, #tpu.memory_space<vmem>>, vector<1x8xf32>
    %85 = vector.broadcast %84 : vector<1x8xf32> to vector<128x8xf32>
    %86 = arith.mulf %83, %85 : vector<128x8xf32>
    %c0_62 = arith.constant 0 : index
    %c0_63 = arith.constant 0 : index
    %87 = vector.load %arg5[%c0_62, %c0_63] : memref<1x8xf32, #tpu.memory_space<vmem>>, vector<1x8xf32>
    %88 = vector.broadcast %87 : vector<1x8xf32> to vector<128x8xf32>
    %89 = arith.addf %86, %88 : vector<128x8xf32>
    %90 = arith.negf %89 : vector<128x8xf32>
    %91 = math.exp %90 : vector<128x8xf32>
    %cst_64 = arith.constant 1.000000e+00 : f32
    %92 = vector.broadcast %cst_64 : f32 to vector<128x8xf32>
    %93 = arith.addf %92, %91 : vector<128x8xf32>
    %94 = arith.divf %92, %93 : vector<128x8xf32>
    %95 = arith.mulf %89, %94 : vector<128x8xf32>
    %96 = arith.truncf %95 : vector<128x8xf32> to vector<128x8xbf16>
    %c0_65 = arith.constant 0 : index
    %c0_66 = arith.constant 0 : index
    %c0_67 = arith.constant 0 : index
    %97 = vector.load %arg6[%c0_65, %c0_66, %c0_67] : memref<1x128x8xbf16, #tpu.memory_space<vmem>>, vector<1x128x8xbf16>
    %98 = vector.shape_cast %97 : vector<1x128x8xbf16> to vector<128x8xbf16>
    %99 = vector.shape_cast %96 : vector<128x8xbf16> to vector<1x128x8xbf16>
    tpu.vector_store %arg6[%c0_65, %c0_66, %c0_67], %99 {strides = array<i32>} : memref<1x128x8xbf16, #tpu.memory_space<vmem>>, vector<1x128x8xbf16>,
    return
  }
  func.func @transform_0(%arg0: i32, %arg1: i32) -> (i32, i32, i32, i32) {
    %c0_i32 = arith.constant 0 : i32
    %c0_i32_0 = arith.constant 0 : i32
    %c0_i32_1 = arith.constant 0 : i32
    %c0_i32_2 = arith.constant 0 : i32
    return %arg0, %c0_i32, %c0_i32_0, %c0_i32_1 : i32, i32, i32, i32
  }
  func.func @transform_1(%arg0: i32, %arg1: i32) -> (i32, i32, i32) {
    %c0_i32 = arith.constant 0 : i32
    %c0_i32_0 = arith.constant 0 : i32
    %c0_i32_1 = arith.constant 0 : i32
    %c0_i32_2 = arith.constant 0 : i32
    return %c0_i32, %c0_i32_0, %c0_i32_1 : i32, i32, i32
  }
  func.func @transform_2(%arg0: i32, %arg1: i32) -> (i32, i32) {
    %c0_i32 = arith.constant 0 : i32
    %c0_i32_0 = arith.constant 0 : i32
    %c0_i32_1 = arith.constant 0 : i32
    return %c0_i32, %c0_i32_0 : i32, i32
  }
  func.func @transform_3(%arg0: i32, %arg1: i32) -> (i32, i32) {
    %c0_i32 = arith.constant 0 : i32
    %c0_i32_0 = arith.constant 0 : i32
    %c0_i32_1 = arith.constant 0 : i32
    return %c0_i32, %c0_i32_0 : i32, i32
  }
  func.func @transform_4(%arg0: i32, %arg1: i32) -> (i32, i32, i32) {
    %c0_i32 = arith.constant 0 : i32
    %c0_i32_0 = arith.constant 0 : i32
    return %arg0, %arg1, %c0_i32 : i32, i32, i32
  }
}

module attributes {stable_mosaic.version = 11 : i64} {
  func.func @_conv3x3_kernel(%arg0: i32, %arg1: i32, %arg2: memref<1x18x18x8xbf16, #tpu.memory_space<vmem>>, %arg3: memref<9x8x6xbf16, #tpu.memory_space<vmem>>, %arg4: memref<1x6xf32, #tpu.memory_space<vmem>>, %arg5: memref<1x6xf32, #tpu.memory_space<vmem>>, %arg6: memref<1x128x6xf32, #tpu.memory_space<vmem>>) attributes {dimension_semantics = [#tpu.dimension_semantics<parallel>, #tpu.dimension_semantics<parallel>], iteration_bounds = array<i64: 2, 2>, scalar_prefetch = 0 : i64, scratch_operands = 0 : i64, tpu.core_type = #tpu.core_type<tc>, window_params = [{transform_indices = @transform_0, window_bounds = array<i64: 1, 18, 18, 8>}, {pipeline_mode = #tpu.pipeline_mode<synchronous>, transform_indices = @transform_1, window_bounds = array<i64: 9, 8, 6>}, {pipeline_mode = #tpu.pipeline_mode<synchronous>, transform_indices = @transform_2, window_bounds = array<i64: 1, 6>}, {pipeline_mode = #tpu.pipeline_mode<synchronous>, transform_indices = @transform_3, window_bounds = array<i64: 1, 6>}, {transform_indices = @transform_4, window_bounds = array<i64: 1, 128, 6>}]} {
    %c8_i32 = arith.constant 8 : i32
    %0 = arith.muli %arg1, %c8_i32 : i32
    %1 = tpu.assume_multiple %0, 8 : i32
    %cst = arith.constant 0.000000e+00 : f32
    %2 = vector.broadcast %cst : f32 to vector<128x6xf32>
    %c0_i32 = arith.constant 0 : i32
    %3 = arith.addi %1, %c0_i32 : i32
    %c0 = arith.constant 0 : index
    %4 = arith.index_cast %3 : i32 to index
    %c0_0 = arith.constant 0 : index
    %c0_1 = arith.constant 0 : index
    %5 = vector.load %arg2[%c0, %4, %c0_0, %c0_1] : memref<1x18x18x8xbf16, #tpu.memory_space<vmem>>, vector<1x8x16x8xbf16>
    %6 = vector.shape_cast %5 : vector<1x8x16x8xbf16> to vector<8x16x8xbf16>
    %7 = vector.shape_cast %6 : vector<8x16x8xbf16> to vector<128x8xbf16>
    %c0_2 = arith.constant 0 : index
    %c0_3 = arith.constant 0 : index
    %c0_4 = arith.constant 0 : index
    %8 = vector.load %arg3[%c0_2, %c0_3, %c0_4] : memref<9x8x6xbf16, #tpu.memory_space<vmem>>, vector<1x8x6xbf16>
    %9 = vector.shape_cast %8 : vector<1x8x6xbf16> to vector<8x6xbf16>
    %cst_5 = arith.constant dense<0.000000e+00> : vector<128x6xf32>
    %10 = tpu.matmul %7, %9, %cst_5 {dimension_numbers = #tpu.dot_dimension_numbers<[1], [0], [0], [1], [0, 0, 1, 1], [], []>} : vector<128x8xbf16>, vector<8x6xbf16>, vector<128x6xf32> -> vector<128x6xf32>
    %11 = arith.addf %2, %10 : vector<128x6xf32>
    %c0_i32_6 = arith.constant 0 : i32
    %12 = arith.addi %1, %c0_i32_6 : i32
    %c0_7 = arith.constant 0 : index
    %13 = arith.index_cast %12 : i32 to index
    %c1 = arith.constant 1 : index
    %c0_8 = arith.constant 0 : index
    %14 = vector.load %arg2[%c0_7, %13, %c1, %c0_8] : memref<1x18x18x8xbf16, #tpu.memory_space<vmem>>, vector<1x8x16x8xbf16>
    %15 = vector.shape_cast %14 : vector<1x8x16x8xbf16> to vector<8x16x8xbf16>
    %16 = vector.shape_cast %15 : vector<8x16x8xbf16> to vector<128x8xbf16>
    %c1_9 = arith.constant 1 : index
    %c0_10 = arith.constant 0 : index
    %c0_11 = arith.constant 0 : index
    %17 = vector.load %arg3[%c1_9, %c0_10, %c0_11] : memref<9x8x6xbf16, #tpu.memory_space<vmem>>, vector<1x8x6xbf16>
    %18 = vector.shape_cast %17 : vector<1x8x6xbf16> to vector<8x6xbf16>
    %cst_12 = arith.constant dense<0.000000e+00> : vector<128x6xf32>
    %19 = tpu.matmul %16, %18, %cst_12 {dimension_numbers = #tpu.dot_dimension_numbers<[1], [0], [0], [1], [0, 0, 1, 1], [], []>} : vector<128x8xbf16>, vector<8x6xbf16>, vector<128x6xf32> -> vector<128x6xf32>
    %20 = arith.addf %11, %19 : vector<128x6xf32>
    %c0_i32_13 = arith.constant 0 : i32
    %21 = arith.addi %1, %c0_i32_13 : i32
    %c0_14 = arith.constant 0 : index
    %22 = arith.index_cast %21 : i32 to index
    %c2 = arith.constant 2 : index
    %c0_15 = arith.constant 0 : index
    %23 = vector.load %arg2[%c0_14, %22, %c2, %c0_15] : memref<1x18x18x8xbf16, #tpu.memory_space<vmem>>, vector<1x8x16x8xbf16>
    %24 = vector.shape_cast %23 : vector<1x8x16x8xbf16> to vector<8x16x8xbf16>
    %25 = vector.shape_cast %24 : vector<8x16x8xbf16> to vector<128x8xbf16>
    %c2_16 = arith.constant 2 : index
    %c0_17 = arith.constant 0 : index
    %c0_18 = arith.constant 0 : index
    %26 = vector.load %arg3[%c2_16, %c0_17, %c0_18] : memref<9x8x6xbf16, #tpu.memory_space<vmem>>, vector<1x8x6xbf16>
    %27 = vector.shape_cast %26 : vector<1x8x6xbf16> to vector<8x6xbf16>
    %cst_19 = arith.constant dense<0.000000e+00> : vector<128x6xf32>
    %28 = tpu.matmul %25, %27, %cst_19 {dimension_numbers = #tpu.dot_dimension_numbers<[1], [0], [0], [1], [0, 0, 1, 1], [], []>} : vector<128x8xbf16>, vector<8x6xbf16>, vector<128x6xf32> -> vector<128x6xf32>
    %29 = arith.addf %20, %28 : vector<128x6xf32>
    %c1_i32 = arith.constant 1 : i32
    %30 = arith.addi %1, %c1_i32 : i32
    %c0_20 = arith.constant 0 : index
    %31 = arith.index_cast %30 : i32 to index
    %c0_21 = arith.constant 0 : index
    %c0_22 = arith.constant 0 : index
    %32 = vector.load %arg2[%c0_20, %31, %c0_21, %c0_22] : memref<1x18x18x8xbf16, #tpu.memory_space<vmem>>, vector<1x8x16x8xbf16>
    %33 = vector.shape_cast %32 : vector<1x8x16x8xbf16> to vector<8x16x8xbf16>
    %34 = vector.shape_cast %33 : vector<8x16x8xbf16> to vector<128x8xbf16>
    %c3 = arith.constant 3 : index
    %c0_23 = arith.constant 0 : index
    %c0_24 = arith.constant 0 : index
    %35 = vector.load %arg3[%c3, %c0_23, %c0_24] : memref<9x8x6xbf16, #tpu.memory_space<vmem>>, vector<1x8x6xbf16>
    %36 = vector.shape_cast %35 : vector<1x8x6xbf16> to vector<8x6xbf16>
    %cst_25 = arith.constant dense<0.000000e+00> : vector<128x6xf32>
    %37 = tpu.matmul %34, %36, %cst_25 {dimension_numbers = #tpu.dot_dimension_numbers<[1], [0], [0], [1], [0, 0, 1, 1], [], []>} : vector<128x8xbf16>, vector<8x6xbf16>, vector<128x6xf32> -> vector<128x6xf32>
    %38 = arith.addf %29, %37 : vector<128x6xf32>
    %c1_i32_26 = arith.constant 1 : i32
    %39 = arith.addi %1, %c1_i32_26 : i32
    %c0_27 = arith.constant 0 : index
    %40 = arith.index_cast %39 : i32 to index
    %c1_28 = arith.constant 1 : index
    %c0_29 = arith.constant 0 : index
    %41 = vector.load %arg2[%c0_27, %40, %c1_28, %c0_29] : memref<1x18x18x8xbf16, #tpu.memory_space<vmem>>, vector<1x8x16x8xbf16>
    %42 = vector.shape_cast %41 : vector<1x8x16x8xbf16> to vector<8x16x8xbf16>
    %43 = vector.shape_cast %42 : vector<8x16x8xbf16> to vector<128x8xbf16>
    %c4 = arith.constant 4 : index
    %c0_30 = arith.constant 0 : index
    %c0_31 = arith.constant 0 : index
    %44 = vector.load %arg3[%c4, %c0_30, %c0_31] : memref<9x8x6xbf16, #tpu.memory_space<vmem>>, vector<1x8x6xbf16>
    %45 = vector.shape_cast %44 : vector<1x8x6xbf16> to vector<8x6xbf16>
    %cst_32 = arith.constant dense<0.000000e+00> : vector<128x6xf32>
    %46 = tpu.matmul %43, %45, %cst_32 {dimension_numbers = #tpu.dot_dimension_numbers<[1], [0], [0], [1], [0, 0, 1, 1], [], []>} : vector<128x8xbf16>, vector<8x6xbf16>, vector<128x6xf32> -> vector<128x6xf32>
    %47 = arith.addf %38, %46 : vector<128x6xf32>
    %c1_i32_33 = arith.constant 1 : i32
    %48 = arith.addi %1, %c1_i32_33 : i32
    %c0_34 = arith.constant 0 : index
    %49 = arith.index_cast %48 : i32 to index
    %c2_35 = arith.constant 2 : index
    %c0_36 = arith.constant 0 : index
    %50 = vector.load %arg2[%c0_34, %49, %c2_35, %c0_36] : memref<1x18x18x8xbf16, #tpu.memory_space<vmem>>, vector<1x8x16x8xbf16>
    %51 = vector.shape_cast %50 : vector<1x8x16x8xbf16> to vector<8x16x8xbf16>
    %52 = vector.shape_cast %51 : vector<8x16x8xbf16> to vector<128x8xbf16>
    %c5 = arith.constant 5 : index
    %c0_37 = arith.constant 0 : index
    %c0_38 = arith.constant 0 : index
    %53 = vector.load %arg3[%c5, %c0_37, %c0_38] : memref<9x8x6xbf16, #tpu.memory_space<vmem>>, vector<1x8x6xbf16>
    %54 = vector.shape_cast %53 : vector<1x8x6xbf16> to vector<8x6xbf16>
    %cst_39 = arith.constant dense<0.000000e+00> : vector<128x6xf32>
    %55 = tpu.matmul %52, %54, %cst_39 {dimension_numbers = #tpu.dot_dimension_numbers<[1], [0], [0], [1], [0, 0, 1, 1], [], []>} : vector<128x8xbf16>, vector<8x6xbf16>, vector<128x6xf32> -> vector<128x6xf32>
    %56 = arith.addf %47, %55 : vector<128x6xf32>
    %c2_i32 = arith.constant 2 : i32
    %57 = arith.addi %1, %c2_i32 : i32
    %c0_40 = arith.constant 0 : index
    %58 = arith.index_cast %57 : i32 to index
    %c0_41 = arith.constant 0 : index
    %c0_42 = arith.constant 0 : index
    %59 = vector.load %arg2[%c0_40, %58, %c0_41, %c0_42] : memref<1x18x18x8xbf16, #tpu.memory_space<vmem>>, vector<1x8x16x8xbf16>
    %60 = vector.shape_cast %59 : vector<1x8x16x8xbf16> to vector<8x16x8xbf16>
    %61 = vector.shape_cast %60 : vector<8x16x8xbf16> to vector<128x8xbf16>
    %c6 = arith.constant 6 : index
    %c0_43 = arith.constant 0 : index
    %c0_44 = arith.constant 0 : index
    %62 = vector.load %arg3[%c6, %c0_43, %c0_44] : memref<9x8x6xbf16, #tpu.memory_space<vmem>>, vector<1x8x6xbf16>
    %63 = vector.shape_cast %62 : vector<1x8x6xbf16> to vector<8x6xbf16>
    %cst_45 = arith.constant dense<0.000000e+00> : vector<128x6xf32>
    %64 = tpu.matmul %61, %63, %cst_45 {dimension_numbers = #tpu.dot_dimension_numbers<[1], [0], [0], [1], [0, 0, 1, 1], [], []>} : vector<128x8xbf16>, vector<8x6xbf16>, vector<128x6xf32> -> vector<128x6xf32>
    %65 = arith.addf %56, %64 : vector<128x6xf32>
    %c2_i32_46 = arith.constant 2 : i32
    %66 = arith.addi %1, %c2_i32_46 : i32
    %c0_47 = arith.constant 0 : index
    %67 = arith.index_cast %66 : i32 to index
    %c1_48 = arith.constant 1 : index
    %c0_49 = arith.constant 0 : index
    %68 = vector.load %arg2[%c0_47, %67, %c1_48, %c0_49] : memref<1x18x18x8xbf16, #tpu.memory_space<vmem>>, vector<1x8x16x8xbf16>
    %69 = vector.shape_cast %68 : vector<1x8x16x8xbf16> to vector<8x16x8xbf16>
    %70 = vector.shape_cast %69 : vector<8x16x8xbf16> to vector<128x8xbf16>
    %c7 = arith.constant 7 : index
    %c0_50 = arith.constant 0 : index
    %c0_51 = arith.constant 0 : index
    %71 = vector.load %arg3[%c7, %c0_50, %c0_51] : memref<9x8x6xbf16, #tpu.memory_space<vmem>>, vector<1x8x6xbf16>
    %72 = vector.shape_cast %71 : vector<1x8x6xbf16> to vector<8x6xbf16>
    %cst_52 = arith.constant dense<0.000000e+00> : vector<128x6xf32>
    %73 = tpu.matmul %70, %72, %cst_52 {dimension_numbers = #tpu.dot_dimension_numbers<[1], [0], [0], [1], [0, 0, 1, 1], [], []>} : vector<128x8xbf16>, vector<8x6xbf16>, vector<128x6xf32> -> vector<128x6xf32>
    %74 = arith.addf %65, %73 : vector<128x6xf32>
    %c2_i32_53 = arith.constant 2 : i32
    %75 = arith.addi %1, %c2_i32_53 : i32
    %c0_54 = arith.constant 0 : index
    %76 = arith.index_cast %75 : i32 to index
    %c2_55 = arith.constant 2 : index
    %c0_56 = arith.constant 0 : index
    %77 = vector.load %arg2[%c0_54, %76, %c2_55, %c0_56] : memref<1x18x18x8xbf16, #tpu.memory_space<vmem>>, vector<1x8x16x8xbf16>
    %78 = vector.shape_cast %77 : vector<1x8x16x8xbf16> to vector<8x16x8xbf16>
    %79 = vector.shape_cast %78 : vector<8x16x8xbf16> to vector<128x8xbf16>
    %c8 = arith.constant 8 : index
    %c0_57 = arith.constant 0 : index
    %c0_58 = arith.constant 0 : index
    %80 = vector.load %arg3[%c8, %c0_57, %c0_58] : memref<9x8x6xbf16, #tpu.memory_space<vmem>>, vector<1x8x6xbf16>
    %81 = vector.shape_cast %80 : vector<1x8x6xbf16> to vector<8x6xbf16>
    %cst_59 = arith.constant dense<0.000000e+00> : vector<128x6xf32>
    %82 = tpu.matmul %79, %81, %cst_59 {dimension_numbers = #tpu.dot_dimension_numbers<[1], [0], [0], [1], [0, 0, 1, 1], [], []>} : vector<128x8xbf16>, vector<8x6xbf16>, vector<128x6xf32> -> vector<128x6xf32>
    %83 = arith.addf %74, %82 : vector<128x6xf32>
    %c0_60 = arith.constant 0 : index
    %c0_61 = arith.constant 0 : index
    %84 = vector.load %arg4[%c0_60, %c0_61] : memref<1x6xf32, #tpu.memory_space<vmem>>, vector<1x6xf32>
    %85 = vector.broadcast %84 : vector<1x6xf32> to vector<128x6xf32>
    %86 = arith.mulf %83, %85 : vector<128x6xf32>
    %c0_62 = arith.constant 0 : index
    %c0_63 = arith.constant 0 : index
    %87 = vector.load %arg5[%c0_62, %c0_63] : memref<1x6xf32, #tpu.memory_space<vmem>>, vector<1x6xf32>
    %88 = vector.broadcast %87 : vector<1x6xf32> to vector<128x6xf32>
    %89 = arith.addf %86, %88 : vector<128x6xf32>
    %90 = math.tanh %89 : vector<128x6xf32>
    %c0_64 = arith.constant 0 : index
    %c0_65 = arith.constant 0 : index
    %c0_66 = arith.constant 0 : index
    %91 = vector.load %arg6[%c0_64, %c0_65, %c0_66] : memref<1x128x6xf32, #tpu.memory_space<vmem>>, vector<1x128x6xf32>
    %92 = vector.shape_cast %91 : vector<1x128x6xf32> to vector<128x6xf32>
    %93 = vector.shape_cast %90 : vector<128x6xf32> to vector<1x128x6xf32>
    tpu.vector_store %arg6[%c0_64, %c0_65, %c0_66], %93 {strides = array<i32>} : memref<1x128x6xf32, #tpu.memory_space<vmem>>, vector<1x128x6xf32>,
    return
  }
  func.func @transform_0(%arg0: i32, %arg1: i32) -> (i32, i32, i32, i32) {
    %c0_i32 = arith.constant 0 : i32
    %c0_i32_0 = arith.constant 0 : i32
    %c0_i32_1 = arith.constant 0 : i32
    %c0_i32_2 = arith.constant 0 : i32
    return %arg0, %c0_i32, %c0_i32_0, %c0_i32_1 : i32, i32, i32, i32
  }
  func.func @transform_1(%arg0: i32, %arg1: i32) -> (i32, i32, i32) {
    %c0_i32 = arith.constant 0 : i32
    %c0_i32_0 = arith.constant 0 : i32
    %c0_i32_1 = arith.constant 0 : i32
    %c0_i32_2 = arith.constant 0 : i32
    return %c0_i32, %c0_i32_0, %c0_i32_1 : i32, i32, i32
  }
  func.func @transform_2(%arg0: i32, %arg1: i32) -> (i32, i32) {
    %c0_i32 = arith.constant 0 : i32
    %c0_i32_0 = arith.constant 0 : i32
    %c0_i32_1 = arith.constant 0 : i32
    return %c0_i32, %c0_i32_0 : i32, i32
  }
  func.func @transform_3(%arg0: i32, %arg1: i32) -> (i32, i32) {
    %c0_i32 = arith.constant 0 : i32
    %c0_i32_0 = arith.constant 0 : i32
    %c0_i32_1 = arith.constant 0 : i32
    return %c0_i32, %c0_i32_0 : i32, i32
  }
  func.func @transform_4(%arg0: i32, %arg1: i32) -> (i32, i32, i32) {
    %c0_i32 = arith.constant 0 : i32
    %c0_i32_0 = arith.constant 0 : i32
    return %arg0, %arg1, %c0_i32 : i32, i32, i32
  }
}

module attributes {stable_mosaic.version = 11 : i64} {
  func.func @_dsc_gn_silu_kernel(%arg0: i32, %arg1: memref<1x256x24xbf16, #tpu.memory_space<vmem>>, %arg2: memref<24x8xbf16, #tpu.memory_space<vmem>>, %arg3: memref<1x8xf32, #tpu.memory_space<vmem>>, %arg4: memref<1x8xf32, #tpu.memory_space<vmem>>, %arg5: memref<1x8xf32, #tpu.memory_space<vmem>>, %arg6: memref<2x8xf32, #tpu.memory_space<vmem>>, %arg7: memref<1x256x8xbf16, #tpu.memory_space<vmem>>) attributes {dimension_semantics = [#tpu.dimension_semantics<parallel>], iteration_bounds = array<i64: 2>, scalar_prefetch = 0 : i64, scratch_operands = 0 : i64, tpu.core_type = #tpu.core_type<tc>, window_params = [{transform_indices = @transform_0, window_bounds = array<i64: 1, 256, 24>}, {pipeline_mode = #tpu.pipeline_mode<synchronous>, transform_indices = @transform_1, window_bounds = array<i64: 24, 8>}, {pipeline_mode = #tpu.pipeline_mode<synchronous>, transform_indices = @transform_2, window_bounds = array<i64: 1, 8>}, {pipeline_mode = #tpu.pipeline_mode<synchronous>, transform_indices = @transform_3, window_bounds = array<i64: 1, 8>}, {pipeline_mode = #tpu.pipeline_mode<synchronous>, transform_indices = @transform_4, window_bounds = array<i64: 1, 8>}, {pipeline_mode = #tpu.pipeline_mode<synchronous>, transform_indices = @transform_5, window_bounds = array<i64: 2, 8>}, {transform_indices = @transform_6, window_bounds = array<i64: 1, 256, 8>}]} {
    %c0 = arith.constant 0 : index
    %c0_0 = arith.constant 0 : index
    %c0_1 = arith.constant 0 : index
    %0 = vector.load %arg1[%c0, %c0_0, %c0_1] : memref<1x256x24xbf16, #tpu.memory_space<vmem>>, vector<1x256x24xbf16>
    %1 = vector.shape_cast %0 : vector<1x256x24xbf16> to vector<256x24xbf16>
    %c0_2 = arith.constant 0 : index
    %c0_3 = arith.constant 0 : index
    %2 = vector.load %arg2[%c0_2, %c0_3] : memref<24x8xbf16, #tpu.memory_space<vmem>>, vector<24x8xbf16>
    %cst = arith.constant dense<0.000000e+00> : vector<256x8xf32>
    %3 = tpu.matmul %1, %2, %cst {dimension_numbers = #tpu.dot_dimension_numbers<[1], [0], [0], [1], [0, 0, 1, 1], [], []>} : vector<256x24xbf16>, vector<24x8xbf16>, vector<256x8xf32> -> vector<256x8xf32>
    %c0_4 = arith.constant 0 : index
    %c0_5 = arith.constant 0 : index
    %4 = vector.load %arg3[%c0_4, %c0_5] : memref<1x8xf32, #tpu.memory_space<vmem>>, vector<1x8xf32>
    %5 = vector.broadcast %4 : vector<1x8xf32> to vector<256x8xf32>
    %6 = arith.addf %3, %5 : vector<256x8xf32>
    %c0_6 = arith.constant 0 : index
    %c0_7 = arith.constant 0 : index
    %7 = vector.load %arg6[%c0_6, %c0_7] : memref<2x8xf32, #tpu.memory_space<vmem>>, vector<2x8xf32>
    %cst_8 = arith.constant dense<0.000000e+00> : vector<8xf32>
    %8 = vector.multi_reduction <add>, %6, %cst_8 [0] : vector<256x8xf32> to vector<8xf32>
    %9 = vector.shape_cast %8 : vector<8xf32> to vector<1x8xf32>
    %10 = arith.mulf %6, %6 : vector<256x8xf32>
    %cst_9 = arith.constant dense<0.000000e+00> : vector<8xf32>
    %11 = vector.multi_reduction <add>, %10, %cst_9 [0] : vector<256x8xf32> to vector<8xf32>
    %12 = vector.shape_cast %11 : vector<8xf32> to vector<1x8xf32>
    %13 = vector.broadcast %9 : vector<1x8xf32> to vector<2x8xf32>
    %14 = arith.mulf %7, %13 : vector<2x8xf32>
    %cst_10 = arith.constant dense<0.000000e+00> : vector<2xf32>
    %15 = vector.multi_reduction <add>, %14, %cst_10 [1] : vector<2x8xf32> to vector<2xf32>
    %16 = vector.shape_cast %15 : vector<2xf32> to vector<2x1xf32>
    %17 = vector.broadcast %12 : vector<1x8xf32> to vector<2x8xf32>
    %18 = arith.mulf %7, %17 : vector<2x8xf32>
    %cst_11 = arith.constant dense<0.000000e+00> : vector<2xf32>
    %19 = vector.multi_reduction <add>, %18, %cst_11 [1] : vector<2x8xf32> to vector<2xf32>
    %20 = vector.shape_cast %19 : vector<2xf32> to vector<2x1xf32>
    %cst_12 = arith.constant 9.765625E-4 : f32
    %21 = vector.broadcast %cst_12 : f32 to vector<2x1xf32>
    %22 = arith.mulf %16, %21 : vector<2x1xf32>
    %cst_13 = arith.constant 9.765625E-4 : f32
    %23 = vector.broadcast %cst_13 : f32 to vector<2x1xf32>
    %24 = arith.mulf %20, %23 : vector<2x1xf32>
    %25 = arith.mulf %22, %22 : vector<2x1xf32>
    %26 = arith.subf %24, %25 : vector<2x1xf32>
    %cst_14 = arith.constant 9.99999974E-6 : f32
    %27 = vector.broadcast %cst_14 : f32 to vector<2x1xf32>
    %28 = arith.addf %26, %27 : vector<2x1xf32>
    %29 = math.rsqrt %28 : vector<2x1xf32>
    %30 = vector.broadcast %22 : vector<2x1xf32> to vector<2x8xf32>
    %31 = arith.mulf %7, %30 : vector<2x8xf32>
    %cst_15 = arith.constant dense<0.000000e+00> : vector<8xf32>
    %32 = vector.multi_reduction <add>, %31, %cst_15 [0] : vector<2x8xf32> to vector<8xf32>
    %33 = vector.shape_cast %32 : vector<8xf32> to vector<1x8xf32>
    %34 = vector.broadcast %29 : vector<2x1xf32> to vector<2x8xf32>
    %35 = arith.mulf %7, %34 : vector<2x8xf32>
    %cst_16 = arith.constant dense<0.000000e+00> : vector<8xf32>
    %36 = vector.multi_reduction <add>, %35, %cst_16 [0] : vector<2x8xf32> to vector<8xf32>
    %37 = vector.shape_cast %36 : vector<8xf32> to vector<1x8xf32>
    %38 = vector.broadcast %33 : vector<1x8xf32> to vector<256x8xf32>
    %39 = arith.subf %6, %38 : vector<256x8xf32>
    %40 = vector.broadcast %37 : vector<1x8xf32> to vector<256x8xf32>
    %41 = arith.mulf %39, %40 : vector<256x8xf32>
    %c0_17 = arith.constant 0 : index
    %c0_18 = arith.constant 0 : index
    %42 = vector.load %arg4[%c0_17, %c0_18] : memref<1x8xf32, #tpu.memory_space<vmem>>, vector<1x8xf32>
    %43 = vector.broadcast %42 : vector<1x8xf32> to vector<256x8xf32>
    %44 = arith.mulf %41, %43 : vector<256x8xf32>
    %c0_19 = arith.constant 0 : index
    %c0_20 = arith.constant 0 : index
    %45 = vector.load %arg5[%c0_19, %c0_20] : memref<1x8xf32, #tpu.memory_space<vmem>>, vector<1x8xf32>
    %46 = vector.broadcast %45 : vector<1x8xf32> to vector<256x8xf32>
    %47 = arith.addf %44, %46 : vector<256x8xf32>
    %48 = arith.negf %47 : vector<256x8xf32>
    %49 = math.exp %48 : vector<256x8xf32>
    %cst_21 = arith.constant 1.000000e+00 : f32
    %50 = vector.broadcast %cst_21 : f32 to vector<256x8xf32>
    %51 = arith.addf %50, %49 : vector<256x8xf32>
    %52 = arith.divf %50, %51 : vector<256x8xf32>
    %53 = arith.mulf %47, %52 : vector<256x8xf32>
    %54 = arith.truncf %53 : vector<256x8xf32> to vector<256x8xbf16>
    %c0_22 = arith.constant 0 : index
    %c0_23 = arith.constant 0 : index
    %c0_24 = arith.constant 0 : index
    %55 = vector.load %arg7[%c0_22, %c0_23, %c0_24] : memref<1x256x8xbf16, #tpu.memory_space<vmem>>, vector<1x256x8xbf16>
    %56 = vector.shape_cast %55 : vector<1x256x8xbf16> to vector<256x8xbf16>
    %57 = vector.shape_cast %54 : vector<256x8xbf16> to vector<1x256x8xbf16>
    tpu.vector_store %arg7[%c0_22, %c0_23, %c0_24], %57 {strides = array<i32>} : memref<1x256x8xbf16, #tpu.memory_space<vmem>>, vector<1x256x8xbf16>,
    return
  }
  func.func @transform_0(%arg0: i32) -> (i32, i32, i32) {
    %c0_i32 = arith.constant 0 : i32
    %c0_i32_0 = arith.constant 0 : i32
    %c0_i32_1 = arith.constant 0 : i32
    return %arg0, %c0_i32, %c0_i32_0 : i32, i32, i32
  }
  func.func @transform_1(%arg0: i32) -> (i32, i32) {
    %c0_i32 = arith.constant 0 : i32
    %c0_i32_0 = arith.constant 0 : i32
    %c0_i32_1 = arith.constant 0 : i32
    return %c0_i32, %c0_i32_0 : i32, i32
  }
  func.func @transform_2(%arg0: i32) -> (i32, i32) {
    %c0_i32 = arith.constant 0 : i32
    %c0_i32_0 = arith.constant 0 : i32
    %c0_i32_1 = arith.constant 0 : i32
    return %c0_i32, %c0_i32_0 : i32, i32
  }
  func.func @transform_3(%arg0: i32) -> (i32, i32) {
    %c0_i32 = arith.constant 0 : i32
    %c0_i32_0 = arith.constant 0 : i32
    %c0_i32_1 = arith.constant 0 : i32
    return %c0_i32, %c0_i32_0 : i32, i32
  }
  func.func @transform_4(%arg0: i32) -> (i32, i32) {
    %c0_i32 = arith.constant 0 : i32
    %c0_i32_0 = arith.constant 0 : i32
    %c0_i32_1 = arith.constant 0 : i32
    return %c0_i32, %c0_i32_0 : i32, i32
  }
  func.func @transform_5(%arg0: i32) -> (i32, i32) {
    %c0_i32 = arith.constant 0 : i32
    %c0_i32_0 = arith.constant 0 : i32
    %c0_i32_1 = arith.constant 0 : i32
    return %c0_i32, %c0_i32_0 : i32, i32
  }
  func.func @transform_6(%arg0: i32) -> (i32, i32, i32) {
    %c0_i32 = arith.constant 0 : i32
    %c0_i32_0 = arith.constant 0 : i32
    %c0_i32_1 = arith.constant 0 : i32
    return %arg0, %c0_i32, %c0_i32_0 : i32, i32, i32
  }
}

module attributes {stable_mosaic.version = 11 : i64} {
  func.func @_fused_cat_mm_kernel(%arg0: i32, %arg1: memref<128x8xbf16, #tpu.memory_space<vmem>>, %arg2: memref<128x8xbf16, #tpu.memory_space<vmem>>, %arg3: memref<128x8xbf16, #tpu.memory_space<vmem>>, %arg4: memref<8x8xbf16, #tpu.memory_space<vmem>>, %arg5: memref<8x8xbf16, #tpu.memory_space<vmem>>, %arg6: memref<8x8xbf16, #tpu.memory_space<vmem>>, %arg7: memref<1x8xf32, #tpu.memory_space<vmem>>, %arg8: memref<1x8xf32, #tpu.memory_space<vmem>>, %arg9: memref<128x8xbf16, #tpu.memory_space<vmem>>) attributes {dimension_semantics = [#tpu.dimension_semantics<parallel>], iteration_bounds = array<i64: 4>, scalar_prefetch = 0 : i64, scratch_operands = 0 : i64, tpu.core_type = #tpu.core_type<tc>, window_params = [{transform_indices = @transform_0, window_bounds = array<i64: 128, 8>}, {transform_indices = @transform_1, window_bounds = array<i64: 128, 8>}, {transform_indices = @transform_2, window_bounds = array<i64: 128, 8>}, {pipeline_mode = #tpu.pipeline_mode<synchronous>, transform_indices = @transform_3, window_bounds = array<i64: 8, 8>}, {pipeline_mode = #tpu.pipeline_mode<synchronous>, transform_indices = @transform_4, window_bounds = array<i64: 8, 8>}, {pipeline_mode = #tpu.pipeline_mode<synchronous>, transform_indices = @transform_5, window_bounds = array<i64: 8, 8>}, {pipeline_mode = #tpu.pipeline_mode<synchronous>, transform_indices = @transform_6, window_bounds = array<i64: 1, 8>}, {pipeline_mode = #tpu.pipeline_mode<synchronous>, transform_indices = @transform_7, window_bounds = array<i64: 1, 8>}, {transform_indices = @transform_8, window_bounds = array<i64: 128, 8>}]} {
    %c0 = arith.constant 0 : index
    %c0_0 = arith.constant 0 : index
    %0 = vector.load %arg1[%c0, %c0_0] : memref<128x8xbf16, #tpu.memory_space<vmem>>, vector<128x8xbf16>
    %c0_1 = arith.constant 0 : index
    %c0_2 = arith.constant 0 : index
    %1 = vector.load %arg4[%c0_1, %c0_2] : memref<8x8xbf16, #tpu.memory_space<vmem>>, vector<8x8xbf16>
    %cst = arith.constant dense<0.000000e+00> : vector<128x8xf32>
    %2 = tpu.matmul %0, %1, %cst {dimension_numbers = #tpu.dot_dimension_numbers<[1], [0], [0], [1], [0, 0, 1, 1], [], []>} : vector<128x8xbf16>, vector<8x8xbf16>, vector<128x8xf32> -> vector<128x8xf32>
    %c0_3 = arith.constant 0 : index
    %c0_4 = arith.constant 0 : index
    %3 = vector.load %arg2[%c0_3, %c0_4] : memref<128x8xbf16, #tpu.memory_space<vmem>>, vector<128x8xbf16>
    %c0_5 = arith.constant 0 : index
    %c0_6 = arith.constant 0 : index
    %4 = vector.load %arg5[%c0_5, %c0_6] : memref<8x8xbf16, #tpu.memory_space<vmem>>, vector<8x8xbf16>
    %cst_7 = arith.constant dense<0.000000e+00> : vector<128x8xf32>
    %5 = tpu.matmul %3, %4, %cst_7 {dimension_numbers = #tpu.dot_dimension_numbers<[1], [0], [0], [1], [0, 0, 1, 1], [], []>} : vector<128x8xbf16>, vector<8x8xbf16>, vector<128x8xf32> -> vector<128x8xf32>
    %6 = arith.addf %2, %5 : vector<128x8xf32>
    %c0_8 = arith.constant 0 : index
    %c0_9 = arith.constant 0 : index
    %7 = vector.load %arg3[%c0_8, %c0_9] : memref<128x8xbf16, #tpu.memory_space<vmem>>, vector<128x8xbf16>
    %c0_10 = arith.constant 0 : index
    %c0_11 = arith.constant 0 : index
    %8 = vector.load %arg6[%c0_10, %c0_11] : memref<8x8xbf16, #tpu.memory_space<vmem>>, vector<8x8xbf16>
    %cst_12 = arith.constant dense<0.000000e+00> : vector<128x8xf32>
    %9 = tpu.matmul %7, %8, %cst_12 {dimension_numbers = #tpu.dot_dimension_numbers<[1], [0], [0], [1], [0, 0, 1, 1], [], []>} : vector<128x8xbf16>, vector<8x8xbf16>, vector<128x8xf32> -> vector<128x8xf32>
    %10 = arith.addf %6, %9 : vector<128x8xf32>
    %c0_13 = arith.constant 0 : index
    %c0_14 = arith.constant 0 : index
    %11 = vector.load %arg7[%c0_13, %c0_14] : memref<1x8xf32, #tpu.memory_space<vmem>>, vector<1x8xf32>
    %12 = vector.broadcast %11 : vector<1x8xf32> to vector<128x8xf32>
    %13 = arith.mulf %10, %12 : vector<128x8xf32>
    %c0_15 = arith.constant 0 : index
    %c0_16 = arith.constant 0 : index
    %14 = vector.load %arg8[%c0_15, %c0_16] : memref<1x8xf32, #tpu.memory_space<vmem>>, vector<1x8xf32>
    %15 = vector.broadcast %14 : vector<1x8xf32> to vector<128x8xf32>
    %16 = arith.addf %13, %15 : vector<128x8xf32>
    %17 = arith.negf %16 : vector<128x8xf32>
    %18 = math.exp %17 : vector<128x8xf32>
    %cst_17 = arith.constant 1.000000e+00 : f32
    %19 = vector.broadcast %cst_17 : f32 to vector<128x8xf32>
    %20 = arith.addf %19, %18 : vector<128x8xf32>
    %21 = arith.divf %19, %20 : vector<128x8xf32>
    %22 = arith.mulf %16, %21 : vector<128x8xf32>
    %23 = arith.truncf %22 : vector<128x8xf32> to vector<128x8xbf16>
    %c0_18 = arith.constant 0 : index
    %c0_19 = arith.constant 0 : index
    %24 = vector.load %arg9[%c0_18, %c0_19] : memref<128x8xbf16, #tpu.memory_space<vmem>>, vector<128x8xbf16>
    tpu.vector_store %arg9[%c0_18, %c0_19], %23 {strides = array<i32>} : memref<128x8xbf16, #tpu.memory_space<vmem>>, vector<128x8xbf16>,
    return
  }
  func.func @transform_0(%arg0: i32) -> (i32, i32) {
    %c0_i32 = arith.constant 0 : i32
    %c0_i32_0 = arith.constant 0 : i32
    return %arg0, %c0_i32 : i32, i32
  }
  func.func @transform_1(%arg0: i32) -> (i32, i32) {
    %c0_i32 = arith.constant 0 : i32
    %c0_i32_0 = arith.constant 0 : i32
    return %arg0, %c0_i32 : i32, i32
  }
  func.func @transform_2(%arg0: i32) -> (i32, i32) {
    %c0_i32 = arith.constant 0 : i32
    %c0_i32_0 = arith.constant 0 : i32
    return %arg0, %c0_i32 : i32, i32
  }
  func.func @transform_3(%arg0: i32) -> (i32, i32) {
    %c0_i32 = arith.constant 0 : i32
    %c0_i32_0 = arith.constant 0 : i32
    %c0_i32_1 = arith.constant 0 : i32
    return %c0_i32, %c0_i32_0 : i32, i32
  }
  func.func @transform_4(%arg0: i32) -> (i32, i32) {
    %c0_i32 = arith.constant 0 : i32
    %c0_i32_0 = arith.constant 0 : i32
    %c0_i32_1 = arith.constant 0 : i32
    return %c0_i32, %c0_i32_0 : i32, i32
  }
  func.func @transform_5(%arg0: i32) -> (i32, i32) {
    %c0_i32 = arith.constant 0 : i32
    %c0_i32_0 = arith.constant 0 : i32
    %c0_i32_1 = arith.constant 0 : i32
    return %c0_i32, %c0_i32_0 : i32, i32
  }
  func.func @transform_6(%arg0: i32) -> (i32, i32) {
    %c0_i32 = arith.constant 0 : i32
    %c0_i32_0 = arith.constant 0 : i32
    %c0_i32_1 = arith.constant 0 : i32
    return %c0_i32, %c0_i32_0 : i32, i32
  }
  func.func @transform_7(%arg0: i32) -> (i32, i32) {
    %c0_i32 = arith.constant 0 : i32
    %c0_i32_0 = arith.constant 0 : i32
    %c0_i32_1 = arith.constant 0 : i32
    return %c0_i32, %c0_i32_0 : i32, i32
  }
  func.func @transform_8(%arg0: i32) -> (i32, i32) {
    %c0_i32 = arith.constant 0 : i32
    %c0_i32_0 = arith.constant 0 : i32
    return %arg0, %c0_i32 : i32, i32
  }
}

module attributes {stable_mosaic.version = 11 : i64} {
  func.func @_fused_cat_mm_kernel(%arg0: i32, %arg1: memref<128x16xbf16, #tpu.memory_space<vmem>>, %arg2: memref<128x8xbf16, #tpu.memory_space<vmem>>, %arg3: memref<16x16xbf16, #tpu.memory_space<vmem>>, %arg4: memref<8x16xbf16, #tpu.memory_space<vmem>>, %arg5: memref<1x16xf32, #tpu.memory_space<vmem>>, %arg6: memref<1x16xf32, #tpu.memory_space<vmem>>, %arg7: memref<128x16xf32, #tpu.memory_space<vmem>>) attributes {dimension_semantics = [#tpu.dimension_semantics<parallel>], iteration_bounds = array<i64: 4>, scalar_prefetch = 0 : i64, scratch_operands = 0 : i64, tpu.core_type = #tpu.core_type<tc>, window_params = [{transform_indices = @transform_0, window_bounds = array<i64: 128, 16>}, {transform_indices = @transform_1, window_bounds = array<i64: 128, 8>}, {pipeline_mode = #tpu.pipeline_mode<synchronous>, transform_indices = @transform_2, window_bounds = array<i64: 16, 16>}, {pipeline_mode = #tpu.pipeline_mode<synchronous>, transform_indices = @transform_3, window_bounds = array<i64: 8, 16>}, {pipeline_mode = #tpu.pipeline_mode<synchronous>, transform_indices = @transform_4, window_bounds = array<i64: 1, 16>}, {pipeline_mode = #tpu.pipeline_mode<synchronous>, transform_indices = @transform_5, window_bounds = array<i64: 1, 16>}, {transform_indices = @transform_6, window_bounds = array<i64: 128, 16>}]} {
    %c0 = arith.constant 0 : index
    %c0_0 = arith.constant 0 : index
    %0 = vector.load %arg1[%c0, %c0_0] : memref<128x16xbf16, #tpu.memory_space<vmem>>, vector<128x16xbf16>
    %c0_1 = arith.constant 0 : index
    %c0_2 = arith.constant 0 : index
    %1 = vector.load %arg3[%c0_1, %c0_2] : memref<16x16xbf16, #tpu.memory_space<vmem>>, vector<16x16xbf16>
    %cst = arith.constant dense<0.000000e+00> : vector<128x16xf32>
    %2 = tpu.matmul %0, %1, %cst {dimension_numbers = #tpu.dot_dimension_numbers<[1], [0], [0], [1], [0, 0, 1, 1], [], []>} : vector<128x16xbf16>, vector<16x16xbf16>, vector<128x16xf32> -> vector<128x16xf32>
    %c0_3 = arith.constant 0 : index
    %c0_4 = arith.constant 0 : index
    %3 = vector.load %arg2[%c0_3, %c0_4] : memref<128x8xbf16, #tpu.memory_space<vmem>>, vector<128x8xbf16>
    %c0_5 = arith.constant 0 : index
    %c0_6 = arith.constant 0 : index
    %4 = vector.load %arg4[%c0_5, %c0_6] : memref<8x16xbf16, #tpu.memory_space<vmem>>, vector<8x16xbf16>
    %cst_7 = arith.constant dense<0.000000e+00> : vector<128x16xf32>
    %5 = tpu.matmul %3, %4, %cst_7 {dimension_numbers = #tpu.dot_dimension_numbers<[1], [0], [0], [1], [0, 0, 1, 1], [], []>} : vector<128x8xbf16>, vector<8x16xbf16>, vector<128x16xf32> -> vector<128x16xf32>
    %6 = arith.addf %2, %5 : vector<128x16xf32>
    %c0_8 = arith.constant 0 : index
    %c0_9 = arith.constant 0 : index
    %7 = vector.load %arg5[%c0_8, %c0_9] : memref<1x16xf32, #tpu.memory_space<vmem>>, vector<1x16xf32>
    %8 = vector.broadcast %7 : vector<1x16xf32> to vector<128x16xf32>
    %9 = arith.mulf %6, %8 : vector<128x16xf32>
    %c0_10 = arith.constant 0 : index
    %c0_11 = arith.constant 0 : index
    %10 = vector.load %arg6[%c0_10, %c0_11] : memref<1x16xf32, #tpu.memory_space<vmem>>, vector<1x16xf32>
    %11 = vector.broadcast %10 : vector<1x16xf32> to vector<128x16xf32>
    %12 = arith.addf %9, %11 : vector<128x16xf32>
    %13 = arith.negf %12 : vector<128x16xf32>
    %14 = math.exp %13 : vector<128x16xf32>
    %cst_12 = arith.constant 1.000000e+00 : f32
    %15 = vector.broadcast %cst_12 : f32 to vector<128x16xf32>
    %16 = arith.addf %15, %14 : vector<128x16xf32>
    %17 = arith.divf %15, %16 : vector<128x16xf32>
    %18 = arith.mulf %12, %17 : vector<128x16xf32>
    %c0_13 = arith.constant 0 : index
    %c0_14 = arith.constant 0 : index
    %19 = vector.load %arg7[%c0_13, %c0_14] : memref<128x16xf32, #tpu.memory_space<vmem>>, vector<128x16xf32>
    tpu.vector_store %arg7[%c0_13, %c0_14], %18 {strides = array<i32>} : memref<128x16xf32, #tpu.memory_space<vmem>>, vector<128x16xf32>,
    return
  }
  func.func @transform_0(%arg0: i32) -> (i32, i32) {
    %c0_i32 = arith.constant 0 : i32
    %c0_i32_0 = arith.constant 0 : i32
    return %arg0, %c0_i32 : i32, i32
  }
  func.func @transform_1(%arg0: i32) -> (i32, i32) {
    %c0_i32 = arith.constant 0 : i32
    %c0_i32_0 = arith.constant 0 : i32
    return %arg0, %c0_i32 : i32, i32
  }
  func.func @transform_2(%arg0: i32) -> (i32, i32) {
    %c0_i32 = arith.constant 0 : i32
    %c0_i32_0 = arith.constant 0 : i32
    %c0_i32_1 = arith.constant 0 : i32
    return %c0_i32, %c0_i32_0 : i32, i32
  }
  func.func @transform_3(%arg0: i32) -> (i32, i32) {
    %c0_i32 = arith.constant 0 : i32
    %c0_i32_0 = arith.constant 0 : i32
    %c0_i32_1 = arith.constant 0 : i32
    return %c0_i32, %c0_i32_0 : i32, i32
  }
  func.func @transform_4(%arg0: i32) -> (i32, i32) {
    %c0_i32 = arith.constant 0 : i32
    %c0_i32_0 = arith.constant 0 : i32
    %c0_i32_1 = arith.constant 0 : i32
    return %c0_i32, %c0_i32_0 : i32, i32
  }
  func.func @transform_5(%arg0: i32) -> (i32, i32) {
    %c0_i32 = arith.constant 0 : i32
    %c0_i32_0 = arith.constant 0 : i32
    %c0_i32_1 = arith.constant 0 : i32
    return %c0_i32, %c0_i32_0 : i32, i32
  }
  func.func @transform_6(%arg0: i32) -> (i32, i32) {
    %c0_i32 = arith.constant 0 : i32
    %c0_i32_0 = arith.constant 0 : i32
    return %arg0, %c0_i32 : i32, i32
  }
}

</mosaic_0001>

<bundles_post_ra>
// kernel: c2f_dysnakeconv_forward.14
= control target key start
LH: loop header
LB: loop body
LE: loop exit
PB: predicated region body
PF: predicated region fallthrough
CT: control target
= control target key end

     0   :  { %s901_s15 = smov 0   ;;  %s1076_s0 = inlined_call_operand.vmem [shape: bf16[512,4], index: 0, kind: input, shape index: {}]   ;;  %s1077_s1 = inlined_call_operand.vmem [shape: bf16[4,16], index: 1, kind: input, shape index: {}]   ;;  %s1078_s2 = inlined_call_operand.vmem [shape: f32[1,16], index: 2, kind: input, shape index: {}]   ;;  %s1079_s3 = inlined_call_operand.vmem [shape: f32[1,16], index: 3, kind: input, shape index: {}]   ;;  %s1080_s4 = inlined_call_operand.vmem [shape: bf16[512,16], index: 4, kind: output, shape index: {}]  }
   0x1 LB: > { %s680_s16 = sadd.s32 4294967295, %s874_s15   ;;  %p684_p0 = scmp.ge.s32.totalorder %s874_s15, 1  ;;  %s874_s15 = sphi %s901_s15, %s14_s15  }
   0x2   : > { %p163_p1 = scmp.lt.s32.totalorder %s874_s15, 5 }
   0x4   : > { %p164_p2 = pnand %p684_p0, %p163_p1 }
   0x5   : > { %v218_v0 = vld [vmem:[%s1077_s1] sm:$0x3] (!%p164_p2)  ;;  %vm284_vm0 = vcmask (!%p164_p2), 1041408   ;;  %s685_s19 = sshll.u32 (!%p164_p2), %s680_s16, 4  ;;  %vm259_vm1 = vcmask (!%p164_p2), 31744   ;;  %vm607_vm2 = vcmask (!%p164_p2), 125952  }
   0x6   : > { %167 = sbr.rel (%p164_p2) target bundleno = 293 (0x125), region = 36  ;;  %786 = vmatprep.subr.msk.bf16.mxu0 (!%p164_p2), %vm284_vm0, %v218_v0  ;;  %787 = vmatprep.subr.msk.bf16.mxu1 (!%p164_p2), %vm284_vm0, %v218_v0  ;;  %v286_v1 = vsel (!%p164_p2), %vm284_vm0, %v218_v0, 0  ;;  %p190_p3 = scmp.lt.s32.totalorder (!%p164_p2), %s685_s19, 63  ;;  %v931_v10 = vld [vmem:[%s1078_s2] ss:$0 sm:$0xff] (!%p164_p2) }
   0x7   : > { %767 = vmatpush3.bf16.msra.mxu0 (!%p164_p2), %v286_v1  ;;  %785 = vmatpush3.bf16.msra.mxu1 (!%p164_p2), %v286_v1  ;;  %v936_v12 = vld [vmem:[%s1079_s3] ss:$0 sm:$0xff] (!%p164_p2) }
   0xd   : > { %s1082_s19 = smov (!%p190_p3, %s685_s19), 63 }
   0xe   : > { %s686_s20 = sshll.u32 %s1082_s19, 2 }
   0xf   : > { %s193_s23 = scalar_lea.vmem %s1076_s0, %s686_s20  ;;  %s1024_s30 = scalar_lea.vmem %s1080_s4, %s686_s20 }
  0x10   : > { %v796_v2 = vld [vmem:[%s193_s23] sm:$0xff]   ;;  %v798_v4 = vld [vmem:[%s193_s23 + $0x8] sm:$0xff]   ;;  %v800_v6 = vld [vmem:[%s193_s23 + $0x10] sm:$0xff]  }
  0x11   : > { %v797_v3 = vld [vmem:[%s193_s23 + $0x20] sm:$0xff]   ;;  %768 = vmatprep.mubr.msk.bf16.mxu0 %vm259_vm1, %v796_v2  ;;  %v799_v5 = vld [vmem:[%s193_s23 + $0x28] sm:$0xff]   ;;  %v801_v7 = vld [vmem:[%s193_s23 + $0x30] sm:$0xff]  }
  0x12   : > { %776 = vmatprep.mubr.msk.bf16.mxu1 %vm259_vm1, %v797_v3  ;;  %769 = vmatmul.mubr.msk.bf16.vlgmr.msra.gmra.mrb[0].mxu0 %vm259_vm1, %v798_v4  ;;  %v802_v8 = vld [vmem:[%s193_s23 + $0x18] sm:$0xff]  }
  0x13   : > { %777 = vmatmul.mubr.msk.bf16.vlgmr.msra.gmra.mrb[0].mxu1 %vm259_vm1, %v799_v5  ;;  %772 = vmatprep.mubr.msk.bf16.mxu0 %vm259_vm1, %v800_v6  ;;  %v803_v9 = vld [vmem:[%s193_s23 + $0x38] sm:$0xff]  }
  0x14   : > { %780 = vmatprep.mubr.msk.bf16.mxu1 %vm259_vm1, %v801_v7 }
  0x1a   : > { %773 = vmatmul.mubr.msk.bf16.gmra.mrb[4].mxu0 %vm259_vm1, %v802_v8 }
  0x1b   : > { %781 = vmatmul.mubr.msk.bf16.gmra.mrb[4].mxu1 %vm259_vm1, %v803_v9 }
  0xe5   : > { %v770_v11 = vpop.f32.mrb[0].mxu0 }
  0xe6   : > { %v394_v13 = vmul.f32 %v770_v11, %v931_v10  ;;  %v778_v14 = vpop.f32.mrb[0].mxu1  ;;  %v322_v15 = vpop.f32.mrb[1].mxu0 }
  0xe7   : > { %v402_v16 = vmul.f32 %v778_v14, %v931_v10  ;;  %v392_v17 = vmul.f32 %v931_v10, %v322_v15  ;;  %v354_v18 = vpop.f32.mrb[1].mxu1  ;;  %v771_v19 = vpop.f32.mrb[2].mxu0 }
  0xe8   : > { %v942_v20 = vadd.f32 %v936_v12, %v394_v13  ;;  %v400_v21 = vmul.f32 %v931_v10, %v354_v18  ;;  %v395_v22 = vmul.f32 %v771_v19, %v931_v10  ;;  %v779_v23 = vpop.f32.mrb[2].mxu1  ;;  %v325_v24 = vpop.f32.mrb[3].mxu0 }
  0xe9   : > { %v947_v25 = vadd.f32 %v936_v12, %v402_v16  ;;  %v950_v26 = vadd.f32 %v936_v12, %v392_v17  ;;  %v403_v27 = vmul.f32 %v779_v23, %v931_v10  ;;  %v393_v28 = vmul.f32 %v931_v10, %v325_v24  ;;  %v357_v29 = vpop.f32.mrb[3].mxu1 }
  0xea   : > { %v709_v30 = vmul.f32 -1.442695, %v942_v20  ;;  %v956_v31 = vadd.f32 %v936_v12, %v400_v21  ;;  %v959_v32 = vadd.f32 %v936_v12, %v395_v22  ;;  %v401_v33 = vmul.f32 %v931_v10, %v357_v29 }
  0xeb   : > { %v717_v34 = vmul.f32 -1.442695, %v947_v25  ;;  %v707_v35 = vmul.f32 -1.442695, %v950_v26  ;;  %v965_v36 = vadd.f32 %v936_v12, %v403_v27  ;;  %v968_v37 = vadd.f32 %v936_v12, %v393_v28 }
  0xec   : > { %804 = vpow2.f32 %v709_v30  ;;  %v715_v38 = vmul.f32 -1.442695, %v956_v31  ;;  %v710_v39 = vmul.f32 -1.442695, %v959_v32  ;;  %v973_v40 = vadd.f32 %v936_v12, %v401_v33 }
  0xed   : > { %806 = vpow2.f32 %v717_v34  ;;  %v718_v41 = vmul.f32 -1.442695, %v965_v36  ;;  %v774_v42 = vpop.f32.mrb[4].mxu0  ;;  %v708_v43 = vmul.f32 -1.442695, %v968_v37 }
  0xee   : > { %808 = vpow2.f32 %v707_v35  ;;  %v398_v44 = vmul.f32 %v774_v42, %v931_v10  ;;  %v782_v45 = vpop.f32.mrb[4].mxu1  ;;  %v338_v46 = vpop.f32.mrb[5].mxu0  ;;  %v716_v47 = vmul.f32 -1.442695, %v973_v40 }
  0xef   : > { %810 = vpow2.f32 %v715_v38  ;;  %v406_v48 = vmul.f32 %v782_v45, %v931_v10  ;;  %v396_v49 = vmul.f32 %v931_v10, %v338_v46  ;;  %v370_v50 = vpop.f32.mrb[5].mxu1  ;;  %v775_v51 = vpop.f32.mrb[6].mxu0 }
  0xf0   : > { %812 = vpow2.f32 %v710_v39  ;;  %v982_v52 = vadd.f32 %v936_v12, %v398_v44  ;;  %v404_v53 = vmul.f32 %v931_v10, %v370_v50  ;;  %v399_v54 = vmul.f32 %v775_v51, %v931_v10  ;;  %v783_v55 = vpop.f32.mrb[6].mxu1  ;;  %v341_v56 = vpop.f32.mrb[7].mxu0 }
  0xf1   : > { %814 = vpow2.f32 %v718_v41  ;;  %v987_v57 = vadd.f32 %v936_v12, %v406_v48  ;;  %v990_v58 = vadd.f32 %v936_v12, %v396_v49  ;;  %v373_v59 = vpop.f32.mrb[7].mxu1  ;;  %v407_v14 = vmul.f32 %v783_v55, %v931_v10 }
  0xf2   : > { %816 = vpow2.f32 %v708_v43  ;;  %v713_v60 = vmul.f32 -1.442695, %v982_v52  ;;  %v994_v61 = vadd.f32 %v936_v12, %v404_v53  ;;  %v997_v62 = vadd.f32 %v936_v12, %v399_v54 }
  0xf3   : > { %818 = vpow2.f32 %v716_v47  ;;  %v721_v63 = vmul.f32 -1.442695, %v987_v57  ;;  %v711_v0 = vmul.f32 -1.442695, %v990_v58  ;;  %v397_v17 = vmul.f32 %v931_v10, %v341_v56 }
  0xf4   : > { %820 = vpow2.f32 %v713_v60  ;;  %v719_v1 = vmul.f32 -1.442695, %v994_v61  ;;  %v714_v2 = vmul.f32 -1.442695, %v997_v62  ;;  %v405_v21 = vmul.f32 %v931_v10, %v373_v59 }
  0xf5   : > { %822 = vpow2.f32 %v721_v63  ;;  %v1007_v28 = vadd.f32 %v936_v12, %v407_v14  ;;  %v1010_v33 = vadd.f32 %v936_v12, %v397_v17 }
  0xf6   : > { %v805_v3 = vpop.eup %804  ;;  %824 = vpow2.f32 %v711_v0  ;;  %v1013_v10 = vadd.f32 %v936_v12, %v405_v21 }
  0xf7   : > { %v807_v4 = vpop.eup %806  ;;  %v481_v5 = vadd.f32 1.0, %v805_v3  ;;  %826 = vpow2.f32 %v719_v1  ;;  %v722_v43 = vmul.f32 -1.442695, %v1007_v28  ;;  %v712_v46 = vmul.f32 -1.442695, %v1010_v33 }
  0xf8   : > { %v809_v6 = vpop.eup %808  ;;  %v489_v7 = vadd.f32 1.0, %v807_v4  ;;  %828 = vpow2.f32 %v714_v2  ;;  %v720_v12 = vmul.f32 -1.442695, %v1013_v10 }
  0xf9   : > { %v811_v8 = vpop.eup %810  ;;  %830 = vrcp.f32 %v481_v5  ;;  %v479_v9 = vadd.f32 1.0, %v809_v6 }
  0xfa   : > { %v813_v11 = vpop.eup %812  ;;  %832 = vrcp.f32 %v489_v7  ;;  %v487_v13 = vadd.f32 1.0, %v811_v8 }
  0xfb   : > { %v815_v15 = vpop.eup %814  ;;  %834 = vrcp.f32 %v479_v9  ;;  %v482_v16 = vadd.f32 1.0, %v813_v11 }
  0xfc   : > { %v817_v18 = vpop.eup %816  ;;  %836 = vrcp.f32 %v487_v13  ;;  %v490_v19 = vadd.f32 1.0, %v815_v15 }
  0xfd   : > { %v819_v22 = vpop.eup %818  ;;  %838 = vrcp.f32 %v482_v16  ;;  %v480_v23 = vadd.f32 1.0, %v817_v18 }
  0xfe   : > { %v821_v24 = vpop.eup %820  ;;  %840 = vrcp.f32 %v490_v19  ;;  %v488_v27 = vadd.f32 1.0, %v819_v22 }
  0xff   : > { %v823_v29 = vpop.eup %822  ;;  %842 = vrcp.f32 %v480_v23  ;;  %v485_v30 = vadd.f32 1.0, %v821_v24 }
 0x100   : > { %v825_v34 = vpop.eup %824  ;;  %844 = vrcp.f32 %v488_v27  ;;  %v493_v35 = vadd.f32 1.0, %v823_v29 }
 0x101   : > { %v827_v38 = vpop.eup %826  ;;  %846 = vrcp.f32 %v485_v30  ;;  %v483_v39 = vadd.f32 1.0, %v825_v34 }
 0x102   : > { %v829_v41 = vpop.eup %828  ;;  %848 = vrcp.f32 %v493_v35  ;;  %v491_v42 = vadd.f32 1.0, %v827_v38 }
 0x103   : > { %v831_v44 = vpop.eup %830  ;;  %850 = vrcp.f32 %v483_v39  ;;  %v486_v45 = vadd.f32 1.0, %v829_v41 }
 0x104   : > { %v833_v47 = vpop.eup %832  ;;  %v529_v48 = vmul.f32 %v831_v44, %v942_v20  ;;  %852 = vrcp.f32 %v491_v42 }
 0x105   : > { %v835_v49 = vpop.eup %834  ;;  %v537_v50 = vmul.f32 %v833_v47, %v947_v25  ;;  %854 = vrcp.f32 %v486_v45 }
 0x106   : > { %v837_v51 = vpop.eup %836  ;;  %v743_v53 = vpack.c.bf16 %v529_v48, %v529_v48  ;;  %v527_v20 = vmul.f32 %v835_v49, %v950_v26  ;;  %856 = vpow2.f32 %v722_v43 }
 0x107   : > { %v839_v54 = vpop.eup %838  ;;  %v751_v55 = vpack.c.bf16 %v537_v50, %v537_v50  ;;  %v535_v56 = vmul.f32 %v837_v51, %v956_v31  ;;  %858 = vpow2.f32 %v712_v46 }
 0x108   : > { %v841_v59 = vpop.eup %840  ;;  %610 = vst.msk [vmem:[%s1024_s30 + $0x8] sm:$0xf] %vm607_vm2, %v743_v53  ;;  %v741_v60 = vpack.c.bf16 %v527_v20, %v527_v20  ;;  %v530_v25 = vmul.f32 %v839_v54, %v959_v32  ;;  %860 = vpow2.f32 %v720_v12 }
 0x109   : > { %v843_v63 = vpop.eup %842  ;;  %618 = vst.msk [vmem:[%s1024_s30 + $0x28] sm:$0xf] %vm607_vm2, %v751_v55  ;;  %v749_v26 = vpack.c.bf16 %v535_v56, %v535_v56  ;;  %v538_v0 = vmul.f32 %v841_v59, %v965_v36 }
 0x10a   : > { %v845_v1 = vpop.eup %844  ;;  %608 = vst.msk [vmem:[%s1024_s30] sm:$0xf] %vm607_vm2, %v741_v60  ;;  %v744_v31 = vpack.c.bf16 %v530_v25, %v530_v25  ;;  %v528_v2 = vmul.f32 %v843_v63, %v968_v37 }
 0x10b   : > { %v847_v3 = vpop.eup %846  ;;  %616 = vst.msk [vmem:[%s1024_s30 + $0x20] sm:$0xf] %vm607_vm2, %v749_v26  ;;  %v752_v32 = vpack.c.bf16 %v538_v0, %v538_v0  ;;  %v536_v4 = vmul.f32 %v845_v1, %v973_v40 }
 0x10c   : > { %v849_v5 = vpop.eup %848  ;;  %611 = vst.msk [vmem:[%s1024_s30 + $0xc] sm:$0xf] %vm607_vm2, %v744_v31  ;;  %v742_v6 = vpack.c.bf16 %v528_v2, %v528_v2  ;;  %v533_v36 = vmul.f32 %v847_v3, %v982_v52 }
 0x10d   : > { %v851_v7 = vpop.eup %850  ;;  %619 = vst.msk [vmem:[%s1024_s30 + $0x2c] sm:$0xf] %vm607_vm2, %v752_v32  ;;  %v750_v8 = vpack.c.bf16 %v536_v4, %v536_v4  ;;  %v541_v37 = vmul.f32 %v849_v5, %v987_v57 }
 0x10e   : > { %v853_v9 = vpop.eup %852  ;;  %609 = vst.msk [vmem:[%s1024_s30 + $0x4] sm:$0xf] %vm607_vm2, %v742_v6  ;;  %v747_v11 = vpack.c.bf16 %v533_v36, %v533_v36  ;;  %v531_v40 = vmul.f32 %v851_v7, %v990_v58 }
 0x10f   : > { %v855_v13 = vpop.eup %854  ;;  %617 = vst.msk [vmem:[%s1024_s30 + $0x24] sm:$0xf] %vm607_vm2, %v750_v8  ;;  %v755_v14 = vpack.c.bf16 %v541_v37, %v541_v37  ;;  %v539_v52 = vmul.f32 %v853_v9, %v994_v61 }
 0x110   : > { %v857_v15 = vpop.eup %856  ;;  %614 = vst.msk [vmem:[%s1024_s30 + $0x18] sm:$0xf] %vm607_vm2, %v747_v11  ;;  %v745_v16 = vpack.c.bf16 %v531_v40, %v531_v40  ;;  %v534_v57 = vmul.f32 %v855_v13, %v997_v62 }
 0x111   : > { %v859_v17 = vpop.eup %858  ;;  %622 = vst.msk [vmem:[%s1024_s30 + $0x38] sm:$0xf] %vm607_vm2, %v755_v14  ;;  %v753_v18 = vpack.c.bf16 %v539_v52, %v539_v52  ;;  %v494_v19 = vadd.f32 1.0, %v857_v15 }
 0x112   : > { %v861_v58 = vpop.eup %860  ;;  %612 = vst.msk [vmem:[%s1024_s30 + $0x10] sm:$0xf] %vm607_vm2, %v745_v16  ;;  %v748_v21 = vpack.c.bf16 %v534_v57, %v534_v57  ;;  %v484_v22 = vadd.f32 1.0, %v859_v17 }
 0x113   : > { %620 = vst.msk [vmem:[%s1024_s30 + $0x30] sm:$0xf] %vm607_vm2, %v753_v18  ;;  %862 = vrcp.f32 %v494_v19  ;;  %v492_v61 = vadd.f32 1.0, %v861_v58 }
 0x114   : > { %615 = vst.msk [vmem:[%s1024_s30 + $0x1c] sm:$0xf] %vm607_vm2, %v748_v21  ;;  %864 = vrcp.f32 %v484_v22 }
 0x115   : > { %866 = vrcp.f32 %v492_v61 }
 0x11d   : > { %v863_v62 = vpop.eup %862 }
 0x11e   : > { %v865_v23 = vpop.eup %864  ;;  %v542_v24 = vmul.f32 %v863_v62, %v1007_v28 }
 0x11f   : > { %v867_v27 = vpop.eup %866  ;;  %v532_v29 = vmul.f32 %v865_v23, %v1010_v33 }
 0x120   : > { %v756_v30 = vpack.c.bf16 %v542_v24, %v542_v24  ;;  %v540_v34 = vmul.f32 %v867_v27, %v1013_v10 }
 0x121   : > { %v746_v35 = vpack.c.bf16 %v532_v29, %v532_v29 }
 0x122   : > { %623 = vst.msk [vmem:[%s1024_s30 + $0x3c] sm:$0xf] %vm607_vm2, %v756_v30  ;;  %v754_v38 = vpack.c.bf16 %v540_v34, %v540_v34 }
 0x123   : > { %613 = vst.msk [vmem:[%s1024_s30 + $0x14] sm:$0xf] %vm607_vm2, %v746_v35 }
 0x124   : > { %621 = vst.msk [vmem:[%s1024_s30 + $0x34] sm:$0xf] %vm607_vm2, %v754_v38 }
 0x125 PF: > { %s14_s15 = sadd.s32 1, %s874_s15  }
 0x126   : > { %p11_p4 = scmp.ge.s32.totalorder %s14_s15, 6  }
 0x128   :  { %13 = sbr.rel (!%p11_p4) target bundleno = 1 (0x1), region = 66 }

// kernel: c2f_dysnakeconv_forward.15
= control target key start
LH: loop header
LB: loop body
LE: loop exit
PB: predicated region body
PF: predicated region fallthrough
CT: control target
= control target key end

     0   :  { %s5652_s0 = inlined_call_operand.hbm [shape: bf16[2,18,18,8], index: 0, kind: input, shape index: {}]   ;;  %s5653_s1 = inlined_call_operand.hbm [shape: bf16[9,8,8], index: 1, kind: input, shape index: {}]   ;;  %s5654_s2 = inlined_call_operand.hbm [shape: f32[1,8], index: 2, kind: input, shape index: {}]   ;;  %s5655_s3 = inlined_call_operand.hbm [shape: f32[1,8], index: 3, kind: input, shape index: {}]   ;;  %s5656_s4 = inlined_call_operand.hbm [shape: bf16[2,256,8], index: 4, kind: output, shape index: {}]  }
   0x1   :  { %5673 = sst [smem:[#allocation22_spill]] %s5653_s1 }
   0x2   :  { %5674 = sst [smem:[#allocation23_spill]] %s5654_s2 }
   0x3   :  { %5675 = sst [smem:[#allocation24_spill]] %s5656_s4 }
   0x4   :  { %9 = vsyncpa [#allocation3], 0 }
   0x5   :  { %11 = vsyncpa [#allocation3 + $0x1], 0 }
   0x6   :  { %12 = vsyncpa [#allocation6], 0 }
   0x7   :  { %13 = vsyncpa [#allocation9], 0 }
   0x8   :  { %14 = vsyncpa [#allocation4], 0 }
   0x9   :  { %16 = vsyncpa [#allocation4 + $0x1], 0  ;;  %s4351_s15 = smov 0   ;;  %s4353_s16 = smov 0  }
   0xa   :  { %s4355_s17 = smov 0   ;;  %s4357_s18 = smov 0  }
   0xb   :  { %s4359_s19 = smov 0   ;;  %s4361_s20 = smov 0  }
   0xc   :  { %s4363_s21 = smov 0   ;;  %s4365_s22 = smov 0  }
   0xd   :  { %s4367_s23 = smov 0   ;;  %s4369_s24 = smov 0  }
   0xe   :  { %s4371_s25 = smov 0  }
   0xf LB: > { %5676 = sst [smem:[#allocation15_spill]] %s4275_s15  ;;  %s3118_s26 = sadd.s32 4294967295, %s4315_s25   ;;  %s4315_s25 = sphi %s4371_s25, %s22_s25   ;;  %s4311_s24 = sphi %s4369_s24, %s5730_s24   ;;  %s4307_s23 = sphi %s4367_s23, %s5729_s23   ;;  %s4303_s22 = sphi %s4365_s22, %s5728_s22   ;;  %s4299_s21 = sphi %s4363_s21, %s5727_s21   ;;  %s4295_s20 = sphi %s4361_s20, %s5726_s20   ;;  %s4291_s19 = sphi %s4359_s19, %s5725_s19   ;;  %s4287_s18 = sphi %s4357_s18, %s5724_s18   ;;  %s4283_s17 = sphi %s4355_s17, %s5723_s17   ;;  %s4279_s16 = sphi %s4353_s16, %s5722_s16   ;;  %s4275_s15 = sphi %s4351_s15, %s5721_s15  }
  0x10   : > { %5677 = sst [smem:[#allocation16_spill]] %s4303_s22  ;;  %s3119_s27 = sadd.s32 4294967294, %s4315_s25  }
  0x11   : > { %p54_p0 = scmp.ne.s32.totalorder %s4291_s19, %s4287_s18  ;;  %p4407_p1 = scmp.eq.s32.totalorder %s3118_s26, 0 }
  0x12   : > { %p142_p2 = scmp.ne.s32.totalorder %s4283_s17, %s4279_s16  ;;  %p143_p4 = scmp.eq.s32.totalorder %s3118_s26, 3 }
  0x13   : > { %s5678_s28 = scalar_select %p4407_p1, 1, 0 }
  0x14   : > { %p4416_p3 = por %p4407_p1, %p54_p0  ;;  %p148_p5 = scmp.ne.s32.totalorder %s4279_s16, %s4275_s15 }
  0x15   : > { %p149_p6 = scmp.eq.s32.totalorder %s3119_s27, 3  ;;  %p4422_p7 = por %p143_p4, %p142_p2 }
  0x16   : > { %s5679_s30 = scalar_select %p4416_p3, 1, 0 }
  0x17   : > { %s5680_s5 = scalar_select %p4422_p7, 1, 0 }
  0x18   : > { %p3120_p8 = scmp.ge.s32.totalorder %s4315_s25, 1  ;;  %p4427_p9 = por %p149_p6, %p148_p5 }
  0x19   : > { %5681 = sst [smem:[#allocation17_spill]] %s5680_s5  ;;  %p156_p10 = scmp.lt.s32.totalorder %s4315_s25, 5 }
  0x1a   : > { %s5682_s6 = scalar_select %p4427_p9, 1, 0 }
  0x1b   : > { %p4432_p11 = pnand %p3120_p8, %p156_p10  ;;  %s4317_s8 = smov [#allocation5]  }
  0x1c   : > { %5683 = sst [smem:[#allocation18_spill]] %s5682_s6  ;;  %s168_s9 = sshll.u32 %s4317_s8, 4  ;;  %s4436_s9 = int_to_ptr.vmem [resolvable:$true] %s168_s9 }
  0x1d   : > { %s5684_s7 = scalar_select %p4432_p11, 1, 0 }
  0x1e   : > { %p3861_p12 = pneg %p4432_p11  ;;  %s4318_s11 = smov [#allocation7]  }
  0x1f   : > { %s182_s12 = sshll.u32 %s4318_s11, 4  ;;  %s4319_s13 = smov [#allocation8]   ;;  %s4446_s12 = int_to_ptr.vmem [resolvable:$true] %s182_s12 }
  0x20   : > { %p4442_p13 = pnand %p3861_p12, %p4407_p1  ;;  %s4448_s14 = sshll.u32 %s4319_s13, 4  ;;  %s194_s14 = int_to_ptr.vmem [resolvable:$true] %s4448_s14 }
  0x21   : > { %s5686_s1 = sld [smem:[#allocation22_spill]] }
  0x22   : > { %p4458_p2 = pneg %p4442_p13 }
  0x27   : > { %s4071_s27 = scalar_lea.hbm %s5686_s1, 576 }
  0x28   : > { %p4072_p0 = scmp.ne.s32.totalorder %s5686_s1, %s4071_s27  ;;  %p4078_p6 = scmp.lt.u32.totalorder %s4071_s27, %s5686_s1 }
  0x2a   : > { %p4074_p4 = pnand %p4458_p2, %p4072_p0 }
  0x2c   : > { %p4075_p5 = pneg %p4074_p4 }
  0x2e   : > { %p4080_p8 = pnand %p4078_p6, %p4075_p5 }
  0x30   : > { %4083 = shalt.err (!%p4080_p8)
}
  0x31   : > { %s4084_s29 = scalar_lea.vmem %s4436_s9, 576  ;;  %p4092_p7 = scmp.lt.s32.totalorder %s4436_s9, %s4436_s9 }
  0x32   : > { %p4085_p10 = scmp.ne.s32.totalorder %s4436_s9, %s4084_s29  ;;  %p4093_p1 = scmp.lt.s32.totalorder %s4084_s29, %s4084_s29 }
  0x34   : > { %p4087_p12 = pnand %p4085_p10, %p4458_p2  ;;  %p4094_p0 = por %p4093_p1, %p4092_p7 }
  0x36   : > { %p4088_p9 = pneg %p4087_p12 }
  0x38   : > { %p4095_p4 = pnand %p4094_p0, %p4088_p9 }
  0x3a   : > { %4098 = shalt.err (!%p4095_p4)
}
  0x3b   : > { %s5667_s18 = smov 64   ;;  %s5668_s26 = smov 4  }
  0x3c   : > { %3864 = dma.hbm_to_vmem [thread:$0]  (!%p4442_p13), %s5686_s1, 576, %s4436_s9, [#allocation6], %s5667_s18, %s5667_s18, %s5668_s26  }
  0x3d   : > { %s5688_s2 = sld [smem:[#allocation23_spill]] }
  0x43   : > { %s4099_s29 = scalar_lea.hbm %s5688_s2, 16 }
  0x44   : > { %p4100_p1 = scmp.ne.s32.totalorder %s5688_s2, %s4099_s29  ;;  %p4106_p5 = scmp.lt.u32.totalorder %s4099_s29, %s5688_s2 }
  0x46   : > { %p4102_p7 = pnand %p4100_p1, %p4458_p2 }
  0x48   : > { %p4103_p9 = pneg %p4102_p7 }
  0x4a   : > { %p4108_p6 = pnand %p4106_p5, %p4103_p9 }
  0x4c   : > { %4111 = shalt.err (!%p4108_p6)
}
  0x4d   : > { %s4112_s9 = scalar_lea.vmem %s4446_s12, 16  ;;  %s4119_s4 = scalar_lea.vmem %s4446_s12, 32 }
  0x4e   : > { %p4113_p8 = scmp.ne.s32.totalorder %s4446_s12, %s4112_s9  ;;  %p4120_p0 = scmp.lt.s32.totalorder %s4446_s12, %s4446_s12 }
  0x4f   : > { %p4121_p4 = scmp.lt.s32.totalorder %s4119_s4, %s4112_s9 }
  0x50   : > { %p4115_p10 = pnand %p4113_p8, %p4458_p2 }
  0x51   : > { %p4122_p1 = por %p4121_p4, %p4120_p0 }
  0x52   : > { %p4116_p12 = pneg %p4115_p10 }
  0x54   : > { %p4123_p7 = pnand %p4122_p1, %p4116_p12 }
  0x56   : > { %4126 = shalt.err (!%p4123_p7)
}
  0x57   : > { %3867 = dma.hbm_to_vmem [thread:$0]  (!%p4442_p13), %s5688_s2, 16, %s4446_s12, [#allocation6]  }
  0x58   : > { %s4127_s8 = scalar_lea.hbm %s5655_s3, 16 }
  0x59   : > { %p4128_p9 = scmp.ne.s32.totalorder %s5655_s3, %s4127_s8  ;;  %p4134_p8 = scmp.lt.u32.totalorder %s4127_s8, %s5655_s3 }
  0x5b   : > { %p4130_p5 = pnand %p4128_p9, %p4458_p2 }
  0x5d   : > { %p4131_p6 = pneg %p4130_p5 }
  0x5f   : > { %p4136_p10 = pnand %p4134_p8, %p4131_p6 }
  0x61   : > { %4139 = shalt.err (!%p4136_p10)
}
  0x62   : > { %s4140_s4 = scalar_lea.vmem %s194_s14, 16  ;;  %s4147_s12 = scalar_lea.vmem %s194_s14, 32 }
  0x63   : > { %p4141_p12 = scmp.ne.s32.totalorder %s194_s14, %s4140_s4  ;;  %p4148_p1 = scmp.lt.s32.totalorder %s194_s14, %s194_s14 }
  0x64   : > { %p4149_p7 = scmp.lt.s32.totalorder %s4147_s12, %s4140_s4 }
  0x65   : > { %p4143_p0 = pnand %p4141_p12, %p4458_p2 }
  0x66   : > { %p4150_p3 = por %p4149_p7, %p4148_p1 }
  0x67   : > { %p4144_p4 = pneg %p4143_p0 }
  0x69   : > { %p4151_p11 = pnand %p4150_p3, %p4144_p4 }
  0x6b   : > { %4154 = shalt.err (!%p4151_p11)
}
  0x6c   : > { %3870 = dma.hbm_to_vmem [thread:$0]  (!%p4442_p13), %s5655_s3, 16, %s194_s14, [#allocation9]  }
  0x6d   : > { %s31_s6 = sadd.s32 1, %s4307_s23  ;;  %s34_s5 = sadd.s32 1, %s4311_s24 }
  0x6e   : > { %p32_p3 = scmp.ge.s32.totalorder %s31_s6, 2  ;;  %s41_s10 = sadd.s32 1, %s4295_s20 }
  0x6f   : > { %p48_p11 = scmp.ne.s32.totalorder %s4295_s20, %s4291_s19  ;;  %p49_p2 = scmp.eq.s32.totalorder %s4315_s25, 0 }
  0x70   : > { %s5732_s6 = smov (%p32_p3, %s31_s6), 0  ;;  %s5734_s5 = smov (!%p32_p3, %s34_s5), %s4311_s24 }
  0x71   : > { %s128_s27 = ssub.s32 %s4307_s23, %s5732_s6  ;;  %p36_p9 = scmp.ge.s32.totalorder %s5734_s5, 2 }
  0x72   : > { %p3882_p5 = scmp.lt.s32.totalorder %s4315_s25, 4  ;;  %p4537_p13 = por %p49_p2, %p48_p11 }
  0x73   : > { %s204_s8 = sand.u32 1, %s4295_s20   ;;  %s5736_s5 = smov (%p36_p9, %s5734_s5), 0 }
  0x74   : > { %s3842_s11 = smul.u32 216, %s204_s8  ;;  %s38_s13 = ssub.s32 %s4311_s24, %s5736_s5 }
  0x75   : > { %s3843_s29 = smul.u32 3456, %s4311_s24  ;;  %p39_p6 = scmp.eq.s32.totalorder %s38_s13, 0 }
  0x76   : > { %s129_s9 = sor.u32 %s128_s27, %s38_s13  ;;  %s5690_s12 = sadd.s32 1, %s4283_s17 }
  0x77   : > { %p130_p8 = scmp.eq.s32.totalorder %s129_s9, 0  ;;  %s4558_s26 = scalar_lea.hbm %s5652_s0, %s3843_s29 }
  0x78   : > { %s4548_s4 = scalar_select %p39_p6, %s4295_s20, %s41_s10  }
  0x79   : > { %s4553_s15 = scalar_select %p130_p8, %s4283_s17, %s5690_s12  }
  0x7a   : > { %s208_s1 = scalar_lea.vmem [#allocation2], %s3842_s11  ;;  %p4566_p10 = pnand %p3882_p5, %p4537_p13 }
  0x7b   : > { %s215_s2 = sshll.u32 %s208_s1, 4  ;;  %s4570_s27 = scalar_lea.sflag [#allocation3], %s204_s8  ;;  %s4560_s2 = int_to_ptr.vmem [resolvable:$true] %s215_s2 }
  0x7c   : > { %s4155_s18 = scalar_lea.hbm %s4558_s26, 3456  ;;  %p4157_p0 = pneg %p4566_p10 }
  0x7d   : > { %p4156_p12 = scmp.ne.s32.totalorder %s4558_s26, %s4155_s18  ;;  %s4160_s14 = scalar_lea.hbm %s5652_s0, 6912 }
  0x7e   : > { %p4161_p7 = scmp.lt.u32.totalorder %s4558_s26, %s5652_s0  ;;  %p4162_p3 = scmp.lt.u32.totalorder %s4160_s14, %s4155_s18 }
  0x7f   : > { %p4158_p4 = pnand %p4157_p0, %p4156_p12  ;;  %p4164_p2 = scmp.lt.u32.totalorder %s4155_s18, %s4558_s26 }
  0x80   : > { %p4163_p11 = por %p4162_p3, %p4161_p7 }
  0x81   : > { %p4159_p1 = pneg %p4158_p4 }
  0x82   : > { %p4165_p9 = por %p4164_p2, %p4163_p11 }
  0x84   : > { %p4166_p5 = pnand %p4165_p9, %p4159_p1 }
  0x86   : > { %4169 = shalt.err (!%p4166_p5)
}
  0x87   : > { %s4170_s8 = scalar_lea.vmem %s4560_s2, 3456  ;;  %s4322_s9 = smov [#allocation2]  }
  0x88   : > { %p4171_p13 = scmp.ne.s32.totalorder %s4560_s2, %s4170_s8  ;;  %s4175_s12 = sshll.u32 %s4322_s9, 4  ;;  %s4176_s12 = int_to_ptr.vmem [resolvable:$false] %s4175_s12 }
  0x89   : > { %s4177_s22 = scalar_lea.vmem %s4176_s12, 6912  ;;  %p4178_p12 = scmp.lt.s32.totalorder %s4560_s2, %s4176_s12 }
  0x8a   : > { %p4173_p6 = pnand %p4171_p13, %p4157_p0  ;;  %p4179_p4 = scmp.lt.s32.totalorder %s4177_s22, %s4170_s8 }
  0x8c   : > { %p4174_p8 = pneg %p4173_p6  ;;  %p4180_p7 = por %p4179_p4, %p4178_p12 }
  0x8e   : > { %p4181_p3 = pnand %p4180_p7, %p4174_p8 }
  0x90   : > { %4184 = shalt.err (!%p4181_p3)
}
  0x91   : > { %s5692_s18 = smov 4   ;;  %s5693_s1 = smov 64  }
  0x92   : > { %3874 = dma.hbm_to_vmem [thread:$0]  (!%p4566_p10), %s4558_s26, 3456, %s4560_s2, %s4570_s27, %s5693_s1, %s5693_s1, %s5692_s18  }
  0x93   : > { %p5694_p0 = scmp.ne.s32.totalorder %s5684_s7, 0 }
  0x95   : > { %227 = sbr.rel (%p5694_p0) target bundleno = 614 (0x266), region = 36 }
  0x9c   : > { %s229_s11 = sand.u32 1, %s4291_s19   ;;  %p5695_p1 = scmp.ne.s32.totalorder %s5679_s30, 0 }
  0x9d   : > { %s3844_s14 = smul.u32 216, %s229_s11  ;;  %s230_s13 = scalar_lea.sflag [#allocation3], %s229_s11 }
  0x9f   : > { %s233_s29 = scalar_lea.vmem [#allocation2], %s3844_s14 }
  0xa0   : > { %4258 = dma.done.wait (%p5695_p1), %s230_s13, 3456  }
  0xa1   : > { %4260 = vsyncadd (%p5695_p1), %s230_s13, 4294963840  ;;  %p5696_p11 = scmp.ne.s32.totalorder %s5678_s28, 0 }
  0xa3   : > { %4262 = dma.done.wait (%p5696_p11), [#allocation6], 592  }
  0xa4   : > { %4264 = vsyncadd (%p5696_p11), [#allocation6], 4294966704 }
  0xa5   : > { %4266 = dma.done.wait (%p5696_p11), [#allocation9], 16  }
  0xa6   : > { %4268 = vsyncadd (%p5696_p11), [#allocation9], 4294967280  ;;  %s3442_s2 = smul.u32 96, %s4299_s21  ;;  %vm547_vm0 = vcmask 1043456   ;;  %vm301_vm1 = vsmask.f32 3328 }
  0xa7   : > { %vm302_vm2 = vsmask.f32 7440  ;;  %v497_v0 = vld [vmem:[#allocation5 + $0x4] sm:$0xf]  ;;  %v1480_v1 = vld [vmem:[#allocation5 + $0x10] sm:$0xf] }
  0xa8   : > { %s4617_s7 = scalar_lea.vmem %s233_s29, %s3442_s2 [#allocation2]  ;;  %3832 = vmatprep.subr.msk.bf16.mxu1 %vm547_vm0, %v497_v0  ;;  %3836 = vmatprep.subr.msk.bf16.mxu0 %vm547_vm0, %v1480_v1  ;;  %v549_v3 = vsel %vm547_vm0, %v497_v0, 0  ;;  %v4626_v4 = vsel %vm547_vm0, %v1480_v1, 0  ;;  %v292_v11 = vld [vmem:[#allocation5] sm:$0xf]  ;;  %v4649_v24 = vld [vmem:[#allocation5 + $0x14] sm:$0xf]  ;;  %vm4660_vm3 = vmor %vm301_vm1, %vm302_vm2 }
  0xa9   : > { %v4620_v2 = vld [vmem:[%s4617_s7] sm:$0xf]  ;;  %v4629_v5 = vld [vmem:[%s4617_s7 + $0x4] sm:$0xf]  ;;  %v4632_v6 = vld [vmem:[%s4617_s7 + $0x8] sm:$0x1]  ;;  %3541 = vmatpush3.bf16.msra.mxu1 %v549_v3  ;;  %3613 = vmatpush3.bf16.msra.mxu0 %v4626_v4 }
  0xaa   : > { %v305_v7 = vshrl.u32 %v4620_v2, 16  ;;  %v308_v8 = vshll.u32 %v4620_v2, 16  ;;  %v314_v9 = vshll.u32 %v4629_v5, 16  ;;  %v318_v10 = vshrl.u32 %v4629_v5, 16  ;;  %3833 = vmatprep.subr.msk.bf16.mxu1 %vm547_vm0, %v292_v11  ;;  %v3224_v13 = vld [vmem:[%s4617_s7 + $0xc] sm:$0xf]  ;;  %3838 = vmatprep.subr.msk.bf16.mxu0 %vm547_vm0, %v4649_v24 }
  0xab   : > { %v324_v12 = vshll.u32 %v4632_v6, 16  ;;  %v4643_v14 = vld [vmem:[%s4617_s7 + $0x10] sm:$0xf]  ;;  %v4646_v19 = vld [vmem:[%s4617_s7 + $0x14] sm:$0x1]  ;;  %v1288_v21 = vshrl.u32 %v3224_v13, 16 }
  0xac   : > { %v307_v15 = vrot.slane %v305_v7, 4  ;;  %v310_v16 = vrot.slane %v308_v8, 5  ;;  %v316_v17 = vrot.slane %v314_v9, 5  ;;  %v320_v18 = vrot.slane %v318_v10, 4  ;;  %v4656_v29 = vld [vmem:[%s4617_s7 + $0xc] sm:$0xf] }
  0xad   : > { %v326_v20 = vrot.slane %v324_v12, 5  ;;  %v1291_v22 = vshll.u32 %v3224_v13, 16  ;;  %v1297_v23 = vshll.u32 %v4643_v14, 16  ;;  %v1301_v27 = vshrl.u32 %v4643_v14, 16  ;;  %v4665_v34 = vld [vmem:[%s4617_s7 + $0x10] sm:$0xf] }
  0xae   : > { %v311_v25 = vor.u32 %v310_v16, %v307_v15  ;;  %v321_v26 = vor.u32 %v320_v18, %v316_v17  ;;  %v1307_v28 = vshll.u32 %v4646_v19, 16  ;;  %v1290_v31 = vrot.slane %v1288_v21, 4  ;;  %v4668_v40 = vld [vmem:[%s4617_s7 + $0x14] sm:$0x1]  ;;  %v3227_v55 = vld [vmem:[%s4617_s7 + $0x18] sm:$0xf] }
  0xaf   : > { %v1293_v32 = vrot.slane %v1291_v22, 5  ;;  %v1299_v33 = vrot.slane %v1297_v23, 5  ;;  %vm522_vm4 = vcmask 64512   ;;  %v1303_v37 = vrot.slane %v1301_v27, 4  ;;  %v4686_v60 = vld [vmem:[%s4617_s7 + $0x1c] sm:$0xf] }
  0xb0   : > { %v312_v35 = vrot.slane %v311_v25, 4  ;;  %v322_v36 = vrot.slane %v321_v26, 4  ;;  %v1309_v39 = vrot.slane %v1307_v28, 5  ;;  %v329_v41 = vshrl.u32 %v4656_v29, 16  ;;  %v4689_v61 = vld [vmem:[%s4617_s7 + $0x20] sm:$0x1] }
  0xb1   : > { %v1294_v38 = vor.u32 %v1293_v32, %v1290_v31  ;;  %v332_v42 = vshll.u32 %v4656_v29, 16  ;;  %v1304_v45 = vor.u32 %v1303_v37, %v1299_v33  ;;  %v338_v46 = vshll.u32 %v4665_v34, 16  ;;  %v4705_v26 = vld [vmem:[%s4617_s7 + $0x1c] sm:$0xf]  ;;  %s267_s28 = sand.u32 1, %s4279_s16   ;;  %s5713_s10 = sld [smem:[#allocation16_spill]] }
  0xb2   : > { %v317_v43 = vsel %vm4660_vm3, %v312_v35, %v316_v17  ;;  %v327_v44 = vsel %vm4660_vm3, %v322_v36, %v326_v20  ;;  %v331_v49 = vrot.slane %v329_v41, 4  ;;  %v342_v53 = vshrl.u32 %v4665_v34, 16  ;;  %v4702_v20 = vld [vmem:[%s4617_s7 + $0x18] sm:$0xf]  ;;  %s3130_s30 = sshll.u32 %s267_s28, 6  ;;  %s3437_s27 = sshll.u32 %s4299_s21, 4 }
  0xb3   : > { %v3134_v47 = vcombine.low %v317_v43, %v327_v44  ;;  %v1295_v48 = vrot.slane %v1294_v38, 4  ;;  %v334_v50 = vrot.slane %v332_v42, 5  ;;  %v1305_v51 = vrot.slane %v1304_v45, 4  ;;  %s5533_s26 = scalar_lea.vmem [#allocation10], %s3130_s30  ;;  %s5714_s22 = sld [smem:[#allocation17_spill]] }
  0xb4   : > { %v340_v52 = vrot.slane %v338_v46, 5  ;;  %v348_v54 = vshll.u32 %v4668_v40, 16  ;;  %v1679_v57 = vrot.slane %v4643_v14, 5  ;;  %v1682_v58 = vrot.slane %v4646_v19, 5  ;;  %s2992_s12 = sshll.u32 %s5533_s26, 4  ;;  %s5715_s11 = sld [smem:[#allocation24_spill]]  ;;  %s5581_s12 = int_to_ptr.vmem [resolvable:$true] %s2992_s12 }
  0xb5   : > { %3542 = vmatprep.mubr.msk.bf16.mxu1 %vm522_vm4, %v3134_v47  ;;  %v1300_v56 = vsel %vm4660_vm3, %v1295_v48, %v1299_v33  ;;  %v335_v59 = vor.u32 %v334_v50, %v331_v49  ;;  %v1310_v62 = vsel %vm4660_vm3, %v1305_v51, %v1309_v39  ;;  %v344_v63 = vrot.slane %v342_v53, 4  ;;  %v4715_v33 = vld [vmem:[%s4617_s7 + $0x20] sm:$0x1]  ;;  %v3230_v39 = vld [vmem:[%s4617_s7 + $0x24] sm:$0xf]  ;;  %s5591_s13 = scalar_lea.sflag [#allocation4], %s267_s28 }
  0xb6   : > { %v350_v0 = vrot.slane %v348_v54, 5  ;;  %v713_v1 = vsel %vm547_vm0, %v292_v11, 0  ;;  %v3248_v3 = vcombine.low %v1300_v56, %v1310_v62  ;;  %v1312_v8 = vshrl.u32 %v3227_v55, 16  ;;  %v4726_v48 = vld [vmem:[%s4617_s7 + $0x28] sm:$0xf]  ;;  %s4185_s29 = scalar_lea.vmem %s5581_s12, 1024 }
  0xb7   : > { %v336_v7 = vrot.slane %v335_v59, 4  ;;  %v1315_v9 = vshll.u32 %v3227_v55, 16  ;;  %v345_v10 = vor.u32 %v344_v63, %v340_v52  ;;  %v1321_v12 = vshll.u32 %v4686_v60, 16  ;;  %v4737_v62 = vld [vmem:[%s4617_s7 + $0x24] sm:$0xf]  ;;  %s3438_s8 = sshll.u32 %s5713_s10, 5  ;;  %p4186_p10 = scmp.ne.s32.totalorder %s5581_s12, %s4185_s29 }
  0xb8   : > { %v1325_v13 = vshrl.u32 %v4686_v60, 16  ;;  %v1331_v15 = vshll.u32 %v4689_v61, 16  ;;  %3614 = vmatprep.mubr.msk.bf16.mxu0 %vm522_vm4, %v3248_v3  ;;  %v1314_v17 = vrot.slane %v1312_v8, 4  ;;  %v1686_v18 = vrot.slane %v4686_v60, 5  ;;  %v4741_v8 = vld [vmem:[%s4617_s7 + $0x28] sm:$0xf]  ;;  %s2989_s9 = sadd.s32 %s3438_s8, %s3437_s27 }
  0xb9   : > { %v341_v16 = vsel %vm4660_vm3, %v336_v7, %v340_v52  ;;  %v1317_v11 = vrot.slane %v1315_v9, 5  ;;  %v346_v21 = vrot.slane %v345_v10, 4  ;;  %v1323_v22 = vrot.slane %v1321_v12, 5  ;;  %v4732_v52 = vld [vmem:[%s4617_s7 + $0x2c] sm:$0x1]  ;;  %s3439_s21 = sshll.u32 %s2989_s9, 6 }
  0xba   : > { %v1327_v23 = vrot.slane %v1325_v13, 4  ;;  %v1333_v25 = vrot.slane %v1331_v15, 5  ;;  %v4709_v28 = vrot.slane %v1686_v18, 4  ;;  %v1689_v31 = vrot.slane %v4689_v61, 5  ;;  %v4745_v13 = vld [vmem:[#allocation5 + $0x18] sm:$0xf]  ;;  %s5579_s14 = scalar_lea.hbm %s5715_s11, %s3439_s21 }
  0xbb   : > { %v1318_v27 = vor.u32 %v1317_v11, %v1314_v17  ;;  %v1784_v32 = vsel %vm547_vm0, %v4649_v24, 0  ;;  %v351_v35 = vsel %vm4660_vm3, %v346_v21, %v350_v0  ;;  %v353_v37 = vshrl.u32 %v4702_v20, 16  ;;  %p5716_p2 = scmp.ne.s32.totalorder %s5714_s22, 0  ;;  %s4323_s2 = smov [#allocation10]  }
  0xbc   : > { %v1328_v36 = vor.u32 %v1327_v23, %v1323_v22  ;;  %v356_v38 = vshll.u32 %v4702_v20, 16  ;;  %v3135_v41 = vcombine.low %v341_v16, %v351_v35  ;;  %v362_v43 = vshll.u32 %v4705_v26, 16  ;;  %v3233_v35 = vld [vmem:[%s4617_s7 + $0x30] sm:$0xf] }
  0xbd   : > { %v1319_v42 = vrot.slane %v1318_v27, 4  ;;  %v366_v44 = vshrl.u32 %v4705_v26, 16  ;;  %v355_v24 = vrot.slane %v353_v37, 4  ;;  %v372_v47 = vshll.u32 %v4715_v33, 16  ;;  %v4753_v27 = vld [vmem:[%s4617_s7 + $0x2c] sm:$0x1]  ;;  %p4187_p9 = pnand %p4186_p10, %p5716_p2 }
  0xbe   : > { %v1329_v45 = vrot.slane %v1328_v36, 4  ;;  %v358_v46 = vrot.slane %v356_v38, 5  ;;  %3543 = vmatmul.mubr.msk.bf16.vlgmr.msra.gmra.mrb[0].mxu1 %vm522_vm4, %v3135_v41  ;;  %v364_v50 = vrot.slane %v362_v43, 5  ;;  %v1336_v53 = vshrl.u32 %v3230_v39, 16 }
  0xbf   : > { %v1324_v49 = vsel %vm4660_vm3, %v1319_v42, %v1323_v22  ;;  %v368_v51 = vrot.slane %v366_v44, 4  ;;  %3559 = vmatpush3.bf16.msra.mxu1 %v713_v1  ;;  %v374_v56 = vrot.slane %v372_v47, 5  ;;  %v1339_v59 = vshll.u32 %v3230_v39, 16  ;;  %v4763_v44 = vld [vmem:[%s4617_s7 + $0x34] sm:$0xf]  ;;  %p4188_p5 = pneg %p4187_p9 }
  0xc0   : > { %v1334_v54 = vsel %vm4660_vm3, %v1329_v45, %v1333_v25  ;;  %v359_v55 = vor.u32 %v358_v46, %v355_v24  ;;  %v1338_v3 = vrot.slane %v1336_v53, 4  ;;  %v1345_v7 = vshll.u32 %v4726_v48, 16  ;;  %v4767_v47 = vld [vmem:[%s4617_s7 + $0x38] sm:$0x1] }
  0xc1   : > { %v3249_v63 = vcombine.low %v1324_v49, %v1334_v54  ;;  %v369_v0 = vor.u32 %v368_v51, %v364_v50  ;;  %v1341_v10 = vrot.slane %v1339_v59, 5  ;;  %v1349_v1 = vshrl.u32 %v4726_v48, 16 }
  0xc2   : > { %v360_v9 = vrot.slane %v359_v55, 4  ;;  %v1355_v12 = vshll.u32 %v4732_v52, 16  ;;  %v1347_v16 = vrot.slane %v1345_v7, 5  ;;  %v377_v17 = vshrl.u32 %v4737_v62, 16  ;;  %v4773_v55 = vld [vmem:[%s4617_s7 + $0x30] sm:$0xf] }
  0xc3   : > { %3615 = vmatmul.mubr.msk.bf16.vlgmr.msra.gmra.mrb[0].mxu0 %vm522_vm4, %v3249_v63  ;;  %v370_v15 = vrot.slane %v369_v0, 4  ;;  %v380_v11 = vshll.u32 %v4737_v62, 16  ;;  %v1342_v22 = vor.u32 %v1341_v10, %v1338_v3  ;;  %v1351_v23 = vrot.slane %v1349_v1, 4  ;;  %v4776_v3 = vld [vmem:[#allocation5 + $0x8] sm:$0xf] }
  0xc4   : > { %3631 = vmatpush3.bf16.msra.mxu0 %v1784_v32  ;;  %v365_v21 = vsel %vm4660_vm3, %v360_v9, %v364_v50  ;;  %v1357_v25 = vrot.slane %v1355_v12, 5  ;;  %vm836_vm5 = vcmask 1042432   ;;  %vm837_vm6 = vcmask 1046532   ;;  %v4782_v12 = vld [vmem:[%s4617_s7 + $0x34] sm:$0xf]  ;;  %3834 = vmatprep.subr.msk.bf16.mxu1 %vm547_vm0, %v4776_v3 }
  0xc5   : > { %v375_v36 = vsel %vm4660_vm3, %v370_v15, %v374_v56  ;;  %v379_v37 = vrot.slane %v377_v17, 4  ;;  %v382_v38 = vrot.slane %v380_v11, 5  ;;  %v386_v32 = vshll.u32 %v4741_v8, 16  ;;  %3839 = vmatprep.subr.msk.bf16.mxu0 %vm547_vm0, %v4745_v13  ;;  %vm4805_vm7 = vmor %vm836_vm5, %vm837_vm6 }
  0xc6   : > { %v3136_v39 = vcombine.low %v365_v21, %v375_v36  ;;  %v1343_v41 = vrot.slane %v1342_v22, 4  ;;  %v1352_v42 = vor.u32 %v1351_v23, %v1347_v16  ;;  %v390_v43 = vshrl.u32 %v4741_v8, 16 }
  0xc7   : > { %v383_v45 = vor.u32 %v382_v38, %v379_v37  ;;  %v388_v24 = vrot.slane %v386_v32, 5  ;;  %v396_v46 = vshll.u32 %v4753_v27, 16  ;;  %v1360_v49 = vshrl.u32 %v3233_v35, 16 }
  0xc8   : > { %3546 = vmatprep.mubr.msk.bf16.mxu1 %vm522_vm4, %v3136_v39  ;;  %v1348_v50 = vsel %vm4660_vm3, %v1343_v41, %v1347_v16  ;;  %v1353_v51 = vrot.slane %v1352_v42, 4  ;;  %v392_v53 = vrot.slane %v390_v43, 4  ;;  %v1363_v54 = vshll.u32 %v3233_v35, 16  ;;  %v3264_v39 = vld [vmem:[%s4617_s7 + $0xc] sm:$0xe] }
  0xc9   : > { %v384_v56 = vrot.slane %v383_v45, 4  ;;  %v398_v59 = vrot.slane %v396_v46, 5  ;;  %v1362_v63 = vrot.slane %v1360_v49, 4  ;;  %v1369_v0 = vshll.u32 %v4763_v44, 16 }
  0xca   : > { %v1358_v7 = vsel %vm4660_vm3, %v1353_v51, %v1357_v25  ;;  %v393_v9 = vor.u32 %v392_v53, %v388_v24  ;;  %v1365_v10 = vrot.slane %v1363_v54, 5  ;;  %v1373_v1 = vshrl.u32 %v4763_v44, 16  ;;  %v4790_v25 = vld [vmem:[%s4617_s7 + $0x38] sm:$0x1] }
  0xcb   : > { %v3250_v15 = vcombine.low %v1348_v50, %v1358_v7  ;;  %v389_v16 = vsel %vm4660_vm3, %v384_v56, %v388_v24  ;;  %v1371_v17 = vrot.slane %v1369_v0, 5  ;;  %v1379_v11 = vshll.u32 %v4767_v47, 16  ;;  %v4801_v24 = vld [vmem:[%s4617_s7 + $0x3c] sm:$0xf]  ;;  %v4813_v0 = vld [vmem:[%s4617_s7 + $0x40] sm:$0xf] }
  0xcc   : > { %v394_v21 = vrot.slane %v393_v9, 4  ;;  %v1366_v22 = vor.u32 %v1365_v10, %v1362_v63  ;;  %v1375_v23 = vrot.slane %v1373_v1, 4  ;;  %v401_v35 = vshrl.u32 %v4773_v55, 16  ;;  %v4819_v1 = vld [vmem:[%s4617_s7 + $0x44] sm:$0x1] }
  0xcd   : > { %3618 = vmatprep.mubr.msk.bf16.mxu0 %vm522_vm4, %v3250_v15  ;;  %v1381_v36 = vrot.slane %v1379_v11, 5  ;;  %v404_v37 = vshll.u32 %v4773_v55, 16  ;;  %v410_v38 = vshll.u32 %v4782_v12, 16  ;;  %v414_v32 = vshrl.u32 %v4782_v12, 16 }
  0xce   : > { %v399_v41 = vsel %vm4660_vm3, %v394_v21, %v398_v59  ;;  %v1367_v42 = vrot.slane %v1366_v22, 4  ;;  %v1376_v43 = vor.u32 %v1375_v23, %v1371_v17  ;;  %v403_v45 = vrot.slane %v401_v35, 4 }
  0xcf   : > { %v3137_v46 = vcombine.low %v389_v16, %v399_v41  ;;  %v406_v49 = vrot.slane %v404_v37, 5  ;;  %v412_v50 = vrot.slane %v410_v38, 5  ;;  %v416_v51 = vrot.slane %v414_v32, 4  ;;  %v3265_v16 = vld [vmem:[%s4617_s7 + $0x18] sm:$0xe] }
  0xd0   : > { %v1372_v54 = vsel %vm4660_vm3, %v1367_v42, %v1371_v17  ;;  %v1377_v56 = vrot.slane %v1376_v43, 4  ;;  %v420_v59 = vshll.u32 %v4790_v25, 16  ;;  %v3272_v63 = vrot.slane %v3264_v39, 9  ;;  %v4835_v32 = vld [vmem:[%s4617_s7 + $0x48] sm:$0xf] }
  0xd1   : > { %3547 = vmatmul.mubr.msk.bf16.gmra.mrb[4].mxu1 %vm522_vm4, %v3137_v46  ;;  %v407_v7 = vor.u32 %v406_v49, %v403_v45  ;;  %v417_v9 = vor.u32 %v416_v51, %v412_v50  ;;  %v1681_v10 = vrot.slane %v1679_v57, 4  ;;  %v425_v15 = vshrl.u32 %v4801_v24, 16  ;;  %v4839_v42 = vld [vmem:[%s4617_s7 + $0x4c] sm:$0xf]  ;;  %v4849_v45 = vld [vmem:[%s4617_s7 + $0x50] sm:$0x1] }
  0xd2   : > { %v1382_v17 = vsel %vm4660_vm3, %v1377_v56, %v1381_v36  ;;  %v422_v11 = vrot.slane %v420_v59, 5  ;;  %v1680_v21 = vsel %vm4805_vm7, %v3272_v63, %v1679_v57  ;;  %v428_v22 = vshll.u32 %v4801_v24, 16 }
  0xd3   : > { %v3251_v23 = vcombine.low %v1372_v54, %v1382_v17  ;;  %v408_v35 = vrot.slane %v407_v7, 4  ;;  %v418_v37 = vrot.slane %v417_v9, 4  ;;  %v1683_v38 = vsel %vm4805_vm7, %v1681_v10, %v1682_v58  ;;  %v3266_v7 = vld [vmem:[%s4617_s7 + $0x24] sm:$0xe] }
  0xd4   : > { %v3280_v36 = vcombine.low %v1680_v21, %v1683_v38  ;;  %v427_v39 = vrot.slane %v425_v15, 4  ;;  %v430_v41 = vrot.slane %v428_v22, 5  ;;  %v434_v14 = vshll.u32 %v4813_v0, 16  ;;  %v4876_v22 = vld [vmem:[%s4617_s7 + $0x58] sm:$0xf] }
  0xd5   : > { %3619 = vmatmul.mubr.msk.bf16.gmra.mrb[4].mxu0 %vm522_vm4, %v3251_v23  ;;  %v413_v57 = vsel %vm4660_vm3, %v408_v35, %v412_v50  ;;  %v423_v19 = vsel %vm4660_vm3, %v418_v37, %v422_v11  ;;  %v438_v58 = vshrl.u32 %v4813_v0, 16  ;;  %v444_v43 = vshll.u32 %v4819_v1, 16  ;;  %v4878_v23 = vld [vmem:[#allocation5 + $0x1c] sm:$0xf] }
  0xd6   : > { %v3138_v46 = vcombine.low %v413_v57, %v423_v19  ;;  %3632 = vmatprep.mubr.msk.bf16.mxu0 %vm522_vm4, %v3280_v36  ;;  %v431_v49 = vor.u32 %v430_v41, %v427_v39  ;;  %v436_v51 = vrot.slane %v434_v14, 5  ;;  %v3273_v54 = vrot.slane %v3265_v16, 9  ;;  %v4868_v16 = vld [vmem:[%s4617_s7 + $0x54] sm:$0xf] }
  0xd7   : > { %v440_v56 = vrot.slane %v438_v58, 4  ;;  %v446_v59 = vrot.slane %v444_v43, 5  ;;  %v1690_v50 = vsel %vm4805_vm7, %v4709_v28, %v1689_v31  ;;  %v1986_v63 = vsel %vm547_vm0, %v4745_v13, 0  ;;  %v4886_v43 = vld [vmem:[%s4617_s7 + $0x5c] sm:$0x1] }
  0xd8   : > { %3550 = vmatprep.mubr.msk.bf16.mxu1 %vm522_vm4, %v3138_v46  ;;  %v432_v9 = vrot.slane %v431_v49, 4  ;;  %v1687_v10 = vsel %vm4805_vm7, %v3273_v54, %v1686_v18  ;;  %v449_v15 = vshrl.u32 %v4835_v32, 16  ;;  %v452_v61 = vshll.u32 %v4835_v32, 16 }
  0xd9   : > { %v441_v28 = vor.u32 %v440_v56, %v436_v51  ;;  %v3281_v31 = vcombine.low %v1687_v10, %v1690_v50  ;;  %v458_v13 = vshll.u32 %v4839_v42, 16  ;;  %v462_v17 = vshrl.u32 %v4839_v42, 16  ;;  %v3267_v56 = vld [vmem:[%s4617_s7 + $0x30] sm:$0xe] }
  0xda   : > { %v437_v11 = vsel %vm4660_vm3, %v432_v9, %v436_v51  ;;  %v451_v21 = vrot.slane %v449_v15, 4  ;;  %v454_v60 = vrot.slane %v452_v61, 5  ;;  %v468_v18 = vshll.u32 %v4849_v45, 16 }
  0xdb   : > { %v442_v35 = vrot.slane %v441_v28, 4  ;;  %v460_v37 = vrot.slane %v458_v13, 5  ;;  %v464_v38 = vrot.slane %v462_v17, 4  ;;  %v3274_v36 = vrot.slane %v3266_v7, 9  ;;  %v3268_v28 = vld [vmem:[%s4617_s7 + $0x3c] sm:$0xe] }
  0xdc   : > { %v455_v39 = vor.u32 %v454_v60, %v451_v21  ;;  %v470_v41 = vrot.slane %v468_v18, 5  ;;  %v1693_v14 = vrot.slane %v4726_v48, 5  ;;  %v1696_v57 = vrot.slane %v4732_v52, 5  ;;  %v4907_v21 = vld [vmem:[%s4617_s7 + $0x40] sm:$0xf] }
  0xdd   : > { %v447_v19 = vsel %vm4660_vm3, %v442_v35, %v446_v59  ;;  %3633 = vmatmul.mubr.msk.bf16.vlgmr.msra.gmra.mrb[0].mxu0 %vm522_vm4, %v3281_v31  ;;  %v465_v58 = vor.u32 %v464_v38, %v460_v37  ;;  %v473_v46 = vshrl.u32 %v4868_v16, 16  ;;  %v476_v49 = vshll.u32 %v4868_v16, 16  ;;  %v4910_v60 = vld [vmem:[%s4617_s7 + $0x44] sm:$0x1] }
  0xde   : > { %v3139_v51 = vcombine.low %v437_v11, %v447_v19  ;;  %3649 = vmatpush3.bf16.msra.mxu0 %v1986_v63  ;;  %v456_v54 = vrot.slane %v455_v39, 4  ;;  %v1694_v48 = vsel %vm4805_vm7, %v3274_v36, %v1693_v14  ;;  %v1695_v52 = vrot.slane %v1693_v14, 4 }
  0xdf   : > { %v466_v59 = vrot.slane %v465_v58, 4  ;;  %v475_v50 = vrot.slane %v473_v46, 4  ;;  %v478_v7 = vrot.slane %v476_v49, 5  ;;  %v482_v9 = vshll.u32 %v4876_v22, 16  ;;  %3840 = vmatprep.subr.msk.bf16.mxu0 %vm547_vm0, %v4878_v23 }
  0xe0   : > { %3551 = vmatmul.mubr.msk.bf16.gmra.mrb[8].mxu1 %vm522_vm4, %v3139_v51  ;;  %v461_v63 = vsel %vm4660_vm3, %v456_v54, %v460_v37  ;;  %v1697_v10 = vsel %vm4805_vm7, %v1695_v52, %v1696_v57  ;;  %v486_v15 = vshrl.u32 %v4876_v22, 16  ;;  %v492_v61 = vshll.u32 %v4886_v43, 16 }
  0xe1   : > { %v471_v31 = vsel %vm4660_vm3, %v466_v59, %v470_v41  ;;  %v3282_v13 = vcombine.low %v1694_v48, %v1697_v10  ;;  %v479_v17 = vor.u32 %v478_v7, %v475_v50  ;;  %v484_v11 = vrot.slane %v482_v9, 5  ;;  %v4930_v59 = vld [vmem:[%s4617_s7 + $0x4c] sm:$0xf]  ;;  %v4933_v50 = vld [vmem:[%s4617_s7 + $0x50] sm:$0x1] }
  0xe2   : > { %v3140_v18 = vcombine.low %v461_v63, %v471_v31  ;;  %v488_v35 = vrot.slane %v486_v15, 4  ;;  %v3275_v37 = vrot.slane %v3267_v56, 9  ;;  %v1700_v36 = vrot.slane %v4763_v44, 5  ;;  %v3269_v44 = vld [vmem:[%s4617_s7 + $0x48] sm:$0xe] }
  0xe3   : > { %3636 = vmatprep.mubr.msk.bf16.mxu0 %vm522_vm4, %v3282_v13  ;;  %v480_v38 = vrot.slane %v479_v17, 4  ;;  %v1703_v39 = vrot.slane %v4767_v47, 5  ;;  %v3276_v41 = vrot.slane %v3268_v28, 9  ;;  %v494_v57 = vrot.slane %v492_v61, 5  ;;  %v3270_v7 = vld [vmem:[%s4617_s7 + $0x54] sm:$0xe] }
  0xe4   : > { %3554 = vmatprep.mubr.msk.bf16.mxu1 %vm522_vm4, %v3140_v18  ;;  %v489_v14 = vor.u32 %v488_v35, %v484_v11  ;;  %v1707_v19 = vrot.slane %v4907_v21, 5  ;;  %v1710_v58 = vrot.slane %v4910_v60, 5  ;;  %v1701_v46 = vsel %vm4805_vm7, %v3275_v37, %v1700_v36  ;;  %v4941_v61 = vld [vmem:[%s4617_s7 + $0x58] sm:$0xf]  ;;  %v4944_v28 = vld [vmem:[%s4617_s7 + $0x5c] sm:$0x1] }
  0xe5   : > { %v1702_v49 = vrot.slane %v1700_v36, 4  ;;  %v485_v47 = vsel %vm4660_vm3, %v480_v38, %v484_v11  ;;  %v3150_v56 = vcombine.low %v4620_v2, %v4629_v5  ;;  %v3277_v15 = vrot.slane %v3269_v44, 9  ;;  %5701 = vst [vmem:[#allocation19_spill] sm:$0xff] %v4944_v28  ;;  %v4947_v13 = vld [vmem:[%s4617_s7 + $0x64] sm:$0xf] }
  0xe6   : > { %v490_v51 = vrot.slane %v489_v14, 4  ;;  %v1708_v54 = vsel %vm4805_vm7, %v3276_v41, %v1707_v19  ;;  %v1709_v48 = vrot.slane %v1707_v19, 4  ;;  %5702 = vst [vmem:[#allocation20_spill] sm:$0xff] %v4947_v13  ;;  %v1714_v17 = vrot.slane %v4930_v59, 5  ;;  %v3271_v38 = vld [vmem:[%s4617_s7 + $0x60] sm:$0xe] }
  0xe7   : > { %v1704_v52 = vsel %vm4805_vm7, %v1702_v49, %v1703_v39  ;;  %v1717_v11 = vrot.slane %v4933_v50, 5  ;;  %v3278_v18 = vrot.slane %v3270_v7, 9  ;;  %v1721_v35 = vrot.slane %v4941_v61, 5  ;;  %v4961_v41 = vld [vmem:[%s4617_s7 + $0x68] sm:$0x1] }
  0xe8   : > { %v495_v9 = vsel %vm4660_vm3, %v490_v51, %v494_v57  ;;  %v3283_v63 = vcombine.low %v1701_v46, %v1704_v52  ;;  %v1711_v10 = vsel %vm4805_vm7, %v1709_v48, %v1710_v58  ;;  %v1724_v37 = vrot.slane %v4944_v28, 5  ;;  %5703 = vst [vmem:[#allocation21_spill] sm:$0xff] %v4961_v41  ;;  %v814_v51 = vld [vmem:[%s4617_s7 + $0x18] sm:$0xe]  ;;  %v5254_v28 = vld [vmem:[%s4617_s7 + $0x70] sm:$0xf] }
  0xe9   : > { %v3141_v2 = vcombine.low %v485_v47, %v495_v9  ;;  %v3284_v31 = vcombine.low %v1708_v54, %v1711_v10  ;;  %v1715_v36 = vsel %vm4805_vm7, %v3277_v15, %v1714_v17  ;;  %v1716_v39 = vrot.slane %v1714_v17, 4  ;;  %v813_v47 = vld [vmem:[%s4617_s7 + $0xc] sm:$0xe]  ;;  %v815_v15 = vld [vmem:[%s4617_s7 + $0x24] sm:$0xe] }
  0xea   : > { %3637 = vmatmul.mubr.msk.bf16.gmra.mrb[4].mxu0 %vm522_vm4, %v3283_v63  ;;  %v1728_v14 = vrot.slane %v4947_v13, 5  ;;  %v1722_v57 = vsel %vm4805_vm7, %v3278_v18, %v1721_v35  ;;  %v1723_v19 = vrot.slane %v1721_v35, 4  ;;  %v848_v58 = vrot.slane %v4665_v34, 5  ;;  %v816_v18 = vld [vmem:[%s4617_s7 + $0x30] sm:$0xe] }
  0xeb   : > { %3555 = vmatmul.mubr.msk.bf16.gmra.mrb[12].mxu1 %vm522_vm4, %v3141_v2  ;;  %3640 = vmatprep.mubr.msk.bf16.mxu0 %vm522_vm4, %v3284_v31  ;;  %v3151_v46 = vcombine.low %v4656_v29, %v4665_v34  ;;  %v1718_v49 = vsel %vm4805_vm7, %v1716_v39, %v1717_v11  ;;  %v3279_v44 = vrot.slane %v3271_v38, 9  ;;  %v851_v7 = vrot.slane %v4668_v40, 5  ;;  %v4979_v34 = vld [vmem:[#allocation5 + $0xc] sm:$0xf] }
  0xec   : > { %3560 = vmatprep.mubr.msk.bf16.mxu1 %vm522_vm4, %v3150_v56  ;;  %v3285_v54 = vcombine.low %v1715_v36, %v1718_v49  ;;  %v1725_v48 = vsel %vm4805_vm7, %v1723_v19, %v1724_v37  ;;  %v1730_v52 = vrot.slane %v1728_v14, 4  ;;  %v1731_v56 = vrot.slane %v4961_v41, 5  ;;  %v3987_v19 = vld [vmem:[%s4617_s7 + $0x18] sm:$0xff]  }
  0xed   : > { %v3152_v9 = vcombine.low %v4702_v20, %v4705_v26  ;;  %v3286_v29 = vcombine.low %v1722_v57, %v1725_v48  ;;  %v946_v63 = vsel %vm547_vm0, %v4776_v3, 0  ;;  %v3167_v10 = vrot.slane %v813_v47, 9 }
  0xee   : > { %v850_v2 = vrot.slane %v848_v58, 4  ;;  %v3168_v31 = vrot.slane %v814_v51, 9  ;;  %v855_v17 = vrot.slane %v4705_v26, 5  ;;  %v1729_v40 = vsel %vm4805_vm7, %v3279_v44, %v1728_v14  ;;  %v812_v51 = vld [vmem:[%s4617_s7] sm:$0xe] }
  0xef   : > { %v1732_v20 = vsel %vm4805_vm7, %v1730_v52, %v1731_v56  ;;  %v4994_v3 = vsel %vm4805_vm7, %v3167_v10, %v848_v58  ;;  %v858_v11 = vrot.slane %v4715_v33, 5  ;;  %v3169_v38 = vrot.slane %v815_v15, 9 }
  0xf0   : > { %v5001_v26 = vsel %vm4805_vm7, %v850_v2, %v851_v7  ;;  %v5005_v35 = vsel %vm4805_vm7, %v3168_v31, %v855_v17  ;;  %v857_v37 = vrot.slane %v855_v17, 4  ;;  %v3153_v36 = vcombine.low %v4737_v62, %v4741_v8  ;;  %v817_v7 = vld [vmem:[%s4617_s7 + $0x3c] sm:$0xe]  ;;  %v3989_v2 = vld [vmem:[%s4617_s7 + $0x24] sm:$0xff]   ;;  %v3330_v31 = vld [vmem:[%s4617_s7 + $0x18] sm:$0xf] }
  0xf1   : > { %v3175_v33 = vcombine.low %v4994_v3, %v5001_v26  ;;  %v862_v39 = vrot.slane %v4741_v8, 5  ;;  %v865_v14 = vrot.slane %v4753_v27, 5  ;;  %v3287_v57 = vcombine.low %v1729_v40, %v1732_v20  ;;  %v3997_v3 = vld [vmem:[%s4617_s7 + $0x6c] sm:$0xff]  }
  0xf2   : > { %3641 = vmatmul.mubr.msk.bf16.gmra.mrb[8].mxu0 %vm522_vm4, %v3285_v54  ;;  %v5018_v58 = vsel %vm4805_vm7, %v857_v37, %v858_v11  ;;  %v869_v62 = vrot.slane %v4782_v12, 5  ;;  %v872_v27 = vrot.slane %v4790_v25, 5  ;;  %v3154_v47 = vcombine.low %v4773_v55, %v4782_v12  ;;  %v5065_v11 = vld [vmem:[%s4617_s7 + $0x1c] sm:$0xf] }
  0xf3   : > { %3561 = vmatmul.mubr.msk.bf16.vlgmr.msra.gmra.mrb[0].mxu1 %vm522_vm4, %v3151_v46  ;;  %3644 = vmatprep.mubr.msk.bf16.mxu0 %vm522_vm4, %v3286_v29  ;;  %v3170_v46 = vrot.slane %v816_v18, 9  ;;  %v5025_v44 = vsel %vm4805_vm7, %v3169_v38, %v862_v39  ;;  %v864_v8 = vrot.slane %v862_v39, 4  ;;  %v841_v52 = vrot.slane %v4629_v5, 5  ;;  %v818_v18 = vld [vmem:[%s4617_s7 + $0x48] sm:$0xe] }
  0xf4   : > { %3577 = vmatpush3.bf16.msra.mxu1 %v946_v63  ;;  %3564 = vmatprep.mubr.msk.bf16.mxu1 %vm522_vm4, %v3152_v9  ;;  %v871_v48 = vrot.slane %v869_v62, 4  ;;  %v3166_v25 = vrot.slane %v812_v51, 9  ;;  %v3171_v9 = vrot.slane %v817_v7, 9  ;;  %v876_v29 = vrot.slane %v4813_v0, 5  ;;  %v3993_v7 = vld [vmem:[%s4617_s7 + $0x3c] sm:$0xff]  }
  0xf5   : > { %3835 = vmatprep.subr.msk.bf16.mxu1 %vm547_vm0, %v4979_v34  ;;  %v5033_v54 = vsel %vm4805_vm7, %v3170_v46, %v869_v62  ;;  %v5038_v56 = vsel %vm4805_vm7, %v864_v8, %v865_v14  ;;  %v879_v63 = vrot.slane %v4819_v1, 5  ;;  %v844_v10 = vrot.slane %v4632_v6, 5  ;;  %v3991_v1 = vld [vmem:[%s4617_s7 + $0x30] sm:$0xff]   ;;  %v3333_v46 = vld [vmem:[%s4617_s7 + $0x24] sm:$0xf] }
  0xf6   : > { %v5046_v12 = vsel %vm4805_vm7, %v871_v48, %v872_v27  ;;  %v843_v15 = vrot.slane %v841_v52, 4  ;;  %v5060_v17 = vsel %vm4805_vm7, %v3171_v9, %v876_v29  ;;  %v878_v40 = vrot.slane %v876_v29, 4  ;;  %v5098_v48 = vld [vmem:[%s4617_s7 + $0x28] sm:$0xf]  ;;  %v3336_v29 = vld [vmem:[%s4617_s7 + $0x30] sm:$0xf] }
  0xf7   : > { %v3155_v20 = vcombine.low %v4801_v24, %v4813_v0  ;;  %v2368_v37 = vsel %vm547_vm0, %v4878_v23, 0  ;;  %v3156_v6 = vcombine.low %v4835_v32, %v4839_v42  ;;  %v842_v38 = vsel %vm4805_vm7, %v3166_v25, %v841_v52  ;;  %v819_v52 = vld [vmem:[%s4617_s7 + $0x54] sm:$0xe] }
  0xf8   : > { %v845_v24 = vsel %vm4805_vm7, %v843_v15, %v844_v10  ;;  %v2126_v0 = vshrl.u32 %v3330_v31, 16  ;;  %v2129_v39 = vshll.u32 %v3330_v31, 16  ;;  %v2135_v32 = vshll.u32 %v5065_v11, 16  ;;  %v3994_v31 = vld [vmem:[%s4617_s7 + $0x48] sm:$0xff]  }
  0xf9   : > { %v2139_v14 = vshrl.u32 %v5065_v11, 16  ;;  %v883_v62 = vrot.slane %v4839_v42, 5  ;;  %v886_v8 = vrot.slane %v4849_v45, 5  ;;  %v1417_v27 = vshll.u32 %v4930_v59, 16 }
  0xfa   : > { %3645 = vmatmul.mubr.msk.bf16.gmra.mrb[12].mxu0 %vm522_vm4, %v3287_v57  ;;  %v5086_v57 = vld [vmem:[#allocation5 + $0x20] sm:$0xf]  ;;  %v3174_v51 = vcombine.low %v842_v38, %v845_v24  ;;  %v2128_v42 = vrot.slane %v2126_v0, 4  ;;  %v2131_v25 = vrot.slane %v2129_v39, 5  ;;  %v2150_v10 = vshrl.u32 %v3333_v46, 16 }
  0xfb   : > { %3565 = vmatmul.mubr.msk.bf16.gmra.mrb[4].mxu1 %vm522_vm4, %v3153_v36  ;;  %3650 = vmatprep.mubr.msk.bf16.mxu0 %vm522_vm4, %v3987_v19  ;;  %v5077_v36 = vsel %vm4805_vm7, %v878_v40, %v879_v63  ;;  %v3172_v19 = vrot.slane %v818_v18, 9  ;;  %v885_v9 = vrot.slane %v883_v62, 4  ;;  %v5109_v63 = vrot.slane %v2135_v32, 5  ;;  %v5116_v40 = vld [vmem:[%s4617_s7 + $0x20] sm:$0x1] }
  0xfc   : > { %3568 = vmatprep.mubr.msk.bf16.mxu1 %vm522_vm4, %v3154_v47  ;;  %v3157_v47 = vcombine.low %v4868_v16, %v4876_v22  ;;  %v2141_v16 = vrot.slane %v2139_v14, 4  ;;  %v2153_v15 = vshll.u32 %v3333_v46, 16  ;;  %v2163_v18 = vshrl.u32 %v5098_v48, 16 }
  0xfd   : > { %v5106_v45 = vsel %vm4805_vm7, %v3172_v19, %v883_v62  ;;  %v2174_v38 = vshrl.u32 %v3336_v29, 16  ;;  %v2177_v24 = vshll.u32 %v3336_v29, 16  ;;  %v890_v0 = vrot.slane %v4876_v22, 5 }
  0xfe   : > { %v1421_v39 = vshrl.u32 %v4930_v59, 16  ;;  %v893_v19 = vrot.slane %v4886_v43, 5  ;;  %v2132_v46 = vor.u32 %v2131_v25, %v2128_v42  ;;  %v2145_v62 = vshll.u32 %v5116_v40, 16  ;;  %v5145_v42 = vld [vmem:[%s4617_s7 + $0x2c] sm:$0x1] }
  0xff   : > { %v892_v22 = vrot.slane %v890_v0, 4  ;;  %v2142_v59 = vor.u32 %v2141_v16, %v5109_v63  ;;  %v2155_v43 = vrot.slane %v2153_v15, 5  ;;  %v2165_v25 = vrot.slane %v2163_v18, 4  ;;  %v5155_v15 = vld [vmem:[%s4617_s7 + $0x38] sm:$0x1] }
 0x100   : > { %v2176_v29 = vrot.slane %v2174_v38, 4  ;;  %v5151_v16 = vrot.slane %v1417_v27, 5  ;;  %v5161_v18 = vrot.slane %v1421_v39, 4  ;;  %v2133_v38 = vrot.slane %v2132_v46, 4  ;;  %v5174_v39 = vld [vmem:[%s4617_s7 + $0x4c] sm:$0xf] }
 0x101   : > { %v1148_v27 = vsel %vm547_vm0, %v4979_v34, 0  ;;  %v5705_v41 = vcombine.low %v5025_v44, %v5038_v56  ;;  %vm2959_vm8 = vcmask 60416  }
 0x102   : > { %3651 = vmatmul.mubr.msk.bf16.vlgmr.msra.gmra.mrb[0].mxu0 %vm522_vm4, %v3989_v2  ;;  %v5112_v2 = vld [vmem:[%s4617_s7 + $0x34] sm:$0xf] }
 0x103   : > { %3569 = vmatmul.mubr.msk.bf16.gmra.mrb[8].mxu1 %vm522_vm4, %v3155_v20  ;;  %3667 = vmatpush3.bf16.msra.mxu0 %v2368_v37  ;;  %v2159_v20 = vshll.u32 %v5098_v48, 16  ;;  %v5122_v37 = vsel %vm4805_vm7, %v885_v9, %v886_v8  ;;  %v2183_v32 = vshll.u32 %v5112_v2, 16  ;;  %v2187_v14 = vshrl.u32 %v5112_v2, 16 }
 0x104   : > { %3572 = vmatprep.mubr.msk.bf16.mxu1 %vm522_vm4, %v3156_v6  ;;  %3654 = vmatprep.mubr.msk.bf16.mxu0 %vm522_vm4, %v3991_v1  ;;  %v3173_v6 = vrot.slane %v819_v52, 9  ;;  %v2152_v52 = vrot.slane %v2150_v10, 4  ;;  %v3996_v10 = vld [vmem:[%s4617_s7 + $0x60] sm:$0xff]   ;;  %v2169_v1 = vshll.u32 %v5145_v42, 16 }
 0x105   : > { %3841 = vmatprep.subr.msk.bf16.mxu0 %vm547_vm0, %v5086_v57  ;;  %v5140_v9 = vrot.slane %v2159_v20, 5  ;;  %v2193_v20 = vshll.u32 %v5155_v15, 16 }
 0x106   : > { %v5135_v8 = vsel %vm4805_vm7, %v3173_v6, %v890_v0  ;;  %v2179_v6 = vrot.slane %v2177_v24, 5  ;;  %v3339_v24 = vld [vmem:[%s4617_s7 + $0x3c] sm:$0xf]  ;;  %v5165_v0 = vld [vmem:[%s4617_s7 + $0x40] sm:$0xf]  ;;  %v2156_v23 = vor.u32 %v2155_v43, %v2152_v52 }
 0x107   : > { %v2198_v55 = vshrl.u32 %v3339_v24, 16  ;;  %v2201_v49 = vshll.u32 %v3339_v24, 16  ;;  %v2207_v34 = vshll.u32 %v5165_v0, 16 }
 0x108   : > { %v2180_v5 = vor.u32 %v2179_v6, %v2176_v29  ;;  %v2171_v29 = vrot.slane %v2169_v1, 5  ;;  %v3345_v6 = vld [vmem:[%s4617_s7 + $0x54] sm:$0xf]  ;;  %v2157_v26 = vrot.slane %v2156_v23, 4 }
 0x109   : > { %v2200_v24 = vrot.slane %v2198_v55, 4 }
 0x10a   : > { %3655 = vmatmul.mubr.msk.bf16.gmra.mrb[4].mxu0 %vm522_vm4, %v3993_v7  ;;  %v3995_v7 = vld [vmem:[%s4617_s7 + $0x54] sm:$0xff]  }
 0x10b   : > { %3573 = vmatmul.mubr.msk.bf16.gmra.mrb[12].mxu1 %vm522_vm4, %v3157_v47  ;;  %3658 = vmatprep.mubr.msk.bf16.mxu0 %vm522_vm4, %v3994_v31  ;;  %v5149_v47 = vsel %vm4805_vm7, %v892_v22, %v893_v19  ;;  %v5157_v31 = vrot.slane %v2183_v32, 5  ;;  %v2143_v19 = vrot.slane %v2142_v59, 4  ;;  %v2147_v22 = vrot.slane %v2145_v62, 5  ;;  %v3342_v32 = vld [vmem:[%s4617_s7 + $0x48] sm:$0xf] }
 0x10c   : > { %3578 = vmatprep.mubr.msk.bf16.mxu1 %vm522_vm4, %v3174_v51  ;;  %v2189_v51 = vrot.slane %v2187_v14, 4  ;;  %v2166_v14 = vor.u32 %v2165_v25, %v5140_v9  ;;  %v2138_v62 = vsel %vm4660_vm3, %v2133_v38, %v5109_v63  ;;  %v2211_v59 = vshrl.u32 %v5165_v0, 16 }
 0x10d   : > { %v2222_v52 = vshrl.u32 %v3342_v32, 16  ;;  %v2225_v43 = vshll.u32 %v3342_v32, 16  ;;  %v2148_v25 = vsel %vm4660_vm3, %v2143_v19, %v2147_v22  ;;  %v2235_v63 = vshrl.u32 %v5174_v39, 16  ;;  %v4070_v32 = vld [vmem:[#allocation5 + $0x10] sm:$0xf] }
 0x10e   : > { %v2190_v46 = vor.u32 %v2189_v51, %v5157_v31  ;;  %v5704_v51 = vcombine.low %v5005_v35, %v5018_v58  ;;  %v2195_v38 = vrot.slane %v2193_v20, 5  ;;  %v2203_v19 = vrot.slane %v2201_v49, 5  ;;  %v5205_v35 = vld [vmem:[%s4617_s7 + $0x44] sm:$0x1]  ;;  %v5208_v20 = vld [vmem:[%s4617_s7 + $0x50] sm:$0x1] }
 0x10f   : > { %v5198_v22 = vrot.slane %v2207_v34, 5  ;;  %v2213_v58 = vrot.slane %v2211_v59, 4  ;;  %v2227_v23 = vrot.slane %v2225_v43, 5  ;;  %v2237_v49 = vrot.slane %v2235_v63, 4  ;;  %v3348_v43 = vld [vmem:[%s4617_s7 + $0x60] sm:$0xf] }
 0x110   : > { %v2191_v1 = vrot.slane %v2190_v46, 4  ;;  %v2249_v46 = vshll.u32 %v3345_v6, 16  ;;  %v2162_v34 = vsel %vm4660_vm3, %v2157_v26, %v5140_v9  ;;  %v2217_v63 = vshll.u32 %v5205_v35, 16  ;;  %v5227_v9 = vld [vmem:[%s4617_s7 + $0x64] sm:$0xf] }
 0x111   : > { %v2241_v26 = vshll.u32 %v5208_v20, 16  ;;  %v2283_v56 = vshrl.u32 %v5227_v9, 16 }
 0x112   : > { %3659 = vmatmul.mubr.msk.bf16.gmra.mrb[8].mxu0 %vm522_vm4, %v3995_v7  ;;  %v2231_v7 = vshll.u32 %v5174_v39, 16 }
 0x113   : > { %3579 = vmatmul.mubr.msk.bf16.vlgmr.msra.gmra.mrb[0].mxu1 %vm522_vm4, %v3175_v33  ;;  %3662 = vmatprep.mubr.msk.bf16.mxu0 %vm522_vm4, %v3996_v10  ;;  %v2167_v33 = vrot.slane %v2166_v14, 4  ;;  %v2181_v10 = vrot.slane %v2180_v5, 4  ;;  %v2246_v14 = vshrl.u32 %v3345_v6, 16  ;;  %v3354_v5 = vcombine.low %v2138_v62, %v2148_v25 }
 0x114   : > { %3595 = vmatpush3.bf16.msra.mxu1 %v1148_v27  ;;  %3582 = vmatprep.mubr.msk.bf16.mxu1 %vm522_vm4, %v5704_v51  ;;  %v5202_v27 = vld [vmem:[%s4617_s7 + $0x58] sm:$0xf]  ;;  %v2224_v51 = vrot.slane %v2222_v52, 4  ;;  %v5210_v55 = vrot.slane %v2231_v7, 5  ;;  %v2196_v25 = vsel %vm4660_vm3, %v2191_v1, %v2195_v38  ;;  %v2204_v7 = vor.u32 %v2203_v19, %v2200_v24 }
 0x115   : > { %3837 = vmatprep.subr.msk.bf16.mxu1 %vm547_vm0, %v4070_v32  ;;  %v2172_v32 = vsel %vm4660_vm3, %v2167_v33, %v2171_v29  ;;  %v2255_v59 = vshll.u32 %v5202_v27, 16  ;;  %v2259_v52 = vshrl.u32 %v5202_v27, 16  ;;  %v2186_v62 = vsel %vm4660_vm3, %v2181_v10, %v5157_v31  ;;  %v5239_v10 = vld [vmem:[%s4617_s7 + $0x5c] sm:$0x1] }
 0x116   : > { %v2214_v29 = vor.u32 %v2213_v58, %v5198_v22  ;;  %v2228_v6 = vor.u32 %v2227_v23, %v2224_v51  ;;  %v2248_v33 = vrot.slane %v2246_v14, 4  ;;  %v2238_v31 = vor.u32 %v2237_v49, %v5210_v55 }
 0x117   : > { %v2251_v38 = vrot.slane %v2249_v46, 5  ;;  %v2273_v1 = vshll.u32 %v3348_v43, 16  ;;  %v5706_v24 = vcombine.low %v5033_v54, %v5046_v12  ;;  %v5245_v19 = vrot.slane %v2255_v59, 5  ;;  %v3351_v46 = vld [vmem:[%s4617_s7 + $0x6c] sm:$0xf] }
 0x118   : > { %v2261_v44 = vrot.slane %v2259_v52, 4  ;;  %v3355_v58 = vcombine.low %v2162_v34, %v2172_v32  ;;  %v2622_v51 = vsel %vm547_vm0, %v5086_v57, 0  ;;  %v3356_v23 = vcombine.low %v2186_v62, %v2196_v25 }
 0x119   : > { %v2219_v14 = vrot.slane %v2217_v63, 5  ;;  %v2215_v49 = vrot.slane %v2214_v29, 4  ;;  %v2243_v54 = vrot.slane %v2241_v26, 5  ;;  %v2265_v12 = vshll.u32 %v5239_v10, 16 }
 0x11a   : > { %3663 = vmatmul.mubr.msk.bf16.gmra.mrb[12].mxu0 %vm522_vm4, %v3997_v3  ;;  %v2270_v3 = vshrl.u32 %v3348_v43, 16  ;;  %v2229_v59 = vrot.slane %v2228_v6, 4  ;;  %v2239_v52 = vrot.slane %v2238_v31, 4  ;;  %v2252_v13 = vor.u32 %v2251_v38, %v2248_v33 }
 0x11b   : > { %3583 = vmatmul.mubr.msk.bf16.gmra.mrb[4].mxu1 %vm522_vm4, %v5705_v41  ;;  %3668 = vmatprep.mubr.msk.bf16.mxu0 %vm522_vm4, %v3354_v5  ;;  %v2279_v41 = vshll.u32 %v5227_v9, 16  ;;  %v2205_v5 = vrot.slane %v2204_v7, 4  ;;  %v2262_v34 = vor.u32 %v2261_v44, %v5245_v19  ;;  %v2285_v57 = vrot.slane %v2283_v56, 4  ;;  %v5263_v7 = vld [vmem:[%s4617_s7 + $0x68] sm:$0x1] }
 0x11c   : > { %3586 = vmatprep.mubr.msk.bf16.mxu1 %vm522_vm4, %v5706_v24  ;;  %v2272_v43 = vrot.slane %v2270_v3, 4  ;;  %v2275_v24 = vrot.slane %v2273_v1, 5  ;;  %v1424_v62 = vor.u32 %v5161_v18, %v5151_v16  ;;  %v1427_v25 = vshll.u32 %v4933_v50, 16 }
 0x11d   : > { %v5257_v32 = vrot.slane %v2279_v41, 5  ;;  %v2294_v63 = vshrl.u32 %v3351_v46, 16  ;;  %v2297_v29 = vshll.u32 %v3351_v46, 16  ;;  %v2210_v6 = vsel %vm4660_vm3, %v2205_v5, %v5198_v22 }
 0x11e   : > { %v2220_v26 = vsel %vm4660_vm3, %v2215_v49, %v2219_v14  ;;  %v2303_v33 = vshll.u32 %v5254_v28, 16  ;;  %v2307_v31 = vshrl.u32 %v5254_v28, 16  ;;  %v5707_v50 = vcombine.low %v5060_v17, %v5077_v36 }
 0x11f   : > { %v2234_v18 = vsel %vm4660_vm3, %v2229_v59, %v5210_v55  ;;  %v2244_v22 = vsel %vm4660_vm3, %v2239_v52, %v2243_v54  ;;  %v2267_v38 = vrot.slane %v2265_v12, 5  ;;  %v2276_v3 = vor.u32 %v2275_v24, %v2272_v43  ;;  %v3239_v24 = vld [vmem:[%s4617_s7 + $0x48] sm:$0xf] }
 0x120   : > { %v5708_v1 = vcombine.low %v5106_v45, %v5122_v37  ;;  %v2253_v17 = vrot.slane %v2252_v13, 4  ;;  %v2263_v36 = vrot.slane %v2262_v34, 4  ;;  %v2286_v44 = vor.u32 %v2285_v57, %v5257_v32  ;;  %v3998_v13 = vld [vmem:[%s4617_s7 + $0xc] sm:$0xff]   ;;  %v3370_v57 = vld [vmem:[%s4617_s7 + $0x18] sm:$0xe] }
 0x121   : > { %v2289_v41 = vshll.u32 %v5263_v7, 16  ;;  %v2296_v55 = vrot.slane %v2294_v63, 4  ;;  %v2299_v56 = vrot.slane %v2297_v29, 5  ;;  %v5292_v14 = vrot.slane %v2303_v33, 5 }
 0x122   : > { %3669 = vmatmul.mubr.msk.bf16.vlgmr.msra.gmra.mrb[0].mxu0 %vm522_vm4, %v3355_v58  ;;  %v3357_v58 = vcombine.low %v2210_v6, %v2220_v26  ;;  %v2309_v45 = vrot.slane %v2307_v31, 4  ;;  %v1425_v37 = vrot.slane %v1424_v62, 4  ;;  %v1429_v5 = vrot.slane %v1427_v25, 5 }
 0x123   : > { %3587 = vmatmul.mubr.msk.bf16.gmra.mrb[8].mxu1 %vm522_vm4, %v5707_v50  ;;  %3685 = vmatpush3.bf16.msra.mxu0 %v2622_v51  ;;  %v5290_v51 = vld [vmem:[%s4617_s7 + $0x74] sm:$0x1]  ;;  %v3358_v49 = vcombine.low %v2234_v18, %v2244_v22  ;;  %v2258_v54 = vsel %vm4660_vm3, %v2253_v17, %v5245_v19  ;;  %v2268_v12 = vsel %vm4660_vm3, %v2263_v36, %v2267_v38  ;;  %v2287_v46 = vrot.slane %v2286_v44, 4  ;;  %v3999_v38 = vld [vmem:[%s4617_s7 + $0x18] sm:$0xff]  }
 0x124   : > { %3590 = vmatprep.mubr.msk.bf16.mxu1 %vm522_vm4, %v5708_v1  ;;  %3672 = vmatprep.mubr.msk.bf16.mxu0 %vm522_vm4, %v3356_v23  ;;  %v2277_v23 = vrot.slane %v2276_v3, 4  ;;  %v2291_v59 = vrot.slane %v2289_v41, 5  ;;  %v2300_v52 = vor.u32 %v2299_v56, %v2296_v55  ;;  %v2313_v43 = vshll.u32 %v5290_v51, 16  ;;  %v4000_v1 = vld [vmem:[%s4617_s7 + $0x24] sm:$0xff]   ;;  %v3236_v17 = vld [vmem:[%s4617_s7 + $0x3c] sm:$0xf] }
 0x125   : > { %v2310_v34 = vor.u32 %v2309_v45, %v5292_v14  ;;  %v2517_v62 = vrot.slane %v5065_v11, 5  ;;  %v5709_v25 = vcombine.low %v5135_v8, %v5149_v47  ;;  %v3359_v19 = vcombine.low %v2258_v54, %v2268_v12  ;;  %v3371_v55 = vld [vmem:[%s4617_s7 + $0x24] sm:$0xe]  ;;  %v3372_v45 = vld [vmem:[%s4617_s7 + $0x30] sm:$0xe] }
 0x126   : > { %v2282_v63 = vsel %vm4660_vm3, %v2277_v23, %v5257_v32  ;;  %v2292_v11 = vsel %vm4660_vm3, %v2287_v46, %v2291_v59  ;;  %v1408_v29 = vshrl.u32 %v3239_v24, 16  ;;  %v1411_v6 = vshll.u32 %v3239_v24, 16  ;;  %v4001_v24 = vld [vmem:[%s4617_s7 + $0x30] sm:$0xff]  }
 0x127   : > { %v1430_v8 = vsel %vm4660_vm3, %v1425_v37, %v1429_v5  ;;  %v2301_v47 = vrot.slane %v2300_v52, 4  ;;  %v2315_v26 = vrot.slane %v2313_v43, 5  ;;  %v3378_v33 = vrot.slane %v3370_v57, 9 }
 0x128   : > { %v2520_v31 = vrot.slane %v5116_v40, 5  ;;  %v2311_v50 = vrot.slane %v2310_v34, 4  ;;  %v2519_v32 = vrot.slane %v2517_v62, 4  ;;  %v1410_v18 = vrot.slane %v1408_v29, 4 }
 0x129   : > { %v1413_v22 = vrot.slane %v1411_v6, 5  ;;  %v3360_v3 = vcombine.low %v2282_v63, %v2292_v11  ;;  %v2306_v44 = vsel %vm4660_vm3, %v2301_v47, %v5292_v14  ;;  %v2518_v41 = vsel %vm4805_vm7, %v3378_v33, %v2517_v62  ;;  %v3373_v63 = vld [vmem:[%s4617_s7 + $0x3c] sm:$0xe]  ;;  %v3242_v6 = vld [vmem:[%s4617_s7 + $0x54] sm:$0xf] }
 0x12a   : > { %3673 = vmatmul.mubr.msk.bf16.gmra.mrb[4].mxu0 %vm522_vm4, %v3357_v58  ;;  %v2524_v40 = vrot.slane %v5098_v48, 5  ;;  %v2316_v56 = vsel %vm4660_vm3, %v2311_v50, %v2315_v26  ;;  %v2521_v58 = vsel %vm4805_vm7, %v2519_v32, %v2520_v31  ;;  %v2531_v37 = vrot.slane %v5112_v2, 5  ;;  %v3374_v33 = vld [vmem:[%s4617_s7 + $0x48] sm:$0xe] }
 0x12b   : > { %3591 = vmatmul.mubr.msk.bf16.gmra.mrb[12].mxu1 %vm522_vm4, %v5709_v25  ;;  %3676 = vmatprep.mubr.msk.bf16.mxu0 %vm522_vm4, %v3358_v49  ;;  %v1414_v36 = vor.u32 %v1413_v22, %v1410_v18  ;;  %v1384_v14 = vshrl.u32 %v3236_v17, 16  ;;  %v1387_v49 = vshll.u32 %v3236_v17, 16  ;;  %v1393_v48 = vshll.u32 %v4907_v21, 16  ;;  %v4002_v25 = vld [vmem:[%s4617_s7 + $0x3c] sm:$0xff]  }
 0x12c   : > { %3596 = vmatprep.mubr.msk.bf16.mxu1 %vm522_vm4, %v3998_v13  ;;  %v1397_v23 = vshrl.u32 %v4907_v21, 16  ;;  %v3379_v13 = vrot.slane %v3371_v55, 9  ;;  %v2526_v54 = vrot.slane %v2524_v40, 4  ;;  %v2527_v12 = vrot.slane %v5145_v42, 5 }
 0x12d   : > { %v1415_v5 = vrot.slane %v1414_v36, 4  ;;  %v3380_v46 = vrot.slane %v3372_v45, 9  ;;  %v3361_v52 = vcombine.low %v2306_v44, %v2316_v56  ;;  %v3386_v43 = vcombine.low %v2518_v41, %v2521_v58  ;;  %v4003_v44 = vld [vmem:[%s4617_s7 + $0x48] sm:$0xff]   ;;  %v4004_v56 = vld [vmem:[%s4617_s7 + $0x54] sm:$0xff]  }
 0x12e   : > { %v2533_v21 = vrot.slane %v2531_v37, 4  ;;  %v1386_v34 = vrot.slane %v1384_v14, 4  ;;  %v1389_v57 = vrot.slane %v1387_v49, 5  ;;  %v5351_v62 = vrot.slane %v1393_v48, 5 }
 0x12f   : > { %v1420_v2 = vsel %vm4660_vm3, %v1415_v5, %v5151_v16  ;;  %v1399_v16 = vrot.slane %v1397_v23, 4  ;;  %v2525_v42 = vsel %vm4805_vm7, %v3379_v13, %v2524_v40  ;;  %v2538_v11 = vrot.slane %v5165_v0, 5  ;;  %v3245_v5 = vld [vmem:[%s4617_s7 + $0x60] sm:$0xf] }
 0x130   : > { %v5347_v59 = vcombine.low %v1420_v2, %v1430_v8  ;;  %v1403_v29 = vshll.u32 %v4910_v60, 16  ;;  %v1390_v47 = vor.u32 %v1389_v57, %v1386_v34  ;;  %v2545_v31 = vrot.slane %v5174_v39, 5  ;;  %v3375_v2 = vld [vmem:[%s4617_s7 + $0x54] sm:$0xe]  ;;  %v5711_v57 = vld [vmem:[#allocation19_spill] sm:$0xff] }
 0x131   : > { %v1400_v26 = vor.u32 %v1399_v16, %v5351_v62  ;;  %v3381_v60 = vrot.slane %v3373_v63, 9  ;;  %v2541_v50 = vrot.slane %v5205_v35, 5  ;;  %v1432_v32 = vshrl.u32 %v3242_v6, 16 }
 0x132   : > { %3677 = vmatmul.mubr.msk.bf16.gmra.mrb[8].mxu0 %vm522_vm4, %v3359_v19  ;;  %v2528_v19 = vsel %vm4805_vm7, %v2526_v54, %v2527_v12  ;;  %v1435_v18 = vshll.u32 %v3242_v6, 16  ;;  %v1441_v22 = vshll.u32 %v4941_v61, 16  ;;  %v1405_v17 = vrot.slane %v1403_v29, 5 }
 0x133   : > { %3597 = vmatmul.mubr.msk.bf16.vlgmr.msra.gmra.mrb[0].mxu1 %vm522_vm4, %v3999_v38  ;;  %3680 = vmatprep.mubr.msk.bf16.mxu0 %vm522_vm4, %v3360_v3  ;;  %v3387_v0 = vcombine.low %v2525_v42, %v2528_v19  ;;  %v1445_v38 = vshrl.u32 %v4941_v61, 16  ;;  %v3382_v36 = vrot.slane %v3374_v33, 9  ;;  %v1391_v39 = vrot.slane %v1390_v47, 4 }
 0x134   : > { %3703 = vmatpush3.bf16.msra.mxu1 %v4626_v4  ;;  %3600 = vmatprep.mubr.msk.bf16.mxu1 %vm522_vm4, %v4000_v1  ;;  %v2534_v4 = vrot.slane %v5155_v15, 5  ;;  %v2532_v15 = vsel %vm4805_vm7, %v3380_v46, %v2531_v37  ;;  %v2540_v1 = vrot.slane %v2538_v11, 4  ;;  %v1401_v41 = vrot.slane %v1400_v26, 4 }
 0x135   : > { %v2547_v55 = vrot.slane %v2545_v31, 4  ;;  %v2548_v40 = vrot.slane %v5208_v20, 5  ;;  %v1434_v35 = vrot.slane %v1432_v32, 4  ;;  %v1437_v58 = vrot.slane %v1435_v18, 5 }
 0x136   : > { %v2535_v8 = vsel %vm4805_vm7, %v2533_v21, %v2534_v4  ;;  %v1443_v45 = vrot.slane %v1441_v22, 5  ;;  %v1447_v37 = vrot.slane %v1445_v38, 4  ;;  %v2539_v61 = vsel %vm4805_vm7, %v3381_v60, %v2538_v11  ;;  %v5712_v38 = vld [vmem:[#allocation21_spill] sm:$0xff] }
 0x137   : > { %v3388_v3 = vcombine.low %v2532_v15, %v2535_v8  ;;  %v2542_v14 = vsel %vm4805_vm7, %v2540_v1, %v2541_v50  ;;  %v2546_v49 = vsel %vm4805_vm7, %v3382_v36, %v2545_v31  ;;  %v2552_v20 = vrot.slane %v5202_v27, 5  ;;  %v3376_v27 = vld [vmem:[%s4617_s7 + $0x60] sm:$0xe]  ;;  %v3377_v1 = vld [vmem:[%s4617_s7 + $0x6c] sm:$0xe] }
 0x138   : > { %v1396_v48 = vsel %vm4660_vm3, %v1391_v39, %v5351_v62  ;;  %v1406_v23 = vsel %vm4660_vm3, %v1401_v41, %v1405_v17  ;;  %v2549_v13 = vsel %vm4805_vm7, %v2547_v55, %v2548_v40  ;;  %v2559_v54 = vrot.slane %v5227_v9, 5  ;;  %v4005_v9 = vld [vmem:[%s4617_s7 + $0x60] sm:$0xff]   ;;  %s4189_s7 = sshll.u32 %s4323_s2, 4  ;;  %s4190_s7 = int_to_ptr.vmem [resolvable:$false] %s4189_s7 }
 0x139   : > { %v1456_v12 = vshrl.u32 %v3245_v5, 16  ;;  %v1459_v46 = vshll.u32 %v3245_v5, 16  ;;  %v3389_v4 = vcombine.low %v2539_v61, %v2542_v14  ;;  %v1448_v34 = vor.u32 %v1447_v37, %v1443_v45  ;;  %s4191_s30 = scalar_lea.vmem %s4190_s7, 2048  ;;  %p4192_p13 = scmp.lt.s32.totalorder %s5581_s12, %s4190_s7 }
 0x13a   : > { %3681 = vmatmul.mubr.msk.bf16.gmra.mrb[12].mxu0 %vm522_vm4, %v3361_v52  ;;  %v5710_v52 = vld [vmem:[#allocation20_spill] sm:$0xff]  ;;  %v1451_v62 = vshll.u32 %v5711_v57, 16  ;;  %v3390_v16 = vcombine.low %v2546_v49, %v2549_v13  ;;  %v2554_v42 = vrot.slane %v2552_v20, 4  ;;  %v2555_v19 = vrot.slane %v5239_v10, 5  ;;  %p4193_p6 = scmp.lt.s32.totalorder %s4191_s30, %s4185_s29 }
 0x13b   : > { %3601 = vmatmul.mubr.msk.bf16.gmra.mrb[4].mxu1 %vm522_vm4, %v4001_v24  ;;  %3686 = vmatprep.mubr.msk.bf16.mxu0 %vm522_vm4, %v3386_v43  ;;  %v1465_v43 = vshll.u32 %v5710_v52, 16  ;;  %v1469_v21 = vshrl.u32 %v5710_v52, 16  ;;  %v1438_v24 = vor.u32 %v1437_v58, %v1434_v35  ;;  %v3252_v63 = vcombine.low %v1396_v48, %v1406_v23 }
 0x13c   : > { %3604 = vmatprep.mubr.msk.bf16.mxu1 %vm522_vm4, %v4002_v25  ;;  %v3383_v25 = vrot.slane %v3375_v2, 9  ;;  %v3384_v15 = vrot.slane %v3376_v27, 9  ;;  %v2561_v11 = vrot.slane %v2559_v54, 4  ;;  %v2562_v29 = vrot.slane %v5263_v7, 5  ;;  %v5442_v27 = vld [vmem:[#allocation7] ss:$0 sm:$0xff]  ;;  %p4194_p8 = por %p4193_p6, %p4192_p13 }
 0x13d   : > { %v1458_v6 = vrot.slane %v1456_v12, 4  ;;  %v1461_v8 = vrot.slane %v1459_v46, 5  ;;  %v1467_v47 = vrot.slane %v1465_v43, 5  ;;  %v1471_v26 = vrot.slane %v1469_v21, 4  ;;  %v5444_v46 = vld [vmem:[#allocation8] ss:$0 sm:$0xff] }
 0x13e   : > { %v1439_v33 = vrot.slane %v1438_v24, 4  ;;  %v1449_v31 = vrot.slane %v1448_v34, 4  ;;  %v2553_v10 = vsel %vm4805_vm7, %v3383_v25, %v2552_v20  ;;  %v2556_v7 = vsel %vm4805_vm7, %v2554_v42, %v2555_v19  ;;  %p4195_p12 = pnand %p4194_p8, %p4188_p5 }
 0x13f   : > { %v2560_v60 = vsel %vm4805_vm7, %v3384_v15, %v2559_v54  ;;  %v2566_v50 = vrot.slane %v5254_v28, 5  ;;  %v2563_v32 = vsel %vm4805_vm7, %v2561_v11, %v2562_v29  ;;  %v1462_v18 = vor.u32 %v1461_v8, %v1458_v6 }
 0x140   : > { %v1472_v22 = vor.u32 %v1471_v26, %v1467_v47  ;;  %v1444_v17 = vsel %vm4660_vm3, %v1439_v33, %v1443_v45  ;;  %v3392_v39 = vcombine.low %v2560_v60, %v2563_v32  ;;  %v3385_v41 = vrot.slane %v3377_v1, 9 }
 0x141   : > { %v2568_v28 = vrot.slane %v2566_v50, 4  ;;  %v2569_v55 = vrot.slane %v5290_v51, 5 }
 0x142   : > { %3687 = vmatmul.mubr.msk.bf16.vlgmr.msra.gmra.mrb[0].mxu0 %vm522_vm4, %v3387_v0  ;;  %v1453_v0 = vrot.slane %v1451_v62, 5  ;;  %v1473_v35 = vrot.slane %v1472_v22, 4  ;;  %v2567_v45 = vsel %vm4805_vm7, %v3385_v41, %v2566_v50 }
 0x143   : > { %3605 = vmatmul.mubr.msk.bf16.gmra.mrb[8].mxu1 %vm522_vm4, %v4003_v44  ;;  %3690 = vmatprep.mubr.msk.bf16.mxu0 %vm522_vm4, %v3388_v3  ;;  %v1475_v3 = vshll.u32 %v5712_v38, 16  ;;  %v3391_v44 = vcombine.low %v2553_v10, %v2556_v7  ;;  %v2570_v37 = vsel %vm4805_vm7, %v2568_v28, %v2569_v55 }
 0x144   : > { %3608 = vmatprep.mubr.msk.bf16.mxu1 %vm522_vm4, %v4004_v56  ;;  %v1454_v36 = vsel %vm4660_vm3, %v1449_v31, %v1453_v0  ;;  %v1463_v56 = vrot.slane %v1462_v18, 4  ;;  %v3393_v61 = vcombine.low %v2567_v45, %v2570_v37 }
 0x145   : > { %v3254_v40 = vcombine.low %v1444_v17, %v1454_v36  ;;  %v1477_v58 = vrot.slane %v1475_v3, 5 }
 0x146   : > { %v1468_v51 = vsel %vm4660_vm3, %v1463_v56, %v1467_v47 }
 0x147   : > { %v1478_v5 = vsel %vm4660_vm3, %v1473_v35, %v1477_v58 }
 0x148   : > { %v3255_v14 = vcombine.low %v1468_v51, %v1478_v5 }
 0x14a   : > { %3691 = vmatmul.mubr.msk.bf16.gmra.mrb[4].mxu0 %vm522_vm4, %v3389_v4 }
 0x14b   : > { %3609 = vmatmul.mubr.msk.bf16.gmra.mrb[12].mxu1 %vm522_vm4, %v4005_v9  ;;  %3694 = vmatprep.mubr.msk.bf16.mxu0 %vm522_vm4, %v3390_v16 }
 0x14c   : > { %3622 = vmatprep.mubr.msk.bf16.mxu1 %vm522_vm4, %v3252_v63 }
 0x152   : > { %3695 = vmatmul.mubr.msk.bf16.gmra.mrb[8].mxu0 %vm522_vm4, %v3391_v44 }
 0x153   : > { %3623 = vmatmul.mubr.msk.bf16.vlgmr.msra.gmra.mrb[8].mxu1 %vm522_vm4, %v5347_v59  ;;  %3698 = vmatprep.mubr.msk.bf16.mxu0 %vm522_vm4, %v3392_v39 }
 0x154   : > { %3626 = vmatprep.mubr.msk.bf16.mxu1 %vm522_vm4, %v3254_v40 }
 0x15a   : > { %3699 = vmatmul.mubr.msk.bf16.gmra.mrb[12].mxu0 %vm522_vm4, %v3393_v61 }
 0x15b   : > { %3627 = vmatmul.mubr.msk.bf16.gmra.mrb[12].mxu1 %vm522_vm4, %v3255_v14 }
 0x206   : > { %v3598_v59 = vpop.f32.mrb[0].mxu1 }
 0x207   : > { %v1184_v49 = vpop.f32.mrb[1].mxu1 }
 0x208   : > { %v3599_v20 = vpop.f32.mrb[2].mxu1 }
 0x209   : > { %v1187_v48 = vpop.f32.mrb[3].mxu1 }
 0x20e   : > { %v3602_v53 = vpop.f32.mrb[4].mxu1 }
 0x20f   : > { %v1200_v23 = vpop.f32.mrb[5].mxu1 }
 0x210   : > { %v3603_v13 = vpop.f32.mrb[6].mxu1 }
 0x211   : > { %v1203_v2 = vpop.f32.mrb[7].mxu1 }
 0x215   : > { %v3688_v54 = vpop.f32.mrb[0].mxu0 }
 0x216   : > { %v3704_v12 = vadd.f32 %v3688_v54, %v3598_v59  ;;  %v2658_v30 = vpop.f32.mrb[1].mxu0 }
 0x217   : > { %v3705_v52 = vadd.f32 %v2658_v30, %v1184_v49  ;;  %v3689_v43 = vpop.f32.mrb[2].mxu0 }
 0x218   : > { %v2746_v21 = vmul.f32 %v3704_v12, %v5442_v27  ;;  %v3706_v4 = vadd.f32 %v3689_v43, %v3599_v20  ;;  %v2661_v24 = vpop.f32.mrb[3].mxu0 }
 0x219   : > { %v2744_v34 = vmul.f32 %v3705_v52, %v5442_v27  ;;  %v3707_v57 = vadd.f32 %v2661_v24, %v1187_v48 }
 0x21a   : > { %v5449_v62 = vadd.f32 %v5444_v46, %v2746_v21  ;;  %v2747_v16 = vmul.f32 %v3706_v4, %v5442_v27 }
 0x21b   : > { %v5453_v25 = vadd.f32 %v5444_v46, %v2744_v34  ;;  %v2745_v42 = vmul.f32 %v3707_v57, %v5442_v27 }
 0x21c   : > { %v3406_v19 = vmul.f32 -1.442695, %v5449_v62  ;;  %v5458_v9 = vadd.f32 %v5444_v46, %v2747_v16 }
 0x21d   : > { %v3404_v63 = vmul.f32 -1.442695, %v5453_v25  ;;  %v5462_v15 = vadd.f32 %v5444_v46, %v2745_v42  ;;  %v3692_v11 = vpop.f32.mrb[4].mxu0 }
 0x21e   : > { %4006 = vpow2.f32 %v3406_v19  ;;  %v3407_v29 = vmul.f32 -1.442695, %v5458_v9  ;;  %v3708_v6 = vadd.f32 %v3692_v11, %v3602_v53  ;;  %v2674_v8 = vpop.f32.mrb[5].mxu0 }
 0x21f   : > { %4008 = vpow2.f32 %v3404_v63  ;;  %v3405_v47 = vmul.f32 -1.442695, %v5462_v15  ;;  %v3709_v26 = vadd.f32 %v2674_v8, %v1200_v23  ;;  %v3693_v33 = vpop.f32.mrb[6].mxu0 }
 0x220   : > { %4010 = vpow2.f32 %v3407_v29  ;;  %v2750_v31 = vmul.f32 %v3708_v6, %v5442_v27  ;;  %v3710_v0 = vadd.f32 %v3693_v33, %v3603_v13  ;;  %v2677_v10 = vpop.f32.mrb[7].mxu0 }
 0x221   : > { %4012 = vpow2.f32 %v3405_v47  ;;  %v2748_v7 = vmul.f32 %v3709_v26, %v5442_v27  ;;  %v3711_v60 = vadd.f32 %v2677_v10, %v1203_v2 }
 0x222   : > { %v5469_v50 = vadd.f32 %v5444_v46, %v2750_v31  ;;  %v2751_v32 = vmul.f32 %v3710_v0, %v5442_v27 }
 0x223   : > { %v5473_v18 = vadd.f32 %v5444_v46, %v2748_v7  ;;  %v2749_v22 = vmul.f32 %v3711_v60, %v5442_v27 }
 0x224   : > { %v3410_v38 = vmul.f32 -1.442695, %v5469_v50  ;;  %v5478_v3 = vadd.f32 %v5444_v46, %v2751_v32 }
 0x225   : > { %v3408_v1 = vmul.f32 -1.442695, %v5473_v18  ;;  %v5482_v17 = vadd.f32 %v5444_v46, %v2749_v22  ;;  %v3696_v36 = vpop.f32.mrb[8].mxu0 }
 0x226   : > { %4014 = vpow2.f32 %v3410_v38  ;;  %v3411_v44 = vmul.f32 -1.442695, %v5478_v3  ;;  %v3624_v39 = vpop.f32.mrb[8].mxu1  ;;  %v2690_v41 = vpop.f32.mrb[9].mxu0 }
 0x227   : > { %4016 = vpow2.f32 %v3408_v1  ;;  %v3409_v28 = vmul.f32 -1.442695, %v5482_v17  ;;  %v3712_v55 = vadd.f32 %v3696_v36, %v3624_v39  ;;  %v1598_v40 = vpop.f32.mrb[9].mxu1  ;;  %v3697_v56 = vpop.f32.mrb[10].mxu0 }
 0x228   : > { %v4007_v35 = vpop.eup %4006  ;;  %4018 = vpow2.f32 %v3411_v44  ;;  %v3713_v58 = vadd.f32 %v2690_v41, %v1598_v40  ;;  %v3625_v45 = vpop.f32.mrb[10].mxu1 }
 0x229   : > { %v2693_v37 = vpop.f32.mrb[11].mxu0  ;;  %v4009_v51 = vpop.eup %4008  ;;  %v2833_v5 = vadd.f32 1.0, %v4007_v35  ;;  %4020 = vpow2.f32 %v3409_v28  ;;  %v2754_v61 = vmul.f32 %v3712_v55, %v5442_v27  ;;  %v3714_v14 = vadd.f32 %v3697_v56, %v3625_v45 }
 0x22a   : > { %v1601_v59 = vpop.f32.mrb[11].mxu1  ;;  %v4011_v49 = vpop.eup %4010  ;;  %v2831_v20 = vadd.f32 1.0, %v4009_v51  ;;  %v2752_v48 = vmul.f32 %v3713_v58, %v5442_v27 }
 0x22b   : > { %v3715_v53 = vadd.f32 %v2693_v37, %v1601_v59  ;;  %v4013_v23 = vpop.eup %4012  ;;  %4022 = vrcp.f32 %v2833_v5  ;;  %v2834_v13 = vadd.f32 1.0, %v4011_v49  ;;  %v5489_v2 = vadd.f32 %v5444_v46, %v2754_v61 }
 0x22c   : > { %v2755_v54 = vmul.f32 %v3714_v14, %v5442_v27  ;;  %4024 = vrcp.f32 %v2831_v20  ;;  %v2832_v12 = vadd.f32 1.0, %v4013_v23  ;;  %v5493_v30 = vadd.f32 %v5444_v46, %v2752_v48 }
 0x22d   : > { %v2753_v52 = vmul.f32 %v3715_v53, %v5442_v27  ;;  %4026 = vrcp.f32 %v2834_v13  ;;  %v3414_v43 = vmul.f32 -1.442695, %v5489_v2  ;;  %v3700_v4 = vpop.f32.mrb[12].mxu0 }
 0x22e   : > { %v5498_v21 = vadd.f32 %v5444_v46, %v2755_v54  ;;  %4028 = vrcp.f32 %v2832_v12  ;;  %v3412_v24 = vmul.f32 -1.442695, %v5493_v30  ;;  %v3628_v57 = vpop.f32.mrb[12].mxu1  ;;  %v2706_v16 = vpop.f32.mrb[13].mxu0 }
 0x22f   : > { %v5502_v34 = vadd.f32 %v5444_v46, %v2753_v52  ;;  %4030 = vpow2.f32 %v3414_v43  ;;  %v3716_v19 = vadd.f32 %v3700_v4, %v3628_v57  ;;  %v1614_v63 = vpop.f32.mrb[13].mxu1  ;;  %v3701_v11 = vpop.f32.mrb[14].mxu0 }
 0x230   : > { %v3415_v42 = vmul.f32 -1.442695, %v5498_v21  ;;  %v4015_v29 = vpop.eup %4014  ;;  %4032 = vpow2.f32 %v3412_v24  ;;  %v3717_v8 = vadd.f32 %v2706_v16, %v1614_v63  ;;  %v3629_v47 = vpop.f32.mrb[14].mxu1 }
 0x231   : > { %v3413_v6 = vmul.f32 -1.442695, %v5502_v34  ;;  %v2709_v26 = vpop.f32.mrb[15].mxu0  ;;  %v4017_v33 = vpop.eup %4016  ;;  %v2837_v31 = vadd.f32 1.0, %v4015_v29  ;;  %v2758_v0 = vmul.f32 %v3716_v19, %v5442_v27  ;;  %v3718_v10 = vadd.f32 %v3701_v11, %v3629_v47 }
 0x232   : > { %4034 = vpow2.f32 %v3415_v42  ;;  %v1617_v7 = vpop.f32.mrb[15].mxu1  ;;  %v4019_v60 = vpop.eup %4018  ;;  %v2835_v32 = vadd.f32 1.0, %v4017_v33  ;;  %v2756_v22 = vmul.f32 %v3717_v8, %v5442_v27 }
 0x233   : > { %4036 = vpow2.f32 %v3413_v6  ;;  %v3719_v38 = vadd.f32 %v2709_v26, %v1617_v7  ;;  %v4021_v1 = vpop.eup %4020  ;;  %v2838_v36 = vadd.f32 1.0, %v4019_v60  ;;  %v5510_v44 = vadd.f32 %v5444_v46, %v2758_v0 }
 0x234   : > { %4038 = vrcp.f32 %v2837_v31  ;;  %v2759_v39 = vmul.f32 %v3718_v10, %v5442_v27  ;;  %v2836_v41 = vadd.f32 1.0, %v4021_v1  ;;  %v5516_v28 = vadd.f32 %v5444_v46, %v2756_v22 }
 0x235   : > { %4040 = vrcp.f32 %v2835_v32  ;;  %v2757_v55 = vmul.f32 %v3719_v38, %v5442_v27  ;;  %v4023_v40 = vpop.eup %4022  ;;  %v3418_v56 = vmul.f32 -1.442695, %v5510_v44 }
 0x236   : > { %4042 = vrcp.f32 %v2838_v36  ;;  %v5521_v35 = vadd.f32 %v5444_v46, %v2759_v39  ;;  %v4025_v58 = vpop.eup %4024  ;;  %v2881_v45 = vmul.f32 %v4023_v40, %v5449_v62  ;;  %v3416_v37 = vmul.f32 -1.442695, %v5516_v28 }
 0x237   : > { %4044 = vrcp.f32 %v2836_v41  ;;  %v5526_v51 = vadd.f32 %v5444_v46, %v2757_v55  ;;  %v4027_v5 = vpop.eup %4026  ;;  %v2879_v27 = vmul.f32 %v4025_v58, %v5453_v25 }
 0x238   : > { %4046 = vpow2.f32 %v3418_v56  ;;  %v3419_v61 = vmul.f32 -1.442695, %v5521_v35  ;;  %v4029_v14 = vpop.eup %4028  ;;  %v3445_v59 = vpack.c.bf16 %v2881_v45, %v2881_v45  ;;  %v2882_v49 = vmul.f32 %v4027_v5, %v5458_v9 }
 0x239   : > { %4048 = vpow2.f32 %v3416_v37  ;;  %v3417_v62 = vmul.f32 -1.442695, %v5526_v51  ;;  %v4031_v20 = vpop.eup %4030  ;;  %v3443_v48 = vpack.c.bf16 %v2879_v27, %v2879_v27  ;;  %v2880_v53 = vmul.f32 %v4029_v14, %v5462_v15 }
 0x23a   : > { %4050 = vpow2.f32 %v3419_v61  ;;  %v4033_v46 = vpop.eup %4032  ;;  %2962 = vst.msk [vmem:[%s5533_s26 + $0x8] sm:$0xf] %vm2959_vm8, %v3445_v59  ;;  %v3446_v25 = vpack.c.bf16 %v2882_v49, %v2882_v49  ;;  %v2841_v23 = vadd.f32 1.0, %v4031_v20 }
 0x23b   : > { %4052 = vpow2.f32 %v3417_v62  ;;  %2960 = vst.msk [vmem:[%s5533_s26] sm:$0xf] %vm2959_vm8, %v3443_v48  ;;  %v3444_v13 = vpack.c.bf16 %v2880_v53, %v2880_v53  ;;  %v2839_v54 = vadd.f32 1.0, %v4033_v46 }
 0x23c   : > { %v4035_v9 = vpop.eup %4034  ;;  %2963 = vst.msk [vmem:[%s5533_s26 + $0xc] sm:$0xf] %vm2959_vm8, %v3446_v25  ;;  %4054 = vrcp.f32 %v2841_v23 }
 0x23d   : > { %v4037_v12 = vpop.eup %4036  ;;  %v2842_v15 = vadd.f32 1.0, %v4035_v9  ;;  %2961 = vst.msk [vmem:[%s5533_s26 + $0x4] sm:$0xf] %vm2959_vm8, %v3444_v13  ;;  %4056 = vrcp.f32 %v2839_v54 }
 0x23e   : > { %v4039_v52 = vpop.eup %4038  ;;  %v2840_v43 = vadd.f32 1.0, %v4037_v12 }
 0x23f   : > { %v4041_v4 = vpop.eup %4040  ;;  %v2885_v24 = vmul.f32 %v4039_v52, %v5469_v50  ;;  %4058 = vrcp.f32 %v2842_v15 }
 0x240   : > { %v4043_v57 = vpop.eup %4042  ;;  %v2883_v16 = vmul.f32 %v4041_v4, %v5473_v18  ;;  %4060 = vrcp.f32 %v2840_v43 }
 0x241   : > { %v4045_v42 = vpop.eup %4044  ;;  %v3449_v19 = vpack.c.bf16 %v2885_v24, %v2885_v24  ;;  %v2886_v63 = vmul.f32 %v4043_v57, %v5478_v3 }
 0x242   : > { %v4047_v11 = vpop.eup %4046  ;;  %v3447_v29 = vpack.c.bf16 %v2883_v16, %v2883_v16  ;;  %v2884_v6 = vmul.f32 %v4045_v42, %v5482_v17 }
 0x243   : > { %v4049_v8 = vpop.eup %4048  ;;  %2966 = vst.msk [vmem:[%s5533_s26 + $0x18] sm:$0xf] %vm2959_vm8, %v3449_v19  ;;  %v3450_v50 = vpack.c.bf16 %v2886_v63, %v2886_v63  ;;  %v2845_v47 = vadd.f32 1.0, %v4047_v11 }
 0x244   : > { %v4051_v26 = vpop.eup %4050  ;;  %2964 = vst.msk [vmem:[%s5533_s26 + $0x10] sm:$0xf] %vm2959_vm8, %v3447_v29  ;;  %v3448_v18 = vpack.c.bf16 %v2884_v6, %v2884_v6  ;;  %v2843_v33 = vadd.f32 1.0, %v4049_v8 }
 0x245   : > { %v4053_v31 = vpop.eup %4052  ;;  %2967 = vst.msk [vmem:[%s5533_s26 + $0x1c] sm:$0xf] %vm2959_vm8, %v3450_v50  ;;  %4062 = vrcp.f32 %v2845_v47  ;;  %v2846_v3 = vadd.f32 1.0, %v4051_v26 }
 0x246   : > { %2965 = vst.msk [vmem:[%s5533_s26 + $0x14] sm:$0xf] %vm2959_vm8, %v3448_v18  ;;  %4064 = vrcp.f32 %v2843_v33  ;;  %v2844_v17 = vadd.f32 1.0, %v4053_v31  ;;  %v4055_v0 = vpop.eup %4054 }
 0x247   : > { %4066 = vrcp.f32 %v2846_v3  ;;  %v4057_v10 = vpop.eup %4056  ;;  %v2889_v7 = vmul.f32 %v4055_v0, %v5489_v2 }
 0x248   : > { %4068 = vrcp.f32 %v2844_v17  ;;  %v2887_v32 = vmul.f32 %v4057_v10, %v5493_v30 }
 0x249   : > { %v4059_v60 = vpop.eup %4058  ;;  %v3453_v38 = vpack.c.bf16 %v2889_v7, %v2889_v7 }
 0x24a   : > { %v4061_v22 = vpop.eup %4060  ;;  %v2890_v1 = vmul.f32 %v4059_v60, %v5498_v21  ;;  %v3451_v36 = vpack.c.bf16 %v2887_v32, %v2887_v32 }
 0x24b   : > { %v2888_v39 = vmul.f32 %v4061_v22, %v5502_v34  ;;  %2970 = vst.msk [vmem:[%s5533_s26 + $0x28] sm:$0xf] %vm2959_vm8, %v3453_v38 }
 0x24c   : > { %v3454_v41 = vpack.c.bf16 %v2890_v1, %v2890_v1  ;;  %2968 = vst.msk [vmem:[%s5533_s26 + $0x20] sm:$0xf] %vm2959_vm8, %v3451_v36 }
 0x24d   : > { %v3452_v2 = vpack.c.bf16 %v2888_v39, %v2888_v39 }
 0x24e   : > { %2971 = vst.msk [vmem:[%s5533_s26 + $0x2c] sm:$0xf] %vm2959_vm8, %v3454_v41 }
 0x24f   : > { %v4063_v30 = vpop.eup %4062  ;;  %2969 = vst.msk [vmem:[%s5533_s26 + $0x24] sm:$0xf] %vm2959_vm8, %v3452_v2 }
 0x250   : > { %v4065_v21 = vpop.eup %4064  ;;  %v2893_v34 = vmul.f32 %v4063_v30, %v5510_v44 }
 0x251   : > { %v4067_v55 = vpop.eup %4066  ;;  %v2891_v40 = vmul.f32 %v4065_v21, %v5516_v28 }
 0x252   : > { %v4069_v56 = vpop.eup %4068  ;;  %v3457_v58 = vpack.c.bf16 %v2893_v34, %v2893_v34  ;;  %v2894_v45 = vmul.f32 %v4067_v55, %v5521_v35 }
 0x253   : > { %v3455_v37 = vpack.c.bf16 %v2891_v40, %v2891_v40  ;;  %v2892_v5 = vmul.f32 %v4069_v56, %v5526_v51 }
 0x254   : > { %2974 = vst.msk [vmem:[%s5533_s26 + $0x38] sm:$0xf] %vm2959_vm8, %v3457_v58  ;;  %v3458_v27 = vpack.c.bf16 %v2894_v45, %v2894_v45 }
 0x255   : > { %2972 = vst.msk [vmem:[%s5533_s26 + $0x30] sm:$0xf] %vm2959_vm8, %v3455_v37  ;;  %v3456_v44 = vpack.c.bf16 %v2892_v5, %v2892_v5 }
 0x256   : > { %2975 = vst.msk [vmem:[%s5533_s26 + $0x3c] sm:$0xf] %vm2959_vm8, %v3458_v27 }
 0x257   : > { %2973 = vst.msk [vmem:[%s5533_s26 + $0x34] sm:$0xf] %vm2959_vm8, %v3456_v44 }
 0x258   : > { %4198 = shalt.err (!%p4195_p12)
}
 0x259   : > { %s4199_s28 = scalar_lea.hbm %s5579_s14, 1024  ;;  %s4203_s27 = scalar_lea.hbm %s5715_s11, 4096 }
 0x25a   : > { %p4200_p4 = scmp.ne.s32.totalorder %s5579_s14, %s4199_s28  ;;  %p4204_p0 = scmp.lt.u32.totalorder %s5579_s14, %s5715_s11 }
 0x25b   : > { %p4205_p1 = scmp.lt.u32.totalorder %s4203_s27, %s4199_s28  ;;  %p4207_p10 = scmp.lt.u32.totalorder %s4199_s28, %s5579_s14 }
 0x25c   : > { %p4201_p7 = pnand %p4200_p4, %p5716_p2 }
 0x25d   : > { %p4206_p11 = por %p4205_p1, %p4204_p0 }
 0x25e   : > { %p4202_p3 = pneg %p4201_p7 }
 0x25f   : > { %p4208_p9 = por %p4207_p10, %p4206_p11 }
 0x261   : > { %p4209_p5 = pnand %p4208_p9, %p4202_p3 }
 0x263   : > { %4212 = shalt.err (!%p4209_p5)
}
 0x264   : > { %s4324_s21 = smov 64   ;;  %s4325_s18 = smov 4  }
 0x265   : > { %3859 = dma.vmem_to_hbm [thread:$0]  (%p5716_p2), %s5581_s12, 1024, %s5579_s14, %s5591_s13, %s4324_s21, %s4324_s21, %s4325_s18  }
 0x266 PF: > { %s5717_s1 = sld [smem:[#allocation15_spill]]  ;;  %s5718_s29 = sld [smem:[#allocation18_spill]] }
 0x267   : > { %p3886_p13 = scmp.ge.s32.totalorder %s4315_s25, 2 }
 0x26c   : > { %s3007_s2 = sand.u32 1, %s5717_s1   ;;  %p5719_p6 = scmp.ne.s32.totalorder %s5718_s29, 0 }
 0x26d   : > { %s3008_s7 = scalar_lea.sflag [#allocation4], %s3007_s2 }
 0x26e   : > { %p3876_p8 = pnand %p3886_p13, %p5719_p6 }
 0x270   : > { %4270 = dma.done.wait (!%p3876_p8), %s3008_s7, 1024  }
 0x271   : > { %4272 = vsyncadd (!%p3876_p8), %s3008_s7, 4294966272  ;;  %s22_s25 = sadd.s32 1, %s4315_s25   ;;  %s5720_s30 = smov %s4553_s15 }
 0x272   : > { %p19_p12 = scmp.ge.s32.totalorder %s22_s25, 6   ;;  %s5721_s15 = smov %s4279_s16 }
 0x273   : > { %s5722_s16 = smov %s4283_s17  ;;  %s5723_s17 = smov %s5720_s30 }
 0x274   : > { %s5724_s18 = smov %s4291_s19  ;;  %s5725_s19 = smov %s4295_s20 }
 0x275   : > { %s5726_s20 = smov %s4548_s4  ;;  %s5727_s21 = smov %s4307_s23 }
 0x276   : > { %s5728_s22 = smov %s4311_s24  ;;  %s5729_s23 = smov %s5732_s6 }
 0x277   : > { %s5730_s24 = smov %s5736_s5  ;;  %21 = sbr.rel (!%p19_p12) target bundleno = 15 (0xf), region = 104 }
 0x27e   :  { %3013 = vsyncpa [#allocation3], 1 }
 0x27f   :  { %3015 = vsyncpa [#allocation3 + $0x1], 1 }
 0x280   :  { %3016 = vsyncpa [#allocation6], 1 }
 0x281   :  { %3017 = vsyncpa [#allocation9], 1 }
 0x282   :  { %3018 = vsyncpa [#allocation4], 1 }
 0x283   :  { %3020 = vsyncpa [#allocation4 + $0x1], 1 }

// kernel: c2f_dysnakeconv_forward.16
= control target key start
LH: loop header
LB: loop body
LE: loop exit
PB: predicated region body
PF: predicated region fallthrough
CT: control target
= control target key end

     0   :  { %s5348_s0 = inlined_call_operand.hbm [shape: bf16[2,18,18,8], index: 0, kind: input, shape index: {}]   ;;  %s5349_s1 = inlined_call_operand.hbm [shape: bf16[9,8,6], index: 1, kind: input, shape index: {}]   ;;  %s5350_s2 = inlined_call_operand.hbm [shape: f32[1,6], index: 2, kind: input, shape index: {}]   ;;  %s5351_s3 = inlined_call_operand.hbm [shape: f32[1,6], index: 3, kind: input, shape index: {}]   ;;  %s5352_s4 = inlined_call_operand.hbm [shape: f32[2,256,6], index: 4, kind: output, shape index: {}]  }
   0x1   :  { %5369 = sst [smem:[#allocation22_spill]] %s5349_s1 }
   0x2   :  { %5370 = sst [smem:[#allocation23_spill]] %s5350_s2 }
   0x3   :  { %5371 = sst [smem:[#allocation24_spill]] %s5352_s4 }
   0x4   :  { %9 = vsyncpa [#allocation3], 0 }
   0x5   :  { %11 = vsyncpa [#allocation3 + $0x1], 0 }
   0x6   :  { %12 = vsyncpa [#allocation6], 0 }
   0x7   :  { %13 = vsyncpa [#allocation9], 0 }
   0x8   :  { %14 = vsyncpa [#allocation4], 0 }
   0x9   :  { %16 = vsyncpa [#allocation4 + $0x1], 0  ;;  %s4111_s15 = smov 0   ;;  %s4113_s16 = smov 0  }
   0xa   :  { %s4115_s17 = smov 0   ;;  %s4117_s18 = smov 0  }
   0xb   :  { %s4119_s19 = smov 0   ;;  %s4121_s20 = smov 0  }
   0xc   :  { %s4123_s21 = smov 0   ;;  %s4125_s22 = smov 0  }
   0xd   :  { %s4127_s23 = smov 0   ;;  %s4129_s24 = smov 0  }
   0xe   :  { %s4131_s25 = smov 0  }
   0xf LB: > { %5372 = sst [smem:[#allocation15_spill]] %s4035_s15  ;;  %s2958_s26 = sadd.s32 4294967295, %s4075_s25   ;;  %s4075_s25 = sphi %s4131_s25, %s22_s25   ;;  %s4071_s24 = sphi %s4129_s24, %s5426_s24   ;;  %s4067_s23 = sphi %s4127_s23, %s5425_s23   ;;  %s4063_s22 = sphi %s4125_s22, %s5424_s22   ;;  %s4059_s21 = sphi %s4123_s21, %s5423_s21   ;;  %s4055_s20 = sphi %s4121_s20, %s5422_s20   ;;  %s4051_s19 = sphi %s4119_s19, %s5421_s19   ;;  %s4047_s18 = sphi %s4117_s18, %s5420_s18   ;;  %s4043_s17 = sphi %s4115_s17, %s5419_s17   ;;  %s4039_s16 = sphi %s4113_s16, %s5418_s16   ;;  %s4035_s15 = sphi %s4111_s15, %s5417_s15  }
  0x10   : > { %5373 = sst [smem:[#allocation16_spill]] %s4063_s22  ;;  %s2959_s27 = sadd.s32 4294967294, %s4075_s25  }
  0x11   : > { %p54_p0 = scmp.ne.s32.totalorder %s4051_s19, %s4047_s18  ;;  %p4167_p1 = scmp.eq.s32.totalorder %s2958_s26, 0 }
  0x12   : > { %p142_p2 = scmp.ne.s32.totalorder %s4043_s17, %s4039_s16  ;;  %p143_p4 = scmp.eq.s32.totalorder %s2958_s26, 3 }
  0x13   : > { %s5374_s28 = scalar_select %p4167_p1, 1, 0 }
  0x14   : > { %p4176_p3 = por %p4167_p1, %p54_p0  ;;  %p148_p5 = scmp.ne.s32.totalorder %s4039_s16, %s4035_s15 }
  0x15   : > { %p149_p6 = scmp.eq.s32.totalorder %s2959_s27, 3  ;;  %p4182_p7 = por %p143_p4, %p142_p2 }
  0x16   : > { %s5375_s30 = scalar_select %p4176_p3, 1, 0 }
  0x17   : > { %s5376_s5 = scalar_select %p4182_p7, 1, 0 }
  0x18   : > { %p2960_p8 = scmp.ge.s32.totalorder %s4075_s25, 1  ;;  %p4187_p9 = por %p149_p6, %p148_p5 }
  0x19   : > { %5377 = sst [smem:[#allocation17_spill]] %s5376_s5  ;;  %p156_p10 = scmp.lt.s32.totalorder %s4075_s25, 5 }
  0x1a   : > { %s5378_s6 = scalar_select %p4187_p9, 1, 0 }
  0x1b   : > { %p4192_p11 = pnand %p2960_p8, %p156_p10  ;;  %s4077_s8 = smov [#allocation5]  }
  0x1c   : > { %5379 = sst [smem:[#allocation18_spill]] %s5378_s6  ;;  %s168_s9 = sshll.u32 %s4077_s8, 4  ;;  %s4196_s9 = int_to_ptr.vmem [resolvable:$true] %s168_s9 }
  0x1d   : > { %s5380_s7 = scalar_select %p4192_p11, 1, 0 }
  0x1e   : > { %p3653_p12 = pneg %p4192_p11  ;;  %s4078_s11 = smov [#allocation7]  }
  0x1f   : > { %s182_s12 = sshll.u32 %s4078_s11, 4  ;;  %s4079_s13 = smov [#allocation8]   ;;  %s4206_s12 = int_to_ptr.vmem [resolvable:$true] %s182_s12 }
  0x20   : > { %p4202_p13 = pnand %p3653_p12, %p4167_p1  ;;  %s4208_s14 = sshll.u32 %s4079_s13, 4  ;;  %s194_s14 = int_to_ptr.vmem [resolvable:$true] %s4208_s14 }
  0x21   : > { %s5382_s1 = sld [smem:[#allocation22_spill]] }
  0x22   : > { %p4218_p2 = pneg %p4202_p13 }
  0x27   : > { %s3831_s27 = scalar_lea.hbm %s5382_s1, 576 }
  0x28   : > { %p3832_p0 = scmp.ne.s32.totalorder %s5382_s1, %s3831_s27  ;;  %p3838_p6 = scmp.lt.u32.totalorder %s3831_s27, %s5382_s1 }
  0x2a   : > { %p3834_p4 = pnand %p4218_p2, %p3832_p0 }
  0x2c   : > { %p3835_p5 = pneg %p3834_p4 }
  0x2e   : > { %p3840_p8 = pnand %p3838_p6, %p3835_p5 }
  0x30   : > { %3843 = shalt.err (!%p3840_p8)
}
  0x31   : > { %s3844_s29 = scalar_lea.vmem %s4196_s9, 576  ;;  %p3852_p7 = scmp.lt.s32.totalorder %s4196_s9, %s4196_s9 }
  0x32   : > { %p3845_p10 = scmp.ne.s32.totalorder %s4196_s9, %s3844_s29  ;;  %p3853_p1 = scmp.lt.s32.totalorder %s3844_s29, %s3844_s29 }
  0x34   : > { %p3847_p12 = pnand %p3845_p10, %p4218_p2  ;;  %p3854_p0 = por %p3853_p1, %p3852_p7 }
  0x36   : > { %p3848_p9 = pneg %p3847_p12 }
  0x38   : > { %p3855_p4 = pnand %p3854_p0, %p3848_p9 }
  0x3a   : > { %3858 = shalt.err (!%p3855_p4)
}
  0x3b   : > { %s5363_s18 = smov 64   ;;  %s5364_s26 = smov 4  }
  0x3c   : > { %3656 = dma.hbm_to_vmem [thread:$0]  (!%p4202_p13), %s5382_s1, 576, %s4196_s9, [#allocation6], %s5363_s18, %s5363_s18, %s5364_s26  }
  0x3d   : > { %s5384_s2 = sld [smem:[#allocation23_spill]] }
  0x43   : > { %s3859_s29 = scalar_lea.hbm %s5384_s2, 16 }
  0x44   : > { %p3860_p1 = scmp.ne.s32.totalorder %s5384_s2, %s3859_s29  ;;  %p3866_p5 = scmp.lt.u32.totalorder %s3859_s29, %s5384_s2 }
  0x46   : > { %p3862_p7 = pnand %p3860_p1, %p4218_p2 }
  0x48   : > { %p3863_p9 = pneg %p3862_p7 }
  0x4a   : > { %p3868_p6 = pnand %p3866_p5, %p3863_p9 }
  0x4c   : > { %3871 = shalt.err (!%p3868_p6)
}
  0x4d   : > { %s3872_s9 = scalar_lea.vmem %s4206_s12, 16  ;;  %s3879_s4 = scalar_lea.vmem %s4206_s12, 32 }
  0x4e   : > { %p3873_p8 = scmp.ne.s32.totalorder %s4206_s12, %s3872_s9  ;;  %p3880_p0 = scmp.lt.s32.totalorder %s4206_s12, %s4206_s12 }
  0x4f   : > { %p3881_p4 = scmp.lt.s32.totalorder %s3879_s4, %s3872_s9 }
  0x50   : > { %p3875_p10 = pnand %p3873_p8, %p4218_p2 }
  0x51   : > { %p3882_p1 = por %p3881_p4, %p3880_p0 }
  0x52   : > { %p3876_p12 = pneg %p3875_p10 }
  0x54   : > { %p3883_p7 = pnand %p3882_p1, %p3876_p12 }
  0x56   : > { %3886 = shalt.err (!%p3883_p7)
}
  0x57   : > { %3659 = dma.hbm_to_vmem [thread:$0]  (!%p4202_p13), %s5384_s2, 16, %s4206_s12, [#allocation6]  }
  0x58   : > { %s3887_s8 = scalar_lea.hbm %s5351_s3, 16 }
  0x59   : > { %p3888_p9 = scmp.ne.s32.totalorder %s5351_s3, %s3887_s8  ;;  %p3894_p8 = scmp.lt.u32.totalorder %s3887_s8, %s5351_s3 }
  0x5b   : > { %p3890_p5 = pnand %p3888_p9, %p4218_p2 }
  0x5d   : > { %p3891_p6 = pneg %p3890_p5 }
  0x5f   : > { %p3896_p10 = pnand %p3894_p8, %p3891_p6 }
  0x61   : > { %3899 = shalt.err (!%p3896_p10)
}
  0x62   : > { %s3900_s4 = scalar_lea.vmem %s194_s14, 16  ;;  %s3907_s12 = scalar_lea.vmem %s194_s14, 32 }
  0x63   : > { %p3901_p12 = scmp.ne.s32.totalorder %s194_s14, %s3900_s4  ;;  %p3908_p1 = scmp.lt.s32.totalorder %s194_s14, %s194_s14 }
  0x64   : > { %p3909_p7 = scmp.lt.s32.totalorder %s3907_s12, %s3900_s4 }
  0x65   : > { %p3903_p0 = pnand %p3901_p12, %p4218_p2 }
  0x66   : > { %p3910_p3 = por %p3909_p7, %p3908_p1 }
  0x67   : > { %p3904_p4 = pneg %p3903_p0 }
  0x69   : > { %p3911_p11 = pnand %p3910_p3, %p3904_p4 }
  0x6b   : > { %3914 = shalt.err (!%p3911_p11)
}
  0x6c   : > { %3662 = dma.hbm_to_vmem [thread:$0]  (!%p4202_p13), %s5351_s3, 16, %s194_s14, [#allocation9]  }
  0x6d   : > { %s31_s6 = sadd.s32 1, %s4067_s23  ;;  %s34_s5 = sadd.s32 1, %s4071_s24 }
  0x6e   : > { %p32_p3 = scmp.ge.s32.totalorder %s31_s6, 2  ;;  %s41_s10 = sadd.s32 1, %s4055_s20 }
  0x6f   : > { %p48_p11 = scmp.ne.s32.totalorder %s4055_s20, %s4051_s19  ;;  %p49_p2 = scmp.eq.s32.totalorder %s4075_s25, 0 }
  0x70   : > { %s5428_s6 = smov (%p32_p3, %s31_s6), 0  ;;  %s5430_s5 = smov (!%p32_p3, %s34_s5), %s4071_s24 }
  0x71   : > { %s128_s27 = ssub.s32 %s4067_s23, %s5428_s6  ;;  %p36_p9 = scmp.ge.s32.totalorder %s5430_s5, 2 }
  0x72   : > { %p3674_p5 = scmp.lt.s32.totalorder %s4075_s25, 4  ;;  %p4297_p13 = por %p49_p2, %p48_p11 }
  0x73   : > { %s204_s8 = sand.u32 1, %s4055_s20   ;;  %s5432_s5 = smov (%p36_p9, %s5430_s5), 0 }
  0x74   : > { %s3634_s11 = smul.u32 216, %s204_s8  ;;  %s38_s13 = ssub.s32 %s4071_s24, %s5432_s5 }
  0x75   : > { %s3635_s29 = smul.u32 3456, %s4071_s24  ;;  %p39_p6 = scmp.eq.s32.totalorder %s38_s13, 0 }
  0x76   : > { %s129_s9 = sor.u32 %s128_s27, %s38_s13  ;;  %s5386_s12 = sadd.s32 1, %s4043_s17 }
  0x77   : > { %p130_p8 = scmp.eq.s32.totalorder %s129_s9, 0  ;;  %s4318_s26 = scalar_lea.hbm %s5348_s0, %s3635_s29 }
  0x78   : > { %s4308_s4 = scalar_select %p39_p6, %s4055_s20, %s41_s10  }
  0x79   : > { %s4313_s15 = scalar_select %p130_p8, %s4043_s17, %s5386_s12  }
  0x7a   : > { %s208_s1 = scalar_lea.vmem [#allocation2], %s3634_s11  ;;  %p4326_p10 = pnand %p3674_p5, %p4297_p13 }
  0x7b   : > { %s215_s2 = sshll.u32 %s208_s1, 4  ;;  %s4330_s27 = scalar_lea.sflag [#allocation3], %s204_s8  ;;  %s4320_s2 = int_to_ptr.vmem [resolvable:$true] %s215_s2 }
  0x7c   : > { %s3915_s18 = scalar_lea.hbm %s4318_s26, 3456  ;;  %p3917_p0 = pneg %p4326_p10 }
  0x7d   : > { %p3916_p12 = scmp.ne.s32.totalorder %s4318_s26, %s3915_s18  ;;  %s3920_s14 = scalar_lea.hbm %s5348_s0, 6912 }
  0x7e   : > { %p3921_p7 = scmp.lt.u32.totalorder %s4318_s26, %s5348_s0  ;;  %p3922_p3 = scmp.lt.u32.totalorder %s3920_s14, %s3915_s18 }
  0x7f   : > { %p3918_p4 = pnand %p3917_p0, %p3916_p12  ;;  %p3924_p2 = scmp.lt.u32.totalorder %s3915_s18, %s4318_s26 }
  0x80   : > { %p3923_p11 = por %p3922_p3, %p3921_p7 }
  0x81   : > { %p3919_p1 = pneg %p3918_p4 }
  0x82   : > { %p3925_p9 = por %p3924_p2, %p3923_p11 }
  0x84   : > { %p3926_p5 = pnand %p3925_p9, %p3919_p1 }
  0x86   : > { %3929 = shalt.err (!%p3926_p5)
}
  0x87   : > { %s3930_s8 = scalar_lea.vmem %s4320_s2, 3456  ;;  %s4082_s9 = smov [#allocation2]  }
  0x88   : > { %p3931_p13 = scmp.ne.s32.totalorder %s4320_s2, %s3930_s8  ;;  %s3935_s12 = sshll.u32 %s4082_s9, 4  ;;  %s3936_s12 = int_to_ptr.vmem [resolvable:$false] %s3935_s12 }
  0x89   : > { %s3937_s22 = scalar_lea.vmem %s3936_s12, 6912  ;;  %p3938_p12 = scmp.lt.s32.totalorder %s4320_s2, %s3936_s12 }
  0x8a   : > { %p3933_p6 = pnand %p3931_p13, %p3917_p0  ;;  %p3939_p4 = scmp.lt.s32.totalorder %s3937_s22, %s3930_s8 }
  0x8c   : > { %p3934_p8 = pneg %p3933_p6  ;;  %p3940_p7 = por %p3939_p4, %p3938_p12 }
  0x8e   : > { %p3941_p3 = pnand %p3940_p7, %p3934_p8 }
  0x90   : > { %3944 = shalt.err (!%p3941_p3)
}
  0x91   : > { %s5388_s18 = smov 4   ;;  %s5389_s1 = smov 64  }
  0x92   : > { %3666 = dma.hbm_to_vmem [thread:$0]  (!%p4326_p10), %s4318_s26, 3456, %s4320_s2, %s4330_s27, %s5389_s1, %s5389_s1, %s5388_s18  }
  0x93   : > { %p5390_p0 = scmp.ne.s32.totalorder %s5380_s7, 0 }
  0x95   : > { %227 = sbr.rel (%p5390_p0) target bundleno = 596 (0x254), region = 36 }
  0x9c   : > { %s229_s11 = sand.u32 1, %s4051_s19   ;;  %p5391_p1 = scmp.ne.s32.totalorder %s5375_s30, 0 }
  0x9d   : > { %s3636_s14 = smul.u32 216, %s229_s11  ;;  %s230_s13 = scalar_lea.sflag [#allocation3], %s229_s11 }
  0x9f   : > { %s233_s29 = scalar_lea.vmem [#allocation2], %s3636_s14 }
  0xa0   : > { %4018 = dma.done.wait (%p5391_p1), %s230_s13, 3456  }
  0xa1   : > { %4020 = vsyncadd (%p5391_p1), %s230_s13, 4294963840  ;;  %p5392_p11 = scmp.ne.s32.totalorder %s5374_s28, 0 }
  0xa3   : > { %4022 = dma.done.wait (%p5392_p11), [#allocation6], 592  }
  0xa4   : > { %4024 = vsyncadd (%p5392_p11), [#allocation6], 4294966704 }
  0xa5   : > { %4026 = dma.done.wait (%p5392_p11), [#allocation9], 16  }
  0xa6   : > { %4028 = vsyncadd (%p5392_p11), [#allocation9], 4294967280  ;;  %s3250_s2 = smul.u32 96, %s4059_s21  ;;  %vm547_vm0 = vcmask 1043456   ;;  %vm301_vm1 = vsmask.f32 3328 }
  0xa7   : > { %vm302_vm2 = vsmask.f32 7440  ;;  %v497_v0 = vld [vmem:[#allocation5 + $0x4] sm:$0xf]  ;;  %v1480_v1 = vld [vmem:[#allocation5 + $0x10] sm:$0xf] }
  0xa8   : > { %s4377_s7 = scalar_lea.vmem %s233_s29, %s3250_s2 [#allocation2]  ;;  %3624 = vmatprep.subr.msk.bf16.mxu1 %vm547_vm0, %v497_v0  ;;  %3628 = vmatprep.subr.msk.bf16.mxu0 %vm547_vm0, %v1480_v1  ;;  %v549_v3 = vsel %vm547_vm0, %v497_v0, 0  ;;  %v4386_v4 = vsel %vm547_vm0, %v1480_v1, 0  ;;  %v292_v11 = vld [vmem:[#allocation5] sm:$0xf]  ;;  %v4409_v24 = vld [vmem:[#allocation5 + $0x14] sm:$0xf]  ;;  %vm4420_vm3 = vmor %vm301_vm1, %vm302_vm2 }
  0xa9   : > { %v4380_v2 = vld [vmem:[%s4377_s7] sm:$0xf]  ;;  %v4389_v5 = vld [vmem:[%s4377_s7 + $0x4] sm:$0xf]  ;;  %v4392_v6 = vld [vmem:[%s4377_s7 + $0x8] sm:$0x1]  ;;  %3333 = vmatpush3.bf16.msra.mxu1 %v549_v3  ;;  %3405 = vmatpush3.bf16.msra.mxu0 %v4386_v4 }
  0xaa   : > { %v305_v7 = vshrl.u32 %v4380_v2, 16  ;;  %v308_v8 = vshll.u32 %v4380_v2, 16  ;;  %v314_v9 = vshll.u32 %v4389_v5, 16  ;;  %v318_v10 = vshrl.u32 %v4389_v5, 16  ;;  %3625 = vmatprep.subr.msk.bf16.mxu1 %vm547_vm0, %v292_v11  ;;  %v3064_v13 = vld [vmem:[%s4377_s7 + $0xc] sm:$0xf]  ;;  %3630 = vmatprep.subr.msk.bf16.mxu0 %vm547_vm0, %v4409_v24 }
  0xab   : > { %v324_v12 = vshll.u32 %v4392_v6, 16  ;;  %v4403_v14 = vld [vmem:[%s4377_s7 + $0x10] sm:$0xf]  ;;  %v4406_v19 = vld [vmem:[%s4377_s7 + $0x14] sm:$0x1]  ;;  %v1288_v21 = vshrl.u32 %v3064_v13, 16 }
  0xac   : > { %v307_v15 = vrot.slane %v305_v7, 4  ;;  %v310_v16 = vrot.slane %v308_v8, 5  ;;  %v316_v17 = vrot.slane %v314_v9, 5  ;;  %v320_v18 = vrot.slane %v318_v10, 4  ;;  %v4416_v29 = vld [vmem:[%s4377_s7 + $0xc] sm:$0xf] }
  0xad   : > { %v326_v20 = vrot.slane %v324_v12, 5  ;;  %v1291_v22 = vshll.u32 %v3064_v13, 16  ;;  %v1297_v23 = vshll.u32 %v4403_v14, 16  ;;  %v1301_v27 = vshrl.u32 %v4403_v14, 16  ;;  %v4425_v34 = vld [vmem:[%s4377_s7 + $0x10] sm:$0xf] }
  0xae   : > { %v311_v25 = vor.u32 %v310_v16, %v307_v15  ;;  %v321_v26 = vor.u32 %v320_v18, %v316_v17  ;;  %v1307_v28 = vshll.u32 %v4406_v19, 16  ;;  %v1290_v31 = vrot.slane %v1288_v21, 4  ;;  %v4428_v40 = vld [vmem:[%s4377_s7 + $0x14] sm:$0x1]  ;;  %v3067_v55 = vld [vmem:[%s4377_s7 + $0x18] sm:$0xf] }
  0xaf   : > { %v1293_v32 = vrot.slane %v1291_v22, 5  ;;  %v1299_v33 = vrot.slane %v1297_v23, 5  ;;  %vm522_vm4 = vcmask 64512   ;;  %v1303_v37 = vrot.slane %v1301_v27, 4  ;;  %v4446_v60 = vld [vmem:[%s4377_s7 + $0x1c] sm:$0xf] }
  0xb0   : > { %v312_v35 = vrot.slane %v311_v25, 4  ;;  %v322_v36 = vrot.slane %v321_v26, 4  ;;  %v1309_v39 = vrot.slane %v1307_v28, 5  ;;  %v329_v41 = vshrl.u32 %v4416_v29, 16  ;;  %v4449_v61 = vld [vmem:[%s4377_s7 + $0x20] sm:$0x1] }
  0xb1   : > { %v1294_v38 = vor.u32 %v1293_v32, %v1290_v31  ;;  %v332_v42 = vshll.u32 %v4416_v29, 16  ;;  %v1304_v45 = vor.u32 %v1303_v37, %v1299_v33  ;;  %v338_v46 = vshll.u32 %v4425_v34, 16  ;;  %v4465_v26 = vld [vmem:[%s4377_s7 + $0x1c] sm:$0xf]  ;;  %s267_s28 = sand.u32 1, %s4039_s16   ;;  %s5409_s10 = sld [smem:[#allocation16_spill]] }
  0xb2   : > { %v317_v43 = vsel %vm4420_vm3, %v312_v35, %v316_v17  ;;  %v327_v44 = vsel %vm4420_vm3, %v322_v36, %v326_v20  ;;  %v331_v49 = vrot.slane %v329_v41, 4  ;;  %v342_v53 = vshrl.u32 %v4425_v34, 16  ;;  %v4462_v20 = vld [vmem:[%s4377_s7 + $0x18] sm:$0xf]  ;;  %s2970_s30 = sshll.u32 %s267_s28, 7  ;;  %s3245_s27 = sshll.u32 %s4059_s21, 4 }
  0xb3   : > { %v2974_v47 = vcombine.low %v317_v43, %v327_v44  ;;  %v1295_v48 = vrot.slane %v1294_v38, 4  ;;  %v334_v50 = vrot.slane %v332_v42, 5  ;;  %v1305_v51 = vrot.slane %v1304_v45, 4  ;;  %s5225_s26 = scalar_lea.vmem [#allocation10], %s2970_s30  ;;  %s5410_s12 = sld [smem:[#allocation17_spill]] }
  0xb4   : > { %v340_v52 = vrot.slane %v338_v46, 5  ;;  %v348_v54 = vshll.u32 %v4428_v40, 16  ;;  %v1679_v57 = vrot.slane %v4403_v14, 5  ;;  %v1682_v58 = vrot.slane %v4406_v19, 5  ;;  %s2832_s22 = sshll.u32 %s5225_s26, 4  ;;  %s5411_s11 = sld [smem:[#allocation24_spill]]  ;;  %s5277_s22 = int_to_ptr.vmem [resolvable:$true] %s2832_s22 }
  0xb5   : > { %3334 = vmatprep.mubr.msk.bf16.mxu1 %vm522_vm4, %v2974_v47  ;;  %v1300_v56 = vsel %vm4420_vm3, %v1295_v48, %v1299_v33  ;;  %v335_v59 = vor.u32 %v334_v50, %v331_v49  ;;  %v1310_v62 = vsel %vm4420_vm3, %v1305_v51, %v1309_v39  ;;  %v344_v63 = vrot.slane %v342_v53, 4  ;;  %v4475_v33 = vld [vmem:[%s4377_s7 + $0x20] sm:$0x1]  ;;  %v3070_v39 = vld [vmem:[%s4377_s7 + $0x24] sm:$0xf]  ;;  %s5287_s13 = scalar_lea.sflag [#allocation4], %s267_s28 }
  0xb6   : > { %v350_v0 = vrot.slane %v348_v54, 5  ;;  %v713_v1 = vsel %vm547_vm0, %v292_v11, 0  ;;  %v3088_v3 = vcombine.low %v1300_v56, %v1310_v62  ;;  %v1312_v8 = vshrl.u32 %v3067_v55, 16  ;;  %v4486_v48 = vld [vmem:[%s4377_s7 + $0x28] sm:$0xf]  ;;  %s3945_s29 = scalar_lea.vmem %s5277_s22, 2048 }
  0xb7   : > { %v336_v7 = vrot.slane %v335_v59, 4  ;;  %v1315_v9 = vshll.u32 %v3067_v55, 16  ;;  %v345_v10 = vor.u32 %v344_v63, %v340_v52  ;;  %v1321_v12 = vshll.u32 %v4446_v60, 16  ;;  %v4497_v62 = vld [vmem:[%s4377_s7 + $0x24] sm:$0xf]  ;;  %s3246_s8 = sshll.u32 %s5409_s10, 5  ;;  %p3946_p10 = scmp.ne.s32.totalorder %s5277_s22, %s3945_s29 }
  0xb8   : > { %v1325_v13 = vshrl.u32 %v4446_v60, 16  ;;  %v1331_v15 = vshll.u32 %v4449_v61, 16  ;;  %3406 = vmatprep.mubr.msk.bf16.mxu0 %vm522_vm4, %v3088_v3  ;;  %v1314_v17 = vrot.slane %v1312_v8, 4  ;;  %v1686_v18 = vrot.slane %v4446_v60, 5  ;;  %v4501_v8 = vld [vmem:[%s4377_s7 + $0x28] sm:$0xf]  ;;  %s2829_s9 = sadd.s32 %s3246_s8, %s3245_s27 }
  0xb9   : > { %v341_v16 = vsel %vm4420_vm3, %v336_v7, %v340_v52  ;;  %v1317_v11 = vrot.slane %v1315_v9, 5  ;;  %v346_v21 = vrot.slane %v345_v10, 4  ;;  %v1323_v22 = vrot.slane %v1321_v12, 5  ;;  %v4492_v52 = vld [vmem:[%s4377_s7 + $0x2c] sm:$0x1]  ;;  %s3247_s21 = sshll.u32 %s2829_s9, 7 }
  0xba   : > { %v1327_v23 = vrot.slane %v1325_v13, 4  ;;  %v1333_v25 = vrot.slane %v1331_v15, 5  ;;  %v4469_v28 = vrot.slane %v1686_v18, 4  ;;  %v1689_v31 = vrot.slane %v4449_v61, 5  ;;  %v4505_v13 = vld [vmem:[#allocation5 + $0x18] sm:$0xf]  ;;  %s5275_s14 = scalar_lea.hbm %s5411_s11, %s3247_s21 }
  0xbb   : > { %v1318_v27 = vor.u32 %v1317_v11, %v1314_v17  ;;  %v1784_v32 = vsel %vm547_vm0, %v4409_v24, 0  ;;  %v351_v35 = vsel %vm4420_vm3, %v346_v21, %v350_v0  ;;  %v353_v37 = vshrl.u32 %v4462_v20, 16  ;;  %p5412_p2 = scmp.ne.s32.totalorder %s5410_s12, 0  ;;  %s4083_s2 = smov [#allocation10]  }
  0xbc   : > { %v1328_v36 = vor.u32 %v1327_v23, %v1323_v22  ;;  %v356_v38 = vshll.u32 %v4462_v20, 16  ;;  %v2975_v41 = vcombine.low %v341_v16, %v351_v35  ;;  %v362_v43 = vshll.u32 %v4465_v26, 16  ;;  %v3073_v35 = vld [vmem:[%s4377_s7 + $0x30] sm:$0xf] }
  0xbd   : > { %v1319_v42 = vrot.slane %v1318_v27, 4  ;;  %v366_v44 = vshrl.u32 %v4465_v26, 16  ;;  %v355_v24 = vrot.slane %v353_v37, 4  ;;  %v372_v47 = vshll.u32 %v4475_v33, 16  ;;  %v4513_v27 = vld [vmem:[%s4377_s7 + $0x2c] sm:$0x1]  ;;  %p3947_p9 = pnand %p3946_p10, %p5412_p2 }
  0xbe   : > { %v1329_v45 = vrot.slane %v1328_v36, 4  ;;  %v358_v46 = vrot.slane %v356_v38, 5  ;;  %3335 = vmatmul.mubr.msk.bf16.vlgmr.msra.gmra.mrb[0].mxu1 %vm522_vm4, %v2975_v41  ;;  %v364_v50 = vrot.slane %v362_v43, 5  ;;  %v1336_v53 = vshrl.u32 %v3070_v39, 16 }
  0xbf   : > { %v1324_v49 = vsel %vm4420_vm3, %v1319_v42, %v1323_v22  ;;  %v368_v51 = vrot.slane %v366_v44, 4  ;;  %3351 = vmatpush3.bf16.msra.mxu1 %v713_v1  ;;  %v374_v56 = vrot.slane %v372_v47, 5  ;;  %v1339_v59 = vshll.u32 %v3070_v39, 16  ;;  %v4523_v44 = vld [vmem:[%s4377_s7 + $0x34] sm:$0xf]  ;;  %p3948_p5 = pneg %p3947_p9 }
  0xc0   : > { %v1334_v54 = vsel %vm4420_vm3, %v1329_v45, %v1333_v25  ;;  %v359_v55 = vor.u32 %v358_v46, %v355_v24  ;;  %v1338_v3 = vrot.slane %v1336_v53, 4  ;;  %v1345_v7 = vshll.u32 %v4486_v48, 16  ;;  %v4527_v47 = vld [vmem:[%s4377_s7 + $0x38] sm:$0x1] }
  0xc1   : > { %v3089_v63 = vcombine.low %v1324_v49, %v1334_v54  ;;  %v369_v0 = vor.u32 %v368_v51, %v364_v50  ;;  %v1341_v10 = vrot.slane %v1339_v59, 5  ;;  %v1349_v1 = vshrl.u32 %v4486_v48, 16 }
  0xc2   : > { %v360_v9 = vrot.slane %v359_v55, 4  ;;  %v1355_v12 = vshll.u32 %v4492_v52, 16  ;;  %v1347_v16 = vrot.slane %v1345_v7, 5  ;;  %v377_v17 = vshrl.u32 %v4497_v62, 16  ;;  %v4533_v55 = vld [vmem:[%s4377_s7 + $0x30] sm:$0xf] }
  0xc3   : > { %3407 = vmatmul.mubr.msk.bf16.vlgmr.msra.gmra.mrb[0].mxu0 %vm522_vm4, %v3089_v63  ;;  %v370_v15 = vrot.slane %v369_v0, 4  ;;  %v380_v11 = vshll.u32 %v4497_v62, 16  ;;  %v1342_v22 = vor.u32 %v1341_v10, %v1338_v3  ;;  %v1351_v23 = vrot.slane %v1349_v1, 4  ;;  %v4536_v3 = vld [vmem:[#allocation5 + $0x8] sm:$0xf] }
  0xc4   : > { %3423 = vmatpush3.bf16.msra.mxu0 %v1784_v32  ;;  %v365_v21 = vsel %vm4420_vm3, %v360_v9, %v364_v50  ;;  %v1357_v25 = vrot.slane %v1355_v12, 5  ;;  %vm836_vm5 = vcmask 1042432   ;;  %vm837_vm6 = vcmask 1046532   ;;  %v4542_v12 = vld [vmem:[%s4377_s7 + $0x34] sm:$0xf]  ;;  %3626 = vmatprep.subr.msk.bf16.mxu1 %vm547_vm0, %v4536_v3 }
  0xc5   : > { %v375_v36 = vsel %vm4420_vm3, %v370_v15, %v374_v56  ;;  %v379_v37 = vrot.slane %v377_v17, 4  ;;  %v382_v38 = vrot.slane %v380_v11, 5  ;;  %v386_v32 = vshll.u32 %v4501_v8, 16  ;;  %3631 = vmatprep.subr.msk.bf16.mxu0 %vm547_vm0, %v4505_v13  ;;  %vm4565_vm7 = vmor %vm836_vm5, %vm837_vm6 }
  0xc6   : > { %v2976_v39 = vcombine.low %v365_v21, %v375_v36  ;;  %v1343_v41 = vrot.slane %v1342_v22, 4  ;;  %v1352_v42 = vor.u32 %v1351_v23, %v1347_v16  ;;  %v390_v43 = vshrl.u32 %v4501_v8, 16 }
  0xc7   : > { %v383_v45 = vor.u32 %v382_v38, %v379_v37  ;;  %v388_v24 = vrot.slane %v386_v32, 5  ;;  %v396_v46 = vshll.u32 %v4513_v27, 16  ;;  %v1360_v49 = vshrl.u32 %v3073_v35, 16 }
  0xc8   : > { %3338 = vmatprep.mubr.msk.bf16.mxu1 %vm522_vm4, %v2976_v39  ;;  %v1348_v50 = vsel %vm4420_vm3, %v1343_v41, %v1347_v16  ;;  %v1353_v51 = vrot.slane %v1352_v42, 4  ;;  %v392_v53 = vrot.slane %v390_v43, 4  ;;  %v1363_v54 = vshll.u32 %v3073_v35, 16  ;;  %v3104_v39 = vld [vmem:[%s4377_s7 + $0xc] sm:$0xe] }
  0xc9   : > { %v384_v56 = vrot.slane %v383_v45, 4  ;;  %v398_v59 = vrot.slane %v396_v46, 5  ;;  %v1362_v63 = vrot.slane %v1360_v49, 4  ;;  %v1369_v0 = vshll.u32 %v4523_v44, 16 }
  0xca   : > { %v1358_v7 = vsel %vm4420_vm3, %v1353_v51, %v1357_v25  ;;  %v393_v9 = vor.u32 %v392_v53, %v388_v24  ;;  %v1365_v10 = vrot.slane %v1363_v54, 5  ;;  %v1373_v1 = vshrl.u32 %v4523_v44, 16  ;;  %v4550_v25 = vld [vmem:[%s4377_s7 + $0x38] sm:$0x1] }
  0xcb   : > { %v3090_v15 = vcombine.low %v1348_v50, %v1358_v7  ;;  %v389_v16 = vsel %vm4420_vm3, %v384_v56, %v388_v24  ;;  %v1371_v17 = vrot.slane %v1369_v0, 5  ;;  %v1379_v11 = vshll.u32 %v4527_v47, 16  ;;  %v4561_v24 = vld [vmem:[%s4377_s7 + $0x3c] sm:$0xf]  ;;  %v4573_v0 = vld [vmem:[%s4377_s7 + $0x40] sm:$0xf] }
  0xcc   : > { %v394_v21 = vrot.slane %v393_v9, 4  ;;  %v1366_v22 = vor.u32 %v1365_v10, %v1362_v63  ;;  %v1375_v23 = vrot.slane %v1373_v1, 4  ;;  %v401_v35 = vshrl.u32 %v4533_v55, 16  ;;  %v4579_v1 = vld [vmem:[%s4377_s7 + $0x44] sm:$0x1] }
  0xcd   : > { %3410 = vmatprep.mubr.msk.bf16.mxu0 %vm522_vm4, %v3090_v15  ;;  %v1381_v36 = vrot.slane %v1379_v11, 5  ;;  %v404_v37 = vshll.u32 %v4533_v55, 16  ;;  %v410_v38 = vshll.u32 %v4542_v12, 16  ;;  %v414_v32 = vshrl.u32 %v4542_v12, 16 }
  0xce   : > { %v399_v41 = vsel %vm4420_vm3, %v394_v21, %v398_v59  ;;  %v1367_v42 = vrot.slane %v1366_v22, 4  ;;  %v1376_v43 = vor.u32 %v1375_v23, %v1371_v17  ;;  %v403_v45 = vrot.slane %v401_v35, 4 }
  0xcf   : > { %v2977_v46 = vcombine.low %v389_v16, %v399_v41  ;;  %v406_v49 = vrot.slane %v404_v37, 5  ;;  %v412_v50 = vrot.slane %v410_v38, 5  ;;  %v416_v51 = vrot.slane %v414_v32, 4  ;;  %v3105_v16 = vld [vmem:[%s4377_s7 + $0x18] sm:$0xe] }
  0xd0   : > { %v1372_v54 = vsel %vm4420_vm3, %v1367_v42, %v1371_v17  ;;  %v1377_v56 = vrot.slane %v1376_v43, 4  ;;  %v420_v59 = vshll.u32 %v4550_v25, 16  ;;  %v3112_v63 = vrot.slane %v3104_v39, 9  ;;  %v4595_v32 = vld [vmem:[%s4377_s7 + $0x48] sm:$0xf] }
  0xd1   : > { %3339 = vmatmul.mubr.msk.bf16.gmra.mrb[4].mxu1 %vm522_vm4, %v2977_v46  ;;  %v407_v7 = vor.u32 %v406_v49, %v403_v45  ;;  %v417_v9 = vor.u32 %v416_v51, %v412_v50  ;;  %v1681_v10 = vrot.slane %v1679_v57, 4  ;;  %v425_v15 = vshrl.u32 %v4561_v24, 16  ;;  %v4599_v42 = vld [vmem:[%s4377_s7 + $0x4c] sm:$0xf]  ;;  %v4609_v45 = vld [vmem:[%s4377_s7 + $0x50] sm:$0x1] }
  0xd2   : > { %v1382_v17 = vsel %vm4420_vm3, %v1377_v56, %v1381_v36  ;;  %v422_v11 = vrot.slane %v420_v59, 5  ;;  %v1680_v21 = vsel %vm4565_vm7, %v3112_v63, %v1679_v57  ;;  %v428_v22 = vshll.u32 %v4561_v24, 16 }
  0xd3   : > { %v3091_v23 = vcombine.low %v1372_v54, %v1382_v17  ;;  %v408_v35 = vrot.slane %v407_v7, 4  ;;  %v418_v37 = vrot.slane %v417_v9, 4  ;;  %v1683_v38 = vsel %vm4565_vm7, %v1681_v10, %v1682_v58  ;;  %v3106_v7 = vld [vmem:[%s4377_s7 + $0x24] sm:$0xe] }
  0xd4   : > { %v3120_v36 = vcombine.low %v1680_v21, %v1683_v38  ;;  %v427_v39 = vrot.slane %v425_v15, 4  ;;  %v430_v41 = vrot.slane %v428_v22, 5  ;;  %v434_v14 = vshll.u32 %v4573_v0, 16  ;;  %v4636_v22 = vld [vmem:[%s4377_s7 + $0x58] sm:$0xf] }
  0xd5   : > { %3411 = vmatmul.mubr.msk.bf16.gmra.mrb[4].mxu0 %vm522_vm4, %v3091_v23  ;;  %v413_v57 = vsel %vm4420_vm3, %v408_v35, %v412_v50  ;;  %v423_v19 = vsel %vm4420_vm3, %v418_v37, %v422_v11  ;;  %v438_v58 = vshrl.u32 %v4573_v0, 16  ;;  %v444_v43 = vshll.u32 %v4579_v1, 16  ;;  %v4638_v23 = vld [vmem:[#allocation5 + $0x1c] sm:$0xf] }
  0xd6   : > { %v2978_v46 = vcombine.low %v413_v57, %v423_v19  ;;  %3424 = vmatprep.mubr.msk.bf16.mxu0 %vm522_vm4, %v3120_v36  ;;  %v431_v49 = vor.u32 %v430_v41, %v427_v39  ;;  %v436_v51 = vrot.slane %v434_v14, 5  ;;  %v3113_v54 = vrot.slane %v3105_v16, 9  ;;  %v4628_v16 = vld [vmem:[%s4377_s7 + $0x54] sm:$0xf] }
  0xd7   : > { %v440_v56 = vrot.slane %v438_v58, 4  ;;  %v446_v59 = vrot.slane %v444_v43, 5  ;;  %v1690_v50 = vsel %vm4565_vm7, %v4469_v28, %v1689_v31  ;;  %v1986_v63 = vsel %vm547_vm0, %v4505_v13, 0  ;;  %v4646_v43 = vld [vmem:[%s4377_s7 + $0x5c] sm:$0x1] }
  0xd8   : > { %3342 = vmatprep.mubr.msk.bf16.mxu1 %vm522_vm4, %v2978_v46  ;;  %v432_v9 = vrot.slane %v431_v49, 4  ;;  %v1687_v10 = vsel %vm4565_vm7, %v3113_v54, %v1686_v18  ;;  %v449_v15 = vshrl.u32 %v4595_v32, 16  ;;  %v452_v61 = vshll.u32 %v4595_v32, 16 }
  0xd9   : > { %v441_v28 = vor.u32 %v440_v56, %v436_v51  ;;  %v3121_v31 = vcombine.low %v1687_v10, %v1690_v50  ;;  %v458_v13 = vshll.u32 %v4599_v42, 16  ;;  %v462_v17 = vshrl.u32 %v4599_v42, 16  ;;  %v3107_v56 = vld [vmem:[%s4377_s7 + $0x30] sm:$0xe] }
  0xda   : > { %v437_v11 = vsel %vm4420_vm3, %v432_v9, %v436_v51  ;;  %v451_v21 = vrot.slane %v449_v15, 4  ;;  %v454_v60 = vrot.slane %v452_v61, 5  ;;  %v468_v18 = vshll.u32 %v4609_v45, 16 }
  0xdb   : > { %v442_v35 = vrot.slane %v441_v28, 4  ;;  %v460_v37 = vrot.slane %v458_v13, 5  ;;  %v464_v38 = vrot.slane %v462_v17, 4  ;;  %v3114_v36 = vrot.slane %v3106_v7, 9  ;;  %v3108_v28 = vld [vmem:[%s4377_s7 + $0x3c] sm:$0xe] }
  0xdc   : > { %v455_v39 = vor.u32 %v454_v60, %v451_v21  ;;  %v470_v41 = vrot.slane %v468_v18, 5  ;;  %v1693_v14 = vrot.slane %v4486_v48, 5  ;;  %v1696_v57 = vrot.slane %v4492_v52, 5  ;;  %v4667_v21 = vld [vmem:[%s4377_s7 + $0x40] sm:$0xf] }
  0xdd   : > { %v447_v19 = vsel %vm4420_vm3, %v442_v35, %v446_v59  ;;  %3425 = vmatmul.mubr.msk.bf16.vlgmr.msra.gmra.mrb[0].mxu0 %vm522_vm4, %v3121_v31  ;;  %v465_v58 = vor.u32 %v464_v38, %v460_v37  ;;  %v473_v46 = vshrl.u32 %v4628_v16, 16  ;;  %v476_v49 = vshll.u32 %v4628_v16, 16  ;;  %v4670_v60 = vld [vmem:[%s4377_s7 + $0x44] sm:$0x1] }
  0xde   : > { %v2979_v51 = vcombine.low %v437_v11, %v447_v19  ;;  %3441 = vmatpush3.bf16.msra.mxu0 %v1986_v63  ;;  %v456_v54 = vrot.slane %v455_v39, 4  ;;  %v1694_v48 = vsel %vm4565_vm7, %v3114_v36, %v1693_v14  ;;  %v1695_v52 = vrot.slane %v1693_v14, 4 }
  0xdf   : > { %v466_v59 = vrot.slane %v465_v58, 4  ;;  %v475_v50 = vrot.slane %v473_v46, 4  ;;  %v478_v7 = vrot.slane %v476_v49, 5  ;;  %v482_v9 = vshll.u32 %v4636_v22, 16  ;;  %3632 = vmatprep.subr.msk.bf16.mxu0 %vm547_vm0, %v4638_v23 }
  0xe0   : > { %3343 = vmatmul.mubr.msk.bf16.gmra.mrb[8].mxu1 %vm522_vm4, %v2979_v51  ;;  %v461_v63 = vsel %vm4420_vm3, %v456_v54, %v460_v37  ;;  %v1697_v10 = vsel %vm4565_vm7, %v1695_v52, %v1696_v57  ;;  %v486_v15 = vshrl.u32 %v4636_v22, 16  ;;  %v492_v61 = vshll.u32 %v4646_v43, 16 }
  0xe1   : > { %v471_v31 = vsel %vm4420_vm3, %v466_v59, %v470_v41  ;;  %v3122_v13 = vcombine.low %v1694_v48, %v1697_v10  ;;  %v479_v17 = vor.u32 %v478_v7, %v475_v50  ;;  %v484_v11 = vrot.slane %v482_v9, 5  ;;  %v4690_v59 = vld [vmem:[%s4377_s7 + $0x4c] sm:$0xf]  ;;  %v4693_v50 = vld [vmem:[%s4377_s7 + $0x50] sm:$0x1] }
  0xe2   : > { %v2980_v18 = vcombine.low %v461_v63, %v471_v31  ;;  %v488_v35 = vrot.slane %v486_v15, 4  ;;  %v3115_v37 = vrot.slane %v3107_v56, 9  ;;  %v1700_v36 = vrot.slane %v4523_v44, 5  ;;  %v3109_v44 = vld [vmem:[%s4377_s7 + $0x48] sm:$0xe] }
  0xe3   : > { %3428 = vmatprep.mubr.msk.bf16.mxu0 %vm522_vm4, %v3122_v13  ;;  %v480_v38 = vrot.slane %v479_v17, 4  ;;  %v1703_v39 = vrot.slane %v4527_v47, 5  ;;  %v3116_v41 = vrot.slane %v3108_v28, 9  ;;  %v494_v57 = vrot.slane %v492_v61, 5  ;;  %v3110_v7 = vld [vmem:[%s4377_s7 + $0x54] sm:$0xe] }
  0xe4   : > { %3346 = vmatprep.mubr.msk.bf16.mxu1 %vm522_vm4, %v2980_v18  ;;  %v489_v14 = vor.u32 %v488_v35, %v484_v11  ;;  %v1707_v19 = vrot.slane %v4667_v21, 5  ;;  %v1710_v58 = vrot.slane %v4670_v60, 5  ;;  %v1701_v46 = vsel %vm4565_vm7, %v3115_v37, %v1700_v36  ;;  %v4701_v61 = vld [vmem:[%s4377_s7 + $0x58] sm:$0xf]  ;;  %v4704_v28 = vld [vmem:[%s4377_s7 + $0x5c] sm:$0x1] }
  0xe5   : > { %v1702_v49 = vrot.slane %v1700_v36, 4  ;;  %v485_v47 = vsel %vm4420_vm3, %v480_v38, %v484_v11  ;;  %v2990_v56 = vcombine.low %v4380_v2, %v4389_v5  ;;  %v3117_v15 = vrot.slane %v3109_v44, 9  ;;  %5397 = vst [vmem:[#allocation19_spill] sm:$0xff] %v4704_v28  ;;  %v4707_v13 = vld [vmem:[%s4377_s7 + $0x64] sm:$0xf] }
  0xe6   : > { %v490_v51 = vrot.slane %v489_v14, 4  ;;  %v1708_v54 = vsel %vm4565_vm7, %v3116_v41, %v1707_v19  ;;  %v1709_v48 = vrot.slane %v1707_v19, 4  ;;  %5398 = vst [vmem:[#allocation20_spill] sm:$0xff] %v4707_v13  ;;  %v1714_v17 = vrot.slane %v4690_v59, 5  ;;  %v3111_v38 = vld [vmem:[%s4377_s7 + $0x60] sm:$0xe] }
  0xe7   : > { %v1704_v52 = vsel %vm4565_vm7, %v1702_v49, %v1703_v39  ;;  %v1717_v11 = vrot.slane %v4693_v50, 5  ;;  %v3118_v18 = vrot.slane %v3110_v7, 9  ;;  %v1721_v35 = vrot.slane %v4701_v61, 5  ;;  %v4721_v41 = vld [vmem:[%s4377_s7 + $0x68] sm:$0x1] }
  0xe8   : > { %v495_v9 = vsel %vm4420_vm3, %v490_v51, %v494_v57  ;;  %v3123_v63 = vcombine.low %v1701_v46, %v1704_v52  ;;  %v1711_v10 = vsel %vm4565_vm7, %v1709_v48, %v1710_v58  ;;  %v1724_v37 = vrot.slane %v4704_v28, 5  ;;  %5399 = vst [vmem:[#allocation21_spill] sm:$0xff] %v4721_v41  ;;  %v814_v51 = vld [vmem:[%s4377_s7 + $0x18] sm:$0xe]  ;;  %v5014_v28 = vld [vmem:[%s4377_s7 + $0x70] sm:$0xf] }
  0xe9   : > { %v2981_v2 = vcombine.low %v485_v47, %v495_v9  ;;  %v3124_v31 = vcombine.low %v1708_v54, %v1711_v10  ;;  %v1715_v36 = vsel %vm4565_vm7, %v3117_v15, %v1714_v17  ;;  %v1716_v39 = vrot.slane %v1714_v17, 4  ;;  %v813_v47 = vld [vmem:[%s4377_s7 + $0xc] sm:$0xe]  ;;  %v815_v15 = vld [vmem:[%s4377_s7 + $0x24] sm:$0xe] }
  0xea   : > { %3429 = vmatmul.mubr.msk.bf16.gmra.mrb[4].mxu0 %vm522_vm4, %v3123_v63  ;;  %v1728_v14 = vrot.slane %v4707_v13, 5  ;;  %v1722_v57 = vsel %vm4565_vm7, %v3118_v18, %v1721_v35  ;;  %v1723_v19 = vrot.slane %v1721_v35, 4  ;;  %v848_v58 = vrot.slane %v4425_v34, 5  ;;  %v816_v18 = vld [vmem:[%s4377_s7 + $0x30] sm:$0xe] }
  0xeb   : > { %3347 = vmatmul.mubr.msk.bf16.gmra.mrb[12].mxu1 %vm522_vm4, %v2981_v2  ;;  %3432 = vmatprep.mubr.msk.bf16.mxu0 %vm522_vm4, %v3124_v31  ;;  %v2991_v46 = vcombine.low %v4416_v29, %v4425_v34  ;;  %v1718_v49 = vsel %vm4565_vm7, %v1716_v39, %v1717_v11  ;;  %v3119_v44 = vrot.slane %v3111_v38, 9  ;;  %v851_v7 = vrot.slane %v4428_v40, 5  ;;  %v4739_v34 = vld [vmem:[#allocation5 + $0xc] sm:$0xf] }
  0xec   : > { %3352 = vmatprep.mubr.msk.bf16.mxu1 %vm522_vm4, %v2990_v56  ;;  %v3125_v54 = vcombine.low %v1715_v36, %v1718_v49  ;;  %v1725_v48 = vsel %vm4565_vm7, %v1723_v19, %v1724_v37  ;;  %v1730_v52 = vrot.slane %v1728_v14, 4  ;;  %v1731_v56 = vrot.slane %v4721_v41, 5  ;;  %v3779_v19 = vld [vmem:[%s4377_s7 + $0x18] sm:$0xff]  }
  0xed   : > { %v2992_v9 = vcombine.low %v4462_v20, %v4465_v26  ;;  %v3126_v29 = vcombine.low %v1722_v57, %v1725_v48  ;;  %v946_v63 = vsel %vm547_vm0, %v4536_v3, 0  ;;  %v3007_v10 = vrot.slane %v813_v47, 9 }
  0xee   : > { %v850_v2 = vrot.slane %v848_v58, 4  ;;  %v3008_v31 = vrot.slane %v814_v51, 9  ;;  %v855_v17 = vrot.slane %v4465_v26, 5  ;;  %v1729_v40 = vsel %vm4565_vm7, %v3119_v44, %v1728_v14  ;;  %v812_v51 = vld [vmem:[%s4377_s7] sm:$0xe] }
  0xef   : > { %v1732_v20 = vsel %vm4565_vm7, %v1730_v52, %v1731_v56  ;;  %v4754_v3 = vsel %vm4565_vm7, %v3007_v10, %v848_v58  ;;  %v858_v11 = vrot.slane %v4475_v33, 5  ;;  %v3009_v38 = vrot.slane %v815_v15, 9 }
  0xf0   : > { %v4761_v26 = vsel %vm4565_vm7, %v850_v2, %v851_v7  ;;  %v4765_v35 = vsel %vm4565_vm7, %v3008_v31, %v855_v17  ;;  %v857_v37 = vrot.slane %v855_v17, 4  ;;  %v2993_v36 = vcombine.low %v4497_v62, %v4501_v8  ;;  %v817_v7 = vld [vmem:[%s4377_s7 + $0x3c] sm:$0xe]  ;;  %v3781_v2 = vld [vmem:[%s4377_s7 + $0x24] sm:$0xff]   ;;  %v3170_v31 = vld [vmem:[%s4377_s7 + $0x18] sm:$0xf] }
  0xf1   : > { %v3015_v33 = vcombine.low %v4754_v3, %v4761_v26  ;;  %v862_v39 = vrot.slane %v4501_v8, 5  ;;  %v865_v14 = vrot.slane %v4513_v27, 5  ;;  %v3127_v57 = vcombine.low %v1729_v40, %v1732_v20  ;;  %v3789_v3 = vld [vmem:[%s4377_s7 + $0x6c] sm:$0xff]  }
  0xf2   : > { %3433 = vmatmul.mubr.msk.bf16.gmra.mrb[8].mxu0 %vm522_vm4, %v3125_v54  ;;  %v4778_v58 = vsel %vm4565_vm7, %v857_v37, %v858_v11  ;;  %v869_v62 = vrot.slane %v4542_v12, 5  ;;  %v872_v27 = vrot.slane %v4550_v25, 5  ;;  %v2994_v47 = vcombine.low %v4533_v55, %v4542_v12  ;;  %v4825_v11 = vld [vmem:[%s4377_s7 + $0x1c] sm:$0xf] }
  0xf3   : > { %3353 = vmatmul.mubr.msk.bf16.vlgmr.msra.gmra.mrb[0].mxu1 %vm522_vm4, %v2991_v46  ;;  %3436 = vmatprep.mubr.msk.bf16.mxu0 %vm522_vm4, %v3126_v29  ;;  %v3010_v46 = vrot.slane %v816_v18, 9  ;;  %v4785_v44 = vsel %vm4565_vm7, %v3009_v38, %v862_v39  ;;  %v864_v8 = vrot.slane %v862_v39, 4  ;;  %v841_v52 = vrot.slane %v4389_v5, 5  ;;  %v818_v18 = vld [vmem:[%s4377_s7 + $0x48] sm:$0xe] }
  0xf4   : > { %3369 = vmatpush3.bf16.msra.mxu1 %v946_v63  ;;  %3356 = vmatprep.mubr.msk.bf16.mxu1 %vm522_vm4, %v2992_v9  ;;  %v871_v48 = vrot.slane %v869_v62, 4  ;;  %v3006_v25 = vrot.slane %v812_v51, 9  ;;  %v3011_v9 = vrot.slane %v817_v7, 9  ;;  %v876_v29 = vrot.slane %v4573_v0, 5  ;;  %v3785_v7 = vld [vmem:[%s4377_s7 + $0x3c] sm:$0xff]  }
  0xf5   : > { %3627 = vmatprep.subr.msk.bf16.mxu1 %vm547_vm0, %v4739_v34  ;;  %v4793_v54 = vsel %vm4565_vm7, %v3010_v46, %v869_v62  ;;  %v4798_v56 = vsel %vm4565_vm7, %v864_v8, %v865_v14  ;;  %v879_v63 = vrot.slane %v4579_v1, 5  ;;  %v844_v10 = vrot.slane %v4392_v6, 5  ;;  %v3783_v1 = vld [vmem:[%s4377_s7 + $0x30] sm:$0xff]   ;;  %v3173_v46 = vld [vmem:[%s4377_s7 + $0x24] sm:$0xf] }
  0xf6   : > { %v4806_v12 = vsel %vm4565_vm7, %v871_v48, %v872_v27  ;;  %v843_v15 = vrot.slane %v841_v52, 4  ;;  %v4820_v17 = vsel %vm4565_vm7, %v3011_v9, %v876_v29  ;;  %v878_v40 = vrot.slane %v876_v29, 4  ;;  %v4858_v48 = vld [vmem:[%s4377_s7 + $0x28] sm:$0xf]  ;;  %v3176_v29 = vld [vmem:[%s4377_s7 + $0x30] sm:$0xf] }
  0xf7   : > { %v2995_v20 = vcombine.low %v4561_v24, %v4573_v0  ;;  %v2368_v37 = vsel %vm547_vm0, %v4638_v23, 0  ;;  %v2996_v6 = vcombine.low %v4595_v32, %v4599_v42  ;;  %v842_v38 = vsel %vm4565_vm7, %v3006_v25, %v841_v52  ;;  %v819_v52 = vld [vmem:[%s4377_s7 + $0x54] sm:$0xe] }
  0xf8   : > { %v845_v24 = vsel %vm4565_vm7, %v843_v15, %v844_v10  ;;  %v2126_v0 = vshrl.u32 %v3170_v31, 16  ;;  %v2129_v39 = vshll.u32 %v3170_v31, 16  ;;  %v2135_v32 = vshll.u32 %v4825_v11, 16  ;;  %v3786_v31 = vld [vmem:[%s4377_s7 + $0x48] sm:$0xff]  }
  0xf9   : > { %v2139_v14 = vshrl.u32 %v4825_v11, 16  ;;  %v883_v62 = vrot.slane %v4599_v42, 5  ;;  %v886_v8 = vrot.slane %v4609_v45, 5  ;;  %v1417_v27 = vshll.u32 %v4690_v59, 16 }
  0xfa   : > { %3437 = vmatmul.mubr.msk.bf16.gmra.mrb[12].mxu0 %vm522_vm4, %v3127_v57  ;;  %v4846_v57 = vld [vmem:[#allocation5 + $0x20] sm:$0xf]  ;;  %v3014_v51 = vcombine.low %v842_v38, %v845_v24  ;;  %v2128_v42 = vrot.slane %v2126_v0, 4  ;;  %v2131_v25 = vrot.slane %v2129_v39, 5  ;;  %v2150_v10 = vshrl.u32 %v3173_v46, 16 }
  0xfb   : > { %3357 = vmatmul.mubr.msk.bf16.gmra.mrb[4].mxu1 %vm522_vm4, %v2993_v36  ;;  %3442 = vmatprep.mubr.msk.bf16.mxu0 %vm522_vm4, %v3779_v19  ;;  %v4837_v36 = vsel %vm4565_vm7, %v878_v40, %v879_v63  ;;  %v3012_v19 = vrot.slane %v818_v18, 9  ;;  %v885_v9 = vrot.slane %v883_v62, 4  ;;  %v4869_v63 = vrot.slane %v2135_v32, 5  ;;  %v4876_v40 = vld [vmem:[%s4377_s7 + $0x20] sm:$0x1] }
  0xfc   : > { %3360 = vmatprep.mubr.msk.bf16.mxu1 %vm522_vm4, %v2994_v47  ;;  %v2997_v47 = vcombine.low %v4628_v16, %v4636_v22  ;;  %v2141_v16 = vrot.slane %v2139_v14, 4  ;;  %v2153_v15 = vshll.u32 %v3173_v46, 16  ;;  %v2163_v18 = vshrl.u32 %v4858_v48, 16 }
  0xfd   : > { %v4866_v45 = vsel %vm4565_vm7, %v3012_v19, %v883_v62  ;;  %v2174_v38 = vshrl.u32 %v3176_v29, 16  ;;  %v2177_v24 = vshll.u32 %v3176_v29, 16  ;;  %v890_v0 = vrot.slane %v4636_v22, 5 }
  0xfe   : > { %v1421_v39 = vshrl.u32 %v4690_v59, 16  ;;  %v893_v19 = vrot.slane %v4646_v43, 5  ;;  %v2132_v46 = vor.u32 %v2131_v25, %v2128_v42  ;;  %v2145_v62 = vshll.u32 %v4876_v40, 16  ;;  %v4905_v42 = vld [vmem:[%s4377_s7 + $0x2c] sm:$0x1] }
  0xff   : > { %v892_v22 = vrot.slane %v890_v0, 4  ;;  %v2142_v59 = vor.u32 %v2141_v16, %v4869_v63  ;;  %v2155_v43 = vrot.slane %v2153_v15, 5  ;;  %v2165_v25 = vrot.slane %v2163_v18, 4  ;;  %v4915_v15 = vld [vmem:[%s4377_s7 + $0x38] sm:$0x1] }
 0x100   : > { %v2176_v29 = vrot.slane %v2174_v38, 4  ;;  %v4911_v16 = vrot.slane %v1417_v27, 5  ;;  %v4921_v18 = vrot.slane %v1421_v39, 4  ;;  %v2133_v38 = vrot.slane %v2132_v46, 4  ;;  %v4934_v39 = vld [vmem:[%s4377_s7 + $0x4c] sm:$0xf] }
 0x101   : > { %v1148_v27 = vsel %vm547_vm0, %v4739_v34, 0  ;;  %v5401_v41 = vcombine.low %v4785_v44, %v4798_v56  ;;  %vm2799_vm8 = vcmask 48128  }
 0x102   : > { %3443 = vmatmul.mubr.msk.bf16.vlgmr.msra.gmra.mrb[0].mxu0 %vm522_vm4, %v3781_v2  ;;  %v4872_v2 = vld [vmem:[%s4377_s7 + $0x34] sm:$0xf] }
 0x103   : > { %3361 = vmatmul.mubr.msk.bf16.gmra.mrb[8].mxu1 %vm522_vm4, %v2995_v20  ;;  %3459 = vmatpush3.bf16.msra.mxu0 %v2368_v37  ;;  %v2159_v20 = vshll.u32 %v4858_v48, 16  ;;  %v4882_v37 = vsel %vm4565_vm7, %v885_v9, %v886_v8  ;;  %v2183_v32 = vshll.u32 %v4872_v2, 16  ;;  %v2187_v14 = vshrl.u32 %v4872_v2, 16 }
 0x104   : > { %3364 = vmatprep.mubr.msk.bf16.mxu1 %vm522_vm4, %v2996_v6  ;;  %3446 = vmatprep.mubr.msk.bf16.mxu0 %vm522_vm4, %v3783_v1  ;;  %v3013_v6 = vrot.slane %v819_v52, 9  ;;  %v2152_v52 = vrot.slane %v2150_v10, 4  ;;  %v3788_v10 = vld [vmem:[%s4377_s7 + $0x60] sm:$0xff]   ;;  %v2169_v1 = vshll.u32 %v4905_v42, 16 }
 0x105   : > { %3633 = vmatprep.subr.msk.bf16.mxu0 %vm547_vm0, %v4846_v57  ;;  %v4900_v9 = vrot.slane %v2159_v20, 5  ;;  %v2193_v20 = vshll.u32 %v4915_v15, 16 }
 0x106   : > { %v4895_v8 = vsel %vm4565_vm7, %v3013_v6, %v890_v0  ;;  %v2179_v6 = vrot.slane %v2177_v24, 5  ;;  %v3179_v24 = vld [vmem:[%s4377_s7 + $0x3c] sm:$0xf]  ;;  %v4925_v0 = vld [vmem:[%s4377_s7 + $0x40] sm:$0xf]  ;;  %v2156_v23 = vor.u32 %v2155_v43, %v2152_v52 }
 0x107   : > { %v2198_v55 = vshrl.u32 %v3179_v24, 16  ;;  %v2201_v49 = vshll.u32 %v3179_v24, 16  ;;  %v2207_v34 = vshll.u32 %v4925_v0, 16 }
 0x108   : > { %v2180_v5 = vor.u32 %v2179_v6, %v2176_v29  ;;  %v2171_v29 = vrot.slane %v2169_v1, 5  ;;  %v3185_v6 = vld [vmem:[%s4377_s7 + $0x54] sm:$0xf]  ;;  %v2157_v26 = vrot.slane %v2156_v23, 4 }
 0x109   : > { %v2200_v24 = vrot.slane %v2198_v55, 4 }
 0x10a   : > { %3447 = vmatmul.mubr.msk.bf16.gmra.mrb[4].mxu0 %vm522_vm4, %v3785_v7  ;;  %v3787_v7 = vld [vmem:[%s4377_s7 + $0x54] sm:$0xff]  }
 0x10b   : > { %3365 = vmatmul.mubr.msk.bf16.gmra.mrb[12].mxu1 %vm522_vm4, %v2997_v47  ;;  %3450 = vmatprep.mubr.msk.bf16.mxu0 %vm522_vm4, %v3786_v31  ;;  %v4909_v47 = vsel %vm4565_vm7, %v892_v22, %v893_v19  ;;  %v4917_v31 = vrot.slane %v2183_v32, 5  ;;  %v2143_v19 = vrot.slane %v2142_v59, 4  ;;  %v2147_v22 = vrot.slane %v2145_v62, 5  ;;  %v3182_v32 = vld [vmem:[%s4377_s7 + $0x48] sm:$0xf] }
 0x10c   : > { %3370 = vmatprep.mubr.msk.bf16.mxu1 %vm522_vm4, %v3014_v51  ;;  %v2189_v51 = vrot.slane %v2187_v14, 4  ;;  %v2166_v14 = vor.u32 %v2165_v25, %v4900_v9  ;;  %v2138_v62 = vsel %vm4420_vm3, %v2133_v38, %v4869_v63  ;;  %v2211_v59 = vshrl.u32 %v4925_v0, 16 }
 0x10d   : > { %v2222_v52 = vshrl.u32 %v3182_v32, 16  ;;  %v2225_v43 = vshll.u32 %v3182_v32, 16  ;;  %v2148_v25 = vsel %vm4420_vm3, %v2143_v19, %v2147_v22  ;;  %v2235_v63 = vshrl.u32 %v4934_v39, 16  ;;  %v3830_v32 = vld [vmem:[#allocation5 + $0x10] sm:$0xf] }
 0x10e   : > { %v2190_v46 = vor.u32 %v2189_v51, %v4917_v31  ;;  %v5400_v51 = vcombine.low %v4765_v35, %v4778_v58  ;;  %v2195_v38 = vrot.slane %v2193_v20, 5  ;;  %v2203_v19 = vrot.slane %v2201_v49, 5  ;;  %v4965_v35 = vld [vmem:[%s4377_s7 + $0x44] sm:$0x1]  ;;  %v4968_v20 = vld [vmem:[%s4377_s7 + $0x50] sm:$0x1] }
 0x10f   : > { %v4958_v22 = vrot.slane %v2207_v34, 5  ;;  %v2213_v58 = vrot.slane %v2211_v59, 4  ;;  %v2227_v23 = vrot.slane %v2225_v43, 5  ;;  %v2237_v49 = vrot.slane %v2235_v63, 4  ;;  %v3188_v43 = vld [vmem:[%s4377_s7 + $0x60] sm:$0xf] }
 0x110   : > { %v2191_v1 = vrot.slane %v2190_v46, 4  ;;  %v2249_v46 = vshll.u32 %v3185_v6, 16  ;;  %v2162_v34 = vsel %vm4420_vm3, %v2157_v26, %v4900_v9  ;;  %v2217_v63 = vshll.u32 %v4965_v35, 16  ;;  %v4987_v9 = vld [vmem:[%s4377_s7 + $0x64] sm:$0xf] }
 0x111   : > { %v2241_v26 = vshll.u32 %v4968_v20, 16  ;;  %v2283_v56 = vshrl.u32 %v4987_v9, 16 }
 0x112   : > { %3451 = vmatmul.mubr.msk.bf16.gmra.mrb[8].mxu0 %vm522_vm4, %v3787_v7  ;;  %v2231_v7 = vshll.u32 %v4934_v39, 16 }
 0x113   : > { %3371 = vmatmul.mubr.msk.bf16.vlgmr.msra.gmra.mrb[0].mxu1 %vm522_vm4, %v3015_v33  ;;  %3454 = vmatprep.mubr.msk.bf16.mxu0 %vm522_vm4, %v3788_v10  ;;  %v2167_v33 = vrot.slane %v2166_v14, 4  ;;  %v2181_v10 = vrot.slane %v2180_v5, 4  ;;  %v2246_v14 = vshrl.u32 %v3185_v6, 16  ;;  %v3194_v5 = vcombine.low %v2138_v62, %v2148_v25 }
 0x114   : > { %3387 = vmatpush3.bf16.msra.mxu1 %v1148_v27  ;;  %3374 = vmatprep.mubr.msk.bf16.mxu1 %vm522_vm4, %v5400_v51  ;;  %v4962_v27 = vld [vmem:[%s4377_s7 + $0x58] sm:$0xf]  ;;  %v2224_v51 = vrot.slane %v2222_v52, 4  ;;  %v4970_v55 = vrot.slane %v2231_v7, 5  ;;  %v2196_v25 = vsel %vm4420_vm3, %v2191_v1, %v2195_v38  ;;  %v2204_v7 = vor.u32 %v2203_v19, %v2200_v24 }
 0x115   : > { %3629 = vmatprep.subr.msk.bf16.mxu1 %vm547_vm0, %v3830_v32  ;;  %v2172_v32 = vsel %vm4420_vm3, %v2167_v33, %v2171_v29  ;;  %v2255_v59 = vshll.u32 %v4962_v27, 16  ;;  %v2259_v52 = vshrl.u32 %v4962_v27, 16  ;;  %v2186_v62 = vsel %vm4420_vm3, %v2181_v10, %v4917_v31  ;;  %v4999_v10 = vld [vmem:[%s4377_s7 + $0x5c] sm:$0x1] }
 0x116   : > { %v2214_v29 = vor.u32 %v2213_v58, %v4958_v22  ;;  %v2228_v6 = vor.u32 %v2227_v23, %v2224_v51  ;;  %v2248_v33 = vrot.slane %v2246_v14, 4  ;;  %v2238_v31 = vor.u32 %v2237_v49, %v4970_v55 }
 0x117   : > { %v2251_v38 = vrot.slane %v2249_v46, 5  ;;  %v2273_v1 = vshll.u32 %v3188_v43, 16  ;;  %v5402_v24 = vcombine.low %v4793_v54, %v4806_v12  ;;  %v5005_v19 = vrot.slane %v2255_v59, 5  ;;  %v3191_v46 = vld [vmem:[%s4377_s7 + $0x6c] sm:$0xf] }
 0x118   : > { %v2261_v44 = vrot.slane %v2259_v52, 4  ;;  %v3195_v58 = vcombine.low %v2162_v34, %v2172_v32  ;;  %v2622_v51 = vsel %vm547_vm0, %v4846_v57, 0  ;;  %v3196_v23 = vcombine.low %v2186_v62, %v2196_v25 }
 0x119   : > { %v2219_v14 = vrot.slane %v2217_v63, 5  ;;  %v2215_v49 = vrot.slane %v2214_v29, 4  ;;  %v2243_v54 = vrot.slane %v2241_v26, 5  ;;  %v2265_v12 = vshll.u32 %v4999_v10, 16 }
 0x11a   : > { %3455 = vmatmul.mubr.msk.bf16.gmra.mrb[12].mxu0 %vm522_vm4, %v3789_v3  ;;  %v2270_v3 = vshrl.u32 %v3188_v43, 16  ;;  %v2229_v59 = vrot.slane %v2228_v6, 4  ;;  %v2239_v52 = vrot.slane %v2238_v31, 4  ;;  %v2252_v13 = vor.u32 %v2251_v38, %v2248_v33 }
 0x11b   : > { %3375 = vmatmul.mubr.msk.bf16.gmra.mrb[4].mxu1 %vm522_vm4, %v5401_v41  ;;  %3460 = vmatprep.mubr.msk.bf16.mxu0 %vm522_vm4, %v3194_v5  ;;  %v2279_v41 = vshll.u32 %v4987_v9, 16  ;;  %v2205_v5 = vrot.slane %v2204_v7, 4  ;;  %v2262_v34 = vor.u32 %v2261_v44, %v5005_v19  ;;  %v2285_v57 = vrot.slane %v2283_v56, 4  ;;  %v5023_v7 = vld [vmem:[%s4377_s7 + $0x68] sm:$0x1] }
 0x11c   : > { %3378 = vmatprep.mubr.msk.bf16.mxu1 %vm522_vm4, %v5402_v24  ;;  %v2272_v43 = vrot.slane %v2270_v3, 4  ;;  %v2275_v24 = vrot.slane %v2273_v1, 5  ;;  %v1424_v62 = vor.u32 %v4921_v18, %v4911_v16  ;;  %v1427_v25 = vshll.u32 %v4693_v50, 16 }
 0x11d   : > { %v5017_v32 = vrot.slane %v2279_v41, 5  ;;  %v2294_v63 = vshrl.u32 %v3191_v46, 16  ;;  %v2297_v29 = vshll.u32 %v3191_v46, 16  ;;  %v2210_v6 = vsel %vm4420_vm3, %v2205_v5, %v4958_v22 }
 0x11e   : > { %v2220_v26 = vsel %vm4420_vm3, %v2215_v49, %v2219_v14  ;;  %v2303_v33 = vshll.u32 %v5014_v28, 16  ;;  %v2307_v31 = vshrl.u32 %v5014_v28, 16  ;;  %v5403_v50 = vcombine.low %v4820_v17, %v4837_v36 }
 0x11f   : > { %v2234_v18 = vsel %vm4420_vm3, %v2229_v59, %v4970_v55  ;;  %v2244_v22 = vsel %vm4420_vm3, %v2239_v52, %v2243_v54  ;;  %v2267_v38 = vrot.slane %v2265_v12, 5  ;;  %v2276_v3 = vor.u32 %v2275_v24, %v2272_v43  ;;  %v3079_v24 = vld [vmem:[%s4377_s7 + $0x48] sm:$0xf] }
 0x120   : > { %v5404_v1 = vcombine.low %v4866_v45, %v4882_v37  ;;  %v2253_v17 = vrot.slane %v2252_v13, 4  ;;  %v2263_v36 = vrot.slane %v2262_v34, 4  ;;  %v2286_v44 = vor.u32 %v2285_v57, %v5017_v32  ;;  %v3790_v13 = vld [vmem:[%s4377_s7 + $0xc] sm:$0xff]   ;;  %v3210_v57 = vld [vmem:[%s4377_s7 + $0x18] sm:$0xe] }
 0x121   : > { %v2289_v41 = vshll.u32 %v5023_v7, 16  ;;  %v2296_v55 = vrot.slane %v2294_v63, 4  ;;  %v2299_v56 = vrot.slane %v2297_v29, 5  ;;  %v5052_v14 = vrot.slane %v2303_v33, 5 }
 0x122   : > { %3461 = vmatmul.mubr.msk.bf16.vlgmr.msra.gmra.mrb[0].mxu0 %vm522_vm4, %v3195_v58  ;;  %v3197_v58 = vcombine.low %v2210_v6, %v2220_v26  ;;  %v2309_v45 = vrot.slane %v2307_v31, 4  ;;  %v1425_v37 = vrot.slane %v1424_v62, 4  ;;  %v1429_v5 = vrot.slane %v1427_v25, 5 }
 0x123   : > { %3379 = vmatmul.mubr.msk.bf16.gmra.mrb[8].mxu1 %vm522_vm4, %v5403_v50  ;;  %3477 = vmatpush3.bf16.msra.mxu0 %v2622_v51  ;;  %v5050_v51 = vld [vmem:[%s4377_s7 + $0x74] sm:$0x1]  ;;  %v3198_v49 = vcombine.low %v2234_v18, %v2244_v22  ;;  %v2258_v54 = vsel %vm4420_vm3, %v2253_v17, %v5005_v19  ;;  %v2268_v12 = vsel %vm4420_vm3, %v2263_v36, %v2267_v38  ;;  %v2287_v46 = vrot.slane %v2286_v44, 4  ;;  %v3791_v38 = vld [vmem:[%s4377_s7 + $0x18] sm:$0xff]  }
 0x124   : > { %3382 = vmatprep.mubr.msk.bf16.mxu1 %vm522_vm4, %v5404_v1  ;;  %3464 = vmatprep.mubr.msk.bf16.mxu0 %vm522_vm4, %v3196_v23  ;;  %v2277_v23 = vrot.slane %v2276_v3, 4  ;;  %v2291_v59 = vrot.slane %v2289_v41, 5  ;;  %v2300_v52 = vor.u32 %v2299_v56, %v2296_v55  ;;  %v2313_v43 = vshll.u32 %v5050_v51, 16  ;;  %v3792_v1 = vld [vmem:[%s4377_s7 + $0x24] sm:$0xff]   ;;  %v3076_v17 = vld [vmem:[%s4377_s7 + $0x3c] sm:$0xf] }
 0x125   : > { %v2310_v34 = vor.u32 %v2309_v45, %v5052_v14  ;;  %v2517_v62 = vrot.slane %v4825_v11, 5  ;;  %v5405_v25 = vcombine.low %v4895_v8, %v4909_v47  ;;  %v3199_v19 = vcombine.low %v2258_v54, %v2268_v12  ;;  %v3211_v55 = vld [vmem:[%s4377_s7 + $0x24] sm:$0xe]  ;;  %v3212_v45 = vld [vmem:[%s4377_s7 + $0x30] sm:$0xe] }
 0x126   : > { %v2282_v63 = vsel %vm4420_vm3, %v2277_v23, %v5017_v32  ;;  %v2292_v11 = vsel %vm4420_vm3, %v2287_v46, %v2291_v59  ;;  %v1408_v29 = vshrl.u32 %v3079_v24, 16  ;;  %v1411_v6 = vshll.u32 %v3079_v24, 16  ;;  %v3793_v24 = vld [vmem:[%s4377_s7 + $0x30] sm:$0xff]  }
 0x127   : > { %v1430_v8 = vsel %vm4420_vm3, %v1425_v37, %v1429_v5  ;;  %v2301_v47 = vrot.slane %v2300_v52, 4  ;;  %v2315_v26 = vrot.slane %v2313_v43, 5  ;;  %v3218_v33 = vrot.slane %v3210_v57, 9 }
 0x128   : > { %v2520_v31 = vrot.slane %v4876_v40, 5  ;;  %v2311_v50 = vrot.slane %v2310_v34, 4  ;;  %v2519_v32 = vrot.slane %v2517_v62, 4  ;;  %v1410_v18 = vrot.slane %v1408_v29, 4 }
 0x129   : > { %v1413_v22 = vrot.slane %v1411_v6, 5  ;;  %v3200_v3 = vcombine.low %v2282_v63, %v2292_v11  ;;  %v2306_v44 = vsel %vm4420_vm3, %v2301_v47, %v5052_v14  ;;  %v2518_v41 = vsel %vm4565_vm7, %v3218_v33, %v2517_v62  ;;  %v3213_v63 = vld [vmem:[%s4377_s7 + $0x3c] sm:$0xe]  ;;  %v3082_v6 = vld [vmem:[%s4377_s7 + $0x54] sm:$0xf] }
 0x12a   : > { %3465 = vmatmul.mubr.msk.bf16.gmra.mrb[4].mxu0 %vm522_vm4, %v3197_v58  ;;  %v2524_v40 = vrot.slane %v4858_v48, 5  ;;  %v2316_v56 = vsel %vm4420_vm3, %v2311_v50, %v2315_v26  ;;  %v2521_v58 = vsel %vm4565_vm7, %v2519_v32, %v2520_v31  ;;  %v2531_v37 = vrot.slane %v4872_v2, 5  ;;  %v3214_v33 = vld [vmem:[%s4377_s7 + $0x48] sm:$0xe] }
 0x12b   : > { %3383 = vmatmul.mubr.msk.bf16.gmra.mrb[12].mxu1 %vm522_vm4, %v5405_v25  ;;  %3468 = vmatprep.mubr.msk.bf16.mxu0 %vm522_vm4, %v3198_v49  ;;  %v1414_v36 = vor.u32 %v1413_v22, %v1410_v18  ;;  %v1384_v14 = vshrl.u32 %v3076_v17, 16  ;;  %v1387_v49 = vshll.u32 %v3076_v17, 16  ;;  %v1393_v48 = vshll.u32 %v4667_v21, 16  ;;  %v3794_v25 = vld [vmem:[%s4377_s7 + $0x3c] sm:$0xff]  }
 0x12c   : > { %3388 = vmatprep.mubr.msk.bf16.mxu1 %vm522_vm4, %v3790_v13  ;;  %v1397_v23 = vshrl.u32 %v4667_v21, 16  ;;  %v3219_v13 = vrot.slane %v3211_v55, 9  ;;  %v2526_v54 = vrot.slane %v2524_v40, 4  ;;  %v2527_v12 = vrot.slane %v4905_v42, 5 }
 0x12d   : > { %v1415_v5 = vrot.slane %v1414_v36, 4  ;;  %v3220_v46 = vrot.slane %v3212_v45, 9  ;;  %v3201_v52 = vcombine.low %v2306_v44, %v2316_v56  ;;  %v3226_v43 = vcombine.low %v2518_v41, %v2521_v58  ;;  %v3795_v44 = vld [vmem:[%s4377_s7 + $0x48] sm:$0xff]   ;;  %v3796_v56 = vld [vmem:[%s4377_s7 + $0x54] sm:$0xff]  }
 0x12e   : > { %v2533_v21 = vrot.slane %v2531_v37, 4  ;;  %v1386_v34 = vrot.slane %v1384_v14, 4  ;;  %v1389_v57 = vrot.slane %v1387_v49, 5  ;;  %v5111_v62 = vrot.slane %v1393_v48, 5 }
 0x12f   : > { %v1420_v2 = vsel %vm4420_vm3, %v1415_v5, %v4911_v16  ;;  %v1399_v16 = vrot.slane %v1397_v23, 4  ;;  %v2525_v42 = vsel %vm4565_vm7, %v3219_v13, %v2524_v40  ;;  %v2538_v11 = vrot.slane %v4925_v0, 5  ;;  %v3085_v5 = vld [vmem:[%s4377_s7 + $0x60] sm:$0xf] }
 0x130   : > { %v5107_v59 = vcombine.low %v1420_v2, %v1430_v8  ;;  %v1403_v29 = vshll.u32 %v4670_v60, 16  ;;  %v1390_v47 = vor.u32 %v1389_v57, %v1386_v34  ;;  %v2545_v31 = vrot.slane %v4934_v39, 5  ;;  %v3215_v2 = vld [vmem:[%s4377_s7 + $0x54] sm:$0xe]  ;;  %v5407_v57 = vld [vmem:[#allocation19_spill] sm:$0xff] }
 0x131   : > { %v1400_v26 = vor.u32 %v1399_v16, %v5111_v62  ;;  %v3221_v60 = vrot.slane %v3213_v63, 9  ;;  %v2541_v50 = vrot.slane %v4965_v35, 5  ;;  %v1432_v32 = vshrl.u32 %v3082_v6, 16 }
 0x132   : > { %3469 = vmatmul.mubr.msk.bf16.gmra.mrb[8].mxu0 %vm522_vm4, %v3199_v19  ;;  %v2528_v19 = vsel %vm4565_vm7, %v2526_v54, %v2527_v12  ;;  %v1435_v18 = vshll.u32 %v3082_v6, 16  ;;  %v1441_v22 = vshll.u32 %v4701_v61, 16  ;;  %v1405_v17 = vrot.slane %v1403_v29, 5 }
 0x133   : > { %3389 = vmatmul.mubr.msk.bf16.vlgmr.msra.gmra.mrb[0].mxu1 %vm522_vm4, %v3791_v38  ;;  %3472 = vmatprep.mubr.msk.bf16.mxu0 %vm522_vm4, %v3200_v3  ;;  %v3227_v0 = vcombine.low %v2525_v42, %v2528_v19  ;;  %v1445_v38 = vshrl.u32 %v4701_v61, 16  ;;  %v3222_v36 = vrot.slane %v3214_v33, 9  ;;  %v1391_v39 = vrot.slane %v1390_v47, 4 }
 0x134   : > { %3495 = vmatpush3.bf16.msra.mxu1 %v4386_v4  ;;  %3392 = vmatprep.mubr.msk.bf16.mxu1 %vm522_vm4, %v3792_v1  ;;  %v2534_v4 = vrot.slane %v4915_v15, 5  ;;  %v2532_v15 = vsel %vm4565_vm7, %v3220_v46, %v2531_v37  ;;  %v2540_v1 = vrot.slane %v2538_v11, 4  ;;  %v1401_v41 = vrot.slane %v1400_v26, 4 }
 0x135   : > { %v2547_v55 = vrot.slane %v2545_v31, 4  ;;  %v2548_v40 = vrot.slane %v4968_v20, 5  ;;  %v1434_v35 = vrot.slane %v1432_v32, 4  ;;  %v1437_v58 = vrot.slane %v1435_v18, 5 }
 0x136   : > { %v2535_v8 = vsel %vm4565_vm7, %v2533_v21, %v2534_v4  ;;  %v1443_v45 = vrot.slane %v1441_v22, 5  ;;  %v1447_v37 = vrot.slane %v1445_v38, 4  ;;  %v2539_v61 = vsel %vm4565_vm7, %v3221_v60, %v2538_v11  ;;  %v5408_v38 = vld [vmem:[#allocation21_spill] sm:$0xff] }
 0x137   : > { %v3228_v3 = vcombine.low %v2532_v15, %v2535_v8  ;;  %v2542_v14 = vsel %vm4565_vm7, %v2540_v1, %v2541_v50  ;;  %v2546_v49 = vsel %vm4565_vm7, %v3222_v36, %v2545_v31  ;;  %v2552_v20 = vrot.slane %v4962_v27, 5  ;;  %v3216_v27 = vld [vmem:[%s4377_s7 + $0x60] sm:$0xe]  ;;  %v3217_v1 = vld [vmem:[%s4377_s7 + $0x6c] sm:$0xe] }
 0x138   : > { %v1396_v48 = vsel %vm4420_vm3, %v1391_v39, %v5111_v62  ;;  %v1406_v23 = vsel %vm4420_vm3, %v1401_v41, %v1405_v17  ;;  %v2549_v13 = vsel %vm4565_vm7, %v2547_v55, %v2548_v40  ;;  %v2559_v54 = vrot.slane %v4987_v9, 5  ;;  %v3797_v9 = vld [vmem:[%s4377_s7 + $0x60] sm:$0xff]   ;;  %s3949_s7 = sshll.u32 %s4083_s2, 4  ;;  %s3950_s7 = int_to_ptr.vmem [resolvable:$false] %s3949_s7 }
 0x139   : > { %v1456_v12 = vshrl.u32 %v3085_v5, 16  ;;  %v1459_v46 = vshll.u32 %v3085_v5, 16  ;;  %v3229_v4 = vcombine.low %v2539_v61, %v2542_v14  ;;  %v1448_v34 = vor.u32 %v1447_v37, %v1443_v45  ;;  %s3951_s30 = scalar_lea.vmem %s3950_s7, 4096  ;;  %p3952_p13 = scmp.lt.s32.totalorder %s5277_s22, %s3950_s7 }
 0x13a   : > { %3473 = vmatmul.mubr.msk.bf16.gmra.mrb[12].mxu0 %vm522_vm4, %v3201_v52  ;;  %v5406_v52 = vld [vmem:[#allocation20_spill] sm:$0xff]  ;;  %v1451_v62 = vshll.u32 %v5407_v57, 16  ;;  %v3230_v16 = vcombine.low %v2546_v49, %v2549_v13  ;;  %v2554_v42 = vrot.slane %v2552_v20, 4  ;;  %v2555_v19 = vrot.slane %v4999_v10, 5  ;;  %p3953_p6 = scmp.lt.s32.totalorder %s3951_s30, %s3945_s29 }
 0x13b   : > { %3393 = vmatmul.mubr.msk.bf16.gmra.mrb[4].mxu1 %vm522_vm4, %v3793_v24  ;;  %3478 = vmatprep.mubr.msk.bf16.mxu0 %vm522_vm4, %v3226_v43  ;;  %v1465_v43 = vshll.u32 %v5406_v52, 16  ;;  %v1469_v21 = vshrl.u32 %v5406_v52, 16  ;;  %v1438_v24 = vor.u32 %v1437_v58, %v1434_v35  ;;  %v3092_v63 = vcombine.low %v1396_v48, %v1406_v23 }
 0x13c   : > { %3396 = vmatprep.mubr.msk.bf16.mxu1 %vm522_vm4, %v3794_v25  ;;  %v3223_v25 = vrot.slane %v3215_v2, 9  ;;  %v3224_v15 = vrot.slane %v3216_v27, 9  ;;  %v2561_v11 = vrot.slane %v2559_v54, 4  ;;  %v2562_v29 = vrot.slane %v5023_v7, 5  ;;  %v5202_v27 = vld [vmem:[#allocation7] ss:$0 sm:$0xff]  ;;  %p3954_p8 = por %p3953_p6, %p3952_p13 }
 0x13d   : > { %v1458_v6 = vrot.slane %v1456_v12, 4  ;;  %v1461_v8 = vrot.slane %v1459_v46, 5  ;;  %v1467_v47 = vrot.slane %v1465_v43, 5  ;;  %v1471_v26 = vrot.slane %v1469_v21, 4  ;;  %v5204_v46 = vld [vmem:[#allocation8] ss:$0 sm:$0xff] }
 0x13e   : > { %v1439_v33 = vrot.slane %v1438_v24, 4  ;;  %v1449_v31 = vrot.slane %v1448_v34, 4  ;;  %v2553_v10 = vsel %vm4565_vm7, %v3223_v25, %v2552_v20  ;;  %v2556_v7 = vsel %vm4565_vm7, %v2554_v42, %v2555_v19  ;;  %p3955_p12 = pnand %p3954_p8, %p3948_p5 }
 0x13f   : > { %v2560_v60 = vsel %vm4565_vm7, %v3224_v15, %v2559_v54  ;;  %v2566_v50 = vrot.slane %v5014_v28, 5  ;;  %v2563_v32 = vsel %vm4565_vm7, %v2561_v11, %v2562_v29  ;;  %v1462_v18 = vor.u32 %v1461_v8, %v1458_v6 }
 0x140   : > { %v1472_v22 = vor.u32 %v1471_v26, %v1467_v47  ;;  %v1444_v17 = vsel %vm4420_vm3, %v1439_v33, %v1443_v45  ;;  %v3232_v39 = vcombine.low %v2560_v60, %v2563_v32  ;;  %v3225_v41 = vrot.slane %v3217_v1, 9 }
 0x141   : > { %v2568_v28 = vrot.slane %v2566_v50, 4  ;;  %v2569_v55 = vrot.slane %v5050_v51, 5 }
 0x142   : > { %3479 = vmatmul.mubr.msk.bf16.vlgmr.msra.gmra.mrb[0].mxu0 %vm522_vm4, %v3227_v0  ;;  %v1453_v0 = vrot.slane %v1451_v62, 5  ;;  %v1473_v35 = vrot.slane %v1472_v22, 4  ;;  %v2567_v45 = vsel %vm4565_vm7, %v3225_v41, %v2566_v50 }
 0x143   : > { %3397 = vmatmul.mubr.msk.bf16.gmra.mrb[8].mxu1 %vm522_vm4, %v3795_v44  ;;  %3482 = vmatprep.mubr.msk.bf16.mxu0 %vm522_vm4, %v3228_v3  ;;  %v1475_v3 = vshll.u32 %v5408_v38, 16  ;;  %v3231_v44 = vcombine.low %v2553_v10, %v2556_v7  ;;  %v2570_v37 = vsel %vm4565_vm7, %v2568_v28, %v2569_v55 }
 0x144   : > { %3400 = vmatprep.mubr.msk.bf16.mxu1 %vm522_vm4, %v3796_v56  ;;  %v1454_v36 = vsel %vm4420_vm3, %v1449_v31, %v1453_v0  ;;  %v1463_v56 = vrot.slane %v1462_v18, 4  ;;  %v3233_v61 = vcombine.low %v2567_v45, %v2570_v37 }
 0x145   : > { %v3094_v40 = vcombine.low %v1444_v17, %v1454_v36  ;;  %v1477_v58 = vrot.slane %v1475_v3, 5 }
 0x146   : > { %v1468_v51 = vsel %vm4420_vm3, %v1463_v56, %v1467_v47 }
 0x147   : > { %v1478_v5 = vsel %vm4420_vm3, %v1473_v35, %v1477_v58 }
 0x148   : > { %v3095_v14 = vcombine.low %v1468_v51, %v1478_v5 }
 0x14a   : > { %3483 = vmatmul.mubr.msk.bf16.gmra.mrb[4].mxu0 %vm522_vm4, %v3229_v4 }
 0x14b   : > { %3401 = vmatmul.mubr.msk.bf16.gmra.mrb[12].mxu1 %vm522_vm4, %v3797_v9  ;;  %3486 = vmatprep.mubr.msk.bf16.mxu0 %vm522_vm4, %v3230_v16 }
 0x14c   : > { %3414 = vmatprep.mubr.msk.bf16.mxu1 %vm522_vm4, %v3092_v63 }
 0x152   : > { %3487 = vmatmul.mubr.msk.bf16.gmra.mrb[8].mxu0 %vm522_vm4, %v3231_v44 }
 0x153   : > { %3415 = vmatmul.mubr.msk.bf16.vlgmr.msra.gmra.mrb[8].mxu1 %vm522_vm4, %v5107_v59  ;;  %3490 = vmatprep.mubr.msk.bf16.mxu0 %vm522_vm4, %v3232_v39 }
 0x154   : > { %3418 = vmatprep.mubr.msk.bf16.mxu1 %vm522_vm4, %v3094_v40 }
 0x15a   : > { %3491 = vmatmul.mubr.msk.bf16.gmra.mrb[12].mxu0 %vm522_vm4, %v3233_v61 }
 0x15b   : > { %3419 = vmatmul.mubr.msk.bf16.gmra.mrb[12].mxu1 %vm522_vm4, %v3095_v14 }
 0x206   : > { %v3390_v59 = vpop.f32.mrb[0].mxu1 }
 0x207   : > { %v1184_v49 = vpop.f32.mrb[1].mxu1 }
 0x208   : > { %v3391_v20 = vpop.f32.mrb[2].mxu1 }
 0x209   : > { %v1187_v48 = vpop.f32.mrb[3].mxu1 }
 0x20e   : > { %v3394_v53 = vpop.f32.mrb[4].mxu1 }
 0x20f   : > { %v1200_v23 = vpop.f32.mrb[5].mxu1 }
 0x210   : > { %v3395_v13 = vpop.f32.mrb[6].mxu1 }
 0x211   : > { %v1203_v2 = vpop.f32.mrb[7].mxu1 }
 0x215   : > { %v3480_v54 = vpop.f32.mrb[0].mxu0 }
 0x216   : > { %v3496_v12 = vadd.f32 %v3480_v54, %v3390_v59  ;;  %v2658_v30 = vpop.f32.mrb[1].mxu0 }
 0x217   : > { %v3497_v52 = vadd.f32 %v2658_v30, %v1184_v49  ;;  %v3481_v43 = vpop.f32.mrb[2].mxu0 }
 0x218   : > { %v2746_v21 = vmul.f32 %v3496_v12, %v5202_v27  ;;  %v3498_v4 = vadd.f32 %v3481_v43, %v3391_v20  ;;  %v2661_v24 = vpop.f32.mrb[3].mxu0 }
 0x219   : > { %v2744_v34 = vmul.f32 %v3497_v52, %v5202_v27  ;;  %v3499_v57 = vadd.f32 %v2661_v24, %v1187_v48 }
 0x21a   : > { %v2769_v62 = vadd.f32 %v5204_v46, %v2746_v21  ;;  %v2747_v16 = vmul.f32 %v3498_v4, %v5202_v27 }
 0x21b   : > { %v2767_v25 = vadd.f32 %v5204_v46, %v2744_v34  ;;  %v2745_v42 = vmul.f32 %v3499_v57, %v5202_v27 }
 0x21c   : > { %3798 = vtanh.f32 %v2769_v62  ;;  %v2770_v19 = vadd.f32 %v5204_v46, %v2747_v16 }
 0x21d   : > { %3800 = vtanh.f32 %v2767_v25  ;;  %v2768_v9 = vadd.f32 %v5204_v46, %v2745_v42  ;;  %v3484_v63 = vpop.f32.mrb[4].mxu0 }
 0x21e   : > { %3802 = vtanh.f32 %v2770_v19  ;;  %v3500_v15 = vadd.f32 %v3484_v63, %v3394_v53  ;;  %v2674_v11 = vpop.f32.mrb[5].mxu0 }
 0x21f   : > { %3804 = vtanh.f32 %v2768_v9  ;;  %v3501_v29 = vadd.f32 %v2674_v11, %v1200_v23  ;;  %v3485_v6 = vpop.f32.mrb[6].mxu0 }
 0x220   : > { %v2750_v8 = vmul.f32 %v3500_v15, %v5202_v27  ;;  %v3502_v47 = vadd.f32 %v3485_v6, %v3395_v13  ;;  %v2677_v26 = vpop.f32.mrb[7].mxu0 }
 0x221   : > { %v2748_v33 = vmul.f32 %v3501_v29, %v5202_v27  ;;  %v3503_v31 = vadd.f32 %v2677_v26, %v1203_v2 }
 0x222   : > { %v2773_v0 = vadd.f32 %v5204_v46, %v2750_v8  ;;  %v2751_v10 = vmul.f32 %v3502_v47, %v5202_v27 }
 0x223   : > { %v2771_v7 = vadd.f32 %v5204_v46, %v2748_v33  ;;  %v2749_v60 = vmul.f32 %v3503_v31, %v5202_v27 }
 0x224   : > { %3806 = vtanh.f32 %v2773_v0  ;;  %v2774_v50 = vadd.f32 %v5204_v46, %v2751_v10 }
 0x225   : > { %3808 = vtanh.f32 %v2771_v7  ;;  %v2772_v32 = vadd.f32 %v5204_v46, %v2749_v60  ;;  %v3488_v18 = vpop.f32.mrb[8].mxu0 }
 0x226   : > { %v3799_v22 = vpop.eup %3798  ;;  %3810 = vtanh.f32 %v2774_v50  ;;  %v3416_v38 = vpop.f32.mrb[8].mxu1 }
 0x227   : > { %v2690_v3 = vpop.f32.mrb[9].mxu0  ;;  %v3801_v1 = vpop.eup %3800  ;;  %2802 = vst.msk [vmem:[%s5225_s26 + $0x10] sm:$0xff] %vm2799_vm8, %v3799_v22  ;;  %3812 = vtanh.f32 %v2772_v32  ;;  %v3504_v17 = vadd.f32 %v3488_v18, %v3416_v38 }
 0x228   : > { %v1598_v36 = vpop.f32.mrb[9].mxu1  ;;  %v3489_v44 = vpop.f32.mrb[10].mxu0  ;;  %2800 = vst.msk [vmem:[%s5225_s26] sm:$0xff] %vm2799_vm8, %v3801_v1 }
 0x229   : > { %v3803_v39 = vpop.eup %3802  ;;  %v3505_v41 = vadd.f32 %v2690_v3, %v1598_v36  ;;  %v3417_v28 = vpop.f32.mrb[10].mxu1  ;;  %v2754_v56 = vmul.f32 %v3504_v17, %v5202_v27 }
 0x22a   : > { %v2693_v55 = vpop.f32.mrb[11].mxu0  ;;  %v3805_v40 = vpop.eup %3804  ;;  %2803 = vst.msk [vmem:[%s5225_s26 + $0x18] sm:$0xff] %vm2799_vm8, %v3803_v39  ;;  %v3506_v35 = vadd.f32 %v3489_v44, %v3417_v28 }
 0x22b   : > { %v1601_v58 = vpop.f32.mrb[11].mxu1  ;;  %2801 = vst.msk [vmem:[%s5225_s26 + $0x8] sm:$0xff] %vm2799_vm8, %v3805_v40  ;;  %v2752_v45 = vmul.f32 %v3505_v41, %v5202_v27  ;;  %v2777_v51 = vadd.f32 %v5204_v46, %v2754_v56 }
 0x22c   : > { %v3507_v37 = vadd.f32 %v2693_v55, %v1601_v58  ;;  %v2755_v5 = vmul.f32 %v3506_v35, %v5202_v27 }
 0x22d   : > { %v2775_v61 = vadd.f32 %v5204_v46, %v2752_v45  ;;  %3814 = vtanh.f32 %v2777_v51  ;;  %v3492_v49 = vpop.f32.mrb[12].mxu0 }
 0x22e   : > { %v2753_v14 = vmul.f32 %v3507_v37, %v5202_v27  ;;  %v2778_v59 = vadd.f32 %v5204_v46, %v2755_v5  ;;  %v3807_v20 = vpop.eup %3806  ;;  %v3420_v53 = vpop.f32.mrb[12].mxu1 }
 0x22f   : > { %3816 = vtanh.f32 %v2775_v61  ;;  %v2706_v23 = vpop.f32.mrb[13].mxu0  ;;  %v3809_v13 = vpop.eup %3808  ;;  %2806 = vst.msk [vmem:[%s5225_s26 + $0x30] sm:$0xff] %vm2799_vm8, %v3807_v20  ;;  %v3508_v2 = vadd.f32 %v3492_v49, %v3420_v53 }
 0x230   : > { %v2776_v48 = vadd.f32 %v5204_v46, %v2753_v14  ;;  %3818 = vtanh.f32 %v2778_v59  ;;  %v1614_v54 = vpop.f32.mrb[13].mxu1  ;;  %v3493_v12 = vpop.f32.mrb[14].mxu0  ;;  %2804 = vst.msk [vmem:[%s5225_s26 + $0x20] sm:$0xff] %vm2799_vm8, %v3809_v13 }
 0x231   : > { %v3811_v30 = vpop.eup %3810  ;;  %v3509_v52 = vadd.f32 %v2706_v23, %v1614_v54  ;;  %v3421_v43 = vpop.f32.mrb[14].mxu1  ;;  %v2758_v24 = vmul.f32 %v3508_v2, %v5202_v27 }
 0x232   : > { %3820 = vtanh.f32 %v2776_v48  ;;  %v2709_v21 = vpop.f32.mrb[15].mxu0  ;;  %v3813_v4 = vpop.eup %3812  ;;  %2807 = vst.msk [vmem:[%s5225_s26 + $0x38] sm:$0xff] %vm2799_vm8, %v3811_v30  ;;  %v3510_v34 = vadd.f32 %v3493_v12, %v3421_v43 }
 0x233   : > { %v1617_v57 = vpop.f32.mrb[15].mxu1  ;;  %2805 = vst.msk [vmem:[%s5225_s26 + $0x28] sm:$0xff] %vm2799_vm8, %v3813_v4  ;;  %v2756_v62 = vmul.f32 %v3509_v52, %v5202_v27  ;;  %v2781_v25 = vadd.f32 %v5204_v46, %v2758_v24 }
 0x234   : > { %v3511_v16 = vadd.f32 %v2709_v21, %v1617_v57  ;;  %v2759_v42 = vmul.f32 %v3510_v34, %v5202_v27 }
 0x235   : > { %v2779_v19 = vadd.f32 %v5204_v46, %v2756_v62  ;;  %3822 = vtanh.f32 %v2781_v25 }
 0x236   : > { %v2757_v9 = vmul.f32 %v3511_v16, %v5202_v27  ;;  %v2782_v63 = vadd.f32 %v5204_v46, %v2759_v42 }
 0x237   : > { %3824 = vtanh.f32 %v2779_v19  ;;  %v3815_v11 = vpop.eup %3814 }
 0x238   : > { %v2780_v15 = vadd.f32 %v5204_v46, %v2757_v9  ;;  %3826 = vtanh.f32 %v2782_v63  ;;  %2810 = vst.msk [vmem:[%s5225_s26 + $0x50] sm:$0xff] %vm2799_vm8, %v3815_v11 }
 0x239   : > { %v3817_v29 = vpop.eup %3816 }
 0x23a   : > { %3828 = vtanh.f32 %v2780_v15  ;;  %v3819_v6 = vpop.eup %3818  ;;  %2808 = vst.msk [vmem:[%s5225_s26 + $0x40] sm:$0xff] %vm2799_vm8, %v3817_v29 }
 0x23b   : > { %2811 = vst.msk [vmem:[%s5225_s26 + $0x58] sm:$0xff] %vm2799_vm8, %v3819_v6 }
 0x23c   : > { %v3821_v27 = vpop.eup %3820 }
 0x23d   : > { %2809 = vst.msk [vmem:[%s5225_s26 + $0x48] sm:$0xff] %vm2799_vm8, %v3821_v27 }
 0x23f   : > { %v3823_v46 = vpop.eup %3822 }
 0x240   : > { %2814 = vst.msk [vmem:[%s5225_s26 + $0x70] sm:$0xff] %vm2799_vm8, %v3823_v46 }
 0x241   : > { %v3825_v8 = vpop.eup %3824 }
 0x242   : > { %v3827_v47 = vpop.eup %3826  ;;  %2812 = vst.msk [vmem:[%s5225_s26 + $0x60] sm:$0xff] %vm2799_vm8, %v3825_v8 }
 0x243   : > { %2815 = vst.msk [vmem:[%s5225_s26 + $0x78] sm:$0xff] %vm2799_vm8, %v3827_v47 }
 0x244   : > { %v3829_v26 = vpop.eup %3828 }
 0x245   : > { %2813 = vst.msk [vmem:[%s5225_s26 + $0x68] sm:$0xff] %vm2799_vm8, %v3829_v26 }
 0x246   : > { %3958 = shalt.err (!%p3955_p12)
}
 0x247   : > { %s3959_s28 = scalar_lea.hbm %s5275_s14, 2048  ;;  %s3963_s27 = scalar_lea.hbm %s5411_s11, 8192 }
 0x248   : > { %p3960_p4 = scmp.ne.s32.totalorder %s5275_s14, %s3959_s28  ;;  %p3964_p0 = scmp.lt.u32.totalorder %s5275_s14, %s5411_s11 }
 0x249   : > { %p3965_p1 = scmp.lt.u32.totalorder %s3963_s27, %s3959_s28  ;;  %p3967_p10 = scmp.lt.u32.totalorder %s3959_s28, %s5275_s14 }
 0x24a   : > { %p3961_p7 = pnand %p3960_p4, %p5412_p2 }
 0x24b   : > { %p3966_p11 = por %p3965_p1, %p3964_p0 }
 0x24c   : > { %p3962_p3 = pneg %p3961_p7 }
 0x24d   : > { %p3968_p9 = por %p3967_p10, %p3966_p11 }
 0x24f   : > { %p3969_p5 = pnand %p3968_p9, %p3962_p3 }
 0x251   : > { %3972 = shalt.err (!%p3969_p5)
}
 0x252   : > { %s4084_s21 = smov 128   ;;  %s4085_s18 = smov 8  }
 0x253   : > { %3651 = dma.vmem_to_hbm [thread:$0]  (%p5412_p2), %s5277_s22, 2048, %s5275_s14, %s5287_s13, %s4084_s21, %s4084_s21, %s4085_s18  }
 0x254 PF: > { %s5413_s1 = sld [smem:[#allocation15_spill]]  ;;  %s5414_s29 = sld [smem:[#allocation18_spill]] }
 0x255   : > { %p3678_p13 = scmp.ge.s32.totalorder %s4075_s25, 2 }
 0x25a   : > { %s2847_s2 = sand.u32 1, %s5413_s1   ;;  %p5415_p6 = scmp.ne.s32.totalorder %s5414_s29, 0 }
 0x25b   : > { %s2848_s7 = scalar_lea.sflag [#allocation4], %s2847_s2 }
 0x25c   : > { %p3668_p8 = pnand %p3678_p13, %p5415_p6 }
 0x25e   : > { %4030 = dma.done.wait (!%p3668_p8), %s2848_s7, 2048  }
 0x25f   : > { %4032 = vsyncadd (!%p3668_p8), %s2848_s7, 4294965248  ;;  %s22_s25 = sadd.s32 1, %s4075_s25   ;;  %s5416_s30 = smov %s4313_s15 }
 0x260   : > { %p19_p12 = scmp.ge.s32.totalorder %s22_s25, 6   ;;  %s5417_s15 = smov %s4039_s16 }
 0x261   : > { %s5418_s16 = smov %s4043_s17  ;;  %s5419_s17 = smov %s5416_s30 }
 0x262   : > { %s5420_s18 = smov %s4051_s19  ;;  %s5421_s19 = smov %s4055_s20 }
 0x263   : > { %s5422_s20 = smov %s4308_s4  ;;  %s5423_s21 = smov %s4067_s23 }
 0x264   : > { %s5424_s22 = smov %s4071_s24  ;;  %s5425_s23 = smov %s5428_s6 }
 0x265   : > { %s5426_s24 = smov %s5432_s5  ;;  %21 = sbr.rel (!%p19_p12) target bundleno = 15 (0xf), region = 104 }
 0x26c   :  { %2853 = vsyncpa [#allocation3], 1 }
 0x26d   :  { %2855 = vsyncpa [#allocation3 + $0x1], 1 }
 0x26e   :  { %2856 = vsyncpa [#allocation6], 1 }
 0x26f   :  { %2857 = vsyncpa [#allocation9], 1 }
 0x270   :  { %2858 = vsyncpa [#allocation4], 1 }
 0x271   :  { %2860 = vsyncpa [#allocation4 + $0x1], 1 }

// kernel: c2f_dysnakeconv_forward.17
= control target key start
LH: loop header
LB: loop body
LE: loop exit
PB: predicated region body
PF: predicated region fallthrough
CT: control target
= control target key end

     0   :  { %11 = vsyncpa [#allocation3], 0  ;;  %s3426_s0 = inlined_call_operand.hbm [shape: bf16[2,256,24], index: 0, kind: input, shape index: {}]   ;;  %s3427_s1 = inlined_call_operand.hbm [shape: bf16[24,8], index: 1, kind: input, shape index: {}]   ;;  %s3428_s2 = inlined_call_operand.hbm [shape: f32[1,8], index: 2, kind: input, shape index: {}]   ;;  %s3429_s3 = inlined_call_operand.hbm [shape: f32[1,8], index: 3, kind: input, shape index: {}]   ;;  %s3430_s4 = inlined_call_operand.hbm [shape: f32[1,8], index: 4, kind: input, shape index: {}]   ;;  %s3431_s5 = inlined_call_operand.hbm [shape: f32[2,8], index: 5, kind: input, shape index: {}]   ;;  %s3432_s6 = inlined_call_operand.hbm [shape: bf16[2,256,8], index: 6, kind: output, shape index: {}]  }
   0x1   :  { %13 = vsyncpa [#allocation3 + $0x1], 0 }
   0x2   :  { %14 = vsyncpa [#allocation6], 0 }
   0x3   :  { %15 = vsyncpa [#allocation9], 0 }
   0x4   :  { %16 = vsyncpa [#allocation12], 0 }
   0x5   :  { %17 = vsyncpa [#allocation4], 0 }
   0x6   :  { %19 = vsyncpa [#allocation4 + $0x1], 0  ;;  %s2310_s21 = smov 0   ;;  %s2312_s22 = smov 0  }
   0x7   :  { %s2314_s23 = smov 0   ;;  %s2316_s24 = smov 0  }
   0x8 LB: > { %s2264_s25 = smov [#allocation5]   ;;  %s2331_s27 = sadd.s32 4294967295, %s2262_s24   ;;  %s2262_s24 = sphi %s2316_s24, %s3463_s24   ;;  %s2258_s23 = sphi %s2314_s23, %s3462_s23   ;;  %s2254_s22 = sphi %s2312_s22, %s3461_s22   ;;  %s2250_s21 = sphi %s2310_s21, %s3460_s21  }
   0x9   : > { %s199_s26 = sshll.u32 %s2264_s25, 4  ;;  %p1547_p0 = scmp.ge.s32.totalorder %s2262_s24, 1  ;;  %s2336_s26 = int_to_ptr.vmem [resolvable:$true] %s199_s26 }
   0xa   : > { %p3433_p1 = scmp.eq.s32.totalorder %s2331_s27, 0  ;;  %p187_p2 = scmp.lt.s32.totalorder %s2262_s24, 3 }
   0xb   : > { %s2265_s29 = smov [#allocation8]   ;;  %s2266_s8 = smov [#allocation7]  }
   0xc   : > { %p2338_p3 = pnand %p1547_p0, %p187_p2  ;;  %s224_s30 = sshll.u32 %s2265_s29, 4  ;;  %s2351_s30 = int_to_ptr.vmem [resolvable:$true] %s224_s30 }
   0xd   : > { %s213_s9 = sshll.u32 %s2266_s8, 4  ;;  %s2014_s12 = scalar_lea.hbm %s3427_s1, 192  ;;  %s2353_s9 = int_to_ptr.vmem [resolvable:$true] %s213_s9 }
   0xe   : > { %s3438_s28 = scalar_select %p2338_p3, 1, 0 }
   0xf   : > { %p1789_p5 = pneg %p2338_p3  ;;  %p2015_p7 = scmp.ne.s32.totalorder %s3427_s1, %s2014_s12 }
  0x10   : > { %p2021_p11 = scmp.lt.u32.totalorder %s2014_s12, %s3427_s1 }
  0x11   : > { %p2347_p6 = pnand %p1789_p5, %p3433_p1 }
  0x13   : > { %p2363_p8 = pneg %p2347_p6 }
  0x15   : > { %p2017_p9 = pnand %p2363_p8, %p2015_p7 }
  0x17   : > { %p2018_p10 = pneg %p2017_p9 }
  0x19   : > { %p2023_p12 = pnand %p2021_p11, %p2018_p10 }
  0x1b   : > { %2026 = shalt.err (!%p2023_p12)
}
  0x1c   : > { %s2027_s18 = scalar_lea.vmem %s2336_s26, 192  ;;  %p2035_p5 = scmp.lt.s32.totalorder %s2336_s26, %s2336_s26 }
  0x1d   : > { %p2028_p13 = scmp.ne.s32.totalorder %s2336_s26, %s2027_s18  ;;  %p2036_p4 = scmp.lt.s32.totalorder %s2027_s18, %s2027_s18 }
  0x1f   : > { %p2030_p0 = pnand %p2028_p13, %p2363_p8  ;;  %p2037_p7 = por %p2036_p4, %p2035_p5 }
  0x21   : > { %p2031_p2 = pneg %p2030_p0 }
  0x23   : > { %p2038_p9 = pnand %p2037_p7, %p2031_p2 }
  0x25   : > { %2041 = shalt.err (!%p2038_p9)
}
  0x26   : > { %s2267_s19 = smov 64   ;;  %s2268_s20 = smov 4  }
  0x27   : > { %1792 = dma.hbm_to_vmem [thread:$0]  (!%p2347_p6), %s3427_s1, 192, %s2336_s26, [#allocation6], %s2267_s19, %s2267_s19, %s2268_s20  }
  0x28   : > { %s2042_s11 = scalar_lea.hbm %s3429_s3, 16 }
  0x29   : > { %p2043_p4 = scmp.ne.s32.totalorder %s3429_s3, %s2042_s11  ;;  %p2049_p12 = scmp.lt.u32.totalorder %s2042_s11, %s3429_s3 }
  0x2b   : > { %p2045_p10 = pnand %p2043_p4, %p2363_p8 }
  0x2d   : > { %p2046_p11 = pneg %p2045_p10 }
  0x2f   : > { %p2051_p13 = pnand %p2049_p12, %p2046_p11 }
  0x31   : > { %2054 = shalt.err (!%p2051_p13)
}
  0x32   : > { %s2055_s26 = scalar_lea.vmem %s2351_s30, 16  ;;  %s2062_s17 = scalar_lea.vmem %s2351_s30, 32 }
  0x33   : > { %p2056_p0 = scmp.ne.s32.totalorder %s2351_s30, %s2055_s26  ;;  %p2063_p7 = scmp.lt.s32.totalorder %s2351_s30, %s2351_s30 }
  0x34   : > { %p2064_p9 = scmp.lt.s32.totalorder %s2062_s17, %s2055_s26 }
  0x35   : > { %p2058_p2 = pnand %p2056_p0, %p2363_p8 }
  0x36   : > { %p2065_p4 = por %p2064_p9, %p2063_p7 }
  0x37   : > { %p2059_p5 = pneg %p2058_p2 }
  0x39   : > { %p2066_p10 = pnand %p2065_p4, %p2059_p5 }
  0x3b   : > { %2069 = shalt.err (!%p2066_p10)
}
  0x3c   : > { %1798 = dma.hbm_to_vmem [thread:$0]  (!%p2347_p6), %s3429_s3, 16, %s2351_s30, [#allocation9]  }
  0x3d   : > { %s2070_s10 = scalar_lea.hbm %s3428_s2, 16 }
  0x3e   : > { %p2071_p11 = scmp.ne.s32.totalorder %s3428_s2, %s2070_s10  ;;  %p2077_p0 = scmp.lt.u32.totalorder %s2070_s10, %s3428_s2 }
  0x40   : > { %p2073_p12 = pnand %p2071_p11, %p2363_p8 }
  0x42   : > { %p2074_p13 = pneg %p2073_p12 }
  0x44   : > { %p2079_p2 = pnand %p2077_p0, %p2074_p13 }
  0x46   : > { %2082 = shalt.err (!%p2079_p2)
}
  0x47   : > { %s2083_s30 = scalar_lea.vmem %s2353_s9, 16  ;;  %s2090_s16 = scalar_lea.vmem %s2353_s9, 32 }
  0x48   : > { %p2084_p5 = scmp.ne.s32.totalorder %s2353_s9, %s2083_s30  ;;  %p2091_p4 = scmp.lt.s32.totalorder %s2353_s9, %s2353_s9 }
  0x49   : > { %p2092_p10 = scmp.lt.s32.totalorder %s2090_s16, %s2083_s30 }
  0x4a   : > { %p2086_p7 = pnand %p2084_p5, %p2363_p8 }
  0x4b   : > { %p2093_p11 = por %p2092_p10, %p2091_p4 }
  0x4c   : > { %p2087_p9 = pneg %p2086_p7 }
  0x4e   : > { %p2094_p12 = pnand %p2093_p11, %p2087_p9 }
  0x50   : > { %2097 = shalt.err (!%p2094_p12)
}
  0x51   : > { %1795 = dma.hbm_to_vmem [thread:$0]  (!%p2347_p6), %s3428_s2, 16, %s2353_s9, [#allocation6]  }
  0x52   : > { %s2269_s18 = smov [#allocation10]   ;;  %s2270_s29 = smov [#allocation11]  }
  0x53   : > { %s235_s25 = sshll.u32 %s2269_s18, 4  ;;  %s246_s8 = sshll.u32 %s2270_s29, 4  ;;  %s236_s25 = int_to_ptr.vmem [resolvable:$true] %s235_s25  ;;  %s247_s8 = int_to_ptr.vmem [resolvable:$true] %s246_s8 }
  0x54   : > { %s2098_s12 = scalar_lea.hbm %s3430_s4, 16 }
  0x55   : > { %p2099_p13 = scmp.ne.s32.totalorder %s3430_s4, %s2098_s12  ;;  %p2105_p5 = scmp.lt.u32.totalorder %s2098_s12, %s3430_s4 }
  0x57   : > { %p2101_p0 = pnand %p2099_p13, %p2363_p8 }
  0x59   : > { %p2102_p2 = pneg %p2101_p0 }
  0x5b   : > { %p2107_p7 = pnand %p2105_p5, %p2102_p2 }
  0x5d   : > { %2110 = shalt.err (!%p2107_p7)
}
  0x5e   : > { %s2111_s9 = scalar_lea.vmem %s236_s25, 16  ;;  %s2118_s26 = scalar_lea.vmem %s236_s25, 32 }
  0x5f   : > { %p2112_p9 = scmp.ne.s32.totalorder %s236_s25, %s2111_s9  ;;  %p2119_p11 = scmp.lt.s32.totalorder %s236_s25, %s236_s25 }
  0x60   : > { %p2120_p12 = scmp.lt.s32.totalorder %s2118_s26, %s2111_s9 }
  0x61   : > { %p2114_p4 = pnand %p2112_p9, %p2363_p8 }
  0x62   : > { %p2121_p1 = por %p2120_p12, %p2119_p11 }
  0x63   : > { %p2115_p10 = pneg %p2114_p4 }
  0x65   : > { %p2122_p3 = pnand %p2121_p1, %p2115_p10 }
  0x67   : > { %2125 = shalt.err (!%p2122_p3)
}
  0x68   : > { %1801 = dma.hbm_to_vmem [thread:$0]  (!%p2347_p6), %s3430_s4, 16, %s236_s25, [#allocation9]  }
  0x69   : > { %s2126_s11 = scalar_lea.hbm %s3431_s5, 32 }
  0x6a   : > { %p2127_p13 = scmp.ne.s32.totalorder %s3431_s5, %s2126_s11  ;;  %p2133_p3 = scmp.lt.u32.totalorder %s2126_s11, %s3431_s5 }
  0x6c   : > { %p2129_p0 = pnand %p2127_p13, %p2363_p8 }
  0x6e   : > { %p2130_p1 = pneg %p2129_p0 }
  0x70   : > { %p2135_p2 = pnand %p2133_p3, %p2130_p1 }
  0x72   : > { %2138 = shalt.err (!%p2135_p2)
}
  0x73   : > { %s2139_s16 = scalar_lea.vmem %s247_s8, 32  ;;  %p2147_p4 = scmp.lt.s32.totalorder %s247_s8, %s247_s8 }
  0x74   : > { %p2140_p5 = scmp.ne.s32.totalorder %s247_s8, %s2139_s16  ;;  %p2148_p10 = scmp.lt.s32.totalorder %s2139_s16, %s2139_s16 }
  0x76   : > { %p2142_p7 = pnand %p2140_p5, %p2363_p8  ;;  %p2149_p11 = por %p2148_p10, %p2147_p4 }
  0x78   : > { %p2143_p9 = pneg %p2142_p7 }
  0x7a   : > { %p2150_p12 = pnand %p2149_p11, %p2143_p9 }
  0x7c   : > { %2153 = shalt.err (!%p2150_p12)
}
  0x7d   : > { %1804 = dma.hbm_to_vmem [thread:$0]  (!%p2347_p6), %s3431_s5, 32, %s247_s8, [#allocation12]  }
  0x7e   : > { %s1546_s15 = sadd.s32 4294967294, %s2262_s24   ;;  %s2473_s7 = sadd.s32 1, %s2262_s24  }
  0x7f   : > { %s32_s26 = sadd.s32 1, %s2258_s23  ;;  %s29_s17 = ssub.s32 %s2262_s24, %s2473_s7 }
  0x80   : > { %p39_p8 = scmp.ne.s32.totalorder %s2258_s23, %s2254_s22  ;;  %p30_p13 = scmp.eq.s32.totalorder %s29_s17, 0 }
  0x81   : > { %p40_p0 = scmp.eq.s32.totalorder %s2262_s24, 0  ;;  %p45_p1 = scmp.ne.s32.totalorder %s2254_s22, %s2250_s21 }
  0x82   : > { %p174_p3 = scmp.eq.s32.totalorder %s2331_s27, 1  ;;  %p3441_p5 = scmp.eq.s32.totalorder %s2331_s27, 0 }
  0x83   : > { %s2485_s18 = scalar_select %p30_p13, %s2258_s23, %s32_s26  }
  0x84   : > { %p41_p2 = por %p40_p0, %p39_p8  ;;  %p2489_p7 = por %p3441_p5, %p45_p1 }
  0x85   : > { %p2493_p6 = por %p174_p3, %p39_p8  ;;  %p180_p9 = scmp.eq.s32.totalorder %s1546_s15, 1 }
  0x86   : > { %p1818_p4 = scmp.lt.s32.totalorder %s2262_s24, 2  ;;  %s257_s10 = sand.u32 1, %s2258_s23  }
  0x87   : > { %s3443_s8 = scalar_select %p2493_p6, 1, 0 }
  0x88   : > { %p2499_p10 = por %p180_p9, %p45_p1  ;;  %s1554_s12 = sshll.u32 %s257_s10, 7 }
  0x89   : > { %s1671_s13 = sshll.u32 %s2262_s24, 11  ;;  %s261_s25 = scalar_lea.vmem [#allocation2], %s1554_s12 }
  0x8a   : > { %s3444_s11 = scalar_select %p2499_p10, 1, 0 }
  0x8b   : > { %s2507_s16 = scalar_lea.hbm %s3426_s0, %s1671_s13  ;;  %s268_s9 = sshll.u32 %s261_s25, 4  ;;  %s2513_s9 = int_to_ptr.vmem [resolvable:$true] %s268_s9 }
  0x8c   : > { %p2509_p11 = pnand %p1818_p4, %p41_p2  ;;  %s2515_s26 = scalar_lea.sflag [#allocation3], %s257_s10 }
  0x8d   : > { %s2154_s17 = scalar_lea.hbm %s2507_s16, 2048  ;;  %s2159_s14 = scalar_lea.hbm %s3426_s0, 4096 }
  0x8e   : > { %p2155_p12 = scmp.ne.s32.totalorder %s2507_s16, %s2154_s17  ;;  %p2156_p8 = pneg %p2509_p11 }
  0x8f   : > { %p2160_p1 = scmp.lt.u32.totalorder %s2507_s16, %s3426_s0  ;;  %p2161_p3 = scmp.lt.u32.totalorder %s2159_s14, %s2154_s17 }
  0x90   : > { %p2157_p13 = pnand %p2156_p8, %p2155_p12  ;;  %p2163_p5 = scmp.lt.u32.totalorder %s2154_s17, %s2507_s16 }
  0x91   : > { %p2162_p2 = por %p2161_p3, %p2160_p1 }
  0x92   : > { %p2158_p0 = pneg %p2157_p13 }
  0x93   : > { %p2164_p9 = por %p2163_p5, %p2162_p2 }
  0x95   : > { %p2165_p4 = pnand %p2164_p9, %p2158_p0 }
  0x97   : > { %2168 = shalt.err (!%p2165_p4)
}
  0x98   : > { %s2169_s10 = scalar_lea.vmem %s2513_s9, 2048  ;;  %s2271_s12 = smov [#allocation2]  }
  0x99   : > { %p2170_p12 = scmp.ne.s32.totalorder %s2513_s9, %s2169_s10  ;;  %s2174_s13 = sshll.u32 %s2271_s12, 4  ;;  %s2175_s13 = int_to_ptr.vmem [resolvable:$false] %s2174_s13 }
  0x9a   : > { %s2176_s30 = scalar_lea.vmem %s2175_s13, 4096  ;;  %p2177_p6 = scmp.lt.s32.totalorder %s2513_s9, %s2175_s13 }
  0x9b   : > { %p2172_p13 = pnand %p2170_p12, %p2156_p8  ;;  %p2178_p1 = scmp.lt.s32.totalorder %s2176_s30, %s2169_s10 }
  0x9d   : > { %p2173_p10 = pneg %p2172_p13  ;;  %p2179_p3 = por %p2178_p1, %p2177_p6 }
  0x9f   : > { %p2180_p2 = pnand %p2179_p3, %p2173_p10 }
  0xa1   : > { %2183 = shalt.err (!%p2180_p2)
}
  0xa2   : > { %1808 = dma.hbm_to_vmem [thread:$0]  (!%p2509_p11), %s2507_s16, 2048, %s2513_s9, %s2515_s26, %s2267_s19, %s2267_s19, %s2268_s20  }
  0xa3   : > { %p3446_p8 = scmp.ne.s32.totalorder %s3438_s28, 0 }
  0xa5   : > { %280 = sbr.rel (%p3446_p8) target bundleno = 775 (0x307), region = 44 }
  0xac   : > { %s2549_s17 = sand.u32 1, %s2254_s22  }
  0xad   : > { %s1558_s14 = sshll.u32 %s2549_s17, 7  ;;  %s283_s25 = scalar_lea.sflag [#allocation3], %s2549_s17 }
  0xae   : > { %s2555_s15 = scalar_lea.vmem [#allocation2], %s1558_s14 }
  0xaf   : > { %2229 = dma.done.wait (%p2489_p7), %s283_s25, 2048  }
  0xb0   : > { %2231 = vsyncadd (%p2489_p7), %s283_s25, 4294965248  ;;  %p3447_p6 = scmp.eq.s32.totalorder %s2331_s27, 0 }
  0xb2   : > { %2233 = dma.done.wait (%p3447_p6), [#allocation6], 208   ;;  %p3448_p10 = pmov %p3447_p6 }
  0xb3   : > { %p3449_p11 = pmov %p3447_p6 }
  0xb4   : > { %2235 = vsyncadd (%p3448_p10), [#allocation6], 4294967088 }
  0xb5   : > { %2237 = dma.done.wait (%p3449_p11), [#allocation9], 32   ;;  %p3450_p0 = pmov %p3447_p6 }
  0xb7   : > { %2239 = vsyncadd (%p3450_p0), [#allocation9], 4294967264  ;;  %p3451_p5 = pmov %p3450_p0 }
  0xb8   : > { %p3452_p9 = pmov %p3450_p0 }
  0xb9   : > { %2241 = dma.done.wait (%p3451_p5), [#allocation12], 32  }
  0xba   : > { %2243 = vsyncadd (%p3452_p9), [#allocation12], 4294967264  ;;  %vm516_vm0 = vcmask 1043456   ;;  %v1866_v0 = vld [vmem:[#allocation5] sm:$0xff]   ;;  %vm467_vm1 = vcmask 195584   ;;  %v1869_v4 = vld [vmem:[%s2555_s15 + $0x8] sm:$0xff]  }
  0xbb   : > { %v1867_v1 = vld [vmem:[#allocation5 + $0x8] ss:$0 sps:$4 sm:$0xff]   ;;  %1723 = vmatprep.subr.bf16.mxu0 %v1866_v0  ;;  %v1868_v2 = vld [vmem:[%s2555_s15] sm:$0xff]   ;;  %1759 = vmatprep.subr.bf16.mxu1 %v1866_v0  ;;  %v1870_v5 = vld [vmem:[%s2555_s15 + $0x10] sm:$0xff]   ;;  %vm682_vm2 = vcmask 64512   ;;  %vm854_vm3 = vcmask 58368  }
  0xbc   : > { %1724 = vmatpush3.bf16.msra.mxu0 %v1866_v0  ;;  %1761 = vmatpush3.bf16.msra.mxu1 %v1866_v0  ;;  %v518_v3 = vsel %vm516_vm0, %v1867_v1, 0  ;;  %v1876_v6 = vld [vmem:[%s2555_s15 + $0x40] sm:$0xff]   ;;  %v1877_v7 = vld [vmem:[%s2555_s15 + $0x48] sm:$0xff]   ;;  %v1878_v8 = vld [vmem:[%s2555_s15 + $0x50] sm:$0xff]   ;;  %vm1378_vm4 = vcmask 60416   ;;  %s3270_s28 = scalar_lea.vmem [#allocation13], %s1558_s14 }
  0xbd   : > { %1763 = vmatprep.subr.msk.bf16.mxu0 %vm516_vm0, %v1867_v1  ;;  %1727 = vmatprep.mubr.msk.bf16.mxu0 %vm467_vm1, %v1868_v2  ;;  %v1871_v9 = vld [vmem:[%s2555_s15 + $0x18] sm:$0xff]   ;;  %v1872_v10 = vld [vmem:[%s2555_s15 + $0x20] sm:$0xff]   ;;  %v1873_v13 = vld [vmem:[%s2555_s15 + $0x28] sm:$0xff]   ;;  %s1704_s19 = sshll.u32 %s2331_s27, 11  ;;  %s1425_s20 = sshll.u32 %s3270_s28, 4  ;;  %s3376_s20 = int_to_ptr.vmem [resolvable:$true] %s1425_s20 }
  0xbe   : > { %1764 = vmatprep.subr.msk.bf16.mxu1 %vm516_vm0, %v1867_v1  ;;  %1743 = vmatprep.mubr.msk.bf16.mxu1 %vm467_vm1, %v1876_v6  ;;  %v1879_v11 = vld [vmem:[%s2555_s15 + $0x58] sm:$0xff]   ;;  %v1880_v12 = vld [vmem:[%s2555_s15 + $0x60] sm:$0xff]   ;;  %v1874_v14 = vld [vmem:[%s2555_s15 + $0x30] sm:$0xff]   ;;  %s3374_s16 = scalar_lea.hbm %s3432_s6, %s1704_s19  ;;  %s1412_s9 = scalar_lea.sflag [#allocation4], %s2549_s17 }
  0xbf   : > { %v1881_v15 = vld [vmem:[%s2555_s15 + $0x68] sm:$0xff]   ;;  %v1882_v16 = vld [vmem:[%s2555_s15 + $0x70] sm:$0xff]   ;;  %v1875_v17 = vld [vmem:[%s2555_s15 + $0x38] sm:$0xff]   ;;  %s2184_s26 = scalar_lea.vmem %s3376_s20, 2048  ;;  %p3457_p4 = scmp.ne.s32.totalorder %s3443_s8, 0 }
  0xc0   : > { %1726 = vmatpush3.bf16.msra.mxu0 %v518_v3  ;;  %1762 = vmatpush3.bf16.msra.mxu1 %v518_v3  ;;  %v1883_v18 = vld [vmem:[%s2555_s15 + $0x78] sm:$0xff]   ;;  %v2605_v19 = vld [vmem:[#allocation7] ss:$0 sm:$0xff]  ;;  %p2185_p7 = scmp.ne.s32.totalorder %s3376_s20, %s2184_s26  ;;  %s2272_s10 = smov [#allocation13]  }
  0xc1   : > { %s2188_s12 = sshll.u32 %s2272_s10, 4  ;;  %s2189_s12 = int_to_ptr.vmem [resolvable:$false] %s2188_s12 }
  0xc2   : > { %p2186_p12 = pnand %p2185_p7, %p3457_p4  ;;  %s2190_s13 = scalar_lea.vmem %s2189_s12, 4096 }
  0xc3   : > { %1728 = vmatmul.mubr.msk.bf16.vlgmr.msra.gmra.mrb[0].mxu0 %vm467_vm1, %v1869_v4  ;;  %1744 = vmatmul.mubr.msk.bf16.vlgmr.msra.gmra.mrb[0].mxu1 %vm467_vm1, %v1877_v7  ;;  %p2191_p1 = scmp.lt.s32.totalorder %s3376_s20, %s2189_s12  ;;  %p2192_p3 = scmp.lt.s32.totalorder %s2190_s13, %s2184_s26 }
  0xc4   : > { %1731 = vmatprep.mubr.msk.bf16.mxu0 %vm467_vm1, %v1870_v5  ;;  %1747 = vmatprep.mubr.msk.bf16.mxu1 %vm467_vm1, %v1878_v8  ;;  %p2187_p13 = pneg %p2186_p12 }
  0xc5   : > { %p2193_p2 = por %p2192_p3, %p2191_p1 }
  0xc7   : > { %p2194_p8 = pnand %p2193_p2, %p2187_p13 }
  0xcb   : > { %1732 = vmatmul.mubr.msk.bf16.gmra.mrb[4].mxu0 %vm467_vm1, %v1871_v9  ;;  %1748 = vmatmul.mubr.msk.bf16.gmra.mrb[4].mxu1 %vm467_vm1, %v1879_v11 }
  0xcc   : > { %1735 = vmatprep.mubr.msk.bf16.mxu0 %vm467_vm1, %v1872_v10  ;;  %1751 = vmatprep.mubr.msk.bf16.mxu1 %vm467_vm1, %v1880_v12 }
  0xd3   : > { %1736 = vmatmul.mubr.msk.bf16.gmra.mrb[8].mxu0 %vm467_vm1, %v1873_v13  ;;  %1752 = vmatmul.mubr.msk.bf16.gmra.mrb[8].mxu1 %vm467_vm1, %v1881_v15 }
  0xd4   : > { %1739 = vmatprep.mubr.msk.bf16.mxu0 %vm467_vm1, %v1874_v14  ;;  %1755 = vmatprep.mubr.msk.bf16.mxu1 %vm467_vm1, %v1882_v16 }
  0xdb   : > { %1740 = vmatmul.mubr.msk.bf16.gmra.mrb[12].mxu0 %vm467_vm1, %v1875_v17  ;;  %1756 = vmatmul.mubr.msk.bf16.gmra.mrb[12].mxu1 %vm467_vm1, %v1883_v18 }
 0x196   : > { %v1729_v20 = vpop.f32.mrb[0].mxu0  ;;  %v2613_v26 = vpop.f32.mrb[0].mxu1 }
 0x197   : > { %v554_v21 = vpop.f32.mrb[1].mxu0  ;;  %v2608_v22 = vadd.f32 %v1729_v20, %v2605_v19  ;;  %v2623_v30 = vpop.f32.mrb[1].mxu1 }
 0x198   : > { %v2611_v23 = vadd.f32 %v2605_v19, %v554_v21  ;;  %v1730_v24 = vpop.f32.mrb[2].mxu0  ;;  %v2625_v31 = vpop.f32.mrb[2].mxu1 }
 0x199   : > { %v557_v25 = vpop.f32.mrb[3].mxu0  ;;  %v2618_v28 = vadd.f32 %v1730_v24, %v2605_v19  ;;  %v754_v32 = vmul.f32 %v2608_v22, %v2608_v22  ;;  %v2635_v36 = vpop.f32.mrb[3].mxu1  ;;  %v686_v38 = vsel %vm682_vm2, %v2608_v22, 0.0 }
 0x19a   : > { %v752_v27 = vmul.f32 %v2611_v23, %v2611_v23  ;;  %v2621_v29 = vadd.f32 %v2605_v19, %v557_v25  ;;  %v683_v33 = vsel %vm682_vm2, %v2611_v23, 0.0 }
 0x19b   : > { %v755_v40 = vmul.f32 %v2618_v28, %v2618_v28  ;;  %v787_v46 = vsel %vm682_vm2, %v754_v32, 0.0  ;;  %v688_v47 = vsel %vm682_vm2, %v2618_v28, 0.0 }
 0x19c   : > { %v684_v34 = vsel %vm682_vm2, %v2621_v29, 0.0  ;;  %v753_v35 = vmul.f32 %v2621_v29, %v2621_v29  ;;  %v784_v39 = vsel %vm682_vm2, %v752_v27, 0.0 }
 0x19d   : > { %v685_v37 = vadd.f32 %v684_v34, %v683_v33  ;;  %v789_v55 = vsel %vm682_vm2, %v755_v40, 0.0 }
 0x19e   : > { %v785_v41 = vsel %vm682_vm2, %v753_v35, 0.0  ;;  %v1733_v42 = vpop.f32.mrb[4].mxu0  ;;  %v2652_v54 = vpop.f32.mrb[4].mxu1 }
 0x19f   : > { %v687_v43 = vadd.f32 %v686_v38, %v685_v37  ;;  %v786_v44 = vadd.f32 %v785_v41, %v784_v39  ;;  %v570_v45 = vpop.f32.mrb[5].mxu0  ;;  %v2650_v51 = vadd.f32 %v1733_v42, %v2605_v19  ;;  %v2662_v59 = vpop.f32.mrb[5].mxu1 }
 0x1a0   : > { %v2647_v48 = vadd.f32 %v2605_v19, %v570_v45  ;;  %v1734_v49 = vpop.f32.mrb[6].mxu0  ;;  %v2667_v63 = vpop.f32.mrb[6].mxu1 }
 0x1a1   : > { %v788_v50 = vadd.f32 %v787_v46, %v786_v44  ;;  %v689_v52 = vadd.f32 %v688_v47, %v687_v43  ;;  %v573_v53 = vpop.f32.mrb[7].mxu0  ;;  %v2665_v62 = vadd.f32 %v1734_v49, %v2605_v19  ;;  %v2672_v2 = vpop.f32.mrb[7].mxu1  ;;  %v758_v3 = vmul.f32 %v2650_v51, %v2650_v51 }
 0x1a2   : > { %v690_v56 = vsel %vm682_vm2, %v2647_v48, 0.0  ;;  %v756_v57 = vmul.f32 %v2647_v48, %v2647_v48  ;;  %v2660_v58 = vadd.f32 %v2605_v19, %v573_v53  ;;  %v694_v7 = vsel %vm682_vm2, %v2650_v51, 0.0 }
 0x1a3   : > { %v691_v60 = vadd.f32 %v690_v56, %v689_v52  ;;  %v790_v61 = vadd.f32 %v789_v55, %v788_v50  ;;  %v759_v9 = vmul.f32 %v2665_v62, %v2665_v62  ;;  %v696_v13 = vsel %vm682_vm2, %v2665_v62, 0.0 }
 0x1a4   : > { %v791_v0 = vsel %vm682_vm2, %v756_v57, 0.0  ;;  %v692_v1 = vsel %vm682_vm2, %v2660_v58, 0.0  ;;  %v757_v6 = vmul.f32 %v2660_v58, %v2660_v58  ;;  %v795_v17 = vsel %vm682_vm2, %v758_v3, 0.0 }
 0x1a5   : > { %v792_v4 = vadd.f32 %v791_v0, %v790_v61  ;;  %v693_v5 = vadd.f32 %v692_v1, %v691_v60  ;;  %v797_v35 = vsel %vm682_vm2, %v759_v9, 0.0 }
 0x1a6   : > { %v1737_v8 = vpop.f32.mrb[8].mxu0  ;;  %v793_v11 = vsel %vm682_vm2, %v757_v6, 0.0  ;;  %v2692_v24 = vpop.f32.mrb[8].mxu1  ;;  %v2734_v6 = vadd.f32 %v2605_v19, %v2623_v30 }
 0x1a7   : > { %v695_v10 = vadd.f32 %v694_v7, %v693_v5  ;;  %v586_v12 = vpop.f32.mrb[9].mxu0  ;;  %v794_v14 = vadd.f32 %v793_v11, %v792_v4  ;;  %v2690_v18 = vadd.f32 %v1737_v8, %v2605_v19  ;;  %v2701_v34 = vpop.f32.mrb[9].mxu1 }
 0x1a8   : > { %v2686_v15 = vadd.f32 %v2605_v19, %v586_v12  ;;  %v1738_v16 = vpop.f32.mrb[10].mxu0  ;;  %v2707_v39 = vpop.f32.mrb[10].mxu1 }
 0x1a9   : > { %v697_v20 = vadd.f32 %v696_v13, %v695_v10  ;;  %v589_v21 = vpop.f32.mrb[11].mxu0  ;;  %v796_v25 = vadd.f32 %v795_v17, %v794_v14  ;;  %v2705_v38 = vadd.f32 %v1738_v16, %v2605_v19  ;;  %v2714_v44 = vpop.f32.mrb[11].mxu1  ;;  %v762_v45 = vmul.f32 %v2690_v18, %v2690_v18 }
 0x1aa   : > { %v698_v27 = vsel %vm682_vm2, %v2686_v15, 0.0  ;;  %v760_v32 = vmul.f32 %v2686_v15, %v2686_v15  ;;  %v2699_v33 = vadd.f32 %v2605_v19, %v589_v21  ;;  %v702_v47 = vsel %vm682_vm2, %v2690_v18, 0.0 }
 0x1ab   : > { %v699_v37 = vadd.f32 %v698_v27, %v697_v20  ;;  %v798_v40 = vadd.f32 %v797_v35, %v796_v25  ;;  %v763_v53 = vmul.f32 %v2705_v38, %v2705_v38  ;;  %v704_v57 = vsel %vm682_vm2, %v2705_v38, 0.0 }
 0x1ac   : > { %v799_v41 = vsel %vm682_vm2, %v760_v32, 0.0  ;;  %v700_v42 = vsel %vm682_vm2, %v2699_v33, 0.0  ;;  %v761_v43 = vmul.f32 %v2699_v33, %v2699_v33  ;;  %v803_v1 = vsel %vm682_vm2, %v762_v45, 0.0 }
 0x1ad   : > { %v701_v46 = vadd.f32 %v700_v42, %v699_v37  ;;  %v800_v49 = vadd.f32 %v799_v41, %v798_v40  ;;  %v805_v13 = vsel %vm682_vm2, %v763_v53, 0.0  ;;  %v768_v42 = vmul.f32 %v2734_v6, %v2734_v6 }
 0x1ae   : > { %v801_v50 = vsel %vm682_vm2, %v761_v43, 0.0  ;;  %v1741_v52 = vpop.f32.mrb[12].mxu0  ;;  %v2736_v7 = vpop.f32.mrb[12].mxu1  ;;  %v2780_v53 = vadd.f32 %v2613_v26, %v2605_v19 }
 0x1af   : > { %v703_v55 = vadd.f32 %v702_v47, %v701_v46  ;;  %v602_v56 = vpop.f32.mrb[13].mxu0  ;;  %v802_v60 = vadd.f32 %v801_v50, %v800_v49  ;;  %v2730_v3 = vadd.f32 %v1741_v52, %v2605_v19  ;;  %v2745_v12 = vpop.f32.mrb[13].mxu1  ;;  %v2771_v46 = vadd.f32 %v2605_v19, %v2635_v36 }
 0x1b0   : > { %v2726_v61 = vadd.f32 %v2605_v19, %v602_v56  ;;  %v1742_v0 = vpop.f32.mrb[14].mxu0  ;;  %v2751_v16 = vpop.f32.mrb[14].mxu1  ;;  %v714_v50 = vsel %vm682_vm2, %v2734_v6, 0.0  ;;  %v2785_v36 = vadd.f32 %v2625_v31, %v2605_v19  ;;  %v718_v31 = vsel %vm682_vm2, %v2780_v53, 0.0 }
 0x1b1   : > { %v705_v4 = vadd.f32 %v704_v57, %v703_v55  ;;  %v605_v5 = vpop.f32.mrb[15].mxu0  ;;  %v804_v8 = vadd.f32 %v803_v1, %v802_v60  ;;  %v2749_v30 = vadd.f32 %v1742_v0, %v2605_v19  ;;  %v2758_v27 = vpop.f32.mrb[15].mxu1  ;;  %v766_v32 = vmul.f32 %v2730_v3, %v2730_v3 }
 0x1b2   : > { %v706_v9 = vsel %vm682_vm2, %v2726_v61, 0.0  ;;  %v764_v10 = vmul.f32 %v2726_v61, %v2726_v61  ;;  %v2743_v11 = vadd.f32 %v2605_v19, %v605_v5  ;;  %v710_v37 = vsel %vm682_vm2, %v2730_v3, 0.0 }
 0x1b3   : > { %v707_v14 = vadd.f32 %v706_v9, %v705_v4  ;;  %v806_v17 = vadd.f32 %v805_v13, %v804_v8  ;;  %v767_v43 = vmul.f32 %v2749_v30, %v2749_v30  ;;  %v712_v47 = vsel %vm682_vm2, %v2749_v30, 0.0 }
 0x1b4   : > { %v807_v20 = vsel %vm682_vm2, %v764_v10, 0.0  ;;  %v708_v21 = vsel %vm682_vm2, %v2743_v11, 0.0  ;;  %v765_v25 = vmul.f32 %v2743_v11, %v2743_v11  ;;  %v811_v52 = vsel %vm682_vm2, %v766_v32, 0.0 }
 0x1b5   : > { %v709_v35 = vadd.f32 %v708_v21, %v707_v14  ;;  %v808_v40 = vadd.f32 %v807_v20, %v806_v17  ;;  %v815_v57 = vsel %vm682_vm2, %v768_v42, 0.0  ;;  %v813_v60 = vsel %vm682_vm2, %v767_v43, 0.0 }
 0x1b6   : > { %v809_v41 = vsel %vm682_vm2, %v765_v25, 0.0  ;;  %v769_v1 = vmul.f32 %v2771_v46, %v2771_v46  ;;  %v2792_v4 = vadd.f32 %v2605_v19, %v2662_v59  ;;  %v716_v5 = vsel %vm682_vm2, %v2771_v46, 0.0 }
 0x1b7   : > { %v711_v45 = vadd.f32 %v710_v37, %v709_v35  ;;  %v810_v49 = vadd.f32 %v809_v41, %v808_v40  ;;  %v770_v8 = vmul.f32 %v2780_v53, %v2780_v53  ;;  %v771_v13 = vmul.f32 %v2785_v36, %v2785_v36 }
 0x1b8   : > { %v817_v17 = vsel %vm682_vm2, %v769_v1, 0.0  ;;  %v772_v59 = vmul.f32 %v2792_v4, %v2792_v4  ;;  %v2807_v20 = vadd.f32 %v2605_v19, %v2672_v2  ;;  %v720_v21 = vsel %vm682_vm2, %v2785_v36, 0.0 }
 0x1b9   : > { %v713_v55 = vadd.f32 %v712_v47, %v711_v45  ;;  %v812_v56 = vadd.f32 %v811_v52, %v810_v49  ;;  %v722_v32 = vsel %vm682_vm2, %v2792_v4, 0.0  ;;  %v819_v35 = vsel %vm682_vm2, %v770_v8, 0.0 }
 0x1ba   : > { %v2816_v37 = vadd.f32 %v2652_v54, %v2605_v19  ;;  %v821_v41 = vsel %vm682_vm2, %v771_v13, 0.0  ;;  %v2821_v2 = vadd.f32 %v2667_v63, %v2605_v19  ;;  %v823_v45 = vsel %vm682_vm2, %v772_v59, 0.0 }
 0x1bb   : > { %v715_v0 = vadd.f32 %v714_v50, %v713_v55  ;;  %v814_v26 = vadd.f32 %v813_v60, %v812_v56  ;;  %v773_v47 = vmul.f32 %v2807_v20, %v2807_v20  ;;  %v2828_v49 = vadd.f32 %v2605_v19, %v2701_v34 }
 0x1bc   : > { %v724_v50 = vsel %vm682_vm2, %v2807_v20, 0.0  ;;  %v774_v52 = vmul.f32 %v2816_v37, %v2816_v37  ;;  %v726_v63 = vsel %vm682_vm2, %v2816_v37, 0.0  ;;  %v2843_v1 = vadd.f32 %v2605_v19, %v2714_v44 }
 0x1bd   : > { %v717_v9 = vadd.f32 %v716_v5, %v715_v0  ;;  %v816_v10 = vadd.f32 %v815_v57, %v814_v26  ;;  %v775_v57 = vmul.f32 %v2821_v2, %v2821_v2  ;;  %v825_v0 = vsel %vm682_vm2, %v773_v47, 0.0 }
 0x1be   : > { %v776_v34 = vmul.f32 %v2828_v49, %v2828_v49  ;;  %v728_v26 = vsel %vm682_vm2, %v2821_v2, 0.0  ;;  %v730_v8 = vsel %vm682_vm2, %v2828_v49, 0.0  ;;  %v2857_v44 = vadd.f32 %v2707_v39, %v2605_v19 }
 0x1bf   : > { %v719_v14 = vadd.f32 %v718_v31, %v717_v9  ;;  %v818_v25 = vadd.f32 %v817_v17, %v816_v10  ;;  %v827_v9 = vsel %vm682_vm2, %v774_v52, 0.0  ;;  %v2852_v31 = vadd.f32 %v2692_v24, %v2605_v19 }
 0x1c0   : > { %v829_v13 = vsel %vm682_vm2, %v775_v57, 0.0  ;;  %v831_v59 = vsel %vm682_vm2, %v776_v34, 0.0  ;;  %v2879_v47 = vadd.f32 %v2605_v19, %v2758_v27  ;;  %v2894_v34 = vadd.f32 %v2751_v16, %v2605_v19 }
 0x1c1   : > { %v721_v40 = vadd.f32 %v720_v21, %v719_v14  ;;  %v820_v42 = vadd.f32 %v819_v35, %v818_v25  ;;  %v777_v21 = vmul.f32 %v2843_v1, %v2843_v1  ;;  %v2864_v25 = vadd.f32 %v2605_v19, %v2745_v12 }
 0x1c2   : > { %v778_v35 = vmul.f32 %v2852_v31, %v2852_v31  ;;  %v734_v39 = vsel %vm682_vm2, %v2852_v31, 0.0 }
 0x1c3   : > { %v723_v43 = vadd.f32 %v722_v32, %v721_v40  ;;  %v822_v54 = vadd.f32 %v821_v41, %v820_v42  ;;  %v732_v32 = vsel %vm682_vm2, %v2843_v1, 0.0  ;;  %v779_v42 = vmul.f32 %v2857_v44, %v2857_v44 }
 0x1c4   : > { %v780_v12 = vmul.f32 %v2864_v25, %v2864_v25  ;;  %v738_v52 = vsel %vm682_vm2, %v2864_v25, 0.0 }
 0x1c5   : > { %v725_v55 = vadd.f32 %v724_v50, %v723_v43  ;;  %v824_v56 = vadd.f32 %v823_v45, %v822_v54  ;;  %v833_v45 = vsel %vm682_vm2, %v777_v21, 0.0  ;;  %v736_v54 = vsel %vm682_vm2, %v2857_v44, 0.0 }
 0x1c6   : > { %v837_v57 = vsel %vm682_vm2, %v779_v42, 0.0  ;;  %v839_v27 = vsel %vm682_vm2, %v780_v12, 0.0 }
 0x1c7   : > { %v727_v60 = vadd.f32 %v726_v63, %v725_v55  ;;  %v826_v5 = vadd.f32 %v825_v0, %v824_v56  ;;  %v835_v55 = vsel %vm682_vm2, %v778_v35, 0.0  ;;  %v2888_v63 = vadd.f32 %v2736_v7, %v2605_v19 }
 0x1c9   : > { %v729_v10 = vadd.f32 %v728_v26, %v727_v60  ;;  %v828_v14 = vadd.f32 %v827_v9, %v826_v5  ;;  %v781_v26 = vmul.f32 %v2879_v47, %v2879_v47  ;;  %v782_v7 = vmul.f32 %v2888_v63, %v2888_v63 }
 0x1cb   : > { %v731_v17 = vadd.f32 %v730_v8, %v729_v10  ;;  %v830_v24 = vadd.f32 %v829_v13, %v828_v14  ;;  %v740_v8 = vsel %vm682_vm2, %v2879_v47, 0.0  ;;  %v742_v10 = vsel %vm682_vm2, %v2888_v63, 0.0 }
 0x1cc   : > { %v783_v14 = vmul.f32 %v2894_v34, %v2894_v34  ;;  %v841_v16 = vsel %vm682_vm2, %v781_v26, 0.0  ;;  %v843_v21 = vsel %vm682_vm2, %v782_v7, 0.0 }
 0x1cd   : > { %v733_v40 = vadd.f32 %v732_v32, %v731_v17  ;;  %v832_v41 = vadd.f32 %v831_v59, %v830_v24  ;;  %v744_v17 = vsel %vm682_vm2, %v2894_v34, 0.0 }
 0x1ce   : > { %v845_v35 = vsel %vm682_vm2, %v783_v14, 0.0 }
 0x1cf   : > { %v735_v43 = vadd.f32 %v734_v39, %v733_v40  ;;  %v834_v50 = vadd.f32 %v833_v45, %v832_v41 }
 0x1d1   : > { %v737_v56 = vadd.f32 %v736_v54, %v735_v43  ;;  %v836_v60 = vadd.f32 %v835_v55, %v834_v50 }
 0x1d3   : > { %v739_v0 = vadd.f32 %v738_v52, %v737_v56  ;;  %v838_v5 = vadd.f32 %v837_v57, %v836_v60  ;;  %v681_v52 = vld [vmem:[#allocation11] sm:$0x3] }
 0x1d5   : > { %v741_v9 = vadd.f32 %v740_v8, %v739_v0  ;;  %v840_v13 = vadd.f32 %v839_v27, %v838_v5 }
 0x1d7   : > { %v743_v19 = vadd.f32 %v742_v10, %v741_v9  ;;  %v842_v59 = vadd.f32 %v841_v16, %v840_v13 }
 0x1d9   : > { %v745_v24 = vadd.f32 %v744_v17, %v743_v19  ;;  %v844_v32 = vadd.f32 %v843_v21, %v842_v59 }
 0x1db   : > { %v746_v40 = vrot.slane %v745_v24, 4  ;;  %v846_v39 = vadd.f32 %v845_v35, %v844_v32 }
 0x1dd   : > { %v747_v41 = vadd.f32 %v746_v40, %v745_v24  ;;  %v847_v42 = vrot.slane %v846_v39, 4 }
 0x1df   : > { %v748_v43 = vrot.slane %v747_v41, 2  ;;  %v848_v45 = vadd.f32 %v847_v42, %v846_v39 }
 0x1e1   : > { %v749_v12 = vadd.f32 %v748_v43, %v747_v41  ;;  %v849_v54 = vrot.slane %v848_v45, 2 }
 0x1e3   : > { %v750_v50 = vrot.slane %v749_v12, 1  ;;  %v850_v55 = vadd.f32 %v849_v54, %v848_v45 }
 0x1e5   : > { %v751_v56 = vadd.f32 %v750_v50, %v749_v12  ;;  %v851_v57 = vrot.slane %v850_v55, 1 }
 0x1e7   : > { %v853_v60 = vmul.f32 %v751_v56, %v681_v52  ;;  %v852_v0 = vadd.f32 %v851_v57, %v850_v55 }
 0x1e9   : > { %v855_v27 = vsel %vm854_vm3, %v853_v60, 0.0  ;;  %v858_v26 = vmul.f32 %v852_v0, %v681_v52 }
 0x1ea   : > { %856 = vadd.xlane.f32.xlu0 %v855_v27 }
 0x1eb   : > { %v859_v5 = vsel %vm854_vm3, %v858_v26, 0.0 }
 0x1ee   : > { %860 = vadd.xlane.f32.xlu0 %v859_v5 }
 0x277   : > { %v857_v8 = vpop.xlane.xlu0 %856 }
 0x278   : > { %v862_v7 = vmul.f32 0.0009765625, %v857_v8  ;;  %v2987_v8 = vld [vmem:[#allocation8] ss:$0 sm:$0xff] }
 0x27a   : > { %v864_v10 = vmul.f32 %v862_v7, %v862_v7  ;;  %v868_v16 = vmul.f32 %v862_v7, %v681_v52 }
 0x27b   : > { %v861_v9 = vpop.xlane.xlu0 %860 }
 0x27c   : > { %v863_v13 = vmul.f32 0.0009765625, %v861_v9  ;;  %v869_v17 = vsel %vm854_vm3, %v868_v16, 0.0 }
 0x27d   : > { %v870_v59 = vrot.slane %v869_v17, 4 }
 0x27e   : > { %v865_v14 = vsub.f32 %v863_v13, %v864_v10 }
 0x27f   : > { %v871_v24 = vadd.f32 %v870_v59, %v869_v17 }
 0x280   : > { %v866_v19 = vadd.f32 1e-05, %v865_v14 }
 0x281   : > { %v872_v35 = vrot.slane %v871_v24, 2 }
 0x282   : > { %1884 = vrsqrt.f32 %v866_v19 }
 0x283   : > { %v873_v41 = vadd.f32 %v872_v35, %v871_v24  ;;  %v3005_v35 = vld [vmem:[#allocation10] ss:$0 sm:$0xff] }
 0x285   : > { %v874_v43 = vrot.slane %v873_v41, 1 }
 0x287   : > { %v2915_v12 = vadd.f32 %v874_v43, %v873_v41 }
 0x289   : > { %v884_v50 = vsub.f32 %v2611_v23, %v2915_v12  ;;  %v885_v55 = vsub.f32 %v2621_v29, %v2915_v12  ;;  %v887_v56 = vsub.f32 %v2618_v28, %v2915_v12  ;;  %v888_v57 = vsub.f32 %v2647_v48, %v2915_v12 }
 0x28a   : > { %v889_v0 = vsub.f32 %v2660_v58, %v2915_v12  ;;  %v890_v27 = vsub.f32 %v2650_v51, %v2915_v12  ;;  %v891_v23 = vsub.f32 %v2665_v62, %v2915_v12  ;;  %v892_v29 = vsub.f32 %v2686_v15, %v2915_v12 }
 0x28b   : > { %v894_v28 = vsub.f32 %v2690_v18, %v2915_v12  ;;  %v895_v48 = vsub.f32 %v2705_v38, %v2915_v12  ;;  %v896_v58 = vsub.f32 %v2726_v61, %v2915_v12  ;;  %v897_v51 = vsub.f32 %v2743_v11, %v2915_v12 }
 0x28c   : > { %v1885_v21 = vpop.eup %1884  ;;  %v898_v62 = vsub.f32 %v2730_v3, %v2915_v12  ;;  %v899_v15 = vsub.f32 %v2749_v30, %v2915_v12  ;;  %v901_v18 = vsub.f32 %v2771_v46, %v2915_v12  ;;  %v902_v38 = vsub.f32 %v2780_v53, %v2915_v12 }
 0x28d   : > { %v876_v32 = vmul.f32 %v1885_v21, %v681_v52  ;;  %v886_v52 = vsub.f32 %v2608_v22, %v2915_v12  ;;  %v893_v22 = vsub.f32 %v2699_v33, %v2915_v12  ;;  %v900_v33 = vsub.f32 %v2734_v6, %v2915_v12 }
 0x28e   : > { %v903_v61 = vsub.f32 %v2785_v36, %v2915_v12  ;;  %v904_v3 = vsub.f32 %v2792_v4, %v2915_v12  ;;  %v905_v11 = vsub.f32 %v2807_v20, %v2915_v12  ;;  %v906_v6 = vsub.f32 %v2816_v37, %v2915_v12 }
 0x28f   : > { %v877_v40 = vsel %vm854_vm3, %v876_v32, 0.0  ;;  %v907_v30 = vsub.f32 %v2821_v2, %v2915_v12  ;;  %v908_v46 = vsub.f32 %v2828_v49, %v2915_v12  ;;  %v909_v53 = vsub.f32 %v2843_v1, %v2915_v12 }
 0x290   : > { %v878_v39 = vrot.slane %v877_v40, 4  ;;  %v910_v36 = vsub.f32 %v2852_v31, %v2915_v12  ;;  %v911_v4 = vsub.f32 %v2857_v44, %v2915_v12  ;;  %v912_v20 = vsub.f32 %v2864_v25, %v2915_v12 }
 0x291   : > { %v913_v37 = vsub.f32 %v2879_v47, %v2915_v12  ;;  %v914_v2 = vsub.f32 %v2888_v63, %v2915_v12  ;;  %v915_v49 = vsub.f32 %v2894_v34, %v2915_v12 }
 0x292   : > { %v879_v42 = vadd.f32 %v878_v39, %v877_v40 }
 0x294   : > { %v880_v45 = vrot.slane %v879_v42, 2 }
 0x296   : > { %v881_v54 = vadd.f32 %v880_v45, %v879_v42 }
 0x298   : > { %v882_v60 = vrot.slane %v881_v54, 1 }
 0x29a   : > { %v2957_v26 = vadd.f32 %v882_v60, %v881_v54 }
 0x29c   : > { %v916_v1 = vmul.f32 %v884_v50, %v2957_v26  ;;  %v917_v5 = vmul.f32 %v885_v55, %v2957_v26  ;;  %v918_v31 = vmul.f32 %v886_v52, %v2957_v26  ;;  %v919_v44 = vmul.f32 %v887_v56, %v2957_v26 }
 0x29d   : > { %v920_v25 = vmul.f32 %v888_v57, %v2957_v26  ;;  %v921_v47 = vmul.f32 %v889_v0, %v2957_v26  ;;  %v922_v7 = vmul.f32 %v890_v27, %v2957_v26  ;;  %v923_v63 = vmul.f32 %v891_v23, %v2957_v26 }
 0x29e   : > { %v924_v34 = vmul.f32 %v892_v29, %v2957_v26  ;;  %v925_v9 = vmul.f32 %v893_v22, %v2957_v26  ;;  %v926_v10 = vmul.f32 %v894_v28, %v2957_v26  ;;  %v927_v13 = vmul.f32 %v895_v48, %v2957_v26 }
 0x29f   : > { %v928_v14 = vmul.f32 %v896_v58, %v2957_v26  ;;  %v929_v19 = vmul.f32 %v897_v51, %v2957_v26  ;;  %v930_v16 = vmul.f32 %v898_v62, %v2957_v26  ;;  %v931_v17 = vmul.f32 %v899_v15, %v2957_v26 }
 0x2a0   : > { %v932_v59 = vmul.f32 %v900_v33, %v2957_v26  ;;  %v955_v21 = vmul.f32 %v2987_v8, %v916_v1  ;;  %v956_v24 = vmul.f32 %v2987_v8, %v917_v5  ;;  %v957_v32 = vmul.f32 %v2987_v8, %v918_v31 }
 0x2a1   : > { %v933_v40 = vmul.f32 %v901_v18, %v2957_v26  ;;  %v934_v39 = vmul.f32 %v902_v38, %v2957_v26  ;;  %v935_v41 = vmul.f32 %v903_v61, %v2957_v26  ;;  %v958_v42 = vmul.f32 %v2987_v8, %v919_v44 }
 0x2a2   : > { %v3012_v43 = vmul.f32 %v904_v3, %v2957_v26  ;;  %v3015_v45 = vmul.f32 %v905_v11, %v2957_v26  ;;  %v3018_v12 = vmul.f32 %v906_v6, %v2957_v26  ;;  %v959_v54 = vmul.f32 %v2987_v8, %v920_v25 }
 0x2a3   : > { %v3022_v50 = vmul.f32 %v907_v30, %v2957_v26  ;;  %v3025_v55 = vmul.f32 %v908_v46, %v2957_v26  ;;  %v3028_v52 = vmul.f32 %v909_v53, %v2957_v26  ;;  %v960_v56 = vmul.f32 %v2987_v8, %v921_v47 }
 0x2a4   : > { %v961_v57 = vmul.f32 %v2987_v8, %v922_v7  ;;  %v3033_v60 = vadd.f32 %v3005_v35, %v955_v21  ;;  %v3036_v0 = vadd.f32 %v3005_v35, %v956_v24  ;;  %v3039_v27 = vadd.f32 %v3005_v35, %v957_v32 }
 0x2a5   : > { %v3042_v23 = vmul.f32 %v910_v36, %v2957_v26  ;;  %v3045_v29 = vmul.f32 %v911_v4, %v2957_v26  ;;  %v962_v22 = vmul.f32 %v2987_v8, %v923_v63  ;;  %v3049_v28 = vadd.f32 %v3005_v35, %v958_v42 }
 0x2a6   : > { %v3052_v48 = vmul.f32 %v912_v20, %v2957_v26  ;;  %v3055_v58 = vmul.f32 %v913_v37, %v2957_v26  ;;  %v963_v51 = vmul.f32 %v2987_v8, %v924_v34  ;;  %v3059_v62 = vadd.f32 %v3005_v35, %v959_v54 }
 0x2a7   : > { %v3062_v15 = vmul.f32 %v914_v2, %v2957_v26  ;;  %v964_v33 = vmul.f32 %v2987_v8, %v925_v9  ;;  %v965_v18 = vmul.f32 %v2987_v8, %v926_v10  ;;  %v3067_v38 = vadd.f32 %v3005_v35, %v960_v56 }
 0x2a8   : > { %v3070_v61 = vadd.f32 %v3005_v35, %v961_v57  ;;  %v1602_v3 = vmul.f32 -1.442695, %v3033_v60  ;;  %v1603_v11 = vmul.f32 -1.442695, %v3036_v0  ;;  %v1604_v6 = vmul.f32 -1.442695, %v3039_v27 }
 0x2a9   : > { %v3076_v30 = vmul.f32 %v915_v49, %v2957_v26  ;;  %v966_v46 = vmul.f32 %v2987_v8, %v927_v13  ;;  %v3080_v53 = vadd.f32 %v3005_v35, %v962_v22  ;;  %v1605_v36 = vmul.f32 -1.442695, %v3049_v28 }
 0x2aa   : > { %v967_v4 = vmul.f32 %v2987_v8, %v928_v14  ;;  %v3085_v20 = vadd.f32 %v3005_v35, %v963_v51  ;;  %1886 = vpow2.f32 %v1602_v3  ;;  %v1606_v37 = vmul.f32 -1.442695, %v3059_v62 }
 0x2ab   : > { %v968_v2 = vmul.f32 %v2987_v8, %v929_v19  ;;  %v3090_v26 = vadd.f32 %v3005_v35, %v964_v33  ;;  %1888 = vpow2.f32 %v1603_v11  ;;  %v1607_v49 = vmul.f32 -1.442695, %v3067_v38 }
 0x2ac   : > { %v969_v1 = vmul.f32 %v2987_v8, %v930_v16  ;;  %v3095_v5 = vadd.f32 %v3005_v35, %v965_v18  ;;  %1890 = vpow2.f32 %v1604_v6  ;;  %v1608_v31 = vmul.f32 -1.442695, %v3070_v61 }
 0x2ad   : > { %v970_v44 = vmul.f32 %v2987_v8, %v931_v17  ;;  %v3100_v25 = vadd.f32 %v3005_v35, %v966_v46  ;;  %1892 = vpow2.f32 %v1605_v36  ;;  %v1609_v47 = vmul.f32 -1.442695, %v3080_v53 }
 0x2ae   : > { %v971_v7 = vmul.f32 %v2987_v8, %v932_v59  ;;  %v3105_v63 = vadd.f32 %v3005_v35, %v967_v4  ;;  %1894 = vpow2.f32 %v1606_v37  ;;  %v1610_v34 = vmul.f32 -1.442695, %v3085_v20 }
 0x2af   : > { %v972_v9 = vmul.f32 %v2987_v8, %v933_v40  ;;  %v3110_v10 = vadd.f32 %v3005_v35, %v968_v2  ;;  %1896 = vpow2.f32 %v1607_v49  ;;  %v1611_v13 = vmul.f32 -1.442695, %v3090_v26 }
 0x2b0   : > { %v973_v14 = vmul.f32 %v2987_v8, %v934_v39  ;;  %v3115_v19 = vadd.f32 %v3005_v35, %v969_v1  ;;  %1898 = vpow2.f32 %v1608_v31  ;;  %v1612_v16 = vmul.f32 -1.442695, %v3095_v5 }
 0x2b1   : > { %v974_v17 = vmul.f32 %v2987_v8, %v935_v41  ;;  %v3120_v59 = vadd.f32 %v3005_v35, %v970_v44  ;;  %1900 = vpow2.f32 %v1609_v47  ;;  %v1613_v21 = vmul.f32 -1.442695, %v3100_v25 }
 0x2b2   : > { %v975_v24 = vmul.f32 %v2987_v8, %v3012_v43  ;;  %v3126_v32 = vadd.f32 %v3005_v35, %v971_v7  ;;  %1902 = vpow2.f32 %v1610_v34  ;;  %v1614_v40 = vmul.f32 -1.442695, %v3105_v63 }
 0x2b3   : > { %v976_v39 = vmul.f32 %v2987_v8, %v3015_v45  ;;  %v3132_v41 = vadd.f32 %v3005_v35, %v972_v9  ;;  %1904 = vpow2.f32 %v1611_v13  ;;  %v1615_v42 = vmul.f32 -1.442695, %v3110_v10 }
 0x2b4   : > { %v3135_v54 = vpop.eup %1886  ;;  %v977_v43 = vmul.f32 %v2987_v8, %v3018_v12  ;;  %v3140_v56 = vadd.f32 %v3005_v35, %v973_v14  ;;  %1906 = vpow2.f32 %v1612_v16  ;;  %v1616_v57 = vmul.f32 -1.442695, %v3115_v19 }
 0x2b5   : > { %v3143_v22 = vpop.eup %1888  ;;  %v978_v45 = vmul.f32 %v2987_v8, %v3022_v50  ;;  %v3148_v51 = vadd.f32 %v3005_v35, %v974_v17  ;;  %1908 = vpow2.f32 %v1613_v21  ;;  %v1617_v33 = vmul.f32 -1.442695, %v3120_v59 }
 0x2b6   : > { %v3151_v18 = vpop.eup %1890  ;;  %v979_v12 = vmul.f32 %v2987_v8, %v3025_v55  ;;  %v3156_v3 = vadd.f32 %v3005_v35, %v975_v24  ;;  %1910 = vpow2.f32 %v1614_v40  ;;  %v1618_v11 = vmul.f32 -1.442695, %v3126_v32 }
 0x2b7   : > { %v3159_v6 = vpop.eup %1892  ;;  %v980_v50 = vmul.f32 %v2987_v8, %v3028_v52  ;;  %v3164_v46 = vadd.f32 %v3005_v35, %v976_v39  ;;  %1912 = vpow2.f32 %v1615_v42  ;;  %v1619_v36 = vmul.f32 -1.442695, %v3132_v41 }
 0x2b8   : > { %v3167_v4 = vpop.eup %1894  ;;  %v981_v55 = vmul.f32 %v2987_v8, %v3042_v23  ;;  %v3172_v37 = vadd.f32 %v3005_v35, %v977_v43  ;;  %1914 = vpow2.f32 %v1616_v57  ;;  %v1620_v2 = vmul.f32 -1.442695, %v3140_v56 }
 0x2b9   : > { %v3175_v49 = vpop.eup %1896  ;;  %v982_v52 = vmul.f32 %v2987_v8, %v3045_v29  ;;  %v3180_v1 = vadd.f32 %v3005_v35, %v978_v45  ;;  %1916 = vpow2.f32 %v1617_v33  ;;  %v1621_v31 = vmul.f32 -1.442695, %v3148_v51 }
 0x2ba   : > { %v3183_v44 = vpop.eup %1898  ;;  %v983_v23 = vmul.f32 %v2987_v8, %v3052_v48  ;;  %v3188_v47 = vadd.f32 %v3005_v35, %v979_v12  ;;  %1918 = vpow2.f32 %v1618_v11  ;;  %v1622_v7 = vmul.f32 -1.442695, %v3156_v3 }
 0x2bb   : > { %v3191_v34 = vpop.eup %1900  ;;  %v984_v29 = vmul.f32 %v2987_v8, %v3055_v58  ;;  %v3196_v9 = vadd.f32 %v3005_v35, %v980_v50  ;;  %1920 = vpow2.f32 %v1619_v36  ;;  %v1623_v13 = vmul.f32 -1.442695, %v3164_v46 }
 0x2bc   : > { %v1903_v14 = vpop.eup %1902  ;;  %v985_v48 = vmul.f32 %v2987_v8, %v3062_v15  ;;  %v3202_v16 = vadd.f32 %v3005_v35, %v981_v55  ;;  %1922 = vpow2.f32 %v1620_v2  ;;  %v1624_v17 = vmul.f32 -1.442695, %v3172_v37 }
 0x2bd   : > { %v1905_v21 = vpop.eup %1904  ;;  %v986_v58 = vmul.f32 %v2987_v8, %v3076_v30  ;;  %v3208_v24 = vadd.f32 %v3005_v35, %v982_v52  ;;  %1924 = vpow2.f32 %v1621_v31  ;;  %v1625_v40 = vmul.f32 -1.442695, %v3180_v1 }
 0x2be   : > { %v1907_v39 = vpop.eup %1906  ;;  %v3212_v42 = vadd.f32 %v3005_v35, %v983_v23  ;;  %1926 = vpow2.f32 %v1622_v7  ;;  %v1626_v15 = vmul.f32 -1.442695, %v3188_v47  ;;  %v3216_v57 = vadd.f32 %v3005_v35, %v984_v29 }
 0x2bf   : > { %v1909_v43 = vpop.eup %1908  ;;  %1928 = vpow2.f32 %v1623_v13  ;;  %v1627_v8 = vmul.f32 -1.442695, %v3196_v9  ;;  %v3220_v45 = vadd.f32 %v3005_v35, %v985_v48  ;;  %v1628_v33 = vmul.f32 -1.442695, %v3202_v16 }
 0x2c0   : > { %v1911_v30 = vpop.eup %1910  ;;  %1930 = vpow2.f32 %v1624_v17  ;;  %v3224_v11 = vadd.f32 %v3005_v35, %v986_v58  ;;  %v1629_v50 = vmul.f32 -1.442695, %v3208_v24  ;;  %v1630_v55 = vmul.f32 -1.442695, %v3212_v42 }
 0x2c1   : > { %3453 = vst [vmem:[#allocation19_spill] sm:$0xff] %v3220_v45  ;;  %v1913_v12 = vpop.eup %1912  ;;  %1932 = vpow2.f32 %v1625_v40  ;;  %v1631_v52 = vmul.f32 -1.442695, %v3216_v57  ;;  %v1632_v23 = vmul.f32 -1.442695, %v3220_v45  ;;  %v1122_v13 = vadd.f32 1.0, %v3135_v54 }
 0x2c2   : > { %3454 = vst [vmem:[#allocation20_spill] sm:$0xff] %v3224_v11  ;;  %v1915_v36 = vpop.eup %1914  ;;  %1934 = vpow2.f32 %v1626_v15  ;;  %v1633_v35 = vmul.f32 -1.442695, %v3224_v11  ;;  %v1123_v17 = vadd.f32 1.0, %v3143_v22  ;;  %v1124_v40 = vadd.f32 1.0, %v3151_v18 }
 0x2c3   : > { %v1917_v2 = vpop.eup %1916  ;;  %1936 = vpow2.f32 %v1627_v8  ;;  %v1125_v8 = vadd.f32 1.0, %v3159_v6  ;;  %v1136_v45 = vadd.f32 1.0, %v1915_v36 }
 0x2c4   : > { %v1919_v31 = vpop.eup %1918  ;;  %1938 = vpow2.f32 %v1628_v33 }
 0x2c5   : > { %v1921_v7 = vpop.eup %1920  ;;  %1940 = vpow2.f32 %v1629_v50  ;;  %v1126_v50 = vadd.f32 1.0, %v3167_v4 }
 0x2c6   : > { %v1923_v29 = vpop.eup %1922  ;;  %1942 = vpow2.f32 %v1630_v55  ;;  %v1127_v55 = vadd.f32 1.0, %v3175_v49 }
 0x2c7   : > { %v1925_v48 = vpop.eup %1924  ;;  %1944 = vpow2.f32 %v1631_v52  ;;  %v1128_v52 = vadd.f32 1.0, %v3183_v44  ;;  %v1133_v44 = vadd.f32 1.0, %v1909_v43  ;;  %v1138_v43 = vadd.f32 1.0, %v1919_v31 }
 0x2c8   : > { %v3233_v58 = vpop.eup %1926  ;;  %1946 = vpow2.f32 %v1632_v23  ;;  %v1129_v23 = vadd.f32 1.0, %v3191_v34  ;;  %v1134_v34 = vadd.f32 1.0, %v1911_v30 }
 0x2c9   : > { %v3236_v15 = vpop.eup %1928  ;;  %1948 = vpow2.f32 %v1633_v35  ;;  %v1130_v35 = vadd.f32 1.0, %v1903_v14  ;;  %v1135_v14 = vadd.f32 1.0, %v1913_v12 }
 0x2ca   : > { %v3239_v33 = vpop.eup %1930  ;;  %1950 = vrcp.f32 %v1122_v13  ;;  %v1131_v13 = vadd.f32 1.0, %v1905_v21 }
 0x2cb   : > { %v3242_v54 = vpop.eup %1932  ;;  %1952 = vrcp.f32 %v1123_v17  ;;  %v1132_v17 = vadd.f32 1.0, %v1907_v39 }
 0x2cc   : > { %v3245_v22 = vpop.eup %1934  ;;  %1954 = vrcp.f32 %v1124_v40 }
 0x2cd   : > { %v3248_v18 = vpop.eup %1936  ;;  %1956 = vrcp.f32 %v1125_v8 }
 0x2ce   : > { %v3251_v6 = vpop.eup %1938  ;;  %1958 = vrcp.f32 %v1126_v50 }
 0x2cf   : > { %v3253_v4 = vpop.eup %1940  ;;  %1960 = vrcp.f32 %v1127_v55  ;;  %v1137_v55 = vadd.f32 1.0, %v1917_v2 }
 0x2d0   : > { %v3255_v49 = vpop.eup %1942  ;;  %1962 = vrcp.f32 %v1128_v52 }
 0x2d1   : > { %v3257_v11 = vpop.eup %1944  ;;  %1964 = vrcp.f32 %v1129_v23 }
 0x2d2   : > { %v3259_v40 = vpop.eup %1946  ;;  %1966 = vrcp.f32 %v1130_v35  ;;  %v1139_v35 = vadd.f32 1.0, %v1921_v7  ;;  %v1143_v7 = vadd.f32 1.0, %v3236_v15  ;;  %v1145_v15 = vadd.f32 1.0, %v3242_v54 }
 0x2d3   : > { %v3261_v8 = vpop.eup %1948  ;;  %1968 = vrcp.f32 %v1131_v13  ;;  %v1147_v54 = vadd.f32 1.0, %v3248_v18  ;;  %v1149_v18 = vadd.f32 1.0, %v3253_v4  ;;  %v1151_v4 = vadd.f32 1.0, %v3257_v11 }
 0x2d4   : > { %v1951_v50 = vpop.eup %1950  ;;  %1970 = vrcp.f32 %v1132_v17  ;;  %v1140_v17 = vadd.f32 1.0, %v1923_v29  ;;  %v1153_v11 = vadd.f32 1.0, %v3261_v8 }
 0x2d5   : > { %v1953_v21 = vpop.eup %1952  ;;  %1972 = vrcp.f32 %v1133_v44  ;;  %v1218_v39 = vmul.f32 %v1951_v50, %v3033_v60  ;;  %v1141_v50 = vadd.f32 1.0, %v1925_v48 }
 0x2d6   : > { %v1955_v52 = vpop.eup %1954  ;;  %1974 = vrcp.f32 %v1134_v34  ;;  %v1219_v23 = vmul.f32 %v1953_v21, %v3036_v0 }
 0x2d7   : > { %v1957_v30 = vpop.eup %1956  ;;  %1976 = vrcp.f32 %v1135_v14  ;;  %v1220_v12 = vmul.f32 %v1955_v52, %v3039_v27  ;;  %v1672_v13 = vpack.c.bf16 %v1218_v39, %v1218_v39  ;;  %v1142_v27 = vadd.f32 1.0, %v3233_v58 }
 0x2d8   : > { %v1959_v36 = vpop.eup %1958  ;;  %1978 = vrcp.f32 %v1136_v45  ;;  %v1221_v2 = vmul.f32 %v1957_v30, %v3049_v28  ;;  %v1673_v44 = vpack.c.bf16 %v1219_v23, %v1219_v23  ;;  %v1144_v58 = vadd.f32 1.0, %v3239_v33 }
 0x2d9   : > { %v1961_v60 = vpop.eup %1960  ;;  %1980 = vrcp.f32 %v1137_v55  ;;  %v1222_v31 = vmul.f32 %v1959_v36, %v3059_v62  ;;  %v1674_v34 = vpack.c.bf16 %v1220_v12, %v1220_v12  ;;  %1379 = vst.msk [vmem:[%s3270_s28] sm:$0xf] %vm1378_vm4, %v1672_v13  ;;  %v1146_v33 = vadd.f32 1.0, %v3245_v22 }
 0x2da   : > { %v1963_v0 = vpop.eup %1962  ;;  %1982 = vrcp.f32 %v1138_v43  ;;  %v1223_v28 = vmul.f32 %v1961_v60, %v3067_v38  ;;  %v1675_v45 = vpack.c.bf16 %v1221_v2, %v1221_v2  ;;  %1380 = vst.msk [vmem:[%s3270_s28 + $0x4] sm:$0xf] %vm1378_vm4, %v1673_v44  ;;  %v1148_v22 = vadd.f32 1.0, %v3251_v6 }
 0x2db   : > { %v1965_v62 = vpop.eup %1964  ;;  %1984 = vrcp.f32 %v1139_v35  ;;  %v1224_v29 = vmul.f32 %v1963_v0, %v3070_v61  ;;  %v1676_v48 = vpack.c.bf16 %v1222_v31, %v1222_v31  ;;  %1381 = vst.msk [vmem:[%s3270_s28 + $0x8] sm:$0xf] %vm1378_vm4, %v1674_v34  ;;  %v1150_v6 = vadd.f32 1.0, %v3255_v49 }
 0x2dc   : > { %v1967_v14 = vpop.eup %1966  ;;  %1986 = vrcp.f32 %v1140_v17  ;;  %v1225_v38 = vmul.f32 %v1965_v62, %v3080_v53  ;;  %v1677_v21 = vpack.c.bf16 %v1223_v28, %v1223_v28  ;;  %1382 = vst.msk [vmem:[%s3270_s28 + $0xc] sm:$0xf] %vm1378_vm4, %v1675_v45  ;;  %v1152_v49 = vadd.f32 1.0, %v3259_v40 }
 0x2dd   : > { %v1969_v55 = vpop.eup %1968  ;;  %1988 = vrcp.f32 %v1141_v50  ;;  %v1226_v61 = vmul.f32 %v1967_v14, %v3085_v20  ;;  %v1678_v39 = vpack.c.bf16 %v1224_v29, %v1224_v29  ;;  %1383 = vst.msk [vmem:[%s3270_s28 + $0x10] sm:$0xf] %vm1378_vm4, %v1676_v48 }
 0x2de   : > { %v1971_v52 = vpop.eup %1970  ;;  %1990 = vrcp.f32 %v1142_v27  ;;  %v1227_v53 = vmul.f32 %v1969_v55, %v3090_v26  ;;  %v1679_v43 = vpack.c.bf16 %v1225_v38, %v1225_v38  ;;  %1384 = vst.msk [vmem:[%s3270_s28 + $0x14] sm:$0xf] %vm1378_vm4, %v1677_v21 }
 0x2df   : > { %v1973_v23 = vpop.eup %1972  ;;  %1992 = vrcp.f32 %v1143_v7  ;;  %v1228_v20 = vmul.f32 %v1971_v52, %v3095_v5  ;;  %v1680_v30 = vpack.c.bf16 %v1226_v61, %v1226_v61  ;;  %1385 = vst.msk [vmem:[%s3270_s28 + $0x18] sm:$0xf] %vm1378_vm4, %v1678_v39 }
 0x2e0   : > { %v1975_v35 = vpop.eup %1974  ;;  %1994 = vrcp.f32 %v1144_v58  ;;  %v1229_v26 = vmul.f32 %v1973_v23, %v3100_v25  ;;  %v1681_v12 = vpack.c.bf16 %v1227_v53, %v1227_v53  ;;  %1386 = vst.msk [vmem:[%s3270_s28 + $0x1c] sm:$0xf] %vm1378_vm4, %v1679_v43 }
 0x2e1   : > { %v1977_v13 = vpop.eup %1976  ;;  %1996 = vrcp.f32 %v1145_v15  ;;  %v1230_v5 = vmul.f32 %v1975_v35, %v3105_v63  ;;  %v1682_v36 = vpack.c.bf16 %v1228_v20, %v1228_v20  ;;  %1387 = vst.msk [vmem:[%s3270_s28 + $0x20] sm:$0xf] %vm1378_vm4, %v1680_v30 }
 0x2e2   : > { %v1979_v17 = vpop.eup %1978  ;;  %1998 = vrcp.f32 %v1146_v33  ;;  %v1231_v25 = vmul.f32 %v1977_v13, %v3110_v10  ;;  %v1683_v2 = vpack.c.bf16 %v1229_v26, %v1229_v26  ;;  %1388 = vst.msk [vmem:[%s3270_s28 + $0x24] sm:$0xf] %vm1378_vm4, %v1681_v12  ;;  %v3455_v26 = vld [vmem:[#allocation19_spill] sm:$0xff]  ;;  %v3456_v13 = vld [vmem:[#allocation20_spill] sm:$0xff] }
 0x2e3   : > { %v1981_v44 = vpop.eup %1980  ;;  %2000 = vrcp.f32 %v1147_v54  ;;  %v1232_v63 = vmul.f32 %v1979_v17, %v3115_v19  ;;  %v1684_v60 = vpack.c.bf16 %v1230_v5, %v1230_v5  ;;  %1389 = vst.msk [vmem:[%s3270_s28 + $0x28] sm:$0xf] %vm1378_vm4, %v1682_v36 }
 0x2e4   : > { %v1983_v50 = vpop.eup %1982  ;;  %2002 = vrcp.f32 %v1148_v22  ;;  %v1233_v10 = vmul.f32 %v1981_v44, %v3120_v59  ;;  %v1685_v31 = vpack.c.bf16 %v1231_v25, %v1231_v25  ;;  %1390 = vst.msk [vmem:[%s3270_s28 + $0x2c] sm:$0xf] %vm1378_vm4, %v1683_v2 }
 0x2e5   : > { %v1985_v34 = vpop.eup %1984  ;;  %2004 = vrcp.f32 %v1149_v18  ;;  %v1234_v19 = vmul.f32 %v1983_v50, %v3126_v32  ;;  %v1686_v0 = vpack.c.bf16 %v1232_v63, %v1232_v63  ;;  %1391 = vst.msk [vmem:[%s3270_s28 + $0x30] sm:$0xf] %vm1378_vm4, %v1684_v60 }
 0x2e6   : > { %v1987_v27 = vpop.eup %1986  ;;  %2006 = vrcp.f32 %v1150_v6  ;;  %v1235_v40 = vmul.f32 %v1985_v34, %v3132_v41  ;;  %v1687_v28 = vpack.c.bf16 %v1233_v10, %v1233_v10  ;;  %1392 = vst.msk [vmem:[%s3270_s28 + $0x34] sm:$0xf] %vm1378_vm4, %v1685_v31 }
 0x2e7   : > { %v1989_v59 = vpop.eup %1988  ;;  %2008 = vrcp.f32 %v1151_v4  ;;  %v1236_v45 = vmul.f32 %v1987_v27, %v3140_v56  ;;  %v1688_v8 = vpack.c.bf16 %v1234_v19, %v1234_v19  ;;  %1393 = vst.msk [vmem:[%s3270_s28 + $0x38] sm:$0xf] %vm1378_vm4, %v1686_v0 }
 0x2e8   : > { %v1991_v32 = vpop.eup %1990  ;;  %2010 = vrcp.f32 %v1152_v49  ;;  %v1237_v62 = vmul.f32 %v1989_v59, %v3148_v51  ;;  %v1689_v7 = vpack.c.bf16 %v1235_v40, %v1235_v40  ;;  %1394 = vst.msk [vmem:[%s3270_s28 + $0x3c] sm:$0xf] %vm1378_vm4, %v1687_v28 }
 0x2e9   : > { %v1993_v41 = vpop.eup %1992  ;;  %2012 = vrcp.f32 %v1153_v11  ;;  %v1238_v29 = vmul.f32 %v1991_v32, %v3156_v3  ;;  %v1690_v48 = vpack.c.bf16 %v1236_v45, %v1236_v45  ;;  %1395 = vst.msk [vmem:[%s3270_s28 + $0x40] sm:$0xf] %vm1378_vm4, %v1688_v8 }
 0x2ea   : > { %v1995_v56 = vpop.eup %1994  ;;  %v1239_v14 = vmul.f32 %v1993_v41, %v3164_v46  ;;  %v1691_v58 = vpack.c.bf16 %v1237_v62, %v1237_v62  ;;  %1396 = vst.msk [vmem:[%s3270_s28 + $0x44] sm:$0xf] %vm1378_vm4, %v1689_v7 }
 0x2eb   : > { %v1997_v51 = vpop.eup %1996  ;;  %v1240_v38 = vmul.f32 %v1995_v56, %v3172_v37  ;;  %v1692_v21 = vpack.c.bf16 %v1238_v29, %v1238_v29  ;;  %1397 = vst.msk [vmem:[%s3270_s28 + $0x48] sm:$0xf] %vm1378_vm4, %v1690_v48 }
 0x2ec   : > { %v1999_v55 = vpop.eup %1998  ;;  %v1241_v3 = vmul.f32 %v1997_v51, %v3180_v1  ;;  %v1693_v15 = vpack.c.bf16 %v1239_v14, %v1239_v14  ;;  %1398 = vst.msk [vmem:[%s3270_s28 + $0x4c] sm:$0xf] %vm1378_vm4, %v1691_v58 }
 0x2ed   : > { %v2001_v61 = vpop.eup %2000  ;;  %v1242_v46 = vmul.f32 %v1999_v55, %v3188_v47  ;;  %v1694_v39 = vpack.c.bf16 %v1240_v38, %v1240_v38  ;;  %1399 = vst.msk [vmem:[%s3270_s28 + $0x50] sm:$0xf] %vm1378_vm4, %v1692_v21 }
 0x2ee   : > { %v2003_v52 = vpop.eup %2002  ;;  %v1243_v37 = vmul.f32 %v2001_v61, %v3196_v9  ;;  %v1695_v33 = vpack.c.bf16 %v1241_v3, %v1241_v3  ;;  %1400 = vst.msk [vmem:[%s3270_s28 + $0x54] sm:$0xf] %vm1378_vm4, %v1693_v15 }
 0x2ef   : > { %v2005_v53 = vpop.eup %2004  ;;  %v1244_v1 = vmul.f32 %v2003_v52, %v3202_v16  ;;  %v1696_v43 = vpack.c.bf16 %v1242_v46, %v1242_v46  ;;  %1401 = vst.msk [vmem:[%s3270_s28 + $0x58] sm:$0xf] %vm1378_vm4, %v1694_v39 }
 0x2f0   : > { %v2007_v47 = vpop.eup %2006  ;;  %v1245_v23 = vmul.f32 %v2005_v53, %v3208_v24  ;;  %v1697_v54 = vpack.c.bf16 %v1243_v37, %v1243_v37  ;;  %1402 = vst.msk [vmem:[%s3270_s28 + $0x5c] sm:$0xf] %vm1378_vm4, %v1695_v33 }
 0x2f1   : > { %v2009_v9 = vpop.eup %2008  ;;  %v1246_v20 = vmul.f32 %v2007_v47, %v3212_v42  ;;  %v1698_v30 = vpack.c.bf16 %v1244_v1, %v1244_v1  ;;  %1403 = vst.msk [vmem:[%s3270_s28 + $0x60] sm:$0xf] %vm1378_vm4, %v1696_v43 }
 0x2f2   : > { %v2011_v16 = vpop.eup %2010  ;;  %v1247_v35 = vmul.f32 %v2009_v9, %v3216_v57  ;;  %v1699_v22 = vpack.c.bf16 %v1245_v23, %v1245_v23  ;;  %1404 = vst.msk [vmem:[%s3270_s28 + $0x64] sm:$0xf] %vm1378_vm4, %v1697_v54 }
 0x2f3   : > { %v2013_v24 = vpop.eup %2012  ;;  %v1248_v12 = vmul.f32 %v2011_v16, %v3455_v26  ;;  %v1700_v42 = vpack.c.bf16 %v1246_v20, %v1246_v20  ;;  %1405 = vst.msk [vmem:[%s3270_s28 + $0x68] sm:$0xf] %vm1378_vm4, %v1698_v30 }
 0x2f4   : > { %v1249_v18 = vmul.f32 %v2013_v24, %v3456_v13  ;;  %v1701_v5 = vpack.c.bf16 %v1247_v35, %v1247_v35  ;;  %1406 = vst.msk [vmem:[%s3270_s28 + $0x6c] sm:$0xf] %vm1378_vm4, %v1699_v22 }
 0x2f5   : > { %v1702_v57 = vpack.c.bf16 %v1248_v12, %v1248_v12  ;;  %1407 = vst.msk [vmem:[%s3270_s28 + $0x70] sm:$0xf] %vm1378_vm4, %v1700_v42 }
 0x2f6   : > { %v1703_v36 = vpack.c.bf16 %v1249_v18, %v1249_v18  ;;  %1408 = vst.msk [vmem:[%s3270_s28 + $0x74] sm:$0xf] %vm1378_vm4, %v1701_v5 }
 0x2f7   : > { %1409 = vst.msk [vmem:[%s3270_s28 + $0x78] sm:$0xf] %vm1378_vm4, %v1702_v57 }
 0x2f8   : > { %1410 = vst.msk [vmem:[%s3270_s28 + $0x7c] sm:$0xf] %vm1378_vm4, %v1703_v36 }
 0x2f9   : > { %2197 = shalt.err (!%p2194_p8)
}
 0x2fa   : > { %s2198_s30 = scalar_lea.hbm %s3374_s16, 2048  ;;  %s2202_s15 = scalar_lea.hbm %s3432_s6, 4096 }
 0x2fb   : > { %p2199_p6 = scmp.ne.s32.totalorder %s3374_s16, %s2198_s30  ;;  %p2203_p0 = scmp.lt.u32.totalorder %s3374_s16, %s3432_s6 }
 0x2fc   : > { %p2204_p5 = scmp.lt.u32.totalorder %s2202_s15, %s2198_s30  ;;  %p2206_p7 = scmp.lt.u32.totalorder %s2198_s30, %s3374_s16 }
 0x2fd   : > { %p2200_p10 = pnand %p2199_p6, %p3457_p4 }
 0x2fe   : > { %p2205_p9 = por %p2204_p5, %p2203_p0 }
 0x2ff   : > { %p2201_p11 = pneg %p2200_p10 }
 0x300   : > { %p2207_p12 = por %p2206_p7, %p2205_p9 }
 0x302   : > { %p2208_p13 = pnand %p2207_p12, %p2201_p11 }
 0x304   : > { %2211 = shalt.err (!%p2208_p13)
}
 0x305   : > { %s2273_s29 = smov 64   ;;  %s2274_s27 = smov 4  }
 0x306   : > { %1787 = dma.vmem_to_hbm [thread:$0]  (%p3457_p4), %s3376_s20, 2048, %s3374_s16, %s1412_s9, %s2273_s29, %s2273_s29, %s2274_s27  }
 0x307 PF: > { %s1440_s26 = sand.u32 1, %s2250_s21   ;;  %p3458_p1 = scmp.ne.s32.totalorder %s3444_s11, 0 }
 0x308   : > { %p3459_p3 = scmp.ge.s32.totalorder %s2262_s24, 2  ;;  %s1441_s10 = scalar_lea.sflag [#allocation4], %s1440_s26 }
 0x30a   : > { %p1810_p2 = pnand %p3459_p3, %p3458_p1 }
 0x30c   : > { %2245 = dma.done.wait (!%p1810_p2), %s1441_s10, 2048  }
 0x30d   : > { %2247 = vsyncadd (!%p1810_p2), %s1441_s10, 4294965248  ;;  %p22_p8 = scmp.ge.s32.totalorder %s2473_s7, 4   ;;  %s3460_s21 = smov %s2254_s22 }
 0x30e   : > { %s3461_s22 = smov %s2258_s23  ;;  %s3462_s23 = smov %s2485_s18 }
 0x30f   : > { %s3463_s24 = smov %s2473_s7  ;;  %24 = sbr.rel (!%p22_p8) target bundleno = 8 (0x8), region = 109 }
 0x316   :  { %1446 = vsyncpa [#allocation3], 1 }
 0x317   :  { %1448 = vsyncpa [#allocation3 + $0x1], 1 }
 0x318   :  { %1449 = vsyncpa [#allocation6], 1 }
 0x319   :  { %1450 = vsyncpa [#allocation9], 1 }
 0x31a   :  { %1451 = vsyncpa [#allocation12], 1 }
 0x31b   :  { %1452 = vsyncpa [#allocation4], 1 }
 0x31c   :  { %1454 = vsyncpa [#allocation4 + $0x1], 1 }

// kernel: c2f_dysnakeconv_forward.20
= control target key start
LH: loop header
LB: loop body
LE: loop exit
PB: predicated region body
PF: predicated region fallthrough
CT: control target
= control target key end

     0   :  { %s2312_s0 = inlined_call_operand.hbm [shape: bf16[512,8], index: 0, kind: input, shape index: {}]   ;;  %s2313_s1 = inlined_call_operand.hbm [shape: bf16[512,8], index: 1, kind: input, shape index: {}]   ;;  %s2314_s2 = inlined_call_operand.hbm [shape: bf16[512,8], index: 2, kind: input, shape index: {}]   ;;  %s2315_s3 = inlined_call_operand.vmem [shape: bf16[8,8], index: 3, kind: input, shape index: {}]   ;;  %s2316_s4 = inlined_call_operand.vmem [shape: bf16[8,8], index: 4, kind: input, shape index: {}]   ;;  %s2317_s5 = inlined_call_operand.vmem [shape: bf16[8,8], index: 5, kind: input, shape index: {}]   ;;  %s2318_s6 = inlined_call_operand.vmem [shape: f32[1,8], index: 6, kind: input, shape index: {}]   ;;  %s2319_s7 = inlined_call_operand.vmem [shape: f32[1,8], index: 7, kind: input, shape index: {}]   ;;  %s2320_s8 = inlined_call_operand.vmem [shape: bf16[512,8], index: 8, kind: output, shape index: {}]  }
   0x1   :  { %2329 = sst [smem:[#allocation11_spill]] %s2313_s1 }
   0x2   :  { %13 = vsyncpa [#allocation3], 0 }
   0x3   :  { %15 = vsyncpa [#allocation3 + $0x1], 0 }
   0x4   :  { %16 = vsyncpa [#allocation5], 0 }
   0x5   :  { %18 = vsyncpa [#allocation5 + $0x1], 0  ;;  %s1878_s27 = smov 0   ;;  %s1880_s28 = smov 0  }
   0x6   :  { %s1882_s29 = smov 0   ;;  %s1884_s30 = smov 0  }
   0x7 LB: > { %s1897_s9 = sadd.s32 4294967295, %s1826_s30   ;;  %s1900_s10 = sadd.s32 1, %s1826_s30   ;;  %s1826_s30 = sphi %s1884_s30, %s2345_s30   ;;  %s1822_s29 = sphi %s1882_s29, %s2349_s29   ;;  %s1818_s28 = sphi %s1880_s28, %s2348_s28   ;;  %s1814_s27 = sphi %s1878_s27, %s2347_s27  }
   0x8   : > { %2330 = sst [smem:[#allocation9_spill]] %s1900_s10  ;;  %s28_s11 = ssub.s32 %s1826_s30, %s1900_s10 }
   0x9   : > { %s31_s12 = sadd.s32 1, %s1822_s29  ;;  %p29_p0 = scmp.eq.s32.totalorder %s28_s11, 0 }
   0xa   : > { %p38_p1 = scmp.ne.s32.totalorder %s1822_s29, %s1818_s28  ;;  %p39_p2 = scmp.eq.s32.totalorder %s1826_s30, 0 }
   0xb   : > { %p44_p3 = scmp.ne.s32.totalorder %s1818_s28, %s1814_s27  ;;  %p45_p5 = scmp.eq.s32.totalorder %s1897_s9, 0 }
   0xc   : > { %s1910_s13 = scalar_select %p29_p0, %s1822_s29, %s31_s12  }
   0xd   : > { %p40_p4 = por %p39_p2, %p38_p1  ;;  %p1575_p6 = scmp.lt.s32.totalorder %s1826_s30, 4 }
   0xe   : > { %2331 = sst [smem:[#allocation10_spill]] %s1910_s13  ;;  %p1914_p7 = por %p45_p5, %p44_p3 }
   0xf   : > { %s2322_s15 = sand.u32 1, %s1822_s29   ;;  %s1924_s17 = sshll.u32 %s1826_s30, 10 }
  0x10   : > { %s2332_s14 = scalar_select %p1914_p7, 1, 0 }
  0x11   : > { %s1921_s16 = sshll.u32 %s2322_s15, 6  ;;  %p1926_p8 = pnand %p1575_p6, %p40_p4 }
  0x12   : > { %s287_s19 = sand.u32 1, %s1826_s30   ;;  %s2334_s1 = sld [smem:[#allocation11_spill]] }
  0x13   : > { %s291_s23 = scalar_lea.vmem [#allocation4], %s1921_s16  ;;  %s1942_s25 = scalar_lea.sflag [#allocation5], %s287_s19 }
  0x14   : > { %s298_s24 = sshll.u32 %s291_s23, 4  ;;  %p1948_p12 = pneg %p1926_p8  ;;  %s1939_s24 = int_to_ptr.vmem [resolvable:$true] %s298_s24 }
  0x18   : > { %s1935_s22 = scalar_lea.hbm %s2334_s1, %s1924_s17  ;;  %s1703_s20 = scalar_lea.hbm %s2334_s1, 4096 }
  0x19   : > { %s1698_s26 = scalar_lea.hbm %s1935_s22, 1024  ;;  %p1704_p1 = scmp.lt.u32.totalorder %s1935_s22, %s2334_s1 }
  0x1a   : > { %p1699_p11 = scmp.ne.s32.totalorder %s1935_s22, %s1698_s26  ;;  %p1705_p2 = scmp.lt.u32.totalorder %s1703_s20, %s1698_s26 }
  0x1b   : > { %p1707_p4 = scmp.lt.u32.totalorder %s1698_s26, %s1935_s22 }
  0x1c   : > { %p1701_p13 = pnand %p1948_p12, %p1699_p11  ;;  %p1706_p3 = por %p1705_p2, %p1704_p1 }
  0x1e   : > { %p1702_p0 = pneg %p1701_p13  ;;  %p1708_p5 = por %p1707_p4, %p1706_p3 }
  0x20   : > { %p1709_p6 = pnand %p1708_p5, %p1702_p0 }
  0x22   : > { %1712 = shalt.err (!%p1709_p6)
}
  0x23   : > { %s1713_s19 = scalar_lea.vmem %s1939_s24, 1024  ;;  %s1828_s11 = smov [#allocation4]  }
  0x24   : > { %p1714_p11 = scmp.ne.s32.totalorder %s1939_s24, %s1713_s19  ;;  %s1718_s12 = sshll.u32 %s1828_s11, 4  ;;  %s1719_s12 = int_to_ptr.vmem [resolvable:$false] %s1718_s12 }
  0x25   : > { %s1720_s21 = scalar_lea.vmem %s1719_s12, 2048  ;;  %p1721_p10 = scmp.lt.s32.totalorder %s1939_s24, %s1719_s12 }
  0x26   : > { %p1716_p13 = pnand %p1714_p11, %p1948_p12  ;;  %p1722_p7 = scmp.lt.s32.totalorder %s1720_s21, %s1713_s19 }
  0x28   : > { %p1717_p9 = pneg %p1716_p13  ;;  %p1723_p1 = por %p1722_p7, %p1721_p10 }
  0x2a   : > { %p1724_p2 = pnand %p1723_p1, %p1717_p9 }
  0x2c   : > { %1727 = shalt.err (!%p1724_p2)
}
  0x2d   : > { %s2323_s26 = smov 64   ;;  %s2325_s20 = smov 4  }
  0x2e   : > { %1571 = dma.hbm_to_vmem [thread:$0]  (!%p1926_p8), %s1935_s22, 1024, %s1939_s24, %s1942_s25, %s2323_s26, %s2323_s26, %s2325_s20  }
  0x2f   : > { %p2336_p7 = scmp.lt.s32.totalorder %s1826_s30, 5  ;;  %p2337_p9 = scmp.ge.s32.totalorder %s1826_s30, 1 }
  0x30   : > { %s1987_s12 = scalar_lea.hbm %s2312_s0, %s1924_s17  ;;  %s270_s21 = scalar_lea.vmem [#allocation2], %s1921_s16 }
  0x31   : > { %p1979_p10 = pnand %p2337_p9, %p2336_p7  ;;  %s277_s15 = sshll.u32 %s270_s21, 4  ;;  %s1990_s15 = int_to_ptr.vmem [resolvable:$true] %s277_s15 }
  0x32   : > { %s1996_s30 = scalar_lea.hbm %s2314_s2, %s1924_s17  ;;  %s2339_s26 = sand.u32 1, %s1822_s29  }
  0x33   : > { %s2338_s23 = scalar_select %p1979_p10, 1, 0 }
  0x34   : > { %s2000_s20 = scalar_lea.sflag [#allocation3], %s2339_s26  ;;  %s1728_s1 = scalar_lea.hbm %s1987_s12, 1024 }
  0x35   : > { %p1729_p0 = scmp.ne.s32.totalorder %s1987_s12, %s1728_s1  ;;  %s1733_s13 = scalar_lea.hbm %s2312_s0, 4096 }
  0x36   : > { %p1734_p5 = scmp.lt.u32.totalorder %s1987_s12, %s2312_s0  ;;  %p1735_p6 = scmp.lt.u32.totalorder %s1733_s13, %s1728_s1 }
  0x37   : > { %p1731_p3 = pnand %p1729_p0, %p1948_p12  ;;  %p1737_p13 = scmp.lt.u32.totalorder %s1728_s1, %s1987_s12 }
  0x38   : > { %p1736_p11 = por %p1735_p6, %p1734_p5 }
  0x39   : > { %p1732_p4 = pneg %p1731_p3 }
  0x3a   : > { %p1738_p1 = por %p1737_p13, %p1736_p11 }
  0x3c   : > { %p1739_p2 = pnand %p1738_p1, %p1732_p4 }
  0x3e   : > { %1742 = shalt.err (!%p1739_p2)
}
  0x3f   : > { %s1743_s17 = scalar_lea.vmem %s1990_s15, 1024  ;;  %s1831_s26 = smov [#allocation2]  }
  0x40   : > { %p1744_p7 = scmp.ne.s32.totalorder %s1990_s15, %s1743_s17  ;;  %s1748_s22 = sshll.u32 %s1831_s26, 4  ;;  %s1749_s22 = int_to_ptr.vmem [resolvable:$false] %s1748_s22 }
  0x41   : > { %s1750_s10 = scalar_lea.vmem %s1749_s22, 2048  ;;  %p1751_p3 = scmp.lt.s32.totalorder %s1990_s15, %s1749_s22 }
  0x42   : > { %p1746_p9 = pnand %p1744_p7, %p1948_p12  ;;  %p1752_p10 = scmp.lt.s32.totalorder %s1750_s10, %s1743_s17 }
  0x44   : > { %p1747_p0 = pneg %p1746_p9  ;;  %p1753_p5 = por %p1752_p10, %p1751_p3 }
  0x46   : > { %p1754_p6 = pnand %p1753_p5, %p1747_p0 }
  0x48   : > { %1757 = shalt.err (!%p1754_p6)
}
  0x49   : > { %s2340_s1 = smov 4   ;;  %s2341_s13 = smov 64  }
  0x4a   : > { %1568 = dma.hbm_to_vmem [thread:$0]  (!%p1926_p8), %s1987_s12, 1024, %s1990_s15, %s2000_s20, %s2341_s13, %s2341_s13, %s2340_s1  }
  0x4b   : > { %s312_s24 = scalar_lea.vmem [#allocation6], %s1921_s16  ;;  %s1758_s11 = scalar_lea.hbm %s1996_s30, 1024 }
  0x4c   : > { %s319_s19 = sshll.u32 %s312_s24, 4  ;;  %p1759_p10 = scmp.ne.s32.totalorder %s1996_s30, %s1758_s11  ;;  %s2028_s19 = int_to_ptr.vmem [resolvable:$true] %s319_s19 }
  0x4d   : > { %s1763_s26 = scalar_lea.hbm %s2314_s2, 4096  ;;  %p1764_p13 = scmp.lt.u32.totalorder %s1996_s30, %s2314_s2 }
  0x4e   : > { %p1761_p4 = pnand %p1759_p10, %p1948_p12  ;;  %p1765_p1 = scmp.lt.u32.totalorder %s1763_s26, %s1758_s11 }
  0x4f   : > { %p1767_p7 = scmp.lt.u32.totalorder %s1758_s11, %s1996_s30 }
  0x50   : > { %p1762_p11 = pneg %p1761_p4  ;;  %p1766_p2 = por %p1765_p1, %p1764_p13 }
  0x52   : > { %p1768_p9 = por %p1767_p7, %p1766_p2 }
  0x54   : > { %p1769_p0 = pnand %p1768_p9, %p1762_p11 }
  0x56   : > { %1772 = shalt.err (!%p1769_p0)
}
  0x57   : > { %s1773_s15 = scalar_lea.vmem %s2028_s19, 1024  ;;  %s1832_s16 = smov [#allocation6]  }
  0x58   : > { %p1774_p3 = scmp.ne.s32.totalorder %s2028_s19, %s1773_s15  ;;  %s1778_s20 = sshll.u32 %s1832_s16, 4  ;;  %s1779_s20 = int_to_ptr.vmem [resolvable:$false] %s1778_s20 }
  0x59   : > { %s1780_s12 = scalar_lea.vmem %s1779_s20, 2048  ;;  %p1781_p10 = scmp.lt.s32.totalorder %s2028_s19, %s1779_s20 }
  0x5a   : > { %p1776_p5 = pnand %p1774_p3, %p1948_p12  ;;  %p1782_p4 = scmp.lt.s32.totalorder %s1780_s12, %s1773_s15 }
  0x5c   : > { %p1777_p6 = pneg %p1776_p5  ;;  %p1783_p13 = por %p1782_p4, %p1781_p10 }
  0x5e   : > { %p1784_p1 = pnand %p1783_p13, %p1777_p6 }
  0x60   : > { %1787 = shalt.err (!%p1784_p1)
}
  0x61   : > { %1574 = dma.hbm_to_vmem [thread:$0]  (!%p1926_p8), %s1996_s30, 1024, %s2028_s19, %s1942_s25, %s2341_s13, %s2341_s13, %s2340_s1  }
  0x62   : > { %p2342_p12 = scmp.ne.s32.totalorder %s2338_s23, 0 }
  0x63   : > { %s333_s27 = sand.u32 (!%p2342_p12), 1, %s1818_s28   ;;  %p2343_p11 = scmp.ne.s32.totalorder (!%p2342_p12), %s2332_s14, 0 }
  0x64   : > { %331 = sbr.rel (%p2342_p12) target bundleno = 410 (0x19a), region = 52  ;;  %s2058_s24 = sshll.u32 (!%p2342_p12), %s333_s27, 6 }
  0x65   : > { %s334_s11 = scalar_lea.sflag (!%p2342_p12), [#allocation3], %s333_s27  ;;  %s2061_s21 = scalar_lea.vmem (!%p2342_p12), [#allocation2], %s2058_s24 }
  0x6b   : > { %1805 = dma.done.wait (%p2343_p11), %s334_s11, 1024  }
  0x6c   : > { %1807 = vsyncadd (%p2343_p11), %s334_s11, 4294966272  ;;  %s342_s18 = sand.u32 1, %s1897_s9   ;;  %s2069_s23 = scalar_lea.vmem [#allocation4], %s2058_s24 }
  0x6d   : > { %s343_s25 = scalar_lea.sflag [#allocation5], %s342_s18 }
  0x6e   : > { %1809 = dma.done.wait (%p2343_p11), %s343_s25, 2048  }
  0x6f   : > { %1811 = vsyncadd (%p2343_p11), %s343_s25, 4294965248  ;;  %vm507_vm0 = vcmask 1043456   ;;  %vm482_vm1 = vcmask 64512   ;;  %v441_v0 = vld [vmem:[%s2316_s4] sm:$0xf]  ;;  %v1612_v6 = vld [vmem:[%s2069_s23 + $0x8] sm:$0xff]  }
  0x70   : > { %v424_v1 = vld [vmem:[%s2315_s3] sm:$0xf]  ;;  %1555 = vmatprep.subr.msk.bf16.mxu1 %vm507_vm0, %v441_v0  ;;  %v509_v2 = vsel %vm507_vm0, %v441_v0, 0  ;;  %v1613_v7 = vld [vmem:[%s2061_s21 + $0x8] sm:$0xff]   ;;  %v1614_v10 = vld [vmem:[%s2069_s23 + $0x10] sm:$0xff]   ;;  %s2107_s26 = scalar_lea.vmem [#allocation6], %s2058_s24 }
  0x71   : > { %1556 = vmatprep.subr.msk.bf16.mxu0 %vm507_vm0, %v424_v1  ;;  %v673_v3 = vsel %vm507_vm0, %v424_v1, 0  ;;  %v1610_v4 = vld [vmem:[%s2069_s23] sm:$0xff]   ;;  %1468 = vmatpush3.bf16.msra.mxu1 %v509_v2  ;;  %v1615_v11 = vld [vmem:[%s2061_s21 + $0x10] sm:$0xff]   ;;  %v1616_v12 = vld [vmem:[%s2069_s23 + $0x18] sm:$0xff]   ;;  %s1335_s20 = sshll.u32 %s1897_s9, 4  ;;  %vm1191_vm2 = vcmask 60416  }
  0x72   : > { %v1611_v5 = vld [vmem:[%s2061_s21] sm:$0xff]   ;;  %1486 = vmatpush3.bf16.msra.mxu0 %v673_v3  ;;  %1469 = vmatprep.mubr.msk.bf16.mxu1 %vm482_vm1, %v1610_v4  ;;  %v1617_v13 = vld [vmem:[%s2061_s21 + $0x18] sm:$0xff]   ;;  %v1620_v16 = vld [vmem:[%s2069_s23 + $0x28] sm:$0xff]   ;;  %p2205_p8 = scmp.lt.s32.totalorder %s1335_s20, 63 }
  0x73   : > { %1487 = vmatprep.mubr.msk.bf16.mxu0 %vm482_vm1, %v1611_v5  ;;  %1557 = vmatprep.subr.msk.bf16.mxu1 %vm507_vm0, %v424_v1  ;;  %v788_v8 = vld [vmem:[%s2317_s5] sm:$0xf]  ;;  %v1621_v17 = vld [vmem:[%s2107_s26 + $0x8] sm:$0xff]   ;;  %v1622_v18 = vld [vmem:[%s2069_s23 + $0x30] sm:$0xff]  }
  0x74   : > { %1470 = vmatmul.mubr.msk.bf16.vlgmr.msra.gmra.mrb[0].mxu1 %vm482_vm1, %v1612_v6  ;;  %1558 = vmatprep.subr.msk.bf16.mxu0 %vm507_vm0, %v788_v8  ;;  %v854_v9 = vsel %vm507_vm0, %v788_v8, 0  ;;  %v1618_v14 = vld [vmem:[%s2069_s23 + $0x20] sm:$0xff]   ;;  %v1623_v19 = vld [vmem:[%s2107_s26 + $0x10] sm:$0xff]   ;;  %v1624_v20 = vld [vmem:[%s2069_s23 + $0x38] sm:$0xff]   ;;  %s2351_s20 = smov (!%p2205_p8, %s1335_s20), 63 }
  0x75   : > { %1488 = vmatmul.mubr.msk.bf16.vlgmr.msra.gmra.mrb[0].mxu0 %vm482_vm1, %v1613_v7  ;;  %1522 = vmatpush3.bf16.msra.mxu1 %v673_v3  ;;  %v1619_v15 = vld [vmem:[%s2107_s26] sm:$0xff]   ;;  %v1625_v21 = vld [vmem:[%s2107_s26 + $0x18] sm:$0xff]   ;;  %v1628_v24 = vld [vmem:[%s2061_s21 + $0x28] sm:$0xff]   ;;  %s1336_s9 = sshll.u32 %s2351_s20, 2 }
  0x76   : > { %1504 = vmatpush3.bf16.msra.mxu0 %v854_v9  ;;  %1473 = vmatprep.mubr.msk.bf16.mxu1 %vm482_vm1, %v1614_v10  ;;  %v1626_v22 = vld [vmem:[%s2061_s21 + $0x20] sm:$0xff]   ;;  %v1629_v25 = vld [vmem:[%s2107_s26 + $0x28] sm:$0xff]   ;;  %v1630_v26 = vld [vmem:[%s2061_s21 + $0x30] sm:$0xff]   ;;  %s2249_s11 = scalar_lea.vmem %s2320_s8, %s1336_s9 }
  0x77   : > { %1491 = vmatprep.mubr.msk.bf16.mxu0 %vm482_vm1, %v1615_v11  ;;  %v1627_v23 = vld [vmem:[%s2107_s26 + $0x20] sm:$0xff]   ;;  %v1631_v27 = vld [vmem:[%s2107_s26 + $0x30] sm:$0xff]   ;;  %v1632_v28 = vld [vmem:[%s2061_s21 + $0x38] sm:$0xff]  }
  0x78   : > { %v1633_v29 = vld [vmem:[%s2107_s26 + $0x38] sm:$0xff]   ;;  %v2145_v39 = vld [vmem:[%s2318_s6] ss:$0 sm:$0xff] }
  0x79   : > { %v2150_v42 = vld [vmem:[%s2319_s7] ss:$0 sm:$0xff] }
  0x7c   : > { %1474 = vmatmul.mubr.msk.bf16.gmra.mrb[4].mxu1 %vm482_vm1, %v1616_v12 }
  0x7d   : > { %1492 = vmatmul.mubr.msk.bf16.gmra.mrb[4].mxu0 %vm482_vm1, %v1617_v13  ;;  %1477 = vmatprep.mubr.msk.bf16.mxu1 %vm482_vm1, %v1618_v14 }
  0x7e   : > { %1505 = vmatprep.mubr.msk.bf16.mxu0 %vm482_vm1, %v1619_v15 }
  0x84   : > { %1478 = vmatmul.mubr.msk.bf16.gmra.mrb[8].mxu1 %vm482_vm1, %v1620_v16 }
  0x85   : > { %1506 = vmatmul.mubr.msk.bf16.vlgmr.msra.gmra.mrb[0].mxu0 %vm482_vm1, %v1621_v17  ;;  %1481 = vmatprep.mubr.msk.bf16.mxu1 %vm482_vm1, %v1622_v18 }
  0x86   : > { %1509 = vmatprep.mubr.msk.bf16.mxu0 %vm482_vm1, %v1623_v19 }
  0x8c   : > { %1482 = vmatmul.mubr.msk.bf16.gmra.mrb[12].mxu1 %vm482_vm1, %v1624_v20 }
  0x8d   : > { %1510 = vmatmul.mubr.msk.bf16.gmra.mrb[4].mxu0 %vm482_vm1, %v1625_v21  ;;  %1495 = vmatprep.mubr.msk.bf16.mxu1 %vm482_vm1, %v1626_v22 }
  0x8e   : > { %1513 = vmatprep.mubr.msk.bf16.mxu0 %vm482_vm1, %v1627_v23 }
  0x94   : > { %1496 = vmatmul.mubr.msk.bf16.vlgmr.msra.gmra.mrb[8].mxu1 %vm482_vm1, %v1628_v24 }
  0x95   : > { %1514 = vmatmul.mubr.msk.bf16.gmra.mrb[8].mxu0 %vm482_vm1, %v1629_v25  ;;  %1499 = vmatprep.mubr.msk.bf16.mxu1 %vm482_vm1, %v1630_v26 }
  0x96   : > { %1517 = vmatprep.mubr.msk.bf16.mxu0 %vm482_vm1, %v1631_v27 }
  0x9c   : > { %1500 = vmatmul.mubr.msk.bf16.gmra.mrb[12].mxu1 %vm482_vm1, %v1632_v28 }
  0x9d   : > { %1518 = vmatmul.mubr.msk.bf16.gmra.mrb[12].mxu0 %vm482_vm1, %v1633_v29 }
 0x147   : > { %v1471_v30 = vpop.f32.mrb[0].mxu1 }
 0x148   : > { %v545_v31 = vpop.f32.mrb[1].mxu1 }
 0x149   : > { %v1472_v32 = vpop.f32.mrb[2].mxu1 }
 0x14a   : > { %v548_v33 = vpop.f32.mrb[3].mxu1 }
 0x14f   : > { %v1475_v34 = vpop.f32.mrb[4].mxu1 }
 0x150   : > { %v561_v35 = vpop.f32.mrb[5].mxu1 }
 0x151   : > { %v1476_v36 = vpop.f32.mrb[6].mxu1 }
 0x152   : > { %v564_v37 = vpop.f32.mrb[7].mxu1 }
 0x158   : > { %v1507_v38 = vpop.f32.mrb[0].mxu0 }
 0x159   : > { %v1523_v40 = vadd.f32 %v1507_v38, %v1471_v30  ;;  %v890_v41 = vpop.f32.mrb[1].mxu0 }
 0x15a   : > { %v1524_v43 = vadd.f32 %v890_v41, %v545_v31  ;;  %v1508_v44 = vpop.f32.mrb[2].mxu0 }
 0x15b   : > { %v978_v45 = vmul.f32 %v1523_v40, %v2145_v39  ;;  %v1525_v46 = vadd.f32 %v1508_v44, %v1472_v32  ;;  %v893_v47 = vpop.f32.mrb[3].mxu0 }
 0x15c   : > { %v976_v48 = vmul.f32 %v1524_v43, %v2145_v39  ;;  %v1526_v49 = vadd.f32 %v893_v47, %v548_v33 }
 0x15d   : > { %v2155_v50 = vadd.f32 %v2150_v42, %v978_v45  ;;  %v979_v51 = vmul.f32 %v1525_v46, %v2145_v39 }
 0x15e   : > { %v2159_v52 = vadd.f32 %v2150_v42, %v976_v48  ;;  %v977_v53 = vmul.f32 %v1526_v49, %v2145_v39 }
 0x15f   : > { %v1389_v54 = vmul.f32 -1.442695, %v2155_v50  ;;  %v2164_v55 = vadd.f32 %v2150_v42, %v979_v51 }
 0x160   : > { %v1387_v56 = vmul.f32 -1.442695, %v2159_v52  ;;  %v2168_v57 = vadd.f32 %v2150_v42, %v977_v53  ;;  %v1511_v58 = vpop.f32.mrb[4].mxu0 }
 0x161   : > { %1634 = vpow2.f32 %v1389_v54  ;;  %v1390_v59 = vmul.f32 -1.442695, %v2164_v55  ;;  %v1527_v60 = vadd.f32 %v1511_v58, %v1475_v34  ;;  %v906_v61 = vpop.f32.mrb[5].mxu0 }
 0x162   : > { %1636 = vpow2.f32 %v1387_v56  ;;  %v1388_v62 = vmul.f32 -1.442695, %v2168_v57  ;;  %v1528_v63 = vadd.f32 %v906_v61, %v561_v35  ;;  %v1512_v0 = vpop.f32.mrb[6].mxu0 }
 0x163   : > { %1638 = vpow2.f32 %v1390_v59  ;;  %v982_v1 = vmul.f32 %v1527_v60, %v2145_v39  ;;  %v1529_v2 = vadd.f32 %v1512_v0, %v1476_v36  ;;  %v909_v3 = vpop.f32.mrb[7].mxu0 }
 0x164   : > { %1640 = vpow2.f32 %v1388_v62  ;;  %v980_v4 = vmul.f32 %v1528_v63, %v2145_v39  ;;  %v1530_v5 = vadd.f32 %v909_v3, %v564_v37 }
 0x165   : > { %v2175_v6 = vadd.f32 %v2150_v42, %v982_v1  ;;  %v983_v7 = vmul.f32 %v1529_v2, %v2145_v39 }
 0x166   : > { %v2179_v8 = vadd.f32 %v2150_v42, %v980_v4  ;;  %v981_v9 = vmul.f32 %v1530_v5, %v2145_v39 }
 0x167   : > { %v1393_v10 = vmul.f32 -1.442695, %v2175_v6  ;;  %v2184_v11 = vadd.f32 %v2150_v42, %v983_v7  ;;  %v1497_v12 = vpop.f32.mrb[8].mxu1 }
 0x168   : > { %v1391_v13 = vmul.f32 -1.442695, %v2179_v8  ;;  %v2188_v14 = vadd.f32 %v2150_v42, %v981_v9  ;;  %v1515_v15 = vpop.f32.mrb[8].mxu0  ;;  %v741_v16 = vpop.f32.mrb[9].mxu1 }
 0x169   : > { %1642 = vpow2.f32 %v1393_v10  ;;  %v1394_v17 = vmul.f32 -1.442695, %v2184_v11  ;;  %v1531_v18 = vadd.f32 %v1515_v15, %v1497_v12  ;;  %v922_v19 = vpop.f32.mrb[9].mxu0  ;;  %v1498_v20 = vpop.f32.mrb[10].mxu1 }
 0x16a   : > { %1644 = vpow2.f32 %v1391_v13  ;;  %v1392_v21 = vmul.f32 -1.442695, %v2188_v14  ;;  %v1532_v22 = vadd.f32 %v922_v19, %v741_v16  ;;  %v1516_v23 = vpop.f32.mrb[10].mxu0  ;;  %v744_v24 = vpop.f32.mrb[11].mxu1 }
 0x16b   : > { %v1635_v25 = vpop.eup %1634  ;;  %1646 = vpow2.f32 %v1394_v17  ;;  %v986_v26 = vmul.f32 %v1531_v18, %v2145_v39  ;;  %v1533_v27 = vadd.f32 %v1516_v23, %v1498_v20  ;;  %v925_v28 = vpop.f32.mrb[11].mxu0 }
 0x16c   : > { %v1637_v29 = vpop.eup %1636  ;;  %v1065_v30 = vadd.f32 1.0, %v1635_v25  ;;  %1648 = vpow2.f32 %v1392_v21  ;;  %v984_v31 = vmul.f32 %v1532_v22, %v2145_v39  ;;  %v1534_v32 = vadd.f32 %v925_v28, %v744_v24 }
 0x16d   : > { %v1639_v33 = vpop.eup %1638  ;;  %v1063_v34 = vadd.f32 1.0, %v1637_v29  ;;  %v2196_v35 = vadd.f32 %v2150_v42, %v986_v26  ;;  %v987_v36 = vmul.f32 %v1533_v27, %v2145_v39 }
 0x16e   : > { %v1641_v37 = vpop.eup %1640  ;;  %1650 = vrcp.f32 %v1065_v30  ;;  %v1066_v38 = vadd.f32 1.0, %v1639_v33  ;;  %v2200_v40 = vadd.f32 %v2150_v42, %v984_v31  ;;  %v985_v41 = vmul.f32 %v1534_v32, %v2145_v39 }
 0x16f   : > { %1652 = vrcp.f32 %v1063_v34  ;;  %v1064_v43 = vadd.f32 1.0, %v1641_v37  ;;  %v1397_v44 = vmul.f32 -1.442695, %v2196_v35  ;;  %v2211_v45 = vadd.f32 %v2150_v42, %v987_v36  ;;  %v1501_v46 = vpop.f32.mrb[12].mxu1 }
 0x170   : > { %1654 = vrcp.f32 %v1066_v38  ;;  %v1395_v47 = vmul.f32 -1.442695, %v2200_v40  ;;  %v2215_v48 = vadd.f32 %v2150_v42, %v985_v41  ;;  %v1519_v49 = vpop.f32.mrb[12].mxu0  ;;  %v757_v51 = vpop.f32.mrb[13].mxu1 }
 0x171   : > { %1656 = vrcp.f32 %v1064_v43  ;;  %v1398_v53 = vmul.f32 -1.442695, %v2211_v45  ;;  %v1535_v54 = vadd.f32 %v1519_v49, %v1501_v46  ;;  %v938_v56 = vpop.f32.mrb[13].mxu0  ;;  %v1502_v58 = vpop.f32.mrb[14].mxu1 }
 0x172   : > { %1658 = vpow2.f32 %v1397_v44  ;;  %v1396_v59 = vmul.f32 -1.442695, %v2215_v48  ;;  %v1536_v60 = vadd.f32 %v938_v56, %v757_v51  ;;  %v1520_v61 = vpop.f32.mrb[14].mxu0  ;;  %v760_v62 = vpop.f32.mrb[15].mxu1 }
 0x173   : > { %v1643_v63 = vpop.eup %1642  ;;  %1660 = vpow2.f32 %v1395_v47  ;;  %v990_v0 = vmul.f32 %v1535_v54, %v2145_v39  ;;  %v1537_v1 = vadd.f32 %v1520_v61, %v1502_v58  ;;  %v941_v2 = vpop.f32.mrb[15].mxu0 }
 0x174   : > { %v1645_v3 = vpop.eup %1644  ;;  %v1069_v4 = vadd.f32 1.0, %v1643_v63  ;;  %1662 = vpow2.f32 %v1398_v53  ;;  %v988_v5 = vmul.f32 %v1536_v60, %v2145_v39  ;;  %v1538_v7 = vadd.f32 %v941_v2, %v760_v62 }
 0x175   : > { %v1647_v9 = vpop.eup %1646  ;;  %v1067_v10 = vadd.f32 1.0, %v1645_v3  ;;  %1664 = vpow2.f32 %v1396_v59  ;;  %v2228_v12 = vadd.f32 %v2150_v42, %v990_v0  ;;  %v991_v13 = vmul.f32 %v1537_v1, %v2145_v39 }
 0x176   : > { %v1649_v15 = vpop.eup %1648  ;;  %1666 = vrcp.f32 %v1069_v4  ;;  %v1070_v16 = vadd.f32 1.0, %v1647_v9  ;;  %v2232_v17 = vadd.f32 %v2150_v42, %v988_v5  ;;  %v989_v18 = vmul.f32 %v1538_v7, %v2145_v39 }
 0x177   : > { %1668 = vrcp.f32 %v1067_v10  ;;  %v1068_v19 = vadd.f32 1.0, %v1649_v15  ;;  %v1401_v20 = vmul.f32 -1.442695, %v2228_v12  ;;  %v2238_v21 = vadd.f32 %v2150_v42, %v991_v13 }
 0x178   : > { %v1651_v22 = vpop.eup %1650  ;;  %1670 = vrcp.f32 %v1070_v16  ;;  %v1399_v23 = vmul.f32 -1.442695, %v2232_v17  ;;  %v2242_v24 = vadd.f32 %v2150_v42, %v989_v18 }
 0x179   : > { %v1653_v25 = vpop.eup %1652  ;;  %v1113_v26 = vmul.f32 %v1651_v22, %v2155_v50  ;;  %1672 = vrcp.f32 %v1068_v19  ;;  %v1402_v39 = vmul.f32 -1.442695, %v2238_v21 }
 0x17a   : > { %v1655_v27 = vpop.eup %1654  ;;  %v1111_v28 = vmul.f32 %v1653_v25, %v2159_v52  ;;  %1674 = vpow2.f32 %v1401_v20  ;;  %v1400_v42 = vmul.f32 -1.442695, %v2242_v24 }
 0x17b   : > { %v1657_v29 = vpop.eup %1656  ;;  %v1426_v30 = vpack.c.bf16 %v1113_v26, %v1113_v26  ;;  %v1114_v50 = vmul.f32 %v1655_v27, %v2164_v55  ;;  %1676 = vpow2.f32 %v1399_v23 }
 0x17c   : > { %v1659_v31 = vpop.eup %1658  ;;  %v1424_v32 = vpack.c.bf16 %v1111_v28, %v1111_v28  ;;  %v1112_v33 = vmul.f32 %v1657_v29, %v2168_v57  ;;  %1678 = vpow2.f32 %v1402_v39 }
 0x17d   : > { %v1661_v34 = vpop.eup %1660  ;;  %1194 = vst.msk [vmem:[%s2249_s11 + $0x8] sm:$0xf] %vm1191_vm2, %v1426_v30  ;;  %v1427_v52 = vpack.c.bf16 %v1114_v50, %v1114_v50  ;;  %v1073_v36 = vadd.f32 1.0, %v1659_v31  ;;  %1680 = vpow2.f32 %v1400_v42 }
 0x17e   : > { %v1663_v37 = vpop.eup %1662  ;;  %1192 = vst.msk [vmem:[%s2249_s11] sm:$0xf] %vm1191_vm2, %v1424_v32  ;;  %v1425_v38 = vpack.c.bf16 %v1112_v33, %v1112_v33  ;;  %v1071_v41 = vadd.f32 1.0, %v1661_v34 }
 0x17f   : > { %v1665_v55 = vpop.eup %1664  ;;  %1195 = vst.msk [vmem:[%s2249_s11 + $0xc] sm:$0xf] %vm1191_vm2, %v1427_v52  ;;  %1682 = vrcp.f32 %v1073_v36  ;;  %v1074_v43 = vadd.f32 1.0, %v1663_v37 }
 0x180   : > { %v1667_v44 = vpop.eup %1666  ;;  %1193 = vst.msk [vmem:[%s2249_s11 + $0x4] sm:$0xf] %vm1191_vm2, %v1425_v38  ;;  %1684 = vrcp.f32 %v1071_v41  ;;  %v1072_v57 = vadd.f32 1.0, %v1665_v55 }
 0x181   : > { %v1669_v46 = vpop.eup %1668  ;;  %v1117_v47 = vmul.f32 %v1667_v44, %v2175_v6  ;;  %1686 = vrcp.f32 %v1074_v43 }
 0x182   : > { %v1671_v49 = vpop.eup %1670  ;;  %v1115_v51 = vmul.f32 %v1669_v46, %v2179_v8  ;;  %1688 = vrcp.f32 %v1072_v57 }
 0x183   : > { %v1673_v53 = vpop.eup %1672  ;;  %v1430_v54 = vpack.c.bf16 %v1117_v47, %v1117_v47  ;;  %v1118_v56 = vmul.f32 %v1671_v49, %v2184_v11 }
 0x184   : > { %v1675_v58 = vpop.eup %1674  ;;  %v1428_v59 = vpack.c.bf16 %v1115_v51, %v1115_v51  ;;  %v1116_v60 = vmul.f32 %v1673_v53, %v2188_v14 }
 0x185   : > { %v1677_v61 = vpop.eup %1676  ;;  %1198 = vst.msk [vmem:[%s2249_s11 + $0x18] sm:$0xf] %vm1191_vm2, %v1430_v54  ;;  %v1431_v6 = vpack.c.bf16 %v1118_v56, %v1118_v56  ;;  %v1077_v62 = vadd.f32 1.0, %v1675_v58 }
 0x186   : > { %v1679_v63 = vpop.eup %1678  ;;  %1196 = vst.msk [vmem:[%s2249_s11 + $0x10] sm:$0xf] %vm1191_vm2, %v1428_v59  ;;  %v1429_v8 = vpack.c.bf16 %v1116_v60, %v1116_v60  ;;  %v1075_v0 = vadd.f32 1.0, %v1677_v61 }
 0x187   : > { %v1681_v1 = vpop.eup %1680  ;;  %1199 = vst.msk [vmem:[%s2249_s11 + $0x1c] sm:$0xf] %vm1191_vm2, %v1431_v6  ;;  %1690 = vrcp.f32 %v1077_v62  ;;  %v1078_v11 = vadd.f32 1.0, %v1679_v63 }
 0x188   : > { %1197 = vst.msk [vmem:[%s2249_s11 + $0x14] sm:$0xf] %vm1191_vm2, %v1429_v8  ;;  %1692 = vrcp.f32 %v1075_v0  ;;  %v1076_v14 = vadd.f32 1.0, %v1681_v1 }
 0x189   : > { %v1683_v2 = vpop.eup %1682  ;;  %1694 = vrcp.f32 %v1078_v11 }
 0x18a   : > { %v1685_v3 = vpop.eup %1684  ;;  %v1121_v4 = vmul.f32 %v1683_v2, %v2196_v35  ;;  %1696 = vrcp.f32 %v1076_v14 }
 0x18b   : > { %v1687_v5 = vpop.eup %1686  ;;  %v1119_v7 = vmul.f32 %v1685_v3, %v2200_v40 }
 0x18c   : > { %v1689_v9 = vpop.eup %1688  ;;  %v1434_v10 = vpack.c.bf16 %v1121_v4, %v1121_v4  ;;  %v1122_v13 = vmul.f32 %v1687_v5, %v2211_v45 }
 0x18d   : > { %v1432_v15 = vpack.c.bf16 %v1119_v7, %v1119_v7  ;;  %v1120_v16 = vmul.f32 %v1689_v9, %v2215_v48 }
 0x18e   : > { %1202 = vst.msk [vmem:[%s2249_s11 + $0x28] sm:$0xf] %vm1191_vm2, %v1434_v10  ;;  %v1435_v18 = vpack.c.bf16 %v1122_v13, %v1122_v13 }
 0x18f   : > { %1200 = vst.msk [vmem:[%s2249_s11 + $0x20] sm:$0xf] %vm1191_vm2, %v1432_v15  ;;  %v1433_v19 = vpack.c.bf16 %v1120_v16, %v1120_v16 }
 0x190   : > { %1203 = vst.msk [vmem:[%s2249_s11 + $0x2c] sm:$0xf] %vm1191_vm2, %v1435_v18 }
 0x191   : > { %v1691_v35 = vpop.eup %1690  ;;  %1201 = vst.msk [vmem:[%s2249_s11 + $0x24] sm:$0xf] %vm1191_vm2, %v1433_v19 }
 0x192   : > { %v1693_v40 = vpop.eup %1692  ;;  %v1125_v45 = vmul.f32 %v1691_v35, %v2228_v12 }
 0x193   : > { %v1695_v20 = vpop.eup %1694  ;;  %v1123_v48 = vmul.f32 %v1693_v40, %v2232_v17 }
 0x194   : > { %v1697_v22 = vpop.eup %1696  ;;  %v1438_v23 = vpack.c.bf16 %v1125_v45, %v1125_v45  ;;  %v1126_v25 = vmul.f32 %v1695_v20, %v2238_v21 }
 0x195   : > { %v1436_v26 = vpack.c.bf16 %v1123_v48, %v1123_v48  ;;  %v1124_v39 = vmul.f32 %v1697_v22, %v2242_v24 }
 0x196   : > { %1206 = vst.msk [vmem:[%s2249_s11 + $0x38] sm:$0xf] %vm1191_vm2, %v1438_v23  ;;  %v1439_v27 = vpack.c.bf16 %v1126_v25, %v1126_v25 }
 0x197   : > { %1204 = vst.msk [vmem:[%s2249_s11 + $0x30] sm:$0xf] %vm1191_vm2, %v1436_v26  ;;  %v1437_v28 = vpack.c.bf16 %v1124_v39, %v1124_v39 }
 0x198   : > { %1207 = vst.msk [vmem:[%s2249_s11 + $0x3c] sm:$0xf] %vm1191_vm2, %v1439_v27 }
 0x199   : > { %1205 = vst.msk [vmem:[%s2249_s11 + $0x34] sm:$0xf] %vm1191_vm2, %v1437_v28 }
 0x19a PF: > { %s2345_s30 = sld [smem:[#allocation9_spill]]  ;;  %s2346_s21 = sld [smem:[#allocation10_spill]] }
 0x19b   : > { %s2347_s27 = smov %s1818_s28  ;;  %s2348_s28 = smov %s1822_s29 }
 0x1a0   : > { %p21_p2 = scmp.ge.s32.totalorder %s2345_s30, 6   ;;  %s2349_s29 = smov %s2346_s21 }
 0x1a2   :  { %23 = sbr.rel (!%p21_p2) target bundleno = 7 (0x7), region = 116 }
 0x1a9   :  { %1230 = vsyncpa [#allocation3], 1 }
 0x1aa   :  { %1232 = vsyncpa [#allocation3 + $0x1], 1 }
 0x1ab   :  { %1233 = vsyncpa [#allocation5], 1 }
 0x1ac   :  { %1235 = vsyncpa [#allocation5 + $0x1], 1 }

// kernel: c2f_dysnakeconv_forward.27
= control target key start
LH: loop header
LB: loop body
LE: loop exit
PB: predicated region body
PF: predicated region fallthrough
CT: control target
= control target key end

     0   :  { %s1156_s21 = smov 0   ;;  %s1362_s0 = inlined_call_operand.vmem [shape: bf16[512,16], index: 0, kind: input, shape index: {}]   ;;  %s1363_s1 = inlined_call_operand.vmem [shape: bf16[512,8], index: 1, kind: input, shape index: {}]   ;;  %s1364_s2 = inlined_call_operand.vmem [shape: bf16[16,16], index: 2, kind: input, shape index: {}]   ;;  %s1365_s3 = inlined_call_operand.vmem [shape: bf16[8,16], index: 3, kind: input, shape index: {}]   ;;  %s1366_s4 = inlined_call_operand.vmem [shape: f32[1,16], index: 4, kind: input, shape index: {}]   ;;  %s1367_s5 = inlined_call_operand.vmem [shape: f32[1,16], index: 5, kind: input, shape index: {}]   ;;  %s1368_s6 = inlined_call_operand.vmem [shape: f32[512,16], index: 6, kind: output, shape index: {}]  }
   0x1 LB: > { %s889_s22 = sadd.s32 4294967295, %s1119_s21   ;;  %p893_p0 = scmp.ge.s32.totalorder %s1119_s21, 1  ;;  %s1119_s21 = sphi %s1156_s21, %s16_s21  }
   0x2   : > { %p224_p1 = scmp.lt.s32.totalorder %s1119_s21, 5 }
   0x4   : > { %p225_p2 = pnand %p893_p0, %p224_p1 }
   0x5   : > { %v312_v0 = vld [vmem:[%s1365_s3] sm:$0xf] (!%p225_p2)  ;;  %vm378_vm0 = vcmask (!%p225_p2), 1043456   ;;  %s894_s27 = sshll.u32 (!%p225_p2), %s889_s22, 4  ;;  %vm353_vm1 = vcmask (!%p225_p2), 64512   ;;  %vm525_vm2 = vcmask (!%p225_p2), 130048  }
   0x6   : > { %228 = sbr.rel (%p225_p2) target bundleno = 294 (0x126), region = 44  ;;  %v1032_v1 = vld [vmem:[%s1364_s2] sm:$0xff] (!%p225_p2)   ;;  %1023 = vmatprep.subr.msk.bf16.mxu1 (!%p225_p2), %vm378_vm0, %v312_v0  ;;  %v380_v2 = vsel (!%p225_p2), %vm378_vm0, %v312_v0, 0  ;;  %p260_p3 = scmp.lt.s32.totalorder (!%p225_p2), %s894_s27, 63 }
   0x7   : > { %989 = vmatprep.subr.bf16.mxu0 (!%p225_p2), %v1032_v1  ;;  %972 = vmatpush3.bf16.msra.mxu1 (!%p225_p2), %v380_v2  ;;  %v1218_v21 = vld [vmem:[%s1366_s4] ss:$0 sm:$0xff] (!%p225_p2) }
   0x8   : > { %990 = vmatpush3.bf16.msra.mxu0 (!%p225_p2), %v1032_v1  ;;  %v1223_v26 = vld [vmem:[%s1367_s5] ss:$0 sm:$0xff] (!%p225_p2) }
   0xd   : > { %s1370_s27 = smov (!%p260_p3, %s894_s27), 63 }
   0xe   : > { %s895_s28 = sshll.u32 %s1370_s27, 2  ;;  %s899_s15 = sshll.u32 %s1370_s27, 3 }
   0xf   : > { %s1176_s7 = scalar_lea.vmem %s1363_s1, %s895_s28  ;;  %s1182_s10 = scalar_lea.vmem %s1362_s0, %s895_s28 }
  0x10   : > { %v1033_v3 = vld [vmem:[%s1176_s7] sm:$0xff]   ;;  %v1035_v5 = vld [vmem:[%s1176_s7 + $0x8] sm:$0xff]   ;;  %v1037_v7 = vld [vmem:[%s1176_s7 + $0x10] sm:$0xff]   ;;  %s1303_s18 = scalar_lea.vmem %s1368_s6, %s899_s15 }
  0x11   : > { %v1034_v4 = vld [vmem:[%s1182_s10] sm:$0xff]   ;;  %973 = vmatprep.mubr.msk.bf16.mxu1 %vm353_vm1, %v1033_v3  ;;  %v1036_v6 = vld [vmem:[%s1182_s10 + $0x8] sm:$0xff]   ;;  %v1038_v8 = vld [vmem:[%s1182_s10 + $0x10] sm:$0xff]  }
  0x12   : > { %991 = vmatprep.mubr.msk.bf16.mxu0 %vm525_vm2, %v1034_v4  ;;  %974 = vmatmul.mubr.msk.bf16.vlgmr.msra.gmra.mrb[0].mxu1 %vm353_vm1, %v1035_v5  ;;  %v1039_v9 = vld [vmem:[%s1176_s7 + $0x18] sm:$0xff]   ;;  %v1041_v11 = vld [vmem:[%s1176_s7 + $0x20] sm:$0xff]   ;;  %v1043_v13 = vld [vmem:[%s1176_s7 + $0x28] sm:$0xff]  }
  0x13   : > { %992 = vmatmul.mubr.msk.bf16.vlgmr.msra.gmra.mrb[0].mxu0 %vm525_vm2, %v1036_v6  ;;  %977 = vmatprep.mubr.msk.bf16.mxu1 %vm353_vm1, %v1037_v7  ;;  %v1040_v10 = vld [vmem:[%s1182_s10 + $0x18] sm:$0xff]   ;;  %v1042_v12 = vld [vmem:[%s1182_s10 + $0x20] sm:$0xff]   ;;  %v1044_v14 = vld [vmem:[%s1182_s10 + $0x28] sm:$0xff]  }
  0x14   : > { %995 = vmatprep.mubr.msk.bf16.mxu0 %vm525_vm2, %v1038_v8  ;;  %v1045_v15 = vld [vmem:[%s1176_s7 + $0x30] sm:$0xff]   ;;  %v1047_v17 = vld [vmem:[%s1176_s7 + $0x38] sm:$0xff]  }
  0x15   : > { %v1046_v16 = vld [vmem:[%s1182_s10 + $0x30] sm:$0xff]   ;;  %v1048_v18 = vld [vmem:[%s1182_s10 + $0x38] sm:$0xff]  }
  0x1a   : > { %978 = vmatmul.mubr.msk.bf16.gmra.mrb[4].mxu1 %vm353_vm1, %v1039_v9 }
  0x1b   : > { %996 = vmatmul.mubr.msk.bf16.gmra.mrb[4].mxu0 %vm525_vm2, %v1040_v10  ;;  %981 = vmatprep.mubr.msk.bf16.mxu1 %vm353_vm1, %v1041_v11 }
  0x1c   : > { %999 = vmatprep.mubr.msk.bf16.mxu0 %vm525_vm2, %v1042_v12 }
  0x22   : > { %982 = vmatmul.mubr.msk.bf16.gmra.mrb[8].mxu1 %vm353_vm1, %v1043_v13 }
  0x23   : > { %1000 = vmatmul.mubr.msk.bf16.gmra.mrb[8].mxu0 %vm525_vm2, %v1044_v14  ;;  %985 = vmatprep.mubr.msk.bf16.mxu1 %vm353_vm1, %v1045_v15 }
  0x24   : > { %1003 = vmatprep.mubr.msk.bf16.mxu0 %vm525_vm2, %v1046_v16 }
  0x2a   : > { %986 = vmatmul.mubr.msk.bf16.gmra.mrb[12].mxu1 %vm353_vm1, %v1047_v17 }
  0x2b   : > { %1004 = vmatmul.mubr.msk.bf16.gmra.mrb[12].mxu0 %vm525_vm2, %v1048_v18 }
  0xe5   : > { %v975_v19 = vpop.f32.mrb[0].mxu1 }
  0xe6   : > { %v993_v20 = vpop.f32.mrb[0].mxu0  ;;  %v416_v22 = vpop.f32.mrb[1].mxu1 }
  0xe7   : > { %v593_v23 = vadd.f32 %v993_v20, %v975_v19  ;;  %v584_v24 = vpop.f32.mrb[1].mxu0  ;;  %v976_v25 = vpop.f32.mrb[2].mxu1 }
  0xe8   : > { %v585_v27 = vadd.f32 %v584_v24, %v416_v22  ;;  %v994_v28 = vpop.f32.mrb[2].mxu0  ;;  %v419_v29 = vpop.f32.mrb[3].mxu1 }
  0xe9   : > { %v656_v30 = vmul.f32 %v1218_v21, %v593_v23  ;;  %v596_v31 = vadd.f32 %v994_v28, %v976_v25  ;;  %v587_v32 = vpop.f32.mrb[3].mxu0 }
  0xea   : > { %v654_v33 = vmul.f32 %v1218_v21, %v585_v27  ;;  %v588_v34 = vadd.f32 %v587_v32, %v419_v29 }
  0xeb   : > { %v1228_v35 = vadd.f32 %v1223_v26, %v656_v30  ;;  %v657_v36 = vmul.f32 %v1218_v21, %v596_v31 }
  0xec   : > { %v1232_v37 = vadd.f32 %v1223_v26, %v654_v33  ;;  %v655_v38 = vmul.f32 %v1218_v21, %v588_v34 }
  0xed   : > { %v937_v39 = vmul.f32 -1.442695, %v1228_v35  ;;  %v1237_v40 = vadd.f32 %v1223_v26, %v657_v36  ;;  %v979_v41 = vpop.f32.mrb[4].mxu1 }
  0xee   : > { %v935_v42 = vmul.f32 -1.442695, %v1232_v37  ;;  %v1241_v43 = vadd.f32 %v1223_v26, %v655_v38  ;;  %v997_v44 = vpop.f32.mrb[4].mxu0  ;;  %v432_v45 = vpop.f32.mrb[5].mxu1 }
  0xef   : > { %1049 = vpow2.f32 %v937_v39  ;;  %v938_v46 = vmul.f32 -1.442695, %v1237_v40  ;;  %v609_v47 = vadd.f32 %v997_v44, %v979_v41  ;;  %v600_v48 = vpop.f32.mrb[5].mxu0  ;;  %v980_v49 = vpop.f32.mrb[6].mxu1 }
  0xf0   : > { %1051 = vpow2.f32 %v935_v42  ;;  %v936_v50 = vmul.f32 -1.442695, %v1241_v43  ;;  %v601_v51 = vadd.f32 %v600_v48, %v432_v45  ;;  %v998_v52 = vpop.f32.mrb[6].mxu0  ;;  %v435_v53 = vpop.f32.mrb[7].mxu1 }
  0xf1   : > { %1053 = vpow2.f32 %v938_v46  ;;  %v660_v54 = vmul.f32 %v1218_v21, %v609_v47  ;;  %v612_v55 = vadd.f32 %v998_v52, %v980_v49  ;;  %v603_v56 = vpop.f32.mrb[7].mxu0 }
  0xf2   : > { %1055 = vpow2.f32 %v936_v50  ;;  %v658_v57 = vmul.f32 %v1218_v21, %v601_v51  ;;  %v604_v58 = vadd.f32 %v603_v56, %v435_v53 }
  0xf3   : > { %v1248_v59 = vadd.f32 %v1223_v26, %v660_v54  ;;  %v661_v60 = vmul.f32 %v1218_v21, %v612_v55 }
  0xf4   : > { %v1252_v61 = vadd.f32 %v1223_v26, %v658_v57  ;;  %v659_v62 = vmul.f32 %v1218_v21, %v604_v58 }
  0xf5   : > { %v941_v63 = vmul.f32 -1.442695, %v1248_v59  ;;  %v1257_v0 = vadd.f32 %v1223_v26, %v661_v60  ;;  %v983_v1 = vpop.f32.mrb[8].mxu1 }
  0xf6   : > { %v939_v2 = vmul.f32 -1.442695, %v1252_v61  ;;  %v1261_v3 = vadd.f32 %v1223_v26, %v659_v62  ;;  %v1001_v4 = vpop.f32.mrb[8].mxu0  ;;  %v448_v5 = vpop.f32.mrb[9].mxu1 }
  0xf7   : > { %1057 = vpow2.f32 %v941_v63  ;;  %v942_v6 = vmul.f32 -1.442695, %v1257_v0  ;;  %v625_v7 = vadd.f32 %v1001_v4, %v983_v1  ;;  %v616_v8 = vpop.f32.mrb[9].mxu0  ;;  %v984_v9 = vpop.f32.mrb[10].mxu1 }
  0xf8   : > { %1059 = vpow2.f32 %v939_v2  ;;  %v940_v10 = vmul.f32 -1.442695, %v1261_v3  ;;  %v617_v11 = vadd.f32 %v616_v8, %v448_v5  ;;  %v1002_v12 = vpop.f32.mrb[10].mxu0  ;;  %v451_v13 = vpop.f32.mrb[11].mxu1 }
  0xf9   : > { %v1050_v14 = vpop.eup %1049  ;;  %1061 = vpow2.f32 %v942_v6  ;;  %v664_v15 = vmul.f32 %v1218_v21, %v625_v7  ;;  %v628_v16 = vadd.f32 %v1002_v12, %v984_v9  ;;  %v619_v17 = vpop.f32.mrb[11].mxu0 }
  0xfa   : > { %v1052_v18 = vpop.eup %1051  ;;  %v743_v19 = vadd.f32 1.0, %v1050_v14  ;;  %1063 = vpow2.f32 %v940_v10  ;;  %v662_v20 = vmul.f32 %v1218_v21, %v617_v11  ;;  %v620_v22 = vadd.f32 %v619_v17, %v451_v13 }
  0xfb   : > { %v1054_v23 = vpop.eup %1053  ;;  %v741_v24 = vadd.f32 1.0, %v1052_v18  ;;  %v1268_v25 = vadd.f32 %v1223_v26, %v664_v15  ;;  %v665_v27 = vmul.f32 %v1218_v21, %v628_v16 }
  0xfc   : > { %v1056_v28 = vpop.eup %1055  ;;  %1065 = vrcp.f32 %v743_v19  ;;  %v744_v29 = vadd.f32 1.0, %v1054_v23  ;;  %v1272_v30 = vadd.f32 %v1223_v26, %v662_v20  ;;  %v663_v31 = vmul.f32 %v1218_v21, %v620_v22 }
  0xfd   : > { %1067 = vrcp.f32 %v741_v24  ;;  %v742_v32 = vadd.f32 1.0, %v1056_v28  ;;  %v945_v33 = vmul.f32 -1.442695, %v1268_v25  ;;  %v1277_v34 = vadd.f32 %v1223_v26, %v665_v27  ;;  %v987_v36 = vpop.f32.mrb[12].mxu1 }
  0xfe   : > { %1069 = vrcp.f32 %v744_v29  ;;  %v943_v38 = vmul.f32 -1.442695, %v1272_v30  ;;  %v1281_v39 = vadd.f32 %v1223_v26, %v663_v31  ;;  %v1005_v41 = vpop.f32.mrb[12].mxu0  ;;  %v464_v42 = vpop.f32.mrb[13].mxu1 }
  0xff   : > { %1071 = vrcp.f32 %v742_v32  ;;  %v946_v44 = vmul.f32 -1.442695, %v1277_v34  ;;  %v641_v45 = vadd.f32 %v1005_v41, %v987_v36  ;;  %v632_v46 = vpop.f32.mrb[13].mxu0  ;;  %v988_v47 = vpop.f32.mrb[14].mxu1 }
 0x100   : > { %1073 = vpow2.f32 %v945_v33  ;;  %v944_v48 = vmul.f32 -1.442695, %v1281_v39  ;;  %v633_v49 = vadd.f32 %v632_v46, %v464_v42  ;;  %v1006_v50 = vpop.f32.mrb[14].mxu0  ;;  %v467_v51 = vpop.f32.mrb[15].mxu1 }
 0x101   : > { %v1058_v52 = vpop.eup %1057  ;;  %1075 = vpow2.f32 %v943_v38  ;;  %v668_v53 = vmul.f32 %v1218_v21, %v641_v45  ;;  %v644_v54 = vadd.f32 %v1006_v50, %v988_v47  ;;  %v635_v55 = vpop.f32.mrb[15].mxu0 }
 0x102   : > { %v1060_v56 = vpop.eup %1059  ;;  %v747_v57 = vadd.f32 1.0, %v1058_v52  ;;  %1077 = vpow2.f32 %v946_v44  ;;  %v666_v58 = vmul.f32 %v1218_v21, %v633_v49  ;;  %v636_v60 = vadd.f32 %v635_v55, %v467_v51 }
 0x103   : > { %v1062_v62 = vpop.eup %1061  ;;  %v745_v63 = vadd.f32 1.0, %v1060_v56  ;;  %1079 = vpow2.f32 %v944_v48  ;;  %v1289_v1 = vadd.f32 %v1223_v26, %v668_v53  ;;  %v669_v2 = vmul.f32 %v1218_v21, %v644_v54 }
 0x104   : > { %v1064_v4 = vpop.eup %1063  ;;  %1081 = vrcp.f32 %v747_v57  ;;  %v748_v5 = vadd.f32 1.0, %v1062_v62  ;;  %v1293_v6 = vadd.f32 %v1223_v26, %v666_v58  ;;  %v667_v7 = vmul.f32 %v1218_v21, %v636_v60 }
 0x105   : > { %1083 = vrcp.f32 %v745_v63  ;;  %v746_v8 = vadd.f32 1.0, %v1064_v4  ;;  %v949_v9 = vmul.f32 -1.442695, %v1289_v1  ;;  %v1298_v10 = vadd.f32 %v1223_v26, %v669_v2 }
 0x106   : > { %v1066_v11 = vpop.eup %1065  ;;  %1085 = vrcp.f32 %v748_v5  ;;  %v947_v12 = vmul.f32 -1.442695, %v1293_v6  ;;  %v1307_v21 = vadd.f32 %v1223_v26, %v667_v7 }
 0x107   : > { %v1068_v13 = vpop.eup %1067  ;;  %v791_v14 = vmul.f32 %v1066_v11, %v1228_v35  ;;  %1087 = vrcp.f32 %v746_v8  ;;  %v950_v15 = vmul.f32 -1.442695, %v1298_v10 }
 0x108   : > { %v1070_v16 = vpop.eup %1069  ;;  %v789_v17 = vmul.f32 %v1068_v13, %v1232_v37  ;;  %1089 = vpow2.f32 %v949_v9  ;;  %v948_v18 = vmul.f32 -1.442695, %v1307_v21 }
 0x109   : > { %v1072_v19 = vpop.eup %1071  ;;  %807 = vst.msk [vmem:[%s1303_s18 + $0x10] sm:$0xff] %vm525_vm2, %v791_v14  ;;  %v792_v26 = vmul.f32 %v1070_v16, %v1237_v40  ;;  %1091 = vpow2.f32 %v947_v12 }
 0x10a   : > { %v1074_v20 = vpop.eup %1073  ;;  %805 = vst.msk [vmem:[%s1303_s18] sm:$0xff] %vm525_vm2, %v789_v17  ;;  %v790_v35 = vmul.f32 %v1072_v19, %v1241_v43  ;;  %1093 = vpow2.f32 %v950_v15 }
 0x10b   : > { %v1076_v22 = vpop.eup %1075  ;;  %808 = vst.msk [vmem:[%s1303_s18 + $0x18] sm:$0xff] %vm525_vm2, %v792_v26  ;;  %v751_v37 = vadd.f32 1.0, %v1074_v20  ;;  %1095 = vpow2.f32 %v948_v18 }
 0x10c   : > { %v1078_v23 = vpop.eup %1077  ;;  %806 = vst.msk [vmem:[%s1303_s18 + $0x8] sm:$0xff] %vm525_vm2, %v790_v35  ;;  %v749_v24 = vadd.f32 1.0, %v1076_v22 }
 0x10d   : > { %v1080_v27 = vpop.eup %1079  ;;  %1097 = vrcp.f32 %v751_v37  ;;  %v752_v40 = vadd.f32 1.0, %v1078_v23 }
 0x10e   : > { %v1082_v28 = vpop.eup %1081  ;;  %1099 = vrcp.f32 %v749_v24  ;;  %v750_v29 = vadd.f32 1.0, %v1080_v27 }
 0x10f   : > { %v1084_v43 = vpop.eup %1083  ;;  %v795_v31 = vmul.f32 %v1082_v28, %v1248_v59  ;;  %1101 = vrcp.f32 %v752_v40 }
 0x110   : > { %v1086_v32 = vpop.eup %1085  ;;  %v793_v33 = vmul.f32 %v1084_v43, %v1252_v61  ;;  %1103 = vrcp.f32 %v750_v29 }
 0x111   : > { %v1088_v36 = vpop.eup %1087  ;;  %811 = vst.msk [vmem:[%s1303_s18 + $0x30] sm:$0xff] %vm525_vm2, %v795_v31  ;;  %v796_v38 = vmul.f32 %v1086_v32, %v1257_v0 }
 0x112   : > { %v1090_v41 = vpop.eup %1089  ;;  %809 = vst.msk [vmem:[%s1303_s18 + $0x20] sm:$0xff] %vm525_vm2, %v793_v33  ;;  %v794_v42 = vmul.f32 %v1088_v36, %v1261_v3 }
 0x113   : > { %v1092_v44 = vpop.eup %1091  ;;  %812 = vst.msk [vmem:[%s1303_s18 + $0x38] sm:$0xff] %vm525_vm2, %v796_v38  ;;  %v755_v45 = vadd.f32 1.0, %v1090_v41 }
 0x114   : > { %v1094_v59 = vpop.eup %1093  ;;  %810 = vst.msk [vmem:[%s1303_s18 + $0x28] sm:$0xff] %vm525_vm2, %v794_v42  ;;  %v753_v61 = vadd.f32 1.0, %v1092_v44 }
 0x115   : > { %v1096_v46 = vpop.eup %1095  ;;  %1105 = vrcp.f32 %v755_v45  ;;  %v756_v47 = vadd.f32 1.0, %v1094_v59 }
 0x116   : > { %1107 = vrcp.f32 %v753_v61  ;;  %v754_v0 = vadd.f32 1.0, %v1096_v46 }
 0x117   : > { %v1098_v48 = vpop.eup %1097  ;;  %1109 = vrcp.f32 %v756_v47 }
 0x118   : > { %v1100_v3 = vpop.eup %1099  ;;  %v799_v49 = vmul.f32 %v1098_v48, %v1268_v25  ;;  %1111 = vrcp.f32 %v754_v0 }
 0x119   : > { %v1102_v50 = vpop.eup %1101  ;;  %v797_v51 = vmul.f32 %v1100_v3, %v1272_v30 }
 0x11a   : > { %v1104_v52 = vpop.eup %1103  ;;  %815 = vst.msk [vmem:[%s1303_s18 + $0x50] sm:$0xff] %vm525_vm2, %v799_v49  ;;  %v800_v53 = vmul.f32 %v1102_v50, %v1277_v34 }
 0x11b   : > { %813 = vst.msk [vmem:[%s1303_s18 + $0x40] sm:$0xff] %vm525_vm2, %v797_v51  ;;  %v798_v54 = vmul.f32 %v1104_v52, %v1281_v39 }
 0x11c   : > { %816 = vst.msk [vmem:[%s1303_s18 + $0x58] sm:$0xff] %vm525_vm2, %v800_v53 }
 0x11d   : > { %814 = vst.msk [vmem:[%s1303_s18 + $0x48] sm:$0xff] %vm525_vm2, %v798_v54 }
 0x11f   : > { %v1106_v25 = vpop.eup %1105 }
 0x120   : > { %v1108_v55 = vpop.eup %1107  ;;  %v803_v30 = vmul.f32 %v1106_v25, %v1289_v1 }
 0x121   : > { %v1110_v56 = vpop.eup %1109  ;;  %v801_v57 = vmul.f32 %v1108_v55, %v1293_v6 }
 0x122   : > { %v1112_v58 = vpop.eup %1111  ;;  %819 = vst.msk [vmem:[%s1303_s18 + $0x70] sm:$0xff] %vm525_vm2, %v803_v30  ;;  %v804_v34 = vmul.f32 %v1110_v56, %v1298_v10 }
 0x123   : > { %817 = vst.msk [vmem:[%s1303_s18 + $0x60] sm:$0xff] %vm525_vm2, %v801_v57  ;;  %v802_v39 = vmul.f32 %v1112_v58, %v1307_v21 }
 0x124   : > { %820 = vst.msk [vmem:[%s1303_s18 + $0x78] sm:$0xff] %vm525_vm2, %v804_v34 }
 0x125   : > { %818 = vst.msk [vmem:[%s1303_s18 + $0x68] sm:$0xff] %vm525_vm2, %v802_v39 }
 0x126 PF: > { %s16_s21 = sadd.s32 1, %s1119_s21  }
 0x127   : > { %p13_p4 = scmp.ge.s32.totalorder %s16_s21, 6  }
 0x129   :  { %15 = sbr.rel (!%p13_p4) target bundleno = 1 (0x1), region = 77 }

</bundles_post_ra>
